<compile_context>
chip_gen: v7x
topology: tpu7x:2x2x1
jax: 0.10.0
libtpu: 0.0.40
codegen_flags: <defaults>
</compile_context>

<pallas_src>
import jax
import jax.numpy as jnp
from jax import lax
from jax.experimental import pallas as pl
from jax.experimental.pallas import tpu as pltpu

NUM_LAYERS = 3
HIDDEN = 24              # H  (per direction)
H2 = 2 * HIDDEN          # 48 (fused fwd|bwd lane width)
LIN_HID = 36
LIN_OUT = 8
NUM_CLASSES = 3
DIN_PAD = 8              # feature dim padded to 8 (zero weight rows for unused cols)

# ---- packed slab row offsets (all multiples of 8) ----
# lin slab (112, 36): lw1@0:8, lw2@8:44, lw3@48:84 (cols 0:8), lb1@88, lb2@96, lb3@104
# gru slab (6*Dp + 144 + 32, 48):
#   A_r@0, A_z@Dp, A_n@2Dp, C_r@3Dp, C_z@4Dp, C_n@5Dp,
#   Whr@6Dp, Whz@6Dp+48, Whn@6Dp+96, biases (b_r, b_z, b_n, b_hn) at 6Dp+144 +0/8/16/24
# fc slab (104, 3): WfcA@0:48, WfcC@48:96, bias(+1e-5)@96


# ------------------------------ fused kernel ------------------------------
def _make_kernel(T, BT):
    TB = T * BT
    unroll = True if T <= 16 else 8

    def kernel(xb_ref, tgt_ref, wgt_ref, lin_ref, g0_ref, g1_ref, g2_ref, fc_ref,
               logits_ref, snll_ref, cnt_ref, swnll_ref, sw_ref,
               gir, giz, gin, out_scr, outrev_scr):
        f32 = jnp.float32

        def dot(a, b):
            return jnp.dot(a, b, preferred_element_type=f32)

        # ---- Stage 1: linStack on [x ; x_reversed] stacked along rows -------------
        # One batched matmul chain with M = 2*T*BT (x[:, :, [0,3]] select is folded
        # into lw1's zero rows; padded feature cols hit zero rows too).
        xb = xb_ref[...]                                                   # (2*TB, 8)
        h = jnp.maximum(dot(xb, lin_ref[0:8, :]) + lin_ref[88:89, :], 0.0)
        h = jnp.maximum(dot(h, lin_ref[8:8 + LIN_HID, :]) + lin_ref[96:97, :], 0.0)
        h = jnp.maximum(dot(h, lin_ref[48:48 + LIN_HID, 0:LIN_OUT])
                        + lin_ref[104:105, 0:LIN_OUT], 0.0)                # (2*TB, 8)
        xlin = h[0:TB, :]            # forward time order
        xlin_rev = h[TB:2 * TB, :]   # time-reversed copy (self.dp -> identity)

        # ---- batched input-gate precompute (independent over time, no loops) ------
        # gi_g[row(s)] = [gate_fwd(time s) | gate_bwd(time T-1-s)]  via zero-block
        # A/C weights; input biases (+ b_hr/b_hz) folded in.
        def precompute_gi(inp, inp_rev, g_ref, dp):
            bo = 6 * dp + 3 * H2

            def A(k):
                return g_ref[k * dp:(k + 1) * dp, :]

            def C(k):
                return g_ref[(3 + k) * dp:(4 + k) * dp, :]

            gir[...] = dot(inp, A(0)) + dot(inp_rev, C(0)) + g_ref[bo:bo + 1, :]
            giz[...] = dot(inp, A(1)) + dot(inp_rev, C(1)) + g_ref[bo + 8:bo + 9, :]
            gin[...] = dot(inp, A(2)) + dot(inp_rev, C(2)) + g_ref[bo + 16:bo + 17, :]

        # ---- fused fwd+bwd recurrence (the only serial part) ----------------------
        def gru_layer(g_ref, dp):
            wb = 6 * dp
            whr = g_ref[wb:wb + H2, :]                   # (48,48) block-diag, loaded once
            whz = g_ref[wb + H2:wb + 2 * H2, :]
            whn = g_ref[wb + 2 * H2:wb + 3 * H2, :]
            bo = 6 * dp + 3 * H2
            bhn = jnp.broadcast_to(g_ref[bo + 24:bo + 25, :], (BT, H2))   # hoisted

            def step(s, hprev):
                row = pl.ds(pl.multiple_of(s * BT, BT), BT)
                rrow = pl.ds(pl.multiple_of((T - 1 - s) * BT, BT), BT)
                ghr = dot(hprev, whr)                     # lane-aligned per-gate dots
                ghz = dot(hprev, whz)
                ghn = dot(hprev, whn)
                r = jax.nn.sigmoid(gir[row, :] + ghr)
                z = jax.nn.sigmoid(giz[row, :] + ghz)
                n = jnp.tanh(gin[row, :] + r * (ghn + bhn))
                hnew = (1.0 - z) * n + z * hprev          # [h_f(s) | h_b(T-1-s)]
                out_scr[row, :] = hnew
                outrev_scr[rrow, :] = hnew                # time-reversed copy for the
                return hnew                               # batched downstream matmuls

            lax.fori_loop(0, T, step, jnp.zeros((BT, H2), f32), unroll=unroll)

        # layer 0
        precompute_gi(xlin, xlin_rev, g0_ref, LIN_OUT)
        gru_layer(g0_ref, LIN_OUT)
        # TODO(synk): GRU inter-layer dropout (p=0.1) omitted — inference mode.
        # layer 1
        precompute_gi(out_scr[...], outrev_scr[...], g1_ref, H2)
        gru_layer(g1_ref, H2)
        # layer 2
        precompute_gi(out_scr[...], outrev_scr[...], g2_ref, H2)
        gru_layer(g2_ref, H2)

        # ---- fc + loss (batched); logits written to HBM exactly once --------------
        outf = out_scr[...]
        outr = outrev_scr[...]
        logits = (dot(outf, fc_ref[0:H2, :]) + dot(outr, fc_ref[H2:2 * H2, :])
                  + fc_ref[96:97, :])                     # (TB, 3); +1e-5 folded in bias
        logits_ref[...] = logits.astype(logits_ref.dtype)

        # TODO(synk): exact loss_giw source unavailable; implemented as masked
        # (ignore_index=-1) CE: loss1 = mean CE, loss2 = weighted mean CE,
        # loss = loss1 + loss2.  Padded batch rows carry target=-1 / weight=0.
        tgt = tgt_ref[...]                                # (TB, 1) int32
        w = wgt_ref[...]                                  # (TB, 1) f32
        m = jnp.max(logits, axis=-1, keepdims=True)
        lse = m + jnp.log(jnp.sum(jnp.exp(logits - m), axis=-1, keepdims=True))
        logp = logits - lse
        cls = lax.broadcasted_iota(jnp.int32, logits.shape, 1)
        nll = -jnp.sum(jnp.where(cls == tgt, logp, 0.0), axis=-1, keepdims=True)
        mask = (tgt != -1).astype(f32)
        snll_ref[...] = jnp.sum(nll * mask, axis=0, keepdims=True)
        cnt_ref[...] = jnp.sum(mask, axis=0, keepdims=True)
        swnll_ref[...] = jnp.sum(nll * mask * w, axis=0, keepdims=True)
        sw_ref[...] = jnp.sum(mask * w, axis=0, keepdims=True)

    return kernel


# ------------------------------- forward -------------------------------
def model3_forward(packed, x, target, weight, batch_tile=8):
    # NOTE: PyTorch's NaN/Inf input asserts are not replicated in-kernel.
    B, T, din = x.shape
    assert din <= DIN_PAD, "column-select fold assumes in_features <= 8"
    BT = batch_tile
    assert BT % 8 == 0
    n_tiles = (B + BT - 1) // BT
    B_pad = n_tiles * BT
    TB = T * BT

    # time-major, batch padded to B_pad, features padded to 8, split into tiles
    xf = jnp.zeros((T, B_pad, DIN_PAD), jnp.float32)
    xf = xf.at[:, :B, :din].set(jnp.transpose(x.astype(jnp.float32), (1, 0, 2)))
    xt = jnp.transpose(xf.reshape(T, n_tiles, BT, DIN_PAD), (1, 0, 2, 3))
    x_both = jnp.concatenate(
        [xt.reshape(n_tiles, TB, DIN_PAD),
         xt[:, ::-1].reshape(n_tiles, TB, DIN_PAD)], axis=1)         # (n, 2*TB, 8)

    tgt_f = jnp.full((T, B_pad), -1, jnp.int32)
    tgt_f = tgt_f.at[:, :B].set(jnp.transpose(target.astype(jnp.int32), (1, 0)))
    tgt_t = jnp.transpose(tgt_f.reshape(T, n_tiles, BT), (1, 0, 2)).reshape(n_tiles, TB, 1)

    wgt_f = jnp.zeros((T, B_pad), jnp.float32)
    wgt_f = wgt_f.at[:, :B].set(jnp.transpose(weight.astype(jnp.float32), (1, 0)))
    wgt_t = jnp.transpose(wgt_f.reshape(T, n_tiles, BT), (1, 0, 2)).reshape(n_tiles, TB, 1)

    g0, g1, g2 = packed["gru"]
    kernel = _make_kernel(T, BT)

    def rep2(shape):        # replicated 2-D weight slab
        return pl.BlockSpec(shape, lambda i: (0, 0))

    def tile3(r, c):        # per-batch-tile 3-D data block (leading dim squeezed)
        return pl.BlockSpec((None, r, c), lambda i: (i, 0, 0))

    out_shapes = (
        jax.ShapeDtypeStruct((n_tiles, TB, NUM_CLASSES), jnp.float32),
        jax.ShapeDtypeStruct((n_tiles, 1, 1), jnp.float32),
        jax.ShapeDtypeStruct((n_tiles, 1, 1), jnp.float32),
        jax.ShapeDtypeStruct((n_tiles, 1, 1), jnp.float32),
        jax.ShapeDtypeStruct((n_tiles, 1, 1), jnp.float32),
    )

    logits_t, snll, cnt, swnll, sw = pl.pallas_call(
        kernel,
        out_shape=out_shapes,
        grid_spec=pltpu.PrefetchScalarGridSpec(
            num_scalar_prefetch=0,
            grid=(n_tiles,),
            in_specs=[
                tile3(2 * TB, DIN_PAD),            # x (fwd ; reversed)
                tile3(TB, 1),                      # target
                tile3(TB, 1),                      # weight
                rep2(packed["lin"].shape),         # linStack slab
                rep2(g0.shape), rep2(g1.shape), rep2(g2.shape),   # GRU slabs
                rep2(packed["fc"].shape),          # fc slab
            ],
            out_specs=[
                tile3(TB, NUM_CLASSES),
                tile3(1, 1), tile3(1, 1), tile3(1, 1), tile3(1, 1),
            ],
            scratch_shapes=[pltpu.VMEM((TB, H2), jnp.float32)] * 5,  # gi_r/z/n, out, out_rev
        ),
        compiler_params=pltpu.CompilerParams(dimension_semantics=("parallel",)),
    )(x_both, tgt_t, wgt_t, packed["lin"], g0, g1, g2, packed["fc"])

    # unpack logits: (n_tiles, T*BT, 3) -> (B, T, 3)
    lg = jnp.transpose(logits_t.reshape(n_tiles, T, BT, NUM_CLASSES), (1, 0, 2, 3))
    logits = jnp.transpose(lg.reshape(T, B_pad, NUM_CLASSES)[:, :B, :], (1, 0, 2))

    loss1 = jnp.sum(snll) / jnp.maximum(jnp.sum(cnt), 1.0)
    loss2 = jnp.sum(swnll) / jnp.maximum(jnp.sum(sw), 1e-8)
    return logits, loss1 + loss2, loss1, loss2


# ----------------------------- parameters -----------------------------
def init_params(key, in_features=4):
    keys = iter(jax.random.split(key, 128))

    def dense(shape, scale=0.1):
        return scale * jax.random.normal(next(keys), shape, jnp.float32)

    lin = {
        "w1": dense((2, LIN_HID)), "b1": dense((1, LIN_HID)),
        "w2": dense((LIN_HID, LIN_HID)), "b2": dense((1, LIN_HID)),
        "w3": dense((LIN_HID, LIN_OUT)), "b3": dense((1, LIN_OUT)),
    }

    gru = []
    for l in range(NUM_LAYERS):
        d = LIN_OUT if l == 0 else H2
        layer = {}
        for direc in ("fwd", "bwd"):
            layer[direc] = {
                "w_ir": dense((d, HIDDEN)), "w_iz": dense((d, HIDDEN)), "w_in": dense((d, HIDDEN)),
                "w_hr": dense((HIDDEN, HIDDEN)), "w_hz": dense((HIDDEN, HIDDEN)), "w_hn": dense((HIDDEN, HIDDEN)),
                "b_ir": dense((1, HIDDEN)), "b_iz": dense((1, HIDDEN)), "b_in": dense((1, HIDDEN)),
                "b_hr": dense((1, HIDDEN)), "b_hz": dense((1, HIDDEN)), "b_hn": dense((1, HIDDEN)),
            }
        gru.append(layer)

    fc_p = {"w": dense((H2, NUM_CLASSES)), "b": dense((1, NUM_CLASSES))}
    return {"lin": lin, "gru": gru, "fc": fc_p, "in_features": in_features}


def pack_params(p):
    """Fold column-select / biases and pack everything into 6 slabs."""
    f32 = jnp.float32
    lin = p["lin"]

    # --- linStack slab (112, 36); x[:, :, [0, 3]] folded into lw1's zero rows ---
    # NOTE: hardcodes in_features<=8 and selected columns [0, 3].
    lin_slab = jnp.zeros((112, LIN_HID), f32)
    lw1 = jnp.zeros((DIN_PAD, LIN_HID), f32)
    lw1 = lw1.at[0, :].set(lin["w1"][0]).at[3, :].set(lin["w1"][1])
    lin_slab = lin_slab.at[0:8, :].set(lw1)
    lin_slab = lin_slab.at[8:8 + LIN_HID, :].set(lin["w2"])
    lin_slab = lin_slab.at[48:48 + LIN_HID, 0:LIN_OUT].set(lin["w3"])
    lin_slab = lin_slab.at[88, :].set(lin["b1"][0])
    lin_slab = lin_slab.at[96, :].set(lin["b2"][0])
    lin_slab = lin_slab.at[104, 0:LIN_OUT].set(lin["b3"][0])

    H = HIDDEN

    def gru_slab(layer, dp):
        f, b = layer["fwd"], layer["bwd"]
        slab = jnp.zeros((6 * dp + 3 * H2 + 32, H2), f32)
        for gi, g in enumerate(("r", "z", "n")):
            wf, wb = f[f"w_i{g}"], b[f"w_i{g}"]
            A = jnp.zeros((dp, H2), f32)
            C = jnp.zeros((dp, H2), f32)
            if dp == LIN_OUT:                         # layer 0: plain x input
                A = A.at[:, :H].set(wf)
                C = C.at[:, H:].set(wb)
            else:                                     # layers 1/2: [h_f|h_b] input
                A = A.at[:H, :H].set(wf[:H, :])
                A = A.at[H:, H:].set(wb[H:, :])
                C = C.at[:H, H:].set(wb[:H, :])
                C = C.at[H:, :H].set(wf[H:, :])
            slab = slab.at[gi * dp:(gi + 1) * dp, :].set(A)
            slab = slab.at[(3 + gi) * dp:(4 + gi) * dp, :].set(C)
        for gi, g in enumerate(("r", "z", "n")):      # block-diagonal recurrent weights
            W = jnp.zeros((H2, H2), f32)
            W = W.at[:H, :H].set(f[f"w_h{g}"])
            W = W.at[H:, H:].set(b[f"w_h{g}"])
            o = 6 * dp + gi * H2
            slab = slab.at[o:o + H2, :].set(W)
        bo = 6 * dp + 3 * H2
        slab = slab.at[bo, :].set(
            jnp.concatenate([f["b_ir"] + f["b_hr"], b["b_ir"] + b["b_hr"]], axis=1)[0])
        slab = slab.at[bo + 8, :].set(
            jnp.concatenate([f["b_iz"] + f["b_hz"], b["b_iz"] + b["b_hz"]], axis=1)[0])
        slab = slab.at[bo + 16, :].set(
            jnp.concatenate([f["b_in"], b["b_in"]], axis=1)[0])
        slab = slab.at[bo + 24, :].set(
            jnp.concatenate([f["b_hn"], b["b_hn"]], axis=1)[0])
        return slab

    g_slabs = [gru_slab(p["gru"][0], LIN_OUT),
               gru_slab(p["gru"][1], H2),
               gru_slab(p["gru"][2], H2)]

    # --- fc slab (104, 3); +1e-5 folded into bias ---
    fc_slab = jnp.zeros((104, NUM_CLASSES), f32)
    fc_slab = fc_slab.at[0:HIDDEN, :].set(p["fc"]["w"][:HIDDEN, :])        # rows fed by out_scr[:, 0:24]
    fc_slab = fc_slab.at[H2 + HIDDEN:2 * H2, :].set(p["fc"]["w"][HIDDEN:, :])  # rows fed by outrev[:, 24:48]
    fc_slab = fc_slab.at[96, :].set(p["fc"]["b"][0] + 1e-05)

    return {"lin": lin_slab, "gru": g_slabs, "fc": fc_slab}


if __name__ == "__main__":
    key = jax.random.PRNGKey(0)
    kx, kt, kw, kp = jax.random.split(key, 4)

    B, T, DIN = 2, 8, 4
    x = jax.random.normal(kx, (B, T, DIN), jnp.float32)          # cols 0 and 3 are used
    target = jax.random.randint(kt, (B, T), -1, NUM_CLASSES)     # -1 == ignore_index
    weight = jax.random.uniform(kw, (B, T), jnp.float32, minval=0.5, maxval=1.5)

    params = init_params(kp, in_features=DIN)
    packed = pack_params(params)

    logits, loss, loss1, loss2 = jax.jit(model3_forward)(packed, x, target, weight)
    jax.block_until_ready((logits, loss, loss1, loss2))
    print("KERNEL_OK")
</pallas_src>

<mosaic_0001>
module attributes {stable_mosaic.version = 11 : i64} {
  func.func @kernel(%arg0: i32, %arg1: memref<1x128x8xf32, #tpu.memory_space<vmem>>, %arg2: memref<1x64x1xi32, #tpu.memory_space<vmem>>, %arg3: memref<1x64x1xf32, #tpu.memory_space<vmem>>, %arg4: memref<112x36xf32, #tpu.memory_space<vmem>>, %arg5: memref<224x48xf32, #tpu.memory_space<vmem>>, %arg6: memref<464x48xf32, #tpu.memory_space<vmem>>, %arg7: memref<464x48xf32, #tpu.memory_space<vmem>>, %arg8: memref<104x3xf32, #tpu.memory_space<vmem>>, %arg9: memref<1x64x3xf32, #tpu.memory_space<vmem>>, %arg10: memref<1x1x1xf32, #tpu.memory_space<vmem>>, %arg11: memref<1x1x1xf32, #tpu.memory_space<vmem>>, %arg12: memref<1x1x1xf32, #tpu.memory_space<vmem>>, %arg13: memref<1x1x1xf32, #tpu.memory_space<vmem>>, %arg14: memref<64x48xf32, #tpu.memory_space<vmem>>, %arg15: memref<64x48xf32, #tpu.memory_space<vmem>>, %arg16: memref<64x48xf32, #tpu.memory_space<vmem>>, %arg17: memref<64x48xf32, #tpu.memory_space<vmem>>, %arg18: memref<64x48xf32, #tpu.memory_space<vmem>>) attributes {dimension_semantics = [#tpu.dimension_semantics<parallel>], iteration_bounds = array<i64: 1>, scalar_prefetch = 0 : i64, scratch_operands = 5 : i64, tpu.core_type = #tpu.core_type<tc>, window_params = [{transform_indices = @transform_0, window_bounds = array<i64: 1, 128, 8>}, {transform_indices = @transform_1, window_bounds = array<i64: 1, 64, 1>}, {transform_indices = @transform_2, window_bounds = array<i64: 1, 64, 1>}, {pipeline_mode = #tpu.pipeline_mode<synchronous>, transform_indices = @transform_3, window_bounds = array<i64: 112, 36>}, {pipeline_mode = #tpu.pipeline_mode<synchronous>, transform_indices = @transform_4, window_bounds = array<i64: 224, 48>}, {pipeline_mode = #tpu.pipeline_mode<synchronous>, transform_indices = @transform_5, window_bounds = array<i64: 464, 48>}, {pipeline_mode = #tpu.pipeline_mode<synchronous>, transform_indices = @transform_6, window_bounds = array<i64: 464, 48>}, {pipeline_mode = #tpu.pipeline_mode<synchronous>, transform_indices = @transform_7, window_bounds = array<i64: 104, 3>}, {transform_indices = @transform_8, window_bounds = array<i64: 1, 64, 3>}, {transform_indices = @transform_9, window_bounds = array<i64: 1, 1, 1>}, {transform_indices = @transform_10, window_bounds = array<i64: 1, 1, 1>}, {transform_indices = @transform_11, window_bounds = array<i64: 1, 1, 1>}, {transform_indices = @transform_12, window_bounds = array<i64: 1, 1, 1>}]} {
    %c0 = arith.constant 0 : index
    %c0_0 = arith.constant 0 : index
    %c0_1 = arith.constant 0 : index
    %0 = vector.load %arg1[%c0, %c0_0, %c0_1] : memref<1x128x8xf32, #tpu.memory_space<vmem>>, vector<1x128x8xf32>
    %1 = vector.shape_cast %0 : vector<1x128x8xf32> to vector<128x8xf32>
    %c0_2 = arith.constant 0 : index
    %c0_3 = arith.constant 0 : index
    %2 = vector.load %arg4[%c0_2, %c0_3] : memref<112x36xf32, #tpu.memory_space<vmem>>, vector<8x36xf32>
    %cst = arith.constant dense<0.000000e+00> : vector<128x36xf32>
    %3 = tpu.matmul %1, %2, %cst {dimension_numbers = #tpu.dot_dimension_numbers<[1], [0], [0], [1], [0, 0, 1, 1], [], []>} : vector<128x8xf32>, vector<8x36xf32>, vector<128x36xf32> -> vector<128x36xf32>
    %c88 = arith.constant 88 : index
    %c0_4 = arith.constant 0 : index
    %4 = vector.load %arg4[%c88, %c0_4] : memref<112x36xf32, #tpu.memory_space<vmem>>, vector<1x36xf32>
    %5 = vector.broadcast %4 : vector<1x36xf32> to vector<128x36xf32>
    %6 = arith.addf %3, %5 : vector<128x36xf32>
    %cst_5 = arith.constant 0.000000e+00 : f32
    %7 = vector.broadcast %cst_5 : f32 to vector<128x36xf32>
    %8 = arith.maximumf %6, %7 : vector<128x36xf32>
    %c8 = arith.constant 8 : index
    %c0_6 = arith.constant 0 : index
    %9 = vector.load %arg4[%c8, %c0_6] : memref<112x36xf32, #tpu.memory_space<vmem>>, vector<36x36xf32>
    %cst_7 = arith.constant dense<0.000000e+00> : vector<128x36xf32>
    %10 = tpu.matmul %8, %9, %cst_7 {dimension_numbers = #tpu.dot_dimension_numbers<[1], [0], [0], [1], [0, 0, 1, 1], [], []>} : vector<128x36xf32>, vector<36x36xf32>, vector<128x36xf32> -> vector<128x36xf32>
    %c96 = arith.constant 96 : index
    %c0_8 = arith.constant 0 : index
    %11 = vector.load %arg4[%c96, %c0_8] : memref<112x36xf32, #tpu.memory_space<vmem>>, vector<1x36xf32>
    %12 = vector.broadcast %11 : vector<1x36xf32> to vector<128x36xf32>
    %13 = arith.addf %10, %12 : vector<128x36xf32>
    %cst_9 = arith.constant 0.000000e+00 : f32
    %14 = vector.broadcast %cst_9 : f32 to vector<128x36xf32>
    %15 = arith.maximumf %13, %14 : vector<128x36xf32>
    %c48 = arith.constant 48 : index
    %c0_10 = arith.constant 0 : index
    %16 = vector.load %arg4[%c48, %c0_10] : memref<112x36xf32, #tpu.memory_space<vmem>>, vector<36x8xf32>
    %cst_11 = arith.constant dense<0.000000e+00> : vector<128x8xf32>
    %17 = tpu.matmul %15, %16, %cst_11 {dimension_numbers = #tpu.dot_dimension_numbers<[1], [0], [0], [1], [0, 0, 1, 1], [], []>} : vector<128x36xf32>, vector<36x8xf32>, vector<128x8xf32> -> vector<128x8xf32>
    %c104 = arith.constant 104 : index
    %c0_12 = arith.constant 0 : index
    %18 = vector.load %arg4[%c104, %c0_12] : memref<112x36xf32, #tpu.memory_space<vmem>>, vector<1x8xf32>
    %19 = vector.broadcast %18 : vector<1x8xf32> to vector<128x8xf32>
    %20 = arith.addf %17, %19 : vector<128x8xf32>
    %cst_13 = arith.constant 0.000000e+00 : f32
    %21 = vector.broadcast %cst_13 : f32 to vector<128x8xf32>
    %22 = arith.maximumf %20, %21 : vector<128x8xf32>
    %23 = vector.extract_strided_slice %22 {offsets = [0, 0], sizes = [64, 8], strides = [1, 1]} : vector<128x8xf32> to vector<64x8xf32>
    %24 = vector.extract_strided_slice %22 {offsets = [64, 0], sizes = [64, 8], strides = [1, 1]} : vector<128x8xf32> to vector<64x8xf32>
    %c0_14 = arith.constant 0 : index
    %c0_15 = arith.constant 0 : index
    %25 = vector.load %arg5[%c0_14, %c0_15] : memref<224x48xf32, #tpu.memory_space<vmem>>, vector<8x48xf32>
    %cst_16 = arith.constant dense<0.000000e+00> : vector<64x48xf32>
    %26 = tpu.matmul %23, %25, %cst_16 {dimension_numbers = #tpu.dot_dimension_numbers<[1], [0], [0], [1], [0, 0, 1, 1], [], []>} : vector<64x8xf32>, vector<8x48xf32>, vector<64x48xf32> -> vector<64x48xf32>
    %c24 = arith.constant 24 : index
    %c0_17 = arith.constant 0 : index
    %27 = vector.load %arg5[%c24, %c0_17] : memref<224x48xf32, #tpu.memory_space<vmem>>, vector<8x48xf32>
    %cst_18 = arith.constant dense<0.000000e+00> : vector<64x48xf32>
    %28 = tpu.matmul %24, %27, %cst_18 {dimension_numbers = #tpu.dot_dimension_numbers<[1], [0], [0], [1], [0, 0, 1, 1], [], []>} : vector<64x8xf32>, vector<8x48xf32>, vector<64x48xf32> -> vector<64x48xf32>
    %29 = arith.addf %26, %28 : vector<64x48xf32>
    %c192 = arith.constant 192 : index
    %c0_19 = arith.constant 0 : index
    %30 = vector.load %arg5[%c192, %c0_19] : memref<224x48xf32, #tpu.memory_space<vmem>>, vector<1x48xf32>
    %31 = vector.broadcast %30 : vector<1x48xf32> to vector<64x48xf32>
    %32 = arith.addf %29, %31 : vector<64x48xf32>
    %c0_20 = arith.constant 0 : index
    %c0_21 = arith.constant 0 : index
    %33 = vector.load %arg14[%c0_20, %c0_21] : memref<64x48xf32, #tpu.memory_space<vmem>>, vector<64x48xf32>
    tpu.vector_store %arg14[%c0_20, %c0_21], %32 {strides = array<i32>} : memref<64x48xf32, #tpu.memory_space<vmem>>, vector<64x48xf32>,
    %c8_22 = arith.constant 8 : index
    %c0_23 = arith.constant 0 : index
    %34 = vector.load %arg5[%c8_22, %c0_23] : memref<224x48xf32, #tpu.memory_space<vmem>>, vector<8x48xf32>
    %cst_24 = arith.constant dense<0.000000e+00> : vector<64x48xf32>
    %35 = tpu.matmul %23, %34, %cst_24 {dimension_numbers = #tpu.dot_dimension_numbers<[1], [0], [0], [1], [0, 0, 1, 1], [], []>} : vector<64x8xf32>, vector<8x48xf32>, vector<64x48xf32> -> vector<64x48xf32>
    %c32 = arith.constant 32 : index
    %c0_25 = arith.constant 0 : index
    %36 = vector.load %arg5[%c32, %c0_25] : memref<224x48xf32, #tpu.memory_space<vmem>>, vector<8x48xf32>
    %cst_26 = arith.constant dense<0.000000e+00> : vector<64x48xf32>
    %37 = tpu.matmul %24, %36, %cst_26 {dimension_numbers = #tpu.dot_dimension_numbers<[1], [0], [0], [1], [0, 0, 1, 1], [], []>} : vector<64x8xf32>, vector<8x48xf32>, vector<64x48xf32> -> vector<64x48xf32>
    %38 = arith.addf %35, %37 : vector<64x48xf32>
    %c200 = arith.constant 200 : index
    %c0_27 = arith.constant 0 : index
    %39 = vector.load %arg5[%c200, %c0_27] : memref<224x48xf32, #tpu.memory_space<vmem>>, vector<1x48xf32>
    %40 = vector.broadcast %39 : vector<1x48xf32> to vector<64x48xf32>
    %41 = arith.addf %38, %40 : vector<64x48xf32>
    %c0_28 = arith.constant 0 : index
    %c0_29 = arith.constant 0 : index
    %42 = vector.load %arg15[%c0_28, %c0_29] : memref<64x48xf32, #tpu.memory_space<vmem>>, vector<64x48xf32>
    tpu.vector_store %arg15[%c0_28, %c0_29], %41 {strides = array<i32>} : memref<64x48xf32, #tpu.memory_space<vmem>>, vector<64x48xf32>,
    %c16 = arith.constant 16 : index
    %c0_30 = arith.constant 0 : index
    %43 = vector.load %arg5[%c16, %c0_30] : memref<224x48xf32, #tpu.memory_space<vmem>>, vector<8x48xf32>
    %cst_31 = arith.constant dense<0.000000e+00> : vector<64x48xf32>
    %44 = tpu.matmul %23, %43, %cst_31 {dimension_numbers = #tpu.dot_dimension_numbers<[1], [0], [0], [1], [0, 0, 1, 1], [], []>} : vector<64x8xf32>, vector<8x48xf32>, vector<64x48xf32> -> vector<64x48xf32>
    %c40 = arith.constant 40 : index
    %c0_32 = arith.constant 0 : index
    %45 = vector.load %arg5[%c40, %c0_32] : memref<224x48xf32, #tpu.memory_space<vmem>>, vector<8x48xf32>
    %cst_33 = arith.constant dense<0.000000e+00> : vector<64x48xf32>
    %46 = tpu.matmul %24, %45, %cst_33 {dimension_numbers = #tpu.dot_dimension_numbers<[1], [0], [0], [1], [0, 0, 1, 1], [], []>} : vector<64x8xf32>, vector<8x48xf32>, vector<64x48xf32> -> vector<64x48xf32>
    %47 = arith.addf %44, %46 : vector<64x48xf32>
    %c208 = arith.constant 208 : index
    %c0_34 = arith.constant 0 : index
    %48 = vector.load %arg5[%c208, %c0_34] : memref<224x48xf32, #tpu.memory_space<vmem>>, vector<1x48xf32>
    %49 = vector.broadcast %48 : vector<1x48xf32> to vector<64x48xf32>
    %50 = arith.addf %47, %49 : vector<64x48xf32>
    %c0_35 = arith.constant 0 : index
    %c0_36 = arith.constant 0 : index
    %51 = vector.load %arg16[%c0_35, %c0_36] : memref<64x48xf32, #tpu.memory_space<vmem>>, vector<64x48xf32>
    tpu.vector_store %arg16[%c0_35, %c0_36], %50 {strides = array<i32>} : memref<64x48xf32, #tpu.memory_space<vmem>>, vector<64x48xf32>,
    %c48_37 = arith.constant 48 : index
    %c0_38 = arith.constant 0 : index
    %52 = vector.load %arg5[%c48_37, %c0_38] : memref<224x48xf32, #tpu.memory_space<vmem>>, vector<48x48xf32>
    %c96_39 = arith.constant 96 : index
    %c0_40 = arith.constant 0 : index
    %53 = vector.load %arg5[%c96_39, %c0_40] : memref<224x48xf32, #tpu.memory_space<vmem>>, vector<48x48xf32>
    %c144 = arith.constant 144 : index
    %c0_41 = arith.constant 0 : index
    %54 = vector.load %arg5[%c144, %c0_41] : memref<224x48xf32, #tpu.memory_space<vmem>>, vector<48x48xf32>
    %c216 = arith.constant 216 : index
    %c0_42 = arith.constant 0 : index
    %55 = vector.load %arg5[%c216, %c0_42] : memref<224x48xf32, #tpu.memory_space<vmem>>, vector<1x48xf32>
    %56 = vector.shape_cast %55 : vector<1x48xf32> to vector<1x48xf32>
    %57 = vector.broadcast %56 : vector<1x48xf32> to vector<8x48xf32>
    %cst_43 = arith.constant 0.000000e+00 : f32
    %58 = vector.broadcast %cst_43 : f32 to vector<8x48xf32>
    %c0_i32 = arith.constant 0 : i32
    %c8_i32 = arith.constant 8 : i32
    %59 = arith.muli %c0_i32, %c8_i32 : i32
    %60 = tpu.assume_multiple %59, 8 : i32
    %c7_i32 = arith.constant 7 : i32
    %61 = arith.subi %c7_i32, %c0_i32 : i32
    %c8_i32_44 = arith.constant 8 : i32
    %62 = arith.muli %61, %c8_i32_44 : i32
    %63 = tpu.assume_multiple %62, 8 : i32
    %cst_45 = arith.constant dense<0.000000e+00> : vector<8x48xf32>
    %64 = tpu.matmul %58, %52, %cst_45 {dimension_numbers = #tpu.dot_dimension_numbers<[1], [0], [0], [1], [0, 0, 1, 1], [], []>} : vector<8x48xf32>, vector<48x48xf32>, vector<8x48xf32> -> vector<8x48xf32>
    %cst_46 = arith.constant dense<0.000000e+00> : vector<8x48xf32>
    %65 = tpu.matmul %58, %53, %cst_46 {dimension_numbers = #tpu.dot_dimension_numbers<[1], [0], [0], [1], [0, 0, 1, 1], [], []>} : vector<8x48xf32>, vector<48x48xf32>, vector<8x48xf32> -> vector<8x48xf32>
    %cst_47 = arith.constant dense<0.000000e+00> : vector<8x48xf32>
    %66 = tpu.matmul %58, %54, %cst_47 {dimension_numbers = #tpu.dot_dimension_numbers<[1], [0], [0], [1], [0, 0, 1, 1], [], []>} : vector<8x48xf32>, vector<48x48xf32>, vector<8x48xf32> -> vector<8x48xf32>
    %67 = arith.index_cast %60 : i32 to index
    %c0_48 = arith.constant 0 : index
    %68 = vector.load %arg14[%67, %c0_48] : memref<64x48xf32, #tpu.memory_space<vmem>>, vector<8x48xf32>
    %69 = arith.addf %68, %64 : vector<8x48xf32>
    %70 = arith.negf %69 : vector<8x48xf32>
    %71 = math.exp %70 : vector<8x48xf32>
    %cst_49 = arith.constant 1.000000e+00 : f32
    %72 = vector.broadcast %cst_49 : f32 to vector<8x48xf32>
    %73 = arith.addf %72, %71 : vector<8x48xf32>
    %74 = arith.divf %72, %73 : vector<8x48xf32>
    %75 = arith.index_cast %60 : i32 to index
    %c0_50 = arith.constant 0 : index
    %76 = vector.load %arg15[%75, %c0_50] : memref<64x48xf32, #tpu.memory_space<vmem>>, vector<8x48xf32>
    %77 = arith.addf %76, %65 : vector<8x48xf32>
    %78 = arith.negf %77 : vector<8x48xf32>
    %79 = math.exp %78 : vector<8x48xf32>
    %cst_51 = arith.constant 1.000000e+00 : f32
    %80 = vector.broadcast %cst_51 : f32 to vector<8x48xf32>
    %81 = arith.addf %80, %79 : vector<8x48xf32>
    %82 = arith.divf %80, %81 : vector<8x48xf32>
    %83 = arith.index_cast %60 : i32 to index
    %c0_52 = arith.constant 0 : index
    %84 = vector.load %arg16[%83, %c0_52] : memref<64x48xf32, #tpu.memory_space<vmem>>, vector<8x48xf32>
    %85 = arith.addf %66, %57 : vector<8x48xf32>
    %86 = arith.mulf %74, %85 : vector<8x48xf32>
    %87 = arith.addf %84, %86 : vector<8x48xf32>
    %88 = math.tanh %87 : vector<8x48xf32>
    %cst_53 = arith.constant 1.000000e+00 : f32
    %89 = vector.broadcast %cst_53 : f32 to vector<8x48xf32>
    %90 = arith.subf %89, %82 : vector<8x48xf32>
    %91 = arith.mulf %90, %88 : vector<8x48xf32>
    %92 = arith.mulf %82, %58 : vector<8x48xf32>
    %93 = arith.addf %91, %92 : vector<8x48xf32>
    %94 = arith.index_cast %60 : i32 to index
    %c0_54 = arith.constant 0 : index
    %95 = vector.load %arg17[%94, %c0_54] : memref<64x48xf32, #tpu.memory_space<vmem>>, vector<8x48xf32>
    tpu.vector_store %arg17[%94, %c0_54], %93 {strides = array<i32>} : memref<64x48xf32, #tpu.memory_space<vmem>>, vector<8x48xf32>,
    %96 = arith.index_cast %63 : i32 to index
    %c0_55 = arith.constant 0 : index
    %97 = vector.load %arg18[%96, %c0_55] : memref<64x48xf32, #tpu.memory_space<vmem>>, vector<8x48xf32>
    tpu.vector_store %arg18[%96, %c0_55], %93 {strides = array<i32>} : memref<64x48xf32, #tpu.memory_space<vmem>>, vector<8x48xf32>,
    %c1_i32 = arith.constant 1 : i32
    %c8_i32_56 = arith.constant 8 : i32
    %98 = arith.muli %c1_i32, %c8_i32_56 : i32
    %99 = tpu.assume_multiple %98, 8 : i32
    %c7_i32_57 = arith.constant 7 : i32
    %100 = arith.subi %c7_i32_57, %c1_i32 : i32
    %c8_i32_58 = arith.constant 8 : i32
    %101 = arith.muli %100, %c8_i32_58 : i32
    %102 = tpu.assume_multiple %101, 8 : i32
    %cst_59 = arith.constant dense<0.000000e+00> : vector<8x48xf32>
    %103 = tpu.matmul %93, %52, %cst_59 {dimension_numbers = #tpu.dot_dimension_numbers<[1], [0], [0], [1], [0, 0, 1, 1], [], []>} : vector<8x48xf32>, vector<48x48xf32>, vector<8x48xf32> -> vector<8x48xf32>
    %cst_60 = arith.constant dense<0.000000e+00> : vector<8x48xf32>
    %104 = tpu.matmul %93, %53, %cst_60 {dimension_numbers = #tpu.dot_dimension_numbers<[1], [0], [0], [1], [0, 0, 1, 1], [], []>} : vector<8x48xf32>, vector<48x48xf32>, vector<8x48xf32> -> vector<8x48xf32>
    %cst_61 = arith.constant dense<0.000000e+00> : vector<8x48xf32>
    %105 = tpu.matmul %93, %54, %cst_61 {dimension_numbers = #tpu.dot_dimension_numbers<[1], [0], [0], [1], [0, 0, 1, 1], [], []>} : vector<8x48xf32>, vector<48x48xf32>, vector<8x48xf32> -> vector<8x48xf32>
    %106 = arith.index_cast %99 : i32 to index
    %c0_62 = arith.constant 0 : index
    %107 = vector.load %arg14[%106, %c0_62] : memref<64x48xf32, #tpu.memory_space<vmem>>, vector<8x48xf32>
    %108 = arith.addf %107, %103 : vector<8x48xf32>
    %109 = arith.negf %108 : vector<8x48xf32>
    %110 = math.exp %109 : vector<8x48xf32>
    %cst_63 = arith.constant 1.000000e+00 : f32
    %111 = vector.broadcast %cst_63 : f32 to vector<8x48xf32>
    %112 = arith.addf %111, %110 : vector<8x48xf32>
    %113 = arith.divf %111, %112 : vector<8x48xf32>
    %114 = arith.index_cast %99 : i32 to index
    %c0_64 = arith.constant 0 : index
    %115 = vector.load %arg15[%114, %c0_64] : memref<64x48xf32, #tpu.memory_space<vmem>>, vector<8x48xf32>
    %116 = arith.addf %115, %104 : vector<8x48xf32>
    %117 = arith.negf %116 : vector<8x48xf32>
    %118 = math.exp %117 : vector<8x48xf32>
    %cst_65 = arith.constant 1.000000e+00 : f32
    %119 = vector.broadcast %cst_65 : f32 to vector<8x48xf32>
    %120 = arith.addf %119, %118 : vector<8x48xf32>
    %121 = arith.divf %119, %120 : vector<8x48xf32>
    %122 = arith.index_cast %99 : i32 to index
    %c0_66 = arith.constant 0 : index
    %123 = vector.load %arg16[%122, %c0_66] : memref<64x48xf32, #tpu.memory_space<vmem>>, vector<8x48xf32>
    %124 = arith.addf %105, %57 : vector<8x48xf32>
    %125 = arith.mulf %113, %124 : vector<8x48xf32>
    %126 = arith.addf %123, %125 : vector<8x48xf32>
    %127 = math.tanh %126 : vector<8x48xf32>
    %cst_67 = arith.constant 1.000000e+00 : f32
    %128 = vector.broadcast %cst_67 : f32 to vector<8x48xf32>
    %129 = arith.subf %128, %121 : vector<8x48xf32>
    %130 = arith.mulf %129, %127 : vector<8x48xf32>
    %131 = arith.mulf %121, %93 : vector<8x48xf32>
    %132 = arith.addf %130, %131 : vector<8x48xf32>
    %133 = arith.index_cast %99 : i32 to index
    %c0_68 = arith.constant 0 : index
    %134 = vector.load %arg17[%133, %c0_68] : memref<64x48xf32, #tpu.memory_space<vmem>>, vector<8x48xf32>
    tpu.vector_store %arg17[%133, %c0_68], %132 {strides = array<i32>} : memref<64x48xf32, #tpu.memory_space<vmem>>, vector<8x48xf32>,
    %135 = arith.index_cast %102 : i32 to index
    %c0_69 = arith.constant 0 : index
    %136 = vector.load %arg18[%135, %c0_69] : memref<64x48xf32, #tpu.memory_space<vmem>>, vector<8x48xf32>
    tpu.vector_store %arg18[%135, %c0_69], %132 {strides = array<i32>} : memref<64x48xf32, #tpu.memory_space<vmem>>, vector<8x48xf32>,
    %c2_i32 = arith.constant 2 : i32
    %c8_i32_70 = arith.constant 8 : i32
    %137 = arith.muli %c2_i32, %c8_i32_70 : i32
    %138 = tpu.assume_multiple %137, 8 : i32
    %c7_i32_71 = arith.constant 7 : i32
    %139 = arith.subi %c7_i32_71, %c2_i32 : i32
    %c8_i32_72 = arith.constant 8 : i32
    %140 = arith.muli %139, %c8_i32_72 : i32
    %141 = tpu.assume_multiple %140, 8 : i32
    %cst_73 = arith.constant dense<0.000000e+00> : vector<8x48xf32>
    %142 = tpu.matmul %132, %52, %cst_73 {dimension_numbers = #tpu.dot_dimension_numbers<[1], [0], [0], [1], [0, 0, 1, 1], [], []>} : vector<8x48xf32>, vector<48x48xf32>, vector<8x48xf32> -> vector<8x48xf32>
    %cst_74 = arith.constant dense<0.000000e+00> : vector<8x48xf32>
    %143 = tpu.matmul %132, %53, %cst_74 {dimension_numbers = #tpu.dot_dimension_numbers<[1], [0], [0], [1], [0, 0, 1, 1], [], []>} : vector<8x48xf32>, vector<48x48xf32>, vector<8x48xf32> -> vector<8x48xf32>
    %cst_75 = arith.constant dense<0.000000e+00> : vector<8x48xf32>
    %144 = tpu.matmul %132, %54, %cst_75 {dimension_numbers = #tpu.dot_dimension_numbers<[1], [0], [0], [1], [0, 0, 1, 1], [], []>} : vector<8x48xf32>, vector<48x48xf32>, vector<8x48xf32> -> vector<8x48xf32>
    %145 = arith.index_cast %138 : i32 to index
    %c0_76 = arith.constant 0 : index
    %146 = vector.load %arg14[%145, %c0_76] : memref<64x48xf32, #tpu.memory_space<vmem>>, vector<8x48xf32>
    %147 = arith.addf %146, %142 : vector<8x48xf32>
    %148 = arith.negf %147 : vector<8x48xf32>
    %149 = math.exp %148 : vector<8x48xf32>
    %cst_77 = arith.constant 1.000000e+00 : f32
    %150 = vector.broadcast %cst_77 : f32 to vector<8x48xf32>
    %151 = arith.addf %150, %149 : vector<8x48xf32>
    %152 = arith.divf %150, %151 : vector<8x48xf32>
    %153 = arith.index_cast %138 : i32 to index
    %c0_78 = arith.constant 0 : index
    %154 = vector.load %arg15[%153, %c0_78] : memref<64x48xf32, #tpu.memory_space<vmem>>, vector<8x48xf32>
    %155 = arith.addf %154, %143 : vector<8x48xf32>
    %156 = arith.negf %155 : vector<8x48xf32>
    %157 = math.exp %156 : vector<8x48xf32>
    %cst_79 = arith.constant 1.000000e+00 : f32
    %158 = vector.broadcast %cst_79 : f32 to vector<8x48xf32>
    %159 = arith.addf %158, %157 : vector<8x48xf32>
    %160 = arith.divf %158, %159 : vector<8x48xf32>
    %161 = arith.index_cast %138 : i32 to index
    %c0_80 = arith.constant 0 : index
    %162 = vector.load %arg16[%161, %c0_80] : memref<64x48xf32, #tpu.memory_space<vmem>>, vector<8x48xf32>
    %163 = arith.addf %144, %57 : vector<8x48xf32>
    %164 = arith.mulf %152, %163 : vector<8x48xf32>
    %165 = arith.addf %162, %164 : vector<8x48xf32>
    %166 = math.tanh %165 : vector<8x48xf32>
    %cst_81 = arith.constant 1.000000e+00 : f32
    %167 = vector.broadcast %cst_81 : f32 to vector<8x48xf32>
    %168 = arith.subf %167, %160 : vector<8x48xf32>
    %169 = arith.mulf %168, %166 : vector<8x48xf32>
    %170 = arith.mulf %160, %132 : vector<8x48xf32>
    %171 = arith.addf %169, %170 : vector<8x48xf32>
    %172 = arith.index_cast %138 : i32 to index
    %c0_82 = arith.constant 0 : index
    %173 = vector.load %arg17[%172, %c0_82] : memref<64x48xf32, #tpu.memory_space<vmem>>, vector<8x48xf32>
    tpu.vector_store %arg17[%172, %c0_82], %171 {strides = array<i32>} : memref<64x48xf32, #tpu.memory_space<vmem>>, vector<8x48xf32>,
    %174 = arith.index_cast %141 : i32 to index
    %c0_83 = arith.constant 0 : index
    %175 = vector.load %arg18[%174, %c0_83] : memref<64x48xf32, #tpu.memory_space<vmem>>, vector<8x48xf32>
    tpu.vector_store %arg18[%174, %c0_83], %171 {strides = array<i32>} : memref<64x48xf32, #tpu.memory_space<vmem>>, vector<8x48xf32>,
    %c3_i32 = arith.constant 3 : i32
    %c8_i32_84 = arith.constant 8 : i32
    %176 = arith.muli %c3_i32, %c8_i32_84 : i32
    %177 = tpu.assume_multiple %176, 8 : i32
    %c7_i32_85 = arith.constant 7 : i32
    %178 = arith.subi %c7_i32_85, %c3_i32 : i32
    %c8_i32_86 = arith.constant 8 : i32
    %179 = arith.muli %178, %c8_i32_86 : i32
    %180 = tpu.assume_multiple %179, 8 : i32
    %cst_87 = arith.constant dense<0.000000e+00> : vector<8x48xf32>
    %181 = tpu.matmul %171, %52, %cst_87 {dimension_numbers = #tpu.dot_dimension_numbers<[1], [0], [0], [1], [0, 0, 1, 1], [], []>} : vector<8x48xf32>, vector<48x48xf32>, vector<8x48xf32> -> vector<8x48xf32>
    %cst_88 = arith.constant dense<0.000000e+00> : vector<8x48xf32>
    %182 = tpu.matmul %171, %53, %cst_88 {dimension_numbers = #tpu.dot_dimension_numbers<[1], [0], [0], [1], [0, 0, 1, 1], [], []>} : vector<8x48xf32>, vector<48x48xf32>, vector<8x48xf32> -> vector<8x48xf32>
    %cst_89 = arith.constant dense<0.000000e+00> : vector<8x48xf32>
    %183 = tpu.matmul %171, %54, %cst_89 {dimension_numbers = #tpu.dot_dimension_numbers<[1], [0], [0], [1], [0, 0, 1, 1], [], []>} : vector<8x48xf32>, vector<48x48xf32>, vector<8x48xf32> -> vector<8x48xf32>
    %184 = arith.index_cast %177 : i32 to index
    %c0_90 = arith.constant 0 : index
    %185 = vector.load %arg14[%184, %c0_90] : memref<64x48xf32, #tpu.memory_space<vmem>>, vector<8x48xf32>
    %186 = arith.addf %185, %181 : vector<8x48xf32>
    %187 = arith.negf %186 : vector<8x48xf32>
    %188 = math.exp %187 : vector<8x48xf32>
    %cst_91 = arith.constant 1.000000e+00 : f32
    %189 = vector.broadcast %cst_91 : f32 to vector<8x48xf32>
    %190 = arith.addf %189, %188 : vector<8x48xf32>
    %191 = arith.divf %189, %190 : vector<8x48xf32>
    %192 = arith.index_cast %177 : i32 to index
    %c0_92 = arith.constant 0 : index
    %193 = vector.load %arg15[%192, %c0_92] : memref<64x48xf32, #tpu.memory_space<vmem>>, vector<8x48xf32>
    %194 = arith.addf %193, %182 : vector<8x48xf32>
    %195 = arith.negf %194 : vector<8x48xf32>
    %196 = math.exp %195 : vector<8x48xf32>
    %cst_93 = arith.constant 1.000000e+00 : f32
    %197 = vector.broadcast %cst_93 : f32 to vector<8x48xf32>
    %198 = arith.addf %197, %196 : vector<8x48xf32>
    %199 = arith.divf %197, %198 : vector<8x48xf32>
    %200 = arith.index_cast %177 : i32 to index
    %c0_94 = arith.constant 0 : index
    %201 = vector.load %arg16[%200, %c0_94] : memref<64x48xf32, #tpu.memory_space<vmem>>, vector<8x48xf32>
    %202 = arith.addf %183, %57 : vector<8x48xf32>
    %203 = arith.mulf %191, %202 : vector<8x48xf32>
    %204 = arith.addf %201, %203 : vector<8x48xf32>
    %205 = math.tanh %204 : vector<8x48xf32>
    %cst_95 = arith.constant 1.000000e+00 : f32
    %206 = vector.broadcast %cst_95 : f32 to vector<8x48xf32>
    %207 = arith.subf %206, %199 : vector<8x48xf32>
    %208 = arith.mulf %207, %205 : vector<8x48xf32>
    %209 = arith.mulf %199, %171 : vector<8x48xf32>
    %210 = arith.addf %208, %209 : vector<8x48xf32>
    %211 = arith.index_cast %177 : i32 to index
    %c0_96 = arith.constant 0 : index
    %212 = vector.load %arg17[%211, %c0_96] : memref<64x48xf32, #tpu.memory_space<vmem>>, vector<8x48xf32>
    tpu.vector_store %arg17[%211, %c0_96], %210 {strides = array<i32>} : memref<64x48xf32, #tpu.memory_space<vmem>>, vector<8x48xf32>,
    %213 = arith.index_cast %180 : i32 to index
    %c0_97 = arith.constant 0 : index
    %214 = vector.load %arg18[%213, %c0_97] : memref<64x48xf32, #tpu.memory_space<vmem>>, vector<8x48xf32>
    tpu.vector_store %arg18[%213, %c0_97], %210 {strides = array<i32>} : memref<64x48xf32, #tpu.memory_space<vmem>>, vector<8x48xf32>,
    %c4_i32 = arith.constant 4 : i32
    %c8_i32_98 = arith.constant 8 : i32
    %215 = arith.muli %c4_i32, %c8_i32_98 : i32
    %216 = tpu.assume_multiple %215, 8 : i32
    %c7_i32_99 = arith.constant 7 : i32
    %217 = arith.subi %c7_i32_99, %c4_i32 : i32
    %c8_i32_100 = arith.constant 8 : i32
    %218 = arith.muli %217, %c8_i32_100 : i32
    %219 = tpu.assume_multiple %218, 8 : i32
    %cst_101 = arith.constant dense<0.000000e+00> : vector<8x48xf32>
    %220 = tpu.matmul %210, %52, %cst_101 {dimension_numbers = #tpu.dot_dimension_numbers<[1], [0], [0], [1], [0, 0, 1, 1], [], []>} : vector<8x48xf32>, vector<48x48xf32>, vector<8x48xf32> -> vector<8x48xf32>
    %cst_102 = arith.constant dense<0.000000e+00> : vector<8x48xf32>
    %221 = tpu.matmul %210, %53, %cst_102 {dimension_numbers = #tpu.dot_dimension_numbers<[1], [0], [0], [1], [0, 0, 1, 1], [], []>} : vector<8x48xf32>, vector<48x48xf32>, vector<8x48xf32> -> vector<8x48xf32>
    %cst_103 = arith.constant dense<0.000000e+00> : vector<8x48xf32>
    %222 = tpu.matmul %210, %54, %cst_103 {dimension_numbers = #tpu.dot_dimension_numbers<[1], [0], [0], [1], [0, 0, 1, 1], [], []>} : vector<8x48xf32>, vector<48x48xf32>, vector<8x48xf32> -> vector<8x48xf32>
    %223 = arith.index_cast %216 : i32 to index
    %c0_104 = arith.constant 0 : index
    %224 = vector.load %arg14[%223, %c0_104] : memref<64x48xf32, #tpu.memory_space<vmem>>, vector<8x48xf32>
    %225 = arith.addf %224, %220 : vector<8x48xf32>
    %226 = arith.negf %225 : vector<8x48xf32>
    %227 = math.exp %226 : vector<8x48xf32>
    %cst_105 = arith.constant 1.000000e+00 : f32
    %228 = vector.broadcast %cst_105 : f32 to vector<8x48xf32>
    %229 = arith.addf %228, %227 : vector<8x48xf32>
    %230 = arith.divf %228, %229 : vector<8x48xf32>
    %231 = arith.index_cast %216 : i32 to index
    %c0_106 = arith.constant 0 : index
    %232 = vector.load %arg15[%231, %c0_106] : memref<64x48xf32, #tpu.memory_space<vmem>>, vector<8x48xf32>
    %233 = arith.addf %232, %221 : vector<8x48xf32>
    %234 = arith.negf %233 : vector<8x48xf32>
    %235 = math.exp %234 : vector<8x48xf32>
    %cst_107 = arith.constant 1.000000e+00 : f32
    %236 = vector.broadcast %cst_107 : f32 to vector<8x48xf32>
    %237 = arith.addf %236, %235 : vector<8x48xf32>
    %238 = arith.divf %236, %237 : vector<8x48xf32>
    %239 = arith.index_cast %216 : i32 to index
    %c0_108 = arith.constant 0 : index
    %240 = vector.load %arg16[%239, %c0_108] : memref<64x48xf32, #tpu.memory_space<vmem>>, vector<8x48xf32>
    %241 = arith.addf %222, %57 : vector<8x48xf32>
    %242 = arith.mulf %230, %241 : vector<8x48xf32>
    %243 = arith.addf %240, %242 : vector<8x48xf32>
    %244 = math.tanh %243 : vector<8x48xf32>
    %cst_109 = arith.constant 1.000000e+00 : f32
    %245 = vector.broadcast %cst_109 : f32 to vector<8x48xf32>
    %246 = arith.subf %245, %238 : vector<8x48xf32>
    %247 = arith.mulf %246, %244 : vector<8x48xf32>
    %248 = arith.mulf %238, %210 : vector<8x48xf32>
    %249 = arith.addf %247, %248 : vector<8x48xf32>
    %250 = arith.index_cast %216 : i32 to index
    %c0_110 = arith.constant 0 : index
    %251 = vector.load %arg17[%250, %c0_110] : memref<64x48xf32, #tpu.memory_space<vmem>>, vector<8x48xf32>
    tpu.vector_store %arg17[%250, %c0_110], %249 {strides = array<i32>} : memref<64x48xf32, #tpu.memory_space<vmem>>, vector<8x48xf32>,
    %252 = arith.index_cast %219 : i32 to index
    %c0_111 = arith.constant 0 : index
    %253 = vector.load %arg18[%252, %c0_111] : memref<64x48xf32, #tpu.memory_space<vmem>>, vector<8x48xf32>
    tpu.vector_store %arg18[%252, %c0_111], %249 {strides = array<i32>} : memref<64x48xf32, #tpu.memory_space<vmem>>, vector<8x48xf32>,
    %c5_i32 = arith.constant 5 : i32
    %c8_i32_112 = arith.constant 8 : i32
    %254 = arith.muli %c5_i32, %c8_i32_112 : i32
    %255 = tpu.assume_multiple %254, 8 : i32
    %c7_i32_113 = arith.constant 7 : i32
    %256 = arith.subi %c7_i32_113, %c5_i32 : i32
    %c8_i32_114 = arith.constant 8 : i32
    %257 = arith.muli %256, %c8_i32_114 : i32
    %258 = tpu.assume_multiple %257, 8 : i32
    %cst_115 = arith.constant dense<0.000000e+00> : vector<8x48xf32>
    %259 = tpu.matmul %249, %52, %cst_115 {dimension_numbers = #tpu.dot_dimension_numbers<[1], [0], [0], [1], [0, 0, 1, 1], [], []>} : vector<8x48xf32>, vector<48x48xf32>, vector<8x48xf32> -> vector<8x48xf32>
    %cst_116 = arith.constant dense<0.000000e+00> : vector<8x48xf32>
    %260 = tpu.matmul %249, %53, %cst_116 {dimension_numbers = #tpu.dot_dimension_numbers<[1], [0], [0], [1], [0, 0, 1, 1], [], []>} : vector<8x48xf32>, vector<48x48xf32>, vector<8x48xf32> -> vector<8x48xf32>
    %cst_117 = arith.constant dense<0.000000e+00> : vector<8x48xf32>
    %261 = tpu.matmul %249, %54, %cst_117 {dimension_numbers = #tpu.dot_dimension_numbers<[1], [0], [0], [1], [0, 0, 1, 1], [], []>} : vector<8x48xf32>, vector<48x48xf32>, vector<8x48xf32> -> vector<8x48xf32>
    %262 = arith.index_cast %255 : i32 to index
    %c0_118 = arith.constant 0 : index
    %263 = vector.load %arg14[%262, %c0_118] : memref<64x48xf32, #tpu.memory_space<vmem>>, vector<8x48xf32>
    %264 = arith.addf %263, %259 : vector<8x48xf32>
    %265 = arith.negf %264 : vector<8x48xf32>
    %266 = math.exp %265 : vector<8x48xf32>
    %cst_119 = arith.constant 1.000000e+00 : f32
    %267 = vector.broadcast %cst_119 : f32 to vector<8x48xf32>
    %268 = arith.addf %267, %266 : vector<8x48xf32>
    %269 = arith.divf %267, %268 : vector<8x48xf32>
    %270 = arith.index_cast %255 : i32 to index
    %c0_120 = arith.constant 0 : index
    %271 = vector.load %arg15[%270, %c0_120] : memref<64x48xf32, #tpu.memory_space<vmem>>, vector<8x48xf32>
    %272 = arith.addf %271, %260 : vector<8x48xf32>
    %273 = arith.negf %272 : vector<8x48xf32>
    %274 = math.exp %273 : vector<8x48xf32>
    %cst_121 = arith.constant 1.000000e+00 : f32
    %275 = vector.broadcast %cst_121 : f32 to vector<8x48xf32>
    %276 = arith.addf %275, %274 : vector<8x48xf32>
    %277 = arith.divf %275, %276 : vector<8x48xf32>
    %278 = arith.index_cast %255 : i32 to index
    %c0_122 = arith.constant 0 : index
    %279 = vector.load %arg16[%278, %c0_122] : memref<64x48xf32, #tpu.memory_space<vmem>>, vector<8x48xf32>
    %280 = arith.addf %261, %57 : vector<8x48xf32>
    %281 = arith.mulf %269, %280 : vector<8x48xf32>
    %282 = arith.addf %279, %281 : vector<8x48xf32>
    %283 = math.tanh %282 : vector<8x48xf32>
    %cst_123 = arith.constant 1.000000e+00 : f32
    %284 = vector.broadcast %cst_123 : f32 to vector<8x48xf32>
    %285 = arith.subf %284, %277 : vector<8x48xf32>
    %286 = arith.mulf %285, %283 : vector<8x48xf32>
    %287 = arith.mulf %277, %249 : vector<8x48xf32>
    %288 = arith.addf %286, %287 : vector<8x48xf32>
    %289 = arith.index_cast %255 : i32 to index
    %c0_124 = arith.constant 0 : index
    %290 = vector.load %arg17[%289, %c0_124] : memref<64x48xf32, #tpu.memory_space<vmem>>, vector<8x48xf32>
    tpu.vector_store %arg17[%289, %c0_124], %288 {strides = array<i32>} : memref<64x48xf32, #tpu.memory_space<vmem>>, vector<8x48xf32>,
    %291 = arith.index_cast %258 : i32 to index
    %c0_125 = arith.constant 0 : index
    %292 = vector.load %arg18[%291, %c0_125] : memref<64x48xf32, #tpu.memory_space<vmem>>, vector<8x48xf32>
    tpu.vector_store %arg18[%291, %c0_125], %288 {strides = array<i32>} : memref<64x48xf32, #tpu.memory_space<vmem>>, vector<8x48xf32>,
    %c6_i32 = arith.constant 6 : i32
    %c8_i32_126 = arith.constant 8 : i32
    %293 = arith.muli %c6_i32, %c8_i32_126 : i32
    %294 = tpu.assume_multiple %293, 8 : i32
    %c7_i32_127 = arith.constant 7 : i32
    %295 = arith.subi %c7_i32_127, %c6_i32 : i32
    %c8_i32_128 = arith.constant 8 : i32
    %296 = arith.muli %295, %c8_i32_128 : i32
    %297 = tpu.assume_multiple %296, 8 : i32
    %cst_129 = arith.constant dense<0.000000e+00> : vector<8x48xf32>
    %298 = tpu.matmul %288, %52, %cst_129 {dimension_numbers = #tpu.dot_dimension_numbers<[1], [0], [0], [1], [0, 0, 1, 1], [], []>} : vector<8x48xf32>, vector<48x48xf32>, vector<8x48xf32> -> vector<8x48xf32>
    %cst_130 = arith.constant dense<0.000000e+00> : vector<8x48xf32>
    %299 = tpu.matmul %288, %53, %cst_130 {dimension_numbers = #tpu.dot_dimension_numbers<[1], [0], [0], [1], [0, 0, 1, 1], [], []>} : vector<8x48xf32>, vector<48x48xf32>, vector<8x48xf32> -> vector<8x48xf32>
    %cst_131 = arith.constant dense<0.000000e+00> : vector<8x48xf32>
    %300 = tpu.matmul %288, %54, %cst_131 {dimension_numbers = #tpu.dot_dimension_numbers<[1], [0], [0], [1], [0, 0, 1, 1], [], []>} : vector<8x48xf32>, vector<48x48xf32>, vector<8x48xf32> -> vector<8x48xf32>
    %301 = arith.index_cast %294 : i32 to index
    %c0_132 = arith.constant 0 : index
    %302 = vector.load %arg14[%301, %c0_132] : memref<64x48xf32, #tpu.memory_space<vmem>>, vector<8x48xf32>
    %303 = arith.addf %302, %298 : vector<8x48xf32>
    %304 = arith.negf %303 : vector<8x48xf32>
    %305 = math.exp %304 : vector<8x48xf32>
    %cst_133 = arith.constant 1.000000e+00 : f32
    %306 = vector.broadcast %cst_133 : f32 to vector<8x48xf32>
    %307 = arith.addf %306, %305 : vector<8x48xf32>
    %308 = arith.divf %306, %307 : vector<8x48xf32>
    %309 = arith.index_cast %294 : i32 to index
    %c0_134 = arith.constant 0 : index
    %310 = vector.load %arg15[%309, %c0_134] : memref<64x48xf32, #tpu.memory_space<vmem>>, vector<8x48xf32>
    %311 = arith.addf %310, %299 : vector<8x48xf32>
    %312 = arith.negf %311 : vector<8x48xf32>
    %313 = math.exp %312 : vector<8x48xf32>
    %cst_135 = arith.constant 1.000000e+00 : f32
    %314 = vector.broadcast %cst_135 : f32 to vector<8x48xf32>
    %315 = arith.addf %314, %313 : vector<8x48xf32>
    %316 = arith.divf %314, %315 : vector<8x48xf32>
    %317 = arith.index_cast %294 : i32 to index
    %c0_136 = arith.constant 0 : index
    %318 = vector.load %arg16[%317, %c0_136] : memref<64x48xf32, #tpu.memory_space<vmem>>, vector<8x48xf32>
    %319 = arith.addf %300, %57 : vector<8x48xf32>
    %320 = arith.mulf %308, %319 : vector<8x48xf32>
    %321 = arith.addf %318, %320 : vector<8x48xf32>
    %322 = math.tanh %321 : vector<8x48xf32>
    %cst_137 = arith.constant 1.000000e+00 : f32
    %323 = vector.broadcast %cst_137 : f32 to vector<8x48xf32>
    %324 = arith.subf %323, %316 : vector<8x48xf32>
    %325 = arith.mulf %324, %322 : vector<8x48xf32>
    %326 = arith.mulf %316, %288 : vector<8x48xf32>
    %327 = arith.addf %325, %326 : vector<8x48xf32>
    %328 = arith.index_cast %294 : i32 to index
    %c0_138 = arith.constant 0 : index
    %329 = vector.load %arg17[%328, %c0_138] : memref<64x48xf32, #tpu.memory_space<vmem>>, vector<8x48xf32>
    tpu.vector_store %arg17[%328, %c0_138], %327 {strides = array<i32>} : memref<64x48xf32, #tpu.memory_space<vmem>>, vector<8x48xf32>,
    %330 = arith.index_cast %297 : i32 to index
    %c0_139 = arith.constant 0 : index
    %331 = vector.load %arg18[%330, %c0_139] : memref<64x48xf32, #tpu.memory_space<vmem>>, vector<8x48xf32>
    tpu.vector_store %arg18[%330, %c0_139], %327 {strides = array<i32>} : memref<64x48xf32, #tpu.memory_space<vmem>>, vector<8x48xf32>,
    %c7_i32_140 = arith.constant 7 : i32
    %c8_i32_141 = arith.constant 8 : i32
    %332 = arith.muli %c7_i32_140, %c8_i32_141 : i32
    %333 = tpu.assume_multiple %332, 8 : i32
    %c7_i32_142 = arith.constant 7 : i32
    %334 = arith.subi %c7_i32_142, %c7_i32_140 : i32
    %c8_i32_143 = arith.constant 8 : i32
    %335 = arith.muli %334, %c8_i32_143 : i32
    %336 = tpu.assume_multiple %335, 8 : i32
    %cst_144 = arith.constant dense<0.000000e+00> : vector<8x48xf32>
    %337 = tpu.matmul %327, %52, %cst_144 {dimension_numbers = #tpu.dot_dimension_numbers<[1], [0], [0], [1], [0, 0, 1, 1], [], []>} : vector<8x48xf32>, vector<48x48xf32>, vector<8x48xf32> -> vector<8x48xf32>
    %cst_145 = arith.constant dense<0.000000e+00> : vector<8x48xf32>
    %338 = tpu.matmul %327, %53, %cst_145 {dimension_numbers = #tpu.dot_dimension_numbers<[1], [0], [0], [1], [0, 0, 1, 1], [], []>} : vector<8x48xf32>, vector<48x48xf32>, vector<8x48xf32> -> vector<8x48xf32>
    %cst_146 = arith.constant dense<0.000000e+00> : vector<8x48xf32>
    %339 = tpu.matmul %327, %54, %cst_146 {dimension_numbers = #tpu.dot_dimension_numbers<[1], [0], [0], [1], [0, 0, 1, 1], [], []>} : vector<8x48xf32>, vector<48x48xf32>, vector<8x48xf32> -> vector<8x48xf32>
    %340 = arith.index_cast %333 : i32 to index
    %c0_147 = arith.constant 0 : index
    %341 = vector.load %arg14[%340, %c0_147] : memref<64x48xf32, #tpu.memory_space<vmem>>, vector<8x48xf32>
    %342 = arith.addf %341, %337 : vector<8x48xf32>
    %343 = arith.negf %342 : vector<8x48xf32>
    %344 = math.exp %343 : vector<8x48xf32>
    %cst_148 = arith.constant 1.000000e+00 : f32
    %345 = vector.broadcast %cst_148 : f32 to vector<8x48xf32>
    %346 = arith.addf %345, %344 : vector<8x48xf32>
    %347 = arith.divf %345, %346 : vector<8x48xf32>
    %348 = arith.index_cast %333 : i32 to index
    %c0_149 = arith.constant 0 : index
    %349 = vector.load %arg15[%348, %c0_149] : memref<64x48xf32, #tpu.memory_space<vmem>>, vector<8x48xf32>
    %350 = arith.addf %349, %338 : vector<8x48xf32>
    %351 = arith.negf %350 : vector<8x48xf32>
    %352 = math.exp %351 : vector<8x48xf32>
    %cst_150 = arith.constant 1.000000e+00 : f32
    %353 = vector.broadcast %cst_150 : f32 to vector<8x48xf32>
    %354 = arith.addf %353, %352 : vector<8x48xf32>
    %355 = arith.divf %353, %354 : vector<8x48xf32>
    %356 = arith.index_cast %333 : i32 to index
    %c0_151 = arith.constant 0 : index
    %357 = vector.load %arg16[%356, %c0_151] : memref<64x48xf32, #tpu.memory_space<vmem>>, vector<8x48xf32>
    %358 = arith.addf %339, %57 : vector<8x48xf32>
    %359 = arith.mulf %347, %358 : vector<8x48xf32>
    %360 = arith.addf %357, %359 : vector<8x48xf32>
    %361 = math.tanh %360 : vector<8x48xf32>
    %cst_152 = arith.constant 1.000000e+00 : f32
    %362 = vector.broadcast %cst_152 : f32 to vector<8x48xf32>
    %363 = arith.subf %362, %355 : vector<8x48xf32>
    %364 = arith.mulf %363, %361 : vector<8x48xf32>
    %365 = arith.mulf %355, %327 : vector<8x48xf32>
    %366 = arith.addf %364, %365 : vector<8x48xf32>
    %367 = arith.index_cast %333 : i32 to index
    %c0_153 = arith.constant 0 : index
    %368 = vector.load %arg17[%367, %c0_153] : memref<64x48xf32, #tpu.memory_space<vmem>>, vector<8x48xf32>
    tpu.vector_store %arg17[%367, %c0_153], %366 {strides = array<i32>} : memref<64x48xf32, #tpu.memory_space<vmem>>, vector<8x48xf32>,
    %369 = arith.index_cast %336 : i32 to index
    %c0_154 = arith.constant 0 : index
    %370 = vector.load %arg18[%369, %c0_154] : memref<64x48xf32, #tpu.memory_space<vmem>>, vector<8x48xf32>
    tpu.vector_store %arg18[%369, %c0_154], %366 {strides = array<i32>} : memref<64x48xf32, #tpu.memory_space<vmem>>, vector<8x48xf32>,
    %c8_i32_155 = arith.constant 8 : i32
    %c0_156 = arith.constant 0 : index
    %c0_157 = arith.constant 0 : index
    %371 = vector.load %arg17[%c0_156, %c0_157] : memref<64x48xf32, #tpu.memory_space<vmem>>, vector<64x48xf32>
    %c0_158 = arith.constant 0 : index
    %c0_159 = arith.constant 0 : index
    %372 = vector.load %arg18[%c0_158, %c0_159] : memref<64x48xf32, #tpu.memory_space<vmem>>, vector<64x48xf32>
    %c0_160 = arith.constant 0 : index
    %c0_161 = arith.constant 0 : index
    %373 = vector.load %arg6[%c0_160, %c0_161] : memref<464x48xf32, #tpu.memory_space<vmem>>, vector<48x48xf32>
    %cst_162 = arith.constant dense<0.000000e+00> : vector<64x48xf32>
    %374 = tpu.matmul %371, %373, %cst_162 {dimension_numbers = #tpu.dot_dimension_numbers<[1], [0], [0], [1], [0, 0, 1, 1], [], []>} : vector<64x48xf32>, vector<48x48xf32>, vector<64x48xf32> -> vector<64x48xf32>
    %c144_163 = arith.constant 144 : index
    %c0_164 = arith.constant 0 : index
    %375 = vector.load %arg6[%c144_163, %c0_164] : memref<464x48xf32, #tpu.memory_space<vmem>>, vector<48x48xf32>
    %cst_165 = arith.constant dense<0.000000e+00> : vector<64x48xf32>
    %376 = tpu.matmul %372, %375, %cst_165 {dimension_numbers = #tpu.dot_dimension_numbers<[1], [0], [0], [1], [0, 0, 1, 1], [], []>} : vector<64x48xf32>, vector<48x48xf32>, vector<64x48xf32> -> vector<64x48xf32>
    %377 = arith.addf %374, %376 : vector<64x48xf32>
    %c432 = arith.constant 432 : index
    %c0_166 = arith.constant 0 : index
    %378 = vector.load %arg6[%c432, %c0_166] : memref<464x48xf32, #tpu.memory_space<vmem>>, vector<1x48xf32>
    %379 = vector.broadcast %378 : vector<1x48xf32> to vector<64x48xf32>
    %380 = arith.addf %377, %379 : vector<64x48xf32>
    %c0_167 = arith.constant 0 : index
    %c0_168 = arith.constant 0 : index
    %381 = vector.load %arg14[%c0_167, %c0_168] : memref<64x48xf32, #tpu.memory_space<vmem>>, vector<64x48xf32>
    tpu.vector_store %arg14[%c0_167, %c0_168], %380 {strides = array<i32>} : memref<64x48xf32, #tpu.memory_space<vmem>>, vector<64x48xf32>,
    %c48_169 = arith.constant 48 : index
    %c0_170 = arith.constant 0 : index
    %382 = vector.load %arg6[%c48_169, %c0_170] : memref<464x48xf32, #tpu.memory_space<vmem>>, vector<48x48xf32>
    %cst_171 = arith.constant dense<0.000000e+00> : vector<64x48xf32>
    %383 = tpu.matmul %371, %382, %cst_171 {dimension_numbers = #tpu.dot_dimension_numbers<[1], [0], [0], [1], [0, 0, 1, 1], [], []>} : vector<64x48xf32>, vector<48x48xf32>, vector<64x48xf32> -> vector<64x48xf32>
    %c192_172 = arith.constant 192 : index
    %c0_173 = arith.constant 0 : index
    %384 = vector.load %arg6[%c192_172, %c0_173] : memref<464x48xf32, #tpu.memory_space<vmem>>, vector<48x48xf32>
    %cst_174 = arith.constant dense<0.000000e+00> : vector<64x48xf32>
    %385 = tpu.matmul %372, %384, %cst_174 {dimension_numbers = #tpu.dot_dimension_numbers<[1], [0], [0], [1], [0, 0, 1, 1], [], []>} : vector<64x48xf32>, vector<48x48xf32>, vector<64x48xf32> -> vector<64x48xf32>
    %386 = arith.addf %383, %385 : vector<64x48xf32>
    %c440 = arith.constant 440 : index
    %c0_175 = arith.constant 0 : index
    %387 = vector.load %arg6[%c440, %c0_175] : memref<464x48xf32, #tpu.memory_space<vmem>>, vector<1x48xf32>
    %388 = vector.broadcast %387 : vector<1x48xf32> to vector<64x48xf32>
    %389 = arith.addf %386, %388 : vector<64x48xf32>
    %c0_176 = arith.constant 0 : index
    %c0_177 = arith.constant 0 : index
    %390 = vector.load %arg15[%c0_176, %c0_177] : memref<64x48xf32, #tpu.memory_space<vmem>>, vector<64x48xf32>
    tpu.vector_store %arg15[%c0_176, %c0_177], %389 {strides = array<i32>} : memref<64x48xf32, #tpu.memory_space<vmem>>, vector<64x48xf32>,
    %c96_178 = arith.constant 96 : index
    %c0_179 = arith.constant 0 : index
    %391 = vector.load %arg6[%c96_178, %c0_179] : memref<464x48xf32, #tpu.memory_space<vmem>>, vector<48x48xf32>
    %cst_180 = arith.constant dense<0.000000e+00> : vector<64x48xf32>
    %392 = tpu.matmul %371, %391, %cst_180 {dimension_numbers = #tpu.dot_dimension_numbers<[1], [0], [0], [1], [0, 0, 1, 1], [], []>} : vector<64x48xf32>, vector<48x48xf32>, vector<64x48xf32> -> vector<64x48xf32>
    %c240 = arith.constant 240 : index
    %c0_181 = arith.constant 0 : index
    %393 = vector.load %arg6[%c240, %c0_181] : memref<464x48xf32, #tpu.memory_space<vmem>>, vector<48x48xf32>
    %cst_182 = arith.constant dense<0.000000e+00> : vector<64x48xf32>
    %394 = tpu.matmul %372, %393, %cst_182 {dimension_numbers = #tpu.dot_dimension_numbers<[1], [0], [0], [1], [0, 0, 1, 1], [], []>} : vector<64x48xf32>, vector<48x48xf32>, vector<64x48xf32> -> vector<64x48xf32>
    %395 = arith.addf %392, %394 : vector<64x48xf32>
    %c448 = arith.constant 448 : index
    %c0_183 = arith.constant 0 : index
    %396 = vector.load %arg6[%c448, %c0_183] : memref<464x48xf32, #tpu.memory_space<vmem>>, vector<1x48xf32>
    %397 = vector.broadcast %396 : vector<1x48xf32> to vector<64x48xf32>
    %398 = arith.addf %395, %397 : vector<64x48xf32>
    %c0_184 = arith.constant 0 : index
    %c0_185 = arith.constant 0 : index
    %399 = vector.load %arg16[%c0_184, %c0_185] : memref<64x48xf32, #tpu.memory_space<vmem>>, vector<64x48xf32>
    tpu.vector_store %arg16[%c0_184, %c0_185], %398 {strides = array<i32>} : memref<64x48xf32, #tpu.memory_space<vmem>>, vector<64x48xf32>,
    %c288 = arith.constant 288 : index
    %c0_186 = arith.constant 0 : index
    %400 = vector.load %arg6[%c288, %c0_186] : memref<464x48xf32, #tpu.memory_space<vmem>>, vector<48x48xf32>
    %c336 = arith.constant 336 : index
    %c0_187 = arith.constant 0 : index
    %401 = vector.load %arg6[%c336, %c0_187] : memref<464x48xf32, #tpu.memory_space<vmem>>, vector<48x48xf32>
    %c384 = arith.constant 384 : index
    %c0_188 = arith.constant 0 : index
    %402 = vector.load %arg6[%c384, %c0_188] : memref<464x48xf32, #tpu.memory_space<vmem>>, vector<48x48xf32>
    %c456 = arith.constant 456 : index
    %c0_189 = arith.constant 0 : index
    %403 = vector.load %arg6[%c456, %c0_189] : memref<464x48xf32, #tpu.memory_space<vmem>>, vector<1x48xf32>
    %404 = vector.shape_cast %403 : vector<1x48xf32> to vector<1x48xf32>
    %405 = vector.broadcast %404 : vector<1x48xf32> to vector<8x48xf32>
    %cst_190 = arith.constant 0.000000e+00 : f32
    %406 = vector.broadcast %cst_190 : f32 to vector<8x48xf32>
    %c0_i32_191 = arith.constant 0 : i32
    %c8_i32_192 = arith.constant 8 : i32
    %407 = arith.muli %c0_i32_191, %c8_i32_192 : i32
    %408 = tpu.assume_multiple %407, 8 : i32
    %c7_i32_193 = arith.constant 7 : i32
    %409 = arith.subi %c7_i32_193, %c0_i32_191 : i32
    %c8_i32_194 = arith.constant 8 : i32
    %410 = arith.muli %409, %c8_i32_194 : i32
    %411 = tpu.assume_multiple %410, 8 : i32
    %cst_195 = arith.constant dense<0.000000e+00> : vector<8x48xf32>
    %412 = tpu.matmul %406, %400, %cst_195 {dimension_numbers = #tpu.dot_dimension_numbers<[1], [0], [0], [1], [0, 0, 1, 1], [], []>} : vector<8x48xf32>, vector<48x48xf32>, vector<8x48xf32> -> vector<8x48xf32>
    %cst_196 = arith.constant dense<0.000000e+00> : vector<8x48xf32>
    %413 = tpu.matmul %406, %401, %cst_196 {dimension_numbers = #tpu.dot_dimension_numbers<[1], [0], [0], [1], [0, 0, 1, 1], [], []>} : vector<8x48xf32>, vector<48x48xf32>, vector<8x48xf32> -> vector<8x48xf32>
    %cst_197 = arith.constant dense<0.000000e+00> : vector<8x48xf32>
    %414 = tpu.matmul %406, %402, %cst_197 {dimension_numbers = #tpu.dot_dimension_numbers<[1], [0], [0], [1], [0, 0, 1, 1], [], []>} : vector<8x48xf32>, vector<48x48xf32>, vector<8x48xf32> -> vector<8x48xf32>
    %415 = arith.index_cast %408 : i32 to index
    %c0_198 = arith.constant 0 : index
    %416 = vector.load %arg14[%415, %c0_198] : memref<64x48xf32, #tpu.memory_space<vmem>>, vector<8x48xf32>
    %417 = arith.addf %416, %412 : vector<8x48xf32>
    %418 = arith.negf %417 : vector<8x48xf32>
    %419 = math.exp %418 : vector<8x48xf32>
    %cst_199 = arith.constant 1.000000e+00 : f32
    %420 = vector.broadcast %cst_199 : f32 to vector<8x48xf32>
    %421 = arith.addf %420, %419 : vector<8x48xf32>
    %422 = arith.divf %420, %421 : vector<8x48xf32>
    %423 = arith.index_cast %408 : i32 to index
    %c0_200 = arith.constant 0 : index
    %424 = vector.load %arg15[%423, %c0_200] : memref<64x48xf32, #tpu.memory_space<vmem>>, vector<8x48xf32>
    %425 = arith.addf %424, %413 : vector<8x48xf32>
    %426 = arith.negf %425 : vector<8x48xf32>
    %427 = math.exp %426 : vector<8x48xf32>
    %cst_201 = arith.constant 1.000000e+00 : f32
    %428 = vector.broadcast %cst_201 : f32 to vector<8x48xf32>
    %429 = arith.addf %428, %427 : vector<8x48xf32>
    %430 = arith.divf %428, %429 : vector<8x48xf32>
    %431 = arith.index_cast %408 : i32 to index
    %c0_202 = arith.constant 0 : index
    %432 = vector.load %arg16[%431, %c0_202] : memref<64x48xf32, #tpu.memory_space<vmem>>, vector<8x48xf32>
    %433 = arith.addf %414, %405 : vector<8x48xf32>
    %434 = arith.mulf %422, %433 : vector<8x48xf32>
    %435 = arith.addf %432, %434 : vector<8x48xf32>
    %436 = math.tanh %435 : vector<8x48xf32>
    %cst_203 = arith.constant 1.000000e+00 : f32
    %437 = vector.broadcast %cst_203 : f32 to vector<8x48xf32>
    %438 = arith.subf %437, %430 : vector<8x48xf32>
    %439 = arith.mulf %438, %436 : vector<8x48xf32>
    %440 = arith.mulf %430, %406 : vector<8x48xf32>
    %441 = arith.addf %439, %440 : vector<8x48xf32>
    %442 = arith.index_cast %408 : i32 to index
    %c0_204 = arith.constant 0 : index
    %443 = vector.load %arg17[%442, %c0_204] : memref<64x48xf32, #tpu.memory_space<vmem>>, vector<8x48xf32>
    tpu.vector_store %arg17[%442, %c0_204], %441 {strides = array<i32>} : memref<64x48xf32, #tpu.memory_space<vmem>>, vector<8x48xf32>,
    %444 = arith.index_cast %411 : i32 to index
    %c0_205 = arith.constant 0 : index
    %445 = vector.load %arg18[%444, %c0_205] : memref<64x48xf32, #tpu.memory_space<vmem>>, vector<8x48xf32>
    tpu.vector_store %arg18[%444, %c0_205], %441 {strides = array<i32>} : memref<64x48xf32, #tpu.memory_space<vmem>>, vector<8x48xf32>,
    %c1_i32_206 = arith.constant 1 : i32
    %c8_i32_207 = arith.constant 8 : i32
    %446 = arith.muli %c1_i32_206, %c8_i32_207 : i32
    %447 = tpu.assume_multiple %446, 8 : i32
    %c7_i32_208 = arith.constant 7 : i32
    %448 = arith.subi %c7_i32_208, %c1_i32_206 : i32
    %c8_i32_209 = arith.constant 8 : i32
    %449 = arith.muli %448, %c8_i32_209 : i32
    %450 = tpu.assume_multiple %449, 8 : i32
    %cst_210 = arith.constant dense<0.000000e+00> : vector<8x48xf32>
    %451 = tpu.matmul %441, %400, %cst_210 {dimension_numbers = #tpu.dot_dimension_numbers<[1], [0], [0], [1], [0, 0, 1, 1], [], []>} : vector<8x48xf32>, vector<48x48xf32>, vector<8x48xf32> -> vector<8x48xf32>
    %cst_211 = arith.constant dense<0.000000e+00> : vector<8x48xf32>
    %452 = tpu.matmul %441, %401, %cst_211 {dimension_numbers = #tpu.dot_dimension_numbers<[1], [0], [0], [1], [0, 0, 1, 1], [], []>} : vector<8x48xf32>, vector<48x48xf32>, vector<8x48xf32> -> vector<8x48xf32>
    %cst_212 = arith.constant dense<0.000000e+00> : vector<8x48xf32>
    %453 = tpu.matmul %441, %402, %cst_212 {dimension_numbers = #tpu.dot_dimension_numbers<[1], [0], [0], [1], [0, 0, 1, 1], [], []>} : vector<8x48xf32>, vector<48x48xf32>, vector<8x48xf32> -> vector<8x48xf32>
    %454 = arith.index_cast %447 : i32 to index
    %c0_213 = arith.constant 0 : index
    %455 = vector.load %arg14[%454, %c0_213] : memref<64x48xf32, #tpu.memory_space<vmem>>, vector<8x48xf32>
    %456 = arith.addf %455, %451 : vector<8x48xf32>
    %457 = arith.negf %456 : vector<8x48xf32>
    %458 = math.exp %457 : vector<8x48xf32>
    %cst_214 = arith.constant 1.000000e+00 : f32
    %459 = vector.broadcast %cst_214 : f32 to vector<8x48xf32>
    %460 = arith.addf %459, %458 : vector<8x48xf32>
    %461 = arith.divf %459, %460 : vector<8x48xf32>
    %462 = arith.index_cast %447 : i32 to index
    %c0_215 = arith.constant 0 : index
    %463 = vector.load %arg15[%462, %c0_215] : memref<64x48xf32, #tpu.memory_space<vmem>>, vector<8x48xf32>
    %464 = arith.addf %463, %452 : vector<8x48xf32>
    %465 = arith.negf %464 : vector<8x48xf32>
    %466 = math.exp %465 : vector<8x48xf32>
    %cst_216 = arith.constant 1.000000e+00 : f32
    %467 = vector.broadcast %cst_216 : f32 to vector<8x48xf32>
    %468 = arith.addf %467, %466 : vector<8x48xf32>
    %469 = arith.divf %467, %468 : vector<8x48xf32>
    %470 = arith.index_cast %447 : i32 to index
    %c0_217 = arith.constant 0 : index
    %471 = vector.load %arg16[%470, %c0_217] : memref<64x48xf32, #tpu.memory_space<vmem>>, vector<8x48xf32>
    %472 = arith.addf %453, %405 : vector<8x48xf32>
    %473 = arith.mulf %461, %472 : vector<8x48xf32>
    %474 = arith.addf %471, %473 : vector<8x48xf32>
    %475 = math.tanh %474 : vector<8x48xf32>
    %cst_218 = arith.constant 1.000000e+00 : f32
    %476 = vector.broadcast %cst_218 : f32 to vector<8x48xf32>
    %477 = arith.subf %476, %469 : vector<8x48xf32>
    %478 = arith.mulf %477, %475 : vector<8x48xf32>
    %479 = arith.mulf %469, %441 : vector<8x48xf32>
    %480 = arith.addf %478, %479 : vector<8x48xf32>
    %481 = arith.index_cast %447 : i32 to index
    %c0_219 = arith.constant 0 : index
    %482 = vector.load %arg17[%481, %c0_219] : memref<64x48xf32, #tpu.memory_space<vmem>>, vector<8x48xf32>
    tpu.vector_store %arg17[%481, %c0_219], %480 {strides = array<i32>} : memref<64x48xf32, #tpu.memory_space<vmem>>, vector<8x48xf32>,
    %483 = arith.index_cast %450 : i32 to index
    %c0_220 = arith.constant 0 : index
    %484 = vector.load %arg18[%483, %c0_220] : memref<64x48xf32, #tpu.memory_space<vmem>>, vector<8x48xf32>
    tpu.vector_store %arg18[%483, %c0_220], %480 {strides = array<i32>} : memref<64x48xf32, #tpu.memory_space<vmem>>, vector<8x48xf32>,
    %c2_i32_221 = arith.constant 2 : i32
    %c8_i32_222 = arith.constant 8 : i32
    %485 = arith.muli %c2_i32_221, %c8_i32_222 : i32
    %486 = tpu.assume_multiple %485, 8 : i32
    %c7_i32_223 = arith.constant 7 : i32
    %487 = arith.subi %c7_i32_223, %c2_i32_221 : i32
    %c8_i32_224 = arith.constant 8 : i32
    %488 = arith.muli %487, %c8_i32_224 : i32
    %489 = tpu.assume_multiple %488, 8 : i32
    %cst_225 = arith.constant dense<0.000000e+00> : vector<8x48xf32>
    %490 = tpu.matmul %480, %400, %cst_225 {dimension_numbers = #tpu.dot_dimension_numbers<[1], [0], [0], [1], [0, 0, 1, 1], [], []>} : vector<8x48xf32>, vector<48x48xf32>, vector<8x48xf32> -> vector<8x48xf32>
    %cst_226 = arith.constant dense<0.000000e+00> : vector<8x48xf32>
    %491 = tpu.matmul %480, %401, %cst_226 {dimension_numbers = #tpu.dot_dimension_numbers<[1], [0], [0], [1], [0, 0, 1, 1], [], []>} : vector<8x48xf32>, vector<48x48xf32>, vector<8x48xf32> -> vector<8x48xf32>
    %cst_227 = arith.constant dense<0.000000e+00> : vector<8x48xf32>
    %492 = tpu.matmul %480, %402, %cst_227 {dimension_numbers = #tpu.dot_dimension_numbers<[1], [0], [0], [1], [0, 0, 1, 1], [], []>} : vector<8x48xf32>, vector<48x48xf32>, vector<8x48xf32> -> vector<8x48xf32>
    %493 = arith.index_cast %486 : i32 to index
    %c0_228 = arith.constant 0 : index
    %494 = vector.load %arg14[%493, %c0_228] : memref<64x48xf32, #tpu.memory_space<vmem>>, vector<8x48xf32>
    %495 = arith.addf %494, %490 : vector<8x48xf32>
    %496 = arith.negf %495 : vector<8x48xf32>
    %497 = math.exp %496 : vector<8x48xf32>
    %cst_229 = arith.constant 1.000000e+00 : f32
    %498 = vector.broadcast %cst_229 : f32 to vector<8x48xf32>
    %499 = arith.addf %498, %497 : vector<8x48xf32>
    %500 = arith.divf %498, %499 : vector<8x48xf32>
    %501 = arith.index_cast %486 : i32 to index
    %c0_230 = arith.constant 0 : index
    %502 = vector.load %arg15[%501, %c0_230] : memref<64x48xf32, #tpu.memory_space<vmem>>, vector<8x48xf32>
    %503 = arith.addf %502, %491 : vector<8x48xf32>
    %504 = arith.negf %503 : vector<8x48xf32>
    %505 = math.exp %504 : vector<8x48xf32>
    %cst_231 = arith.constant 1.000000e+00 : f32
    %506 = vector.broadcast %cst_231 : f32 to vector<8x48xf32>
    %507 = arith.addf %506, %505 : vector<8x48xf32>
    %508 = arith.divf %506, %507 : vector<8x48xf32>
    %509 = arith.index_cast %486 : i32 to index
    %c0_232 = arith.constant 0 : index
    %510 = vector.load %arg16[%509, %c0_232] : memref<64x48xf32, #tpu.memory_space<vmem>>, vector<8x48xf32>
    %511 = arith.addf %492, %405 : vector<8x48xf32>
    %512 = arith.mulf %500, %511 : vector<8x48xf32>
    %513 = arith.addf %510, %512 : vector<8x48xf32>
    %514 = math.tanh %513 : vector<8x48xf32>
    %cst_233 = arith.constant 1.000000e+00 : f32
    %515 = vector.broadcast %cst_233 : f32 to vector<8x48xf32>
    %516 = arith.subf %515, %508 : vector<8x48xf32>
    %517 = arith.mulf %516, %514 : vector<8x48xf32>
    %518 = arith.mulf %508, %480 : vector<8x48xf32>
    %519 = arith.addf %517, %518 : vector<8x48xf32>
    %520 = arith.index_cast %486 : i32 to index
    %c0_234 = arith.constant 0 : index
    %521 = vector.load %arg17[%520, %c0_234] : memref<64x48xf32, #tpu.memory_space<vmem>>, vector<8x48xf32>
    tpu.vector_store %arg17[%520, %c0_234], %519 {strides = array<i32>} : memref<64x48xf32, #tpu.memory_space<vmem>>, vector<8x48xf32>,
    %522 = arith.index_cast %489 : i32 to index
    %c0_235 = arith.constant 0 : index
    %523 = vector.load %arg18[%522, %c0_235] : memref<64x48xf32, #tpu.memory_space<vmem>>, vector<8x48xf32>
    tpu.vector_store %arg18[%522, %c0_235], %519 {strides = array<i32>} : memref<64x48xf32, #tpu.memory_space<vmem>>, vector<8x48xf32>,
    %c3_i32_236 = arith.constant 3 : i32
    %c8_i32_237 = arith.constant 8 : i32
    %524 = arith.muli %c3_i32_236, %c8_i32_237 : i32
    %525 = tpu.assume_multiple %524, 8 : i32
    %c7_i32_238 = arith.constant 7 : i32
    %526 = arith.subi %c7_i32_238, %c3_i32_236 : i32
    %c8_i32_239 = arith.constant 8 : i32
    %527 = arith.muli %526, %c8_i32_239 : i32
    %528 = tpu.assume_multiple %527, 8 : i32
    %cst_240 = arith.constant dense<0.000000e+00> : vector<8x48xf32>
    %529 = tpu.matmul %519, %400, %cst_240 {dimension_numbers = #tpu.dot_dimension_numbers<[1], [0], [0], [1], [0, 0, 1, 1], [], []>} : vector<8x48xf32>, vector<48x48xf32>, vector<8x48xf32> -> vector<8x48xf32>
    %cst_241 = arith.constant dense<0.000000e+00> : vector<8x48xf32>
    %530 = tpu.matmul %519, %401, %cst_241 {dimension_numbers = #tpu.dot_dimension_numbers<[1], [0], [0], [1], [0, 0, 1, 1], [], []>} : vector<8x48xf32>, vector<48x48xf32>, vector<8x48xf32> -> vector<8x48xf32>
    %cst_242 = arith.constant dense<0.000000e+00> : vector<8x48xf32>
    %531 = tpu.matmul %519, %402, %cst_242 {dimension_numbers = #tpu.dot_dimension_numbers<[1], [0], [0], [1], [0, 0, 1, 1], [], []>} : vector<8x48xf32>, vector<48x48xf32>, vector<8x48xf32> -> vector<8x48xf32>
    %532 = arith.index_cast %525 : i32 to index
    %c0_243 = arith.constant 0 : index
    %533 = vector.load %arg14[%532, %c0_243] : memref<64x48xf32, #tpu.memory_space<vmem>>, vector<8x48xf32>
    %534 = arith.addf %533, %529 : vector<8x48xf32>
    %535 = arith.negf %534 : vector<8x48xf32>
    %536 = math.exp %535 : vector<8x48xf32>
    %cst_244 = arith.constant 1.000000e+00 : f32
    %537 = vector.broadcast %cst_244 : f32 to vector<8x48xf32>
    %538 = arith.addf %537, %536 : vector<8x48xf32>
    %539 = arith.divf %537, %538 : vector<8x48xf32>
    %540 = arith.index_cast %525 : i32 to index
    %c0_245 = arith.constant 0 : index
    %541 = vector.load %arg15[%540, %c0_245] : memref<64x48xf32, #tpu.memory_space<vmem>>, vector<8x48xf32>
    %542 = arith.addf %541, %530 : vector<8x48xf32>
    %543 = arith.negf %542 : vector<8x48xf32>
    %544 = math.exp %543 : vector<8x48xf32>
    %cst_246 = arith.constant 1.000000e+00 : f32
    %545 = vector.broadcast %cst_246 : f32 to vector<8x48xf32>
    %546 = arith.addf %545, %544 : vector<8x48xf32>
    %547 = arith.divf %545, %546 : vector<8x48xf32>
    %548 = arith.index_cast %525 : i32 to index
    %c0_247 = arith.constant 0 : index
    %549 = vector.load %arg16[%548, %c0_247] : memref<64x48xf32, #tpu.memory_space<vmem>>, vector<8x48xf32>
    %550 = arith.addf %531, %405 : vector<8x48xf32>
    %551 = arith.mulf %539, %550 : vector<8x48xf32>
    %552 = arith.addf %549, %551 : vector<8x48xf32>
    %553 = math.tanh %552 : vector<8x48xf32>
    %cst_248 = arith.constant 1.000000e+00 : f32
    %554 = vector.broadcast %cst_248 : f32 to vector<8x48xf32>
    %555 = arith.subf %554, %547 : vector<8x48xf32>
    %556 = arith.mulf %555, %553 : vector<8x48xf32>
    %557 = arith.mulf %547, %519 : vector<8x48xf32>
    %558 = arith.addf %556, %557 : vector<8x48xf32>
    %559 = arith.index_cast %525 : i32 to index
    %c0_249 = arith.constant 0 : index
    %560 = vector.load %arg17[%559, %c0_249] : memref<64x48xf32, #tpu.memory_space<vmem>>, vector<8x48xf32>
    tpu.vector_store %arg17[%559, %c0_249], %558 {strides = array<i32>} : memref<64x48xf32, #tpu.memory_space<vmem>>, vector<8x48xf32>,
    %561 = arith.index_cast %528 : i32 to index
    %c0_250 = arith.constant 0 : index
    %562 = vector.load %arg18[%561, %c0_250] : memref<64x48xf32, #tpu.memory_space<vmem>>, vector<8x48xf32>
    tpu.vector_store %arg18[%561, %c0_250], %558 {strides = array<i32>} : memref<64x48xf32, #tpu.memory_space<vmem>>, vector<8x48xf32>,
    %c4_i32_251 = arith.constant 4 : i32
    %c8_i32_252 = arith.constant 8 : i32
    %563 = arith.muli %c4_i32_251, %c8_i32_252 : i32
    %564 = tpu.assume_multiple %563, 8 : i32
    %c7_i32_253 = arith.constant 7 : i32
    %565 = arith.subi %c7_i32_253, %c4_i32_251 : i32
    %c8_i32_254 = arith.constant 8 : i32
    %566 = arith.muli %565, %c8_i32_254 : i32
    %567 = tpu.assume_multiple %566, 8 : i32
    %cst_255 = arith.constant dense<0.000000e+00> : vector<8x48xf32>
    %568 = tpu.matmul %558, %400, %cst_255 {dimension_numbers = #tpu.dot_dimension_numbers<[1], [0], [0], [1], [0, 0, 1, 1], [], []>} : vector<8x48xf32>, vector<48x48xf32>, vector<8x48xf32> -> vector<8x48xf32>
    %cst_256 = arith.constant dense<0.000000e+00> : vector<8x48xf32>
    %569 = tpu.matmul %558, %401, %cst_256 {dimension_numbers = #tpu.dot_dimension_numbers<[1], [0], [0], [1], [0, 0, 1, 1], [], []>} : vector<8x48xf32>, vector<48x48xf32>, vector<8x48xf32> -> vector<8x48xf32>
    %cst_257 = arith.constant dense<0.000000e+00> : vector<8x48xf32>
    %570 = tpu.matmul %558, %402, %cst_257 {dimension_numbers = #tpu.dot_dimension_numbers<[1], [0], [0], [1], [0, 0, 1, 1], [], []>} : vector<8x48xf32>, vector<48x48xf32>, vector<8x48xf32> -> vector<8x48xf32>
    %571 = arith.index_cast %564 : i32 to index
    %c0_258 = arith.constant 0 : index
    %572 = vector.load %arg14[%571, %c0_258] : memref<64x48xf32, #tpu.memory_space<vmem>>, vector<8x48xf32>
    %573 = arith.addf %572, %568 : vector<8x48xf32>
    %574 = arith.negf %573 : vector<8x48xf32>
    %575 = math.exp %574 : vector<8x48xf32>
    %cst_259 = arith.constant 1.000000e+00 : f32
    %576 = vector.broadcast %cst_259 : f32 to vector<8x48xf32>
    %577 = arith.addf %576, %575 : vector<8x48xf32>
    %578 = arith.divf %576, %577 : vector<8x48xf32>
    %579 = arith.index_cast %564 : i32 to index
    %c0_260 = arith.constant 0 : index
    %580 = vector.load %arg15[%579, %c0_260] : memref<64x48xf32, #tpu.memory_space<vmem>>, vector<8x48xf32>
    %581 = arith.addf %580, %569 : vector<8x48xf32>
    %582 = arith.negf %581 : vector<8x48xf32>
    %583 = math.exp %582 : vector<8x48xf32>
    %cst_261 = arith.constant 1.000000e+00 : f32
    %584 = vector.broadcast %cst_261 : f32 to vector<8x48xf32>
    %585 = arith.addf %584, %583 : vector<8x48xf32>
    %586 = arith.divf %584, %585 : vector<8x48xf32>
    %587 = arith.index_cast %564 : i32 to index
    %c0_262 = arith.constant 0 : index
    %588 = vector.load %arg16[%587, %c0_262] : memref<64x48xf32, #tpu.memory_space<vmem>>, vector<8x48xf32>
    %589 = arith.addf %570, %405 : vector<8x48xf32>
    %590 = arith.mulf %578, %589 : vector<8x48xf32>
    %591 = arith.addf %588, %590 : vector<8x48xf32>
    %592 = math.tanh %591 : vector<8x48xf32>
    %cst_263 = arith.constant 1.000000e+00 : f32
    %593 = vector.broadcast %cst_263 : f32 to vector<8x48xf32>
    %594 = arith.subf %593, %586 : vector<8x48xf32>
    %595 = arith.mulf %594, %592 : vector<8x48xf32>
    %596 = arith.mulf %586, %558 : vector<8x48xf32>
    %597 = arith.addf %595, %596 : vector<8x48xf32>
    %598 = arith.index_cast %564 : i32 to index
    %c0_264 = arith.constant 0 : index
    %599 = vector.load %arg17[%598, %c0_264] : memref<64x48xf32, #tpu.memory_space<vmem>>, vector<8x48xf32>
    tpu.vector_store %arg17[%598, %c0_264], %597 {strides = array<i32>} : memref<64x48xf32, #tpu.memory_space<vmem>>, vector<8x48xf32>,
    %600 = arith.index_cast %567 : i32 to index
    %c0_265 = arith.constant 0 : index
    %601 = vector.load %arg18[%600, %c0_265] : memref<64x48xf32, #tpu.memory_space<vmem>>, vector<8x48xf32>
    tpu.vector_store %arg18[%600, %c0_265], %597 {strides = array<i32>} : memref<64x48xf32, #tpu.memory_space<vmem>>, vector<8x48xf32>,
    %c5_i32_266 = arith.constant 5 : i32
    %c8_i32_267 = arith.constant 8 : i32
    %602 = arith.muli %c5_i32_266, %c8_i32_267 : i32
    %603 = tpu.assume_multiple %602, 8 : i32
    %c7_i32_268 = arith.constant 7 : i32
    %604 = arith.subi %c7_i32_268, %c5_i32_266 : i32
    %c8_i32_269 = arith.constant 8 : i32
    %605 = arith.muli %604, %c8_i32_269 : i32
    %606 = tpu.assume_multiple %605, 8 : i32
    %cst_270 = arith.constant dense<0.000000e+00> : vector<8x48xf32>
    %607 = tpu.matmul %597, %400, %cst_270 {dimension_numbers = #tpu.dot_dimension_numbers<[1], [0], [0], [1], [0, 0, 1, 1], [], []>} : vector<8x48xf32>, vector<48x48xf32>, vector<8x48xf32> -> vector<8x48xf32>
    %cst_271 = arith.constant dense<0.000000e+00> : vector<8x48xf32>
    %608 = tpu.matmul %597, %401, %cst_271 {dimension_numbers = #tpu.dot_dimension_numbers<[1], [0], [0], [1], [0, 0, 1, 1], [], []>} : vector<8x48xf32>, vector<48x48xf32>, vector<8x48xf32> -> vector<8x48xf32>
    %cst_272 = arith.constant dense<0.000000e+00> : vector<8x48xf32>
    %609 = tpu.matmul %597, %402, %cst_272 {dimension_numbers = #tpu.dot_dimension_numbers<[1], [0], [0], [1], [0, 0, 1, 1], [], []>} : vector<8x48xf32>, vector<48x48xf32>, vector<8x48xf32> -> vector<8x48xf32>
    %610 = arith.index_cast %603 : i32 to index
    %c0_273 = arith.constant 0 : index
    %611 = vector.load %arg14[%610, %c0_273] : memref<64x48xf32, #tpu.memory_space<vmem>>, vector<8x48xf32>
    %612 = arith.addf %611, %607 : vector<8x48xf32>
    %613 = arith.negf %612 : vector<8x48xf32>
    %614 = math.exp %613 : vector<8x48xf32>
    %cst_274 = arith.constant 1.000000e+00 : f32
    %615 = vector.broadcast %cst_274 : f32 to vector<8x48xf32>
    %616 = arith.addf %615, %614 : vector<8x48xf32>
    %617 = arith.divf %615, %616 : vector<8x48xf32>
    %618 = arith.index_cast %603 : i32 to index
    %c0_275 = arith.constant 0 : index
    %619 = vector.load %arg15[%618, %c0_275] : memref<64x48xf32, #tpu.memory_space<vmem>>, vector<8x48xf32>
    %620 = arith.addf %619, %608 : vector<8x48xf32>
    %621 = arith.negf %620 : vector<8x48xf32>
    %622 = math.exp %621 : vector<8x48xf32>
    %cst_276 = arith.constant 1.000000e+00 : f32
    %623 = vector.broadcast %cst_276 : f32 to vector<8x48xf32>
    %624 = arith.addf %623, %622 : vector<8x48xf32>
    %625 = arith.divf %623, %624 : vector<8x48xf32>
    %626 = arith.index_cast %603 : i32 to index
    %c0_277 = arith.constant 0 : index
    %627 = vector.load %arg16[%626, %c0_277] : memref<64x48xf32, #tpu.memory_space<vmem>>, vector<8x48xf32>
    %628 = arith.addf %609, %405 : vector<8x48xf32>
    %629 = arith.mulf %617, %628 : vector<8x48xf32>
    %630 = arith.addf %627, %629 : vector<8x48xf32>
    %631 = math.tanh %630 : vector<8x48xf32>
    %cst_278 = arith.constant 1.000000e+00 : f32
    %632 = vector.broadcast %cst_278 : f32 to vector<8x48xf32>
    %633 = arith.subf %632, %625 : vector<8x48xf32>
    %634 = arith.mulf %633, %631 : vector<8x48xf32>
    %635 = arith.mulf %625, %597 : vector<8x48xf32>
    %636 = arith.addf %634, %635 : vector<8x48xf32>
    %637 = arith.index_cast %603 : i32 to index
    %c0_279 = arith.constant 0 : index
    %638 = vector.load %arg17[%637, %c0_279] : memref<64x48xf32, #tpu.memory_space<vmem>>, vector<8x48xf32>
    tpu.vector_store %arg17[%637, %c0_279], %636 {strides = array<i32>} : memref<64x48xf32, #tpu.memory_space<vmem>>, vector<8x48xf32>,
    %639 = arith.index_cast %606 : i32 to index
    %c0_280 = arith.constant 0 : index
    %640 = vector.load %arg18[%639, %c0_280] : memref<64x48xf32, #tpu.memory_space<vmem>>, vector<8x48xf32>
    tpu.vector_store %arg18[%639, %c0_280], %636 {strides = array<i32>} : memref<64x48xf32, #tpu.memory_space<vmem>>, vector<8x48xf32>,
    %c6_i32_281 = arith.constant 6 : i32
    %c8_i32_282 = arith.constant 8 : i32
    %641 = arith.muli %c6_i32_281, %c8_i32_282 : i32
    %642 = tpu.assume_multiple %641, 8 : i32
    %c7_i32_283 = arith.constant 7 : i32
    %643 = arith.subi %c7_i32_283, %c6_i32_281 : i32
    %c8_i32_284 = arith.constant 8 : i32
    %644 = arith.muli %643, %c8_i32_284 : i32
    %645 = tpu.assume_multiple %644, 8 : i32
    %cst_285 = arith.constant dense<0.000000e+00> : vector<8x48xf32>
    %646 = tpu.matmul %636, %400, %cst_285 {dimension_numbers = #tpu.dot_dimension_numbers<[1], [0], [0], [1], [0, 0, 1, 1], [], []>} : vector<8x48xf32>, vector<48x48xf32>, vector<8x48xf32> -> vector<8x48xf32>
    %cst_286 = arith.constant dense<0.000000e+00> : vector<8x48xf32>
    %647 = tpu.matmul %636, %401, %cst_286 {dimension_numbers = #tpu.dot_dimension_numbers<[1], [0], [0], [1], [0, 0, 1, 1], [], []>} : vector<8x48xf32>, vector<48x48xf32>, vector<8x48xf32> -> vector<8x48xf32>
    %cst_287 = arith.constant dense<0.000000e+00> : vector<8x48xf32>
    %648 = tpu.matmul %636, %402, %cst_287 {dimension_numbers = #tpu.dot_dimension_numbers<[1], [0], [0], [1], [0, 0, 1, 1], [], []>} : vector<8x48xf32>, vector<48x48xf32>, vector<8x48xf32> -> vector<8x48xf32>
    %649 = arith.index_cast %642 : i32 to index
    %c0_288 = arith.constant 0 : index
    %650 = vector.load %arg14[%649, %c0_288] : memref<64x48xf32, #tpu.memory_space<vmem>>, vector<8x48xf32>
    %651 = arith.addf %650, %646 : vector<8x48xf32>
    %652 = arith.negf %651 : vector<8x48xf32>
    %653 = math.exp %652 : vector<8x48xf32>
    %cst_289 = arith.constant 1.000000e+00 : f32
    %654 = vector.broadcast %cst_289 : f32 to vector<8x48xf32>
    %655 = arith.addf %654, %653 : vector<8x48xf32>
    %656 = arith.divf %654, %655 : vector<8x48xf32>
    %657 = arith.index_cast %642 : i32 to index
    %c0_290 = arith.constant 0 : index
    %658 = vector.load %arg15[%657, %c0_290] : memref<64x48xf32, #tpu.memory_space<vmem>>, vector<8x48xf32>
    %659 = arith.addf %658, %647 : vector<8x48xf32>
    %660 = arith.negf %659 : vector<8x48xf32>
    %661 = math.exp %660 : vector<8x48xf32>
    %cst_291 = arith.constant 1.000000e+00 : f32
    %662 = vector.broadcast %cst_291 : f32 to vector<8x48xf32>
    %663 = arith.addf %662, %661 : vector<8x48xf32>
    %664 = arith.divf %662, %663 : vector<8x48xf32>
    %665 = arith.index_cast %642 : i32 to index
    %c0_292 = arith.constant 0 : index
    %666 = vector.load %arg16[%665, %c0_292] : memref<64x48xf32, #tpu.memory_space<vmem>>, vector<8x48xf32>
    %667 = arith.addf %648, %405 : vector<8x48xf32>
    %668 = arith.mulf %656, %667 : vector<8x48xf32>
    %669 = arith.addf %666, %668 : vector<8x48xf32>
    %670 = math.tanh %669 : vector<8x48xf32>
    %cst_293 = arith.constant 1.000000e+00 : f32
    %671 = vector.broadcast %cst_293 : f32 to vector<8x48xf32>
    %672 = arith.subf %671, %664 : vector<8x48xf32>
    %673 = arith.mulf %672, %670 : vector<8x48xf32>
    %674 = arith.mulf %664, %636 : vector<8x48xf32>
    %675 = arith.addf %673, %674 : vector<8x48xf32>
    %676 = arith.index_cast %642 : i32 to index
    %c0_294 = arith.constant 0 : index
    %677 = vector.load %arg17[%676, %c0_294] : memref<64x48xf32, #tpu.memory_space<vmem>>, vector<8x48xf32>
    tpu.vector_store %arg17[%676, %c0_294], %675 {strides = array<i32>} : memref<64x48xf32, #tpu.memory_space<vmem>>, vector<8x48xf32>,
    %678 = arith.index_cast %645 : i32 to index
    %c0_295 = arith.constant 0 : index
    %679 = vector.load %arg18[%678, %c0_295] : memref<64x48xf32, #tpu.memory_space<vmem>>, vector<8x48xf32>
    tpu.vector_store %arg18[%678, %c0_295], %675 {strides = array<i32>} : memref<64x48xf32, #tpu.memory_space<vmem>>, vector<8x48xf32>,
    %c7_i32_296 = arith.constant 7 : i32
    %c8_i32_297 = arith.constant 8 : i32
    %680 = arith.muli %c7_i32_296, %c8_i32_297 : i32
    %681 = tpu.assume_multiple %680, 8 : i32
    %c7_i32_298 = arith.constant 7 : i32
    %682 = arith.subi %c7_i32_298, %c7_i32_296 : i32
    %c8_i32_299 = arith.constant 8 : i32
    %683 = arith.muli %682, %c8_i32_299 : i32
    %684 = tpu.assume_multiple %683, 8 : i32
    %cst_300 = arith.constant dense<0.000000e+00> : vector<8x48xf32>
    %685 = tpu.matmul %675, %400, %cst_300 {dimension_numbers = #tpu.dot_dimension_numbers<[1], [0], [0], [1], [0, 0, 1, 1], [], []>} : vector<8x48xf32>, vector<48x48xf32>, vector<8x48xf32> -> vector<8x48xf32>
    %cst_301 = arith.constant dense<0.000000e+00> : vector<8x48xf32>
    %686 = tpu.matmul %675, %401, %cst_301 {dimension_numbers = #tpu.dot_dimension_numbers<[1], [0], [0], [1], [0, 0, 1, 1], [], []>} : vector<8x48xf32>, vector<48x48xf32>, vector<8x48xf32> -> vector<8x48xf32>
    %cst_302 = arith.constant dense<0.000000e+00> : vector<8x48xf32>
    %687 = tpu.matmul %675, %402, %cst_302 {dimension_numbers = #tpu.dot_dimension_numbers<[1], [0], [0], [1], [0, 0, 1, 1], [], []>} : vector<8x48xf32>, vector<48x48xf32>, vector<8x48xf32> -> vector<8x48xf32>
    %688 = arith.index_cast %681 : i32 to index
    %c0_303 = arith.constant 0 : index
    %689 = vector.load %arg14[%688, %c0_303] : memref<64x48xf32, #tpu.memory_space<vmem>>, vector<8x48xf32>
    %690 = arith.addf %689, %685 : vector<8x48xf32>
    %691 = arith.negf %690 : vector<8x48xf32>
    %692 = math.exp %691 : vector<8x48xf32>
    %cst_304 = arith.constant 1.000000e+00 : f32
    %693 = vector.broadcast %cst_304 : f32 to vector<8x48xf32>
    %694 = arith.addf %693, %692 : vector<8x48xf32>
    %695 = arith.divf %693, %694 : vector<8x48xf32>
    %696 = arith.index_cast %681 : i32 to index
    %c0_305 = arith.constant 0 : index
    %697 = vector.load %arg15[%696, %c0_305] : memref<64x48xf32, #tpu.memory_space<vmem>>, vector<8x48xf32>
    %698 = arith.addf %697, %686 : vector<8x48xf32>
    %699 = arith.negf %698 : vector<8x48xf32>
    %700 = math.exp %699 : vector<8x48xf32>
    %cst_306 = arith.constant 1.000000e+00 : f32
    %701 = vector.broadcast %cst_306 : f32 to vector<8x48xf32>
    %702 = arith.addf %701, %700 : vector<8x48xf32>
    %703 = arith.divf %701, %702 : vector<8x48xf32>
    %704 = arith.index_cast %681 : i32 to index
    %c0_307 = arith.constant 0 : index
    %705 = vector.load %arg16[%704, %c0_307] : memref<64x48xf32, #tpu.memory_space<vmem>>, vector<8x48xf32>
    %706 = arith.addf %687, %405 : vector<8x48xf32>
    %707 = arith.mulf %695, %706 : vector<8x48xf32>
    %708 = arith.addf %705, %707 : vector<8x48xf32>
    %709 = math.tanh %708 : vector<8x48xf32>
    %cst_308 = arith.constant 1.000000e+00 : f32
    %710 = vector.broadcast %cst_308 : f32 to vector<8x48xf32>
    %711 = arith.subf %710, %703 : vector<8x48xf32>
    %712 = arith.mulf %711, %709 : vector<8x48xf32>
    %713 = arith.mulf %703, %675 : vector<8x48xf32>
    %714 = arith.addf %712, %713 : vector<8x48xf32>
    %715 = arith.index_cast %681 : i32 to index
    %c0_309 = arith.constant 0 : index
    %716 = vector.load %arg17[%715, %c0_309] : memref<64x48xf32, #tpu.memory_space<vmem>>, vector<8x48xf32>
    tpu.vector_store %arg17[%715, %c0_309], %714 {strides = array<i32>} : memref<64x48xf32, #tpu.memory_space<vmem>>, vector<8x48xf32>,
    %717 = arith.index_cast %684 : i32 to index
    %c0_310 = arith.constant 0 : index
    %718 = vector.load %arg18[%717, %c0_310] : memref<64x48xf32, #tpu.memory_space<vmem>>, vector<8x48xf32>
    tpu.vector_store %arg18[%717, %c0_310], %714 {strides = array<i32>} : memref<64x48xf32, #tpu.memory_space<vmem>>, vector<8x48xf32>,
    %c8_i32_311 = arith.constant 8 : i32
    %c0_312 = arith.constant 0 : index
    %c0_313 = arith.constant 0 : index
    %719 = vector.load %arg17[%c0_312, %c0_313] : memref<64x48xf32, #tpu.memory_space<vmem>>, vector<64x48xf32>
    %c0_314 = arith.constant 0 : index
    %c0_315 = arith.constant 0 : index
    %720 = vector.load %arg18[%c0_314, %c0_315] : memref<64x48xf32, #tpu.memory_space<vmem>>, vector<64x48xf32>
    %c0_316 = arith.constant 0 : index
    %c0_317 = arith.constant 0 : index
    %721 = vector.load %arg7[%c0_316, %c0_317] : memref<464x48xf32, #tpu.memory_space<vmem>>, vector<48x48xf32>
    %cst_318 = arith.constant dense<0.000000e+00> : vector<64x48xf32>
    %722 = tpu.matmul %719, %721, %cst_318 {dimension_numbers = #tpu.dot_dimension_numbers<[1], [0], [0], [1], [0, 0, 1, 1], [], []>} : vector<64x48xf32>, vector<48x48xf32>, vector<64x48xf32> -> vector<64x48xf32>
    %c144_319 = arith.constant 144 : index
    %c0_320 = arith.constant 0 : index
    %723 = vector.load %arg7[%c144_319, %c0_320] : memref<464x48xf32, #tpu.memory_space<vmem>>, vector<48x48xf32>
    %cst_321 = arith.constant dense<0.000000e+00> : vector<64x48xf32>
    %724 = tpu.matmul %720, %723, %cst_321 {dimension_numbers = #tpu.dot_dimension_numbers<[1], [0], [0], [1], [0, 0, 1, 1], [], []>} : vector<64x48xf32>, vector<48x48xf32>, vector<64x48xf32> -> vector<64x48xf32>
    %725 = arith.addf %722, %724 : vector<64x48xf32>
    %c432_322 = arith.constant 432 : index
    %c0_323 = arith.constant 0 : index
    %726 = vector.load %arg7[%c432_322, %c0_323] : memref<464x48xf32, #tpu.memory_space<vmem>>, vector<1x48xf32>
    %727 = vector.broadcast %726 : vector<1x48xf32> to vector<64x48xf32>
    %728 = arith.addf %725, %727 : vector<64x48xf32>
    %c0_324 = arith.constant 0 : index
    %c0_325 = arith.constant 0 : index
    %729 = vector.load %arg14[%c0_324, %c0_325] : memref<64x48xf32, #tpu.memory_space<vmem>>, vector<64x48xf32>
    tpu.vector_store %arg14[%c0_324, %c0_325], %728 {strides = array<i32>} : memref<64x48xf32, #tpu.memory_space<vmem>>, vector<64x48xf32>,
    %c48_326 = arith.constant 48 : index
    %c0_327 = arith.constant 0 : index
    %730 = vector.load %arg7[%c48_326, %c0_327] : memref<464x48xf32, #tpu.memory_space<vmem>>, vector<48x48xf32>
    %cst_328 = arith.constant dense<0.000000e+00> : vector<64x48xf32>
    %731 = tpu.matmul %719, %730, %cst_328 {dimension_numbers = #tpu.dot_dimension_numbers<[1], [0], [0], [1], [0, 0, 1, 1], [], []>} : vector<64x48xf32>, vector<48x48xf32>, vector<64x48xf32> -> vector<64x48xf32>
    %c192_329 = arith.constant 192 : index
    %c0_330 = arith.constant 0 : index
    %732 = vector.load %arg7[%c192_329, %c0_330] : memref<464x48xf32, #tpu.memory_space<vmem>>, vector<48x48xf32>
    %cst_331 = arith.constant dense<0.000000e+00> : vector<64x48xf32>
    %733 = tpu.matmul %720, %732, %cst_331 {dimension_numbers = #tpu.dot_dimension_numbers<[1], [0], [0], [1], [0, 0, 1, 1], [], []>} : vector<64x48xf32>, vector<48x48xf32>, vector<64x48xf32> -> vector<64x48xf32>
    %734 = arith.addf %731, %733 : vector<64x48xf32>
    %c440_332 = arith.constant 440 : index
    %c0_333 = arith.constant 0 : index
    %735 = vector.load %arg7[%c440_332, %c0_333] : memref<464x48xf32, #tpu.memory_space<vmem>>, vector<1x48xf32>
    %736 = vector.broadcast %735 : vector<1x48xf32> to vector<64x48xf32>
    %737 = arith.addf %734, %736 : vector<64x48xf32>
    %c0_334 = arith.constant 0 : index
    %c0_335 = arith.constant 0 : index
    %738 = vector.load %arg15[%c0_334, %c0_335] : memref<64x48xf32, #tpu.memory_space<vmem>>, vector<64x48xf32>
    tpu.vector_store %arg15[%c0_334, %c0_335], %737 {strides = array<i32>} : memref<64x48xf32, #tpu.memory_space<vmem>>, vector<64x48xf32>,
    %c96_336 = arith.constant 96 : index
    %c0_337 = arith.constant 0 : index
    %739 = vector.load %arg7[%c96_336, %c0_337] : memref<464x48xf32, #tpu.memory_space<vmem>>, vector<48x48xf32>
    %cst_338 = arith.constant dense<0.000000e+00> : vector<64x48xf32>
    %740 = tpu.matmul %719, %739, %cst_338 {dimension_numbers = #tpu.dot_dimension_numbers<[1], [0], [0], [1], [0, 0, 1, 1], [], []>} : vector<64x48xf32>, vector<48x48xf32>, vector<64x48xf32> -> vector<64x48xf32>
    %c240_339 = arith.constant 240 : index
    %c0_340 = arith.constant 0 : index
    %741 = vector.load %arg7[%c240_339, %c0_340] : memref<464x48xf32, #tpu.memory_space<vmem>>, vector<48x48xf32>
    %cst_341 = arith.constant dense<0.000000e+00> : vector<64x48xf32>
    %742 = tpu.matmul %720, %741, %cst_341 {dimension_numbers = #tpu.dot_dimension_numbers<[1], [0], [0], [1], [0, 0, 1, 1], [], []>} : vector<64x48xf32>, vector<48x48xf32>, vector<64x48xf32> -> vector<64x48xf32>
    %743 = arith.addf %740, %742 : vector<64x48xf32>
    %c448_342 = arith.constant 448 : index
    %c0_343 = arith.constant 0 : index
    %744 = vector.load %arg7[%c448_342, %c0_343] : memref<464x48xf32, #tpu.memory_space<vmem>>, vector<1x48xf32>
    %745 = vector.broadcast %744 : vector<1x48xf32> to vector<64x48xf32>
    %746 = arith.addf %743, %745 : vector<64x48xf32>
    %c0_344 = arith.constant 0 : index
    %c0_345 = arith.constant 0 : index
    %747 = vector.load %arg16[%c0_344, %c0_345] : memref<64x48xf32, #tpu.memory_space<vmem>>, vector<64x48xf32>
    tpu.vector_store %arg16[%c0_344, %c0_345], %746 {strides = array<i32>} : memref<64x48xf32, #tpu.memory_space<vmem>>, vector<64x48xf32>,
    %c288_346 = arith.constant 288 : index
    %c0_347 = arith.constant 0 : index
    %748 = vector.load %arg7[%c288_346, %c0_347] : memref<464x48xf32, #tpu.memory_space<vmem>>, vector<48x48xf32>
    %c336_348 = arith.constant 336 : index
    %c0_349 = arith.constant 0 : index
    %749 = vector.load %arg7[%c336_348, %c0_349] : memref<464x48xf32, #tpu.memory_space<vmem>>, vector<48x48xf32>
    %c384_350 = arith.constant 384 : index
    %c0_351 = arith.constant 0 : index
    %750 = vector.load %arg7[%c384_350, %c0_351] : memref<464x48xf32, #tpu.memory_space<vmem>>, vector<48x48xf32>
    %c456_352 = arith.constant 456 : index
    %c0_353 = arith.constant 0 : index
    %751 = vector.load %arg7[%c456_352, %c0_353] : memref<464x48xf32, #tpu.memory_space<vmem>>, vector<1x48xf32>
    %752 = vector.shape_cast %751 : vector<1x48xf32> to vector<1x48xf32>
    %753 = vector.broadcast %752 : vector<1x48xf32> to vector<8x48xf32>
    %cst_354 = arith.constant 0.000000e+00 : f32
    %754 = vector.broadcast %cst_354 : f32 to vector<8x48xf32>
    %c0_i32_355 = arith.constant 0 : i32
    %c8_i32_356 = arith.constant 8 : i32
    %755 = arith.muli %c0_i32_355, %c8_i32_356 : i32
    %756 = tpu.assume_multiple %755, 8 : i32
    %c7_i32_357 = arith.constant 7 : i32
    %757 = arith.subi %c7_i32_357, %c0_i32_355 : i32
    %c8_i32_358 = arith.constant 8 : i32
    %758 = arith.muli %757, %c8_i32_358 : i32
    %759 = tpu.assume_multiple %758, 8 : i32
    %cst_359 = arith.constant dense<0.000000e+00> : vector<8x48xf32>
    %760 = tpu.matmul %754, %748, %cst_359 {dimension_numbers = #tpu.dot_dimension_numbers<[1], [0], [0], [1], [0, 0, 1, 1], [], []>} : vector<8x48xf32>, vector<48x48xf32>, vector<8x48xf32> -> vector<8x48xf32>
    %cst_360 = arith.constant dense<0.000000e+00> : vector<8x48xf32>
    %761 = tpu.matmul %754, %749, %cst_360 {dimension_numbers = #tpu.dot_dimension_numbers<[1], [0], [0], [1], [0, 0, 1, 1], [], []>} : vector<8x48xf32>, vector<48x48xf32>, vector<8x48xf32> -> vector<8x48xf32>
    %cst_361 = arith.constant dense<0.000000e+00> : vector<8x48xf32>
    %762 = tpu.matmul %754, %750, %cst_361 {dimension_numbers = #tpu.dot_dimension_numbers<[1], [0], [0], [1], [0, 0, 1, 1], [], []>} : vector<8x48xf32>, vector<48x48xf32>, vector<8x48xf32> -> vector<8x48xf32>
    %763 = arith.index_cast %756 : i32 to index
    %c0_362 = arith.constant 0 : index
    %764 = vector.load %arg14[%763, %c0_362] : memref<64x48xf32, #tpu.memory_space<vmem>>, vector<8x48xf32>
    %765 = arith.addf %764, %760 : vector<8x48xf32>
    %766 = arith.negf %765 : vector<8x48xf32>
    %767 = math.exp %766 : vector<8x48xf32>
    %cst_363 = arith.constant 1.000000e+00 : f32
    %768 = vector.broadcast %cst_363 : f32 to vector<8x48xf32>
    %769 = arith.addf %768, %767 : vector<8x48xf32>
    %770 = arith.divf %768, %769 : vector<8x48xf32>
    %771 = arith.index_cast %756 : i32 to index
    %c0_364 = arith.constant 0 : index
    %772 = vector.load %arg15[%771, %c0_364] : memref<64x48xf32, #tpu.memory_space<vmem>>, vector<8x48xf32>
    %773 = arith.addf %772, %761 : vector<8x48xf32>
    %774 = arith.negf %773 : vector<8x48xf32>
    %775 = math.exp %774 : vector<8x48xf32>
    %cst_365 = arith.constant 1.000000e+00 : f32
    %776 = vector.broadcast %cst_365 : f32 to vector<8x48xf32>
    %777 = arith.addf %776, %775 : vector<8x48xf32>
    %778 = arith.divf %776, %777 : vector<8x48xf32>
    %779 = arith.index_cast %756 : i32 to index
    %c0_366 = arith.constant 0 : index
    %780 = vector.load %arg16[%779, %c0_366] : memref<64x48xf32, #tpu.memory_space<vmem>>, vector<8x48xf32>
    %781 = arith.addf %762, %753 : vector<8x48xf32>
    %782 = arith.mulf %770, %781 : vector<8x48xf32>
    %783 = arith.addf %780, %782 : vector<8x48xf32>
    %784 = math.tanh %783 : vector<8x48xf32>
    %cst_367 = arith.constant 1.000000e+00 : f32
    %785 = vector.broadcast %cst_367 : f32 to vector<8x48xf32>
    %786 = arith.subf %785, %778 : vector<8x48xf32>
    %787 = arith.mulf %786, %784 : vector<8x48xf32>
    %788 = arith.mulf %778, %754 : vector<8x48xf32>
    %789 = arith.addf %787, %788 : vector<8x48xf32>
    %790 = arith.index_cast %756 : i32 to index
    %c0_368 = arith.constant 0 : index
    %791 = vector.load %arg17[%790, %c0_368] : memref<64x48xf32, #tpu.memory_space<vmem>>, vector<8x48xf32>
    tpu.vector_store %arg17[%790, %c0_368], %789 {strides = array<i32>} : memref<64x48xf32, #tpu.memory_space<vmem>>, vector<8x48xf32>,
    %792 = arith.index_cast %759 : i32 to index
    %c0_369 = arith.constant 0 : index
    %793 = vector.load %arg18[%792, %c0_369] : memref<64x48xf32, #tpu.memory_space<vmem>>, vector<8x48xf32>
    tpu.vector_store %arg18[%792, %c0_369], %789 {strides = array<i32>} : memref<64x48xf32, #tpu.memory_space<vmem>>, vector<8x48xf32>,
    %c1_i32_370 = arith.constant 1 : i32
    %c8_i32_371 = arith.constant 8 : i32
    %794 = arith.muli %c1_i32_370, %c8_i32_371 : i32
    %795 = tpu.assume_multiple %794, 8 : i32
    %c7_i32_372 = arith.constant 7 : i32
    %796 = arith.subi %c7_i32_372, %c1_i32_370 : i32
    %c8_i32_373 = arith.constant 8 : i32
    %797 = arith.muli %796, %c8_i32_373 : i32
    %798 = tpu.assume_multiple %797, 8 : i32
    %cst_374 = arith.constant dense<0.000000e+00> : vector<8x48xf32>
    %799 = tpu.matmul %789, %748, %cst_374 {dimension_numbers = #tpu.dot_dimension_numbers<[1], [0], [0], [1], [0, 0, 1, 1], [], []>} : vector<8x48xf32>, vector<48x48xf32>, vector<8x48xf32> -> vector<8x48xf32>
    %cst_375 = arith.constant dense<0.000000e+00> : vector<8x48xf32>
    %800 = tpu.matmul %789, %749, %cst_375 {dimension_numbers = #tpu.dot_dimension_numbers<[1], [0], [0], [1], [0, 0, 1, 1], [], []>} : vector<8x48xf32>, vector<48x48xf32>, vector<8x48xf32> -> vector<8x48xf32>
    %cst_376 = arith.constant dense<0.000000e+00> : vector<8x48xf32>
    %801 = tpu.matmul %789, %750, %cst_376 {dimension_numbers = #tpu.dot_dimension_numbers<[1], [0], [0], [1], [0, 0, 1, 1], [], []>} : vector<8x48xf32>, vector<48x48xf32>, vector<8x48xf32> -> vector<8x48xf32>
    %802 = arith.index_cast %795 : i32 to index
    %c0_377 = arith.constant 0 : index
    %803 = vector.load %arg14[%802, %c0_377] : memref<64x48xf32, #tpu.memory_space<vmem>>, vector<8x48xf32>
    %804 = arith.addf %803, %799 : vector<8x48xf32>
    %805 = arith.negf %804 : vector<8x48xf32>
    %806 = math.exp %805 : vector<8x48xf32>
    %cst_378 = arith.constant 1.000000e+00 : f32
    %807 = vector.broadcast %cst_378 : f32 to vector<8x48xf32>
    %808 = arith.addf %807, %806 : vector<8x48xf32>
    %809 = arith.divf %807, %808 : vector<8x48xf32>
    %810 = arith.index_cast %795 : i32 to index
    %c0_379 = arith.constant 0 : index
    %811 = vector.load %arg15[%810, %c0_379] : memref<64x48xf32, #tpu.memory_space<vmem>>, vector<8x48xf32>
    %812 = arith.addf %811, %800 : vector<8x48xf32>
    %813 = arith.negf %812 : vector<8x48xf32>
    %814 = math.exp %813 : vector<8x48xf32>
    %cst_380 = arith.constant 1.000000e+00 : f32
    %815 = vector.broadcast %cst_380 : f32 to vector<8x48xf32>
    %816 = arith.addf %815, %814 : vector<8x48xf32>
    %817 = arith.divf %815, %816 : vector<8x48xf32>
    %818 = arith.index_cast %795 : i32 to index
    %c0_381 = arith.constant 0 : index
    %819 = vector.load %arg16[%818, %c0_381] : memref<64x48xf32, #tpu.memory_space<vmem>>, vector<8x48xf32>
    %820 = arith.addf %801, %753 : vector<8x48xf32>
    %821 = arith.mulf %809, %820 : vector<8x48xf32>
    %822 = arith.addf %819, %821 : vector<8x48xf32>
    %823 = math.tanh %822 : vector<8x48xf32>
    %cst_382 = arith.constant 1.000000e+00 : f32
    %824 = vector.broadcast %cst_382 : f32 to vector<8x48xf32>
    %825 = arith.subf %824, %817 : vector<8x48xf32>
    %826 = arith.mulf %825, %823 : vector<8x48xf32>
    %827 = arith.mulf %817, %789 : vector<8x48xf32>
    %828 = arith.addf %826, %827 : vector<8x48xf32>
    %829 = arith.index_cast %795 : i32 to index
    %c0_383 = arith.constant 0 : index
    %830 = vector.load %arg17[%829, %c0_383] : memref<64x48xf32, #tpu.memory_space<vmem>>, vector<8x48xf32>
    tpu.vector_store %arg17[%829, %c0_383], %828 {strides = array<i32>} : memref<64x48xf32, #tpu.memory_space<vmem>>, vector<8x48xf32>,
    %831 = arith.index_cast %798 : i32 to index
    %c0_384 = arith.constant 0 : index
    %832 = vector.load %arg18[%831, %c0_384] : memref<64x48xf32, #tpu.memory_space<vmem>>, vector<8x48xf32>
    tpu.vector_store %arg18[%831, %c0_384], %828 {strides = array<i32>} : memref<64x48xf32, #tpu.memory_space<vmem>>, vector<8x48xf32>,
    %c2_i32_385 = arith.constant 2 : i32
    %c8_i32_386 = arith.constant 8 : i32
    %833 = arith.muli %c2_i32_385, %c8_i32_386 : i32
    %834 = tpu.assume_multiple %833, 8 : i32
    %c7_i32_387 = arith.constant 7 : i32
    %835 = arith.subi %c7_i32_387, %c2_i32_385 : i32
    %c8_i32_388 = arith.constant 8 : i32
    %836 = arith.muli %835, %c8_i32_388 : i32
    %837 = tpu.assume_multiple %836, 8 : i32
    %cst_389 = arith.constant dense<0.000000e+00> : vector<8x48xf32>
    %838 = tpu.matmul %828, %748, %cst_389 {dimension_numbers = #tpu.dot_dimension_numbers<[1], [0], [0], [1], [0, 0, 1, 1], [], []>} : vector<8x48xf32>, vector<48x48xf32>, vector<8x48xf32> -> vector<8x48xf32>
    %cst_390 = arith.constant dense<0.000000e+00> : vector<8x48xf32>
    %839 = tpu.matmul %828, %749, %cst_390 {dimension_numbers = #tpu.dot_dimension_numbers<[1], [0], [0], [1], [0, 0, 1, 1], [], []>} : vector<8x48xf32>, vector<48x48xf32>, vector<8x48xf32> -> vector<8x48xf32>
    %cst_391 = arith.constant dense<0.000000e+00> : vector<8x48xf32>
    %840 = tpu.matmul %828, %750, %cst_391 {dimension_numbers = #tpu.dot_dimension_numbers<[1], [0], [0], [1], [0, 0, 1, 1], [], []>} : vector<8x48xf32>, vector<48x48xf32>, vector<8x48xf32> -> vector<8x48xf32>
    %841 = arith.index_cast %834 : i32 to index
    %c0_392 = arith.constant 0 : index
    %842 = vector.load %arg14[%841, %c0_392] : memref<64x48xf32, #tpu.memory_space<vmem>>, vector<8x48xf32>
    %843 = arith.addf %842, %838 : vector<8x48xf32>
    %844 = arith.negf %843 : vector<8x48xf32>
    %845 = math.exp %844 : vector<8x48xf32>
    %cst_393 = arith.constant 1.000000e+00 : f32
    %846 = vector.broadcast %cst_393 : f32 to vector<8x48xf32>
    %847 = arith.addf %846, %845 : vector<8x48xf32>
    %848 = arith.divf %846, %847 : vector<8x48xf32>
    %849 = arith.index_cast %834 : i32 to index
    %c0_394 = arith.constant 0 : index
    %850 = vector.load %arg15[%849, %c0_394] : memref<64x48xf32, #tpu.memory_space<vmem>>, vector<8x48xf32>
    %851 = arith.addf %850, %839 : vector<8x48xf32>
    %852 = arith.negf %851 : vector<8x48xf32>
    %853 = math.exp %852 : vector<8x48xf32>
    %cst_395 = arith.constant 1.000000e+00 : f32
    %854 = vector.broadcast %cst_395 : f32 to vector<8x48xf32>
    %855 = arith.addf %854, %853 : vector<8x48xf32>
    %856 = arith.divf %854, %855 : vector<8x48xf32>
    %857 = arith.index_cast %834 : i32 to index
    %c0_396 = arith.constant 0 : index
    %858 = vector.load %arg16[%857, %c0_396] : memref<64x48xf32, #tpu.memory_space<vmem>>, vector<8x48xf32>
    %859 = arith.addf %840, %753 : vector<8x48xf32>
    %860 = arith.mulf %848, %859 : vector<8x48xf32>
    %861 = arith.addf %858, %860 : vector<8x48xf32>
    %862 = math.tanh %861 : vector<8x48xf32>
    %cst_397 = arith.constant 1.000000e+00 : f32
    %863 = vector.broadcast %cst_397 : f32 to vector<8x48xf32>
    %864 = arith.subf %863, %856 : vector<8x48xf32>
    %865 = arith.mulf %864, %862 : vector<8x48xf32>
    %866 = arith.mulf %856, %828 : vector<8x48xf32>
    %867 = arith.addf %865, %866 : vector<8x48xf32>
    %868 = arith.index_cast %834 : i32 to index
    %c0_398 = arith.constant 0 : index
    %869 = vector.load %arg17[%868, %c0_398] : memref<64x48xf32, #tpu.memory_space<vmem>>, vector<8x48xf32>
    tpu.vector_store %arg17[%868, %c0_398], %867 {strides = array<i32>} : memref<64x48xf32, #tpu.memory_space<vmem>>, vector<8x48xf32>,
    %870 = arith.index_cast %837 : i32 to index
    %c0_399 = arith.constant 0 : index
    %871 = vector.load %arg18[%870, %c0_399] : memref<64x48xf32, #tpu.memory_space<vmem>>, vector<8x48xf32>
    tpu.vector_store %arg18[%870, %c0_399], %867 {strides = array<i32>} : memref<64x48xf32, #tpu.memory_space<vmem>>, vector<8x48xf32>,
    %c3_i32_400 = arith.constant 3 : i32
    %c8_i32_401 = arith.constant 8 : i32
    %872 = arith.muli %c3_i32_400, %c8_i32_401 : i32
    %873 = tpu.assume_multiple %872, 8 : i32
    %c7_i32_402 = arith.constant 7 : i32
    %874 = arith.subi %c7_i32_402, %c3_i32_400 : i32
    %c8_i32_403 = arith.constant 8 : i32
    %875 = arith.muli %874, %c8_i32_403 : i32
    %876 = tpu.assume_multiple %875, 8 : i32
    %cst_404 = arith.constant dense<0.000000e+00> : vector<8x48xf32>
    %877 = tpu.matmul %867, %748, %cst_404 {dimension_numbers = #tpu.dot_dimension_numbers<[1], [0], [0], [1], [0, 0, 1, 1], [], []>} : vector<8x48xf32>, vector<48x48xf32>, vector<8x48xf32> -> vector<8x48xf32>
    %cst_405 = arith.constant dense<0.000000e+00> : vector<8x48xf32>
    %878 = tpu.matmul %867, %749, %cst_405 {dimension_numbers = #tpu.dot_dimension_numbers<[1], [0], [0], [1], [0, 0, 1, 1], [], []>} : vector<8x48xf32>, vector<48x48xf32>, vector<8x48xf32> -> vector<8x48xf32>
    %cst_406 = arith.constant dense<0.000000e+00> : vector<8x48xf32>
    %879 = tpu.matmul %867, %750, %cst_406 {dimension_numbers = #tpu.dot_dimension_numbers<[1], [0], [0], [1], [0, 0, 1, 1], [], []>} : vector<8x48xf32>, vector<48x48xf32>, vector<8x48xf32> -> vector<8x48xf32>
    %880 = arith.index_cast %873 : i32 to index
    %c0_407 = arith.constant 0 : index
    %881 = vector.load %arg14[%880, %c0_407] : memref<64x48xf32, #tpu.memory_space<vmem>>, vector<8x48xf32>
    %882 = arith.addf %881, %877 : vector<8x48xf32>
    %883 = arith.negf %882 : vector<8x48xf32>
    %884 = math.exp %883 : vector<8x48xf32>
    %cst_408 = arith.constant 1.000000e+00 : f32
    %885 = vector.broadcast %cst_408 : f32 to vector<8x48xf32>
    %886 = arith.addf %885, %884 : vector<8x48xf32>
    %887 = arith.divf %885, %886 : vector<8x48xf32>
    %888 = arith.index_cast %873 : i32 to index
    %c0_409 = arith.constant 0 : index
    %889 = vector.load %arg15[%888, %c0_409] : memref<64x48xf32, #tpu.memory_space<vmem>>, vector<8x48xf32>
    %890 = arith.addf %889, %878 : vector<8x48xf32>
    %891 = arith.negf %890 : vector<8x48xf32>
    %892 = math.exp %891 : vector<8x48xf32>
    %cst_410 = arith.constant 1.000000e+00 : f32
    %893 = vector.broadcast %cst_410 : f32 to vector<8x48xf32>
    %894 = arith.addf %893, %892 : vector<8x48xf32>
    %895 = arith.divf %893, %894 : vector<8x48xf32>
    %896 = arith.index_cast %873 : i32 to index
    %c0_411 = arith.constant 0 : index
    %897 = vector.load %arg16[%896, %c0_411] : memref<64x48xf32, #tpu.memory_space<vmem>>, vector<8x48xf32>
    %898 = arith.addf %879, %753 : vector<8x48xf32>
    %899 = arith.mulf %887, %898 : vector<8x48xf32>
    %900 = arith.addf %897, %899 : vector<8x48xf32>
    %901 = math.tanh %900 : vector<8x48xf32>
    %cst_412 = arith.constant 1.000000e+00 : f32
    %902 = vector.broadcast %cst_412 : f32 to vector<8x48xf32>
    %903 = arith.subf %902, %895 : vector<8x48xf32>
    %904 = arith.mulf %903, %901 : vector<8x48xf32>
    %905 = arith.mulf %895, %867 : vector<8x48xf32>
    %906 = arith.addf %904, %905 : vector<8x48xf32>
    %907 = arith.index_cast %873 : i32 to index
    %c0_413 = arith.constant 0 : index
    %908 = vector.load %arg17[%907, %c0_413] : memref<64x48xf32, #tpu.memory_space<vmem>>, vector<8x48xf32>
    tpu.vector_store %arg17[%907, %c0_413], %906 {strides = array<i32>} : memref<64x48xf32, #tpu.memory_space<vmem>>, vector<8x48xf32>,
    %909 = arith.index_cast %876 : i32 to index
    %c0_414 = arith.constant 0 : index
    %910 = vector.load %arg18[%909, %c0_414] : memref<64x48xf32, #tpu.memory_space<vmem>>, vector<8x48xf32>
    tpu.vector_store %arg18[%909, %c0_414], %906 {strides = array<i32>} : memref<64x48xf32, #tpu.memory_space<vmem>>, vector<8x48xf32>,
    %c4_i32_415 = arith.constant 4 : i32
    %c8_i32_416 = arith.constant 8 : i32
    %911 = arith.muli %c4_i32_415, %c8_i32_416 : i32
    %912 = tpu.assume_multiple %911, 8 : i32
    %c7_i32_417 = arith.constant 7 : i32
    %913 = arith.subi %c7_i32_417, %c4_i32_415 : i32
    %c8_i32_418 = arith.constant 8 : i32
    %914 = arith.muli %913, %c8_i32_418 : i32
    %915 = tpu.assume_multiple %914, 8 : i32
    %cst_419 = arith.constant dense<0.000000e+00> : vector<8x48xf32>
    %916 = tpu.matmul %906, %748, %cst_419 {dimension_numbers = #tpu.dot_dimension_numbers<[1], [0], [0], [1], [0, 0, 1, 1], [], []>} : vector<8x48xf32>, vector<48x48xf32>, vector<8x48xf32> -> vector<8x48xf32>
    %cst_420 = arith.constant dense<0.000000e+00> : vector<8x48xf32>
    %917 = tpu.matmul %906, %749, %cst_420 {dimension_numbers = #tpu.dot_dimension_numbers<[1], [0], [0], [1], [0, 0, 1, 1], [], []>} : vector<8x48xf32>, vector<48x48xf32>, vector<8x48xf32> -> vector<8x48xf32>
    %cst_421 = arith.constant dense<0.000000e+00> : vector<8x48xf32>
    %918 = tpu.matmul %906, %750, %cst_421 {dimension_numbers = #tpu.dot_dimension_numbers<[1], [0], [0], [1], [0, 0, 1, 1], [], []>} : vector<8x48xf32>, vector<48x48xf32>, vector<8x48xf32> -> vector<8x48xf32>
    %919 = arith.index_cast %912 : i32 to index
    %c0_422 = arith.constant 0 : index
    %920 = vector.load %arg14[%919, %c0_422] : memref<64x48xf32, #tpu.memory_space<vmem>>, vector<8x48xf32>
    %921 = arith.addf %920, %916 : vector<8x48xf32>
    %922 = arith.negf %921 : vector<8x48xf32>
    %923 = math.exp %922 : vector<8x48xf32>
    %cst_423 = arith.constant 1.000000e+00 : f32
    %924 = vector.broadcast %cst_423 : f32 to vector<8x48xf32>
    %925 = arith.addf %924, %923 : vector<8x48xf32>
    %926 = arith.divf %924, %925 : vector<8x48xf32>
    %927 = arith.index_cast %912 : i32 to index
    %c0_424 = arith.constant 0 : index
    %928 = vector.load %arg15[%927, %c0_424] : memref<64x48xf32, #tpu.memory_space<vmem>>, vector<8x48xf32>
    %929 = arith.addf %928, %917 : vector<8x48xf32>
    %930 = arith.negf %929 : vector<8x48xf32>
    %931 = math.exp %930 : vector<8x48xf32>
    %cst_425 = arith.constant 1.000000e+00 : f32
    %932 = vector.broadcast %cst_425 : f32 to vector<8x48xf32>
    %933 = arith.addf %932, %931 : vector<8x48xf32>
    %934 = arith.divf %932, %933 : vector<8x48xf32>
    %935 = arith.index_cast %912 : i32 to index
    %c0_426 = arith.constant 0 : index
    %936 = vector.load %arg16[%935, %c0_426] : memref<64x48xf32, #tpu.memory_space<vmem>>, vector<8x48xf32>
    %937 = arith.addf %918, %753 : vector<8x48xf32>
    %938 = arith.mulf %926, %937 : vector<8x48xf32>
    %939 = arith.addf %936, %938 : vector<8x48xf32>
    %940 = math.tanh %939 : vector<8x48xf32>
    %cst_427 = arith.constant 1.000000e+00 : f32
    %941 = vector.broadcast %cst_427 : f32 to vector<8x48xf32>
    %942 = arith.subf %941, %934 : vector<8x48xf32>
    %943 = arith.mulf %942, %940 : vector<8x48xf32>
    %944 = arith.mulf %934, %906 : vector<8x48xf32>
    %945 = arith.addf %943, %944 : vector<8x48xf32>
    %946 = arith.index_cast %912 : i32 to index
    %c0_428 = arith.constant 0 : index
    %947 = vector.load %arg17[%946, %c0_428] : memref<64x48xf32, #tpu.memory_space<vmem>>, vector<8x48xf32>
    tpu.vector_store %arg17[%946, %c0_428], %945 {strides = array<i32>} : memref<64x48xf32, #tpu.memory_space<vmem>>, vector<8x48xf32>,
    %948 = arith.index_cast %915 : i32 to index
    %c0_429 = arith.constant 0 : index
    %949 = vector.load %arg18[%948, %c0_429] : memref<64x48xf32, #tpu.memory_space<vmem>>, vector<8x48xf32>
    tpu.vector_store %arg18[%948, %c0_429], %945 {strides = array<i32>} : memref<64x48xf32, #tpu.memory_space<vmem>>, vector<8x48xf32>,
    %c5_i32_430 = arith.constant 5 : i32
    %c8_i32_431 = arith.constant 8 : i32
    %950 = arith.muli %c5_i32_430, %c8_i32_431 : i32
    %951 = tpu.assume_multiple %950, 8 : i32
    %c7_i32_432 = arith.constant 7 : i32
    %952 = arith.subi %c7_i32_432, %c5_i32_430 : i32
    %c8_i32_433 = arith.constant 8 : i32
    %953 = arith.muli %952, %c8_i32_433 : i32
    %954 = tpu.assume_multiple %953, 8 : i32
    %cst_434 = arith.constant dense<0.000000e+00> : vector<8x48xf32>
    %955 = tpu.matmul %945, %748, %cst_434 {dimension_numbers = #tpu.dot_dimension_numbers<[1], [0], [0], [1], [0, 0, 1, 1], [], []>} : vector<8x48xf32>, vector<48x48xf32>, vector<8x48xf32> -> vector<8x48xf32>
    %cst_435 = arith.constant dense<0.000000e+00> : vector<8x48xf32>
    %956 = tpu.matmul %945, %749, %cst_435 {dimension_numbers = #tpu.dot_dimension_numbers<[1], [0], [0], [1], [0, 0, 1, 1], [], []>} : vector<8x48xf32>, vector<48x48xf32>, vector<8x48xf32> -> vector<8x48xf32>
    %cst_436 = arith.constant dense<0.000000e+00> : vector<8x48xf32>
    %957 = tpu.matmul %945, %750, %cst_436 {dimension_numbers = #tpu.dot_dimension_numbers<[1], [0], [0], [1], [0, 0, 1, 1], [], []>} : vector<8x48xf32>, vector<48x48xf32>, vector<8x48xf32> -> vector<8x48xf32>
    %958 = arith.index_cast %951 : i32 to index
    %c0_437 = arith.constant 0 : index
    %959 = vector.load %arg14[%958, %c0_437] : memref<64x48xf32, #tpu.memory_space<vmem>>, vector<8x48xf32>
    %960 = arith.addf %959, %955 : vector<8x48xf32>
    %961 = arith.negf %960 : vector<8x48xf32>
    %962 = math.exp %961 : vector<8x48xf32>
    %cst_438 = arith.constant 1.000000e+00 : f32
    %963 = vector.broadcast %cst_438 : f32 to vector<8x48xf32>
    %964 = arith.addf %963, %962 : vector<8x48xf32>
    %965 = arith.divf %963, %964 : vector<8x48xf32>
    %966 = arith.index_cast %951 : i32 to index
    %c0_439 = arith.constant 0 : index
    %967 = vector.load %arg15[%966, %c0_439] : memref<64x48xf32, #tpu.memory_space<vmem>>, vector<8x48xf32>
    %968 = arith.addf %967, %956 : vector<8x48xf32>
    %969 = arith.negf %968 : vector<8x48xf32>
    %970 = math.exp %969 : vector<8x48xf32>
    %cst_440 = arith.constant 1.000000e+00 : f32
    %971 = vector.broadcast %cst_440 : f32 to vector<8x48xf32>
    %972 = arith.addf %971, %970 : vector<8x48xf32>
    %973 = arith.divf %971, %972 : vector<8x48xf32>
    %974 = arith.index_cast %951 : i32 to index
    %c0_441 = arith.constant 0 : index
    %975 = vector.load %arg16[%974, %c0_441] : memref<64x48xf32, #tpu.memory_space<vmem>>, vector<8x48xf32>
    %976 = arith.addf %957, %753 : vector<8x48xf32>
    %977 = arith.mulf %965, %976 : vector<8x48xf32>
    %978 = arith.addf %975, %977 : vector<8x48xf32>
    %979 = math.tanh %978 : vector<8x48xf32>
    %cst_442 = arith.constant 1.000000e+00 : f32
    %980 = vector.broadcast %cst_442 : f32 to vector<8x48xf32>
    %981 = arith.subf %980, %973 : vector<8x48xf32>
    %982 = arith.mulf %981, %979 : vector<8x48xf32>
    %983 = arith.mulf %973, %945 : vector<8x48xf32>
    %984 = arith.addf %982, %983 : vector<8x48xf32>
    %985 = arith.index_cast %951 : i32 to index
    %c0_443 = arith.constant 0 : index
    %986 = vector.load %arg17[%985, %c0_443] : memref<64x48xf32, #tpu.memory_space<vmem>>, vector<8x48xf32>
    tpu.vector_store %arg17[%985, %c0_443], %984 {strides = array<i32>} : memref<64x48xf32, #tpu.memory_space<vmem>>, vector<8x48xf32>,
    %987 = arith.index_cast %954 : i32 to index
    %c0_444 = arith.constant 0 : index
    %988 = vector.load %arg18[%987, %c0_444] : memref<64x48xf32, #tpu.memory_space<vmem>>, vector<8x48xf32>
    tpu.vector_store %arg18[%987, %c0_444], %984 {strides = array<i32>} : memref<64x48xf32, #tpu.memory_space<vmem>>, vector<8x48xf32>,
    %c6_i32_445 = arith.constant 6 : i32
    %c8_i32_446 = arith.constant 8 : i32
    %989 = arith.muli %c6_i32_445, %c8_i32_446 : i32
    %990 = tpu.assume_multiple %989, 8 : i32
    %c7_i32_447 = arith.constant 7 : i32
    %991 = arith.subi %c7_i32_447, %c6_i32_445 : i32
    %c8_i32_448 = arith.constant 8 : i32
    %992 = arith.muli %991, %c8_i32_448 : i32
    %993 = tpu.assume_multiple %992, 8 : i32
    %cst_449 = arith.constant dense<0.000000e+00> : vector<8x48xf32>
    %994 = tpu.matmul %984, %748, %cst_449 {dimension_numbers = #tpu.dot_dimension_numbers<[1], [0], [0], [1], [0, 0, 1, 1], [], []>} : vector<8x48xf32>, vector<48x48xf32>, vector<8x48xf32> -> vector<8x48xf32>
    %cst_450 = arith.constant dense<0.000000e+00> : vector<8x48xf32>
    %995 = tpu.matmul %984, %749, %cst_450 {dimension_numbers = #tpu.dot_dimension_numbers<[1], [0], [0], [1], [0, 0, 1, 1], [], []>} : vector<8x48xf32>, vector<48x48xf32>, vector<8x48xf32> -> vector<8x48xf32>
    %cst_451 = arith.constant dense<0.000000e+00> : vector<8x48xf32>
    %996 = tpu.matmul %984, %750, %cst_451 {dimension_numbers = #tpu.dot_dimension_numbers<[1], [0], [0], [1], [0, 0, 1, 1], [], []>} : vector<8x48xf32>, vector<48x48xf32>, vector<8x48xf32> -> vector<8x48xf32>
    %997 = arith.index_cast %990 : i32 to index
    %c0_452 = arith.constant 0 : index
    %998 = vector.load %arg14[%997, %c0_452] : memref<64x48xf32, #tpu.memory_space<vmem>>, vector<8x48xf32>
    %999 = arith.addf %998, %994 : vector<8x48xf32>
    %1000 = arith.negf %999 : vector<8x48xf32>
    %1001 = math.exp %1000 : vector<8x48xf32>
    %cst_453 = arith.constant 1.000000e+00 : f32
    %1002 = vector.broadcast %cst_453 : f32 to vector<8x48xf32>
    %1003 = arith.addf %1002, %1001 : vector<8x48xf32>
    %1004 = arith.divf %1002, %1003 : vector<8x48xf32>
    %1005 = arith.index_cast %990 : i32 to index
    %c0_454 = arith.constant 0 : index
    %1006 = vector.load %arg15[%1005, %c0_454] : memref<64x48xf32, #tpu.memory_space<vmem>>, vector<8x48xf32>
    %1007 = arith.addf %1006, %995 : vector<8x48xf32>
    %1008 = arith.negf %1007 : vector<8x48xf32>
    %1009 = math.exp %1008 : vector<8x48xf32>
    %cst_455 = arith.constant 1.000000e+00 : f32
    %1010 = vector.broadcast %cst_455 : f32 to vector<8x48xf32>
    %1011 = arith.addf %1010, %1009 : vector<8x48xf32>
    %1012 = arith.divf %1010, %1011 : vector<8x48xf32>
    %1013 = arith.index_cast %990 : i32 to index
    %c0_456 = arith.constant 0 : index
    %1014 = vector.load %arg16[%1013, %c0_456] : memref<64x48xf32, #tpu.memory_space<vmem>>, vector<8x48xf32>
    %1015 = arith.addf %996, %753 : vector<8x48xf32>
    %1016 = arith.mulf %1004, %1015 : vector<8x48xf32>
    %1017 = arith.addf %1014, %1016 : vector<8x48xf32>
    %1018 = math.tanh %1017 : vector<8x48xf32>
    %cst_457 = arith.constant 1.000000e+00 : f32
    %1019 = vector.broadcast %cst_457 : f32 to vector<8x48xf32>
    %1020 = arith.subf %1019, %1012 : vector<8x48xf32>
    %1021 = arith.mulf %1020, %1018 : vector<8x48xf32>
    %1022 = arith.mulf %1012, %984 : vector<8x48xf32>
    %1023 = arith.addf %1021, %1022 : vector<8x48xf32>
    %1024 = arith.index_cast %990 : i32 to index
    %c0_458 = arith.constant 0 : index
    %1025 = vector.load %arg17[%1024, %c0_458] : memref<64x48xf32, #tpu.memory_space<vmem>>, vector<8x48xf32>
    tpu.vector_store %arg17[%1024, %c0_458], %1023 {strides = array<i32>} : memref<64x48xf32, #tpu.memory_space<vmem>>, vector<8x48xf32>,
    %1026 = arith.index_cast %993 : i32 to index
    %c0_459 = arith.constant 0 : index
    %1027 = vector.load %arg18[%1026, %c0_459] : memref<64x48xf32, #tpu.memory_space<vmem>>, vector<8x48xf32>
    tpu.vector_store %arg18[%1026, %c0_459], %1023 {strides = array<i32>} : memref<64x48xf32, #tpu.memory_space<vmem>>, vector<8x48xf32>,
    %c7_i32_460 = arith.constant 7 : i32
    %c8_i32_461 = arith.constant 8 : i32
    %1028 = arith.muli %c7_i32_460, %c8_i32_461 : i32
    %1029 = tpu.assume_multiple %1028, 8 : i32
    %c7_i32_462 = arith.constant 7 : i32
    %1030 = arith.subi %c7_i32_462, %c7_i32_460 : i32
    %c8_i32_463 = arith.constant 8 : i32
    %1031 = arith.muli %1030, %c8_i32_463 : i32
    %1032 = tpu.assume_multiple %1031, 8 : i32
    %cst_464 = arith.constant dense<0.000000e+00> : vector<8x48xf32>
    %1033 = tpu.matmul %1023, %748, %cst_464 {dimension_numbers = #tpu.dot_dimension_numbers<[1], [0], [0], [1], [0, 0, 1, 1], [], []>} : vector<8x48xf32>, vector<48x48xf32>, vector<8x48xf32> -> vector<8x48xf32>
    %cst_465 = arith.constant dense<0.000000e+00> : vector<8x48xf32>
    %1034 = tpu.matmul %1023, %749, %cst_465 {dimension_numbers = #tpu.dot_dimension_numbers<[1], [0], [0], [1], [0, 0, 1, 1], [], []>} : vector<8x48xf32>, vector<48x48xf32>, vector<8x48xf32> -> vector<8x48xf32>
    %cst_466 = arith.constant dense<0.000000e+00> : vector<8x48xf32>
    %1035 = tpu.matmul %1023, %750, %cst_466 {dimension_numbers = #tpu.dot_dimension_numbers<[1], [0], [0], [1], [0, 0, 1, 1], [], []>} : vector<8x48xf32>, vector<48x48xf32>, vector<8x48xf32> -> vector<8x48xf32>
    %1036 = arith.index_cast %1029 : i32 to index
    %c0_467 = arith.constant 0 : index
    %1037 = vector.load %arg14[%1036, %c0_467] : memref<64x48xf32, #tpu.memory_space<vmem>>, vector<8x48xf32>
    %1038 = arith.addf %1037, %1033 : vector<8x48xf32>
    %1039 = arith.negf %1038 : vector<8x48xf32>
    %1040 = math.exp %1039 : vector<8x48xf32>
    %cst_468 = arith.constant 1.000000e+00 : f32
    %1041 = vector.broadcast %cst_468 : f32 to vector<8x48xf32>
    %1042 = arith.addf %1041, %1040 : vector<8x48xf32>
    %1043 = arith.divf %1041, %1042 : vector<8x48xf32>
    %1044 = arith.index_cast %1029 : i32 to index
    %c0_469 = arith.constant 0 : index
    %1045 = vector.load %arg15[%1044, %c0_469] : memref<64x48xf32, #tpu.memory_space<vmem>>, vector<8x48xf32>
    %1046 = arith.addf %1045, %1034 : vector<8x48xf32>
    %1047 = arith.negf %1046 : vector<8x48xf32>
    %1048 = math.exp %1047 : vector<8x48xf32>
    %cst_470 = arith.constant 1.000000e+00 : f32
    %1049 = vector.broadcast %cst_470 : f32 to vector<8x48xf32>
    %1050 = arith.addf %1049, %1048 : vector<8x48xf32>
    %1051 = arith.divf %1049, %1050 : vector<8x48xf32>
    %1052 = arith.index_cast %1029 : i32 to index
    %c0_471 = arith.constant 0 : index
    %1053 = vector.load %arg16[%1052, %c0_471] : memref<64x48xf32, #tpu.memory_space<vmem>>, vector<8x48xf32>
    %1054 = arith.addf %1035, %753 : vector<8x48xf32>
    %1055 = arith.mulf %1043, %1054 : vector<8x48xf32>
    %1056 = arith.addf %1053, %1055 : vector<8x48xf32>
    %1057 = math.tanh %1056 : vector<8x48xf32>
    %cst_472 = arith.constant 1.000000e+00 : f32
    %1058 = vector.broadcast %cst_472 : f32 to vector<8x48xf32>
    %1059 = arith.subf %1058, %1051 : vector<8x48xf32>
    %1060 = arith.mulf %1059, %1057 : vector<8x48xf32>
    %1061 = arith.mulf %1051, %1023 : vector<8x48xf32>
    %1062 = arith.addf %1060, %1061 : vector<8x48xf32>
    %1063 = arith.index_cast %1029 : i32 to index
    %c0_473 = arith.constant 0 : index
    %1064 = vector.load %arg17[%1063, %c0_473] : memref<64x48xf32, #tpu.memory_space<vmem>>, vector<8x48xf32>
    tpu.vector_store %arg17[%1063, %c0_473], %1062 {strides = array<i32>} : memref<64x48xf32, #tpu.memory_space<vmem>>, vector<8x48xf32>,
    %1065 = arith.index_cast %1032 : i32 to index
    %c0_474 = arith.constant 0 : index
    %1066 = vector.load %arg18[%1065, %c0_474] : memref<64x48xf32, #tpu.memory_space<vmem>>, vector<8x48xf32>
    tpu.vector_store %arg18[%1065, %c0_474], %1062 {strides = array<i32>} : memref<64x48xf32, #tpu.memory_space<vmem>>, vector<8x48xf32>,
    %c8_i32_475 = arith.constant 8 : i32
    %c0_476 = arith.constant 0 : index
    %c0_477 = arith.constant 0 : index
    %1067 = vector.load %arg17[%c0_476, %c0_477] : memref<64x48xf32, #tpu.memory_space<vmem>>, vector<64x48xf32>
    %c0_478 = arith.constant 0 : index
    %c0_479 = arith.constant 0 : index
    %1068 = vector.load %arg18[%c0_478, %c0_479] : memref<64x48xf32, #tpu.memory_space<vmem>>, vector<64x48xf32>
    %c0_480 = arith.constant 0 : index
    %c0_481 = arith.constant 0 : index
    %1069 = vector.load %arg8[%c0_480, %c0_481] : memref<104x3xf32, #tpu.memory_space<vmem>>, vector<48x3xf32>
    %cst_482 = arith.constant dense<0.000000e+00> : vector<64x3xf32>
    %1070 = tpu.matmul %1067, %1069, %cst_482 {dimension_numbers = #tpu.dot_dimension_numbers<[1], [0], [0], [1], [0, 0, 1, 1], [], []>} : vector<64x48xf32>, vector<48x3xf32>, vector<64x3xf32> -> vector<64x3xf32>
    %c48_483 = arith.constant 48 : index
    %c0_484 = arith.constant 0 : index
    %1071 = vector.load %arg8[%c48_483, %c0_484] : memref<104x3xf32, #tpu.memory_space<vmem>>, vector<48x3xf32>
    %cst_485 = arith.constant dense<0.000000e+00> : vector<64x3xf32>
    %1072 = tpu.matmul %1068, %1071, %cst_485 {dimension_numbers = #tpu.dot_dimension_numbers<[1], [0], [0], [1], [0, 0, 1, 1], [], []>} : vector<64x48xf32>, vector<48x3xf32>, vector<64x3xf32> -> vector<64x3xf32>
    %1073 = arith.addf %1070, %1072 : vector<64x3xf32>
    %c96_486 = arith.constant 96 : index
    %c0_487 = arith.constant 0 : index
    %1074 = vector.load %arg8[%c96_486, %c0_487] : memref<104x3xf32, #tpu.memory_space<vmem>>, vector<1x3xf32>
    %1075 = vector.broadcast %1074 : vector<1x3xf32> to vector<64x3xf32>
    %1076 = arith.addf %1073, %1075 : vector<64x3xf32>
    %c0_488 = arith.constant 0 : index
    %c0_489 = arith.constant 0 : index
    %c0_490 = arith.constant 0 : index
    %1077 = vector.load %arg9[%c0_488, %c0_489, %c0_490] : memref<1x64x3xf32, #tpu.memory_space<vmem>>, vector<1x64x3xf32>
    %1078 = vector.shape_cast %1077 : vector<1x64x3xf32> to vector<64x3xf32>
    %1079 = vector.shape_cast %1076 : vector<64x3xf32> to vector<1x64x3xf32>
    tpu.vector_store %arg9[%c0_488, %c0_489, %c0_490], %1079 {strides = array<i32>} : memref<1x64x3xf32, #tpu.memory_space<vmem>>, vector<1x64x3xf32>,
    %c0_491 = arith.constant 0 : index
    %c0_492 = arith.constant 0 : index
    %c0_493 = arith.constant 0 : index
    %1080 = vector.load %arg2[%c0_491, %c0_492, %c0_493] : memref<1x64x1xi32, #tpu.memory_space<vmem>>, vector<1x64x1xi32>
    %1081 = vector.shape_cast %1080 : vector<1x64x1xi32> to vector<64x1xi32>
    %c0_494 = arith.constant 0 : index
    %c0_495 = arith.constant 0 : index
    %c0_496 = arith.constant 0 : index
    %1082 = vector.load %arg3[%c0_494, %c0_495, %c0_496] : memref<1x64x1xf32, #tpu.memory_space<vmem>>, vector<1x64x1xf32>
    %1083 = vector.shape_cast %1082 : vector<1x64x1xf32> to vector<64x1xf32>
    %cst_497 = arith.constant dense<0xFF800000> : vector<64xf32>
    %1084 = vector.multi_reduction <maximumf>, %1076, %cst_497 [1] : vector<64x3xf32> to vector<64xf32>
    %1085 = vector.shape_cast %1084 : vector<64xf32> to vector<64x1xf32>
    %1086 = vector.broadcast %1085 : vector<64x1xf32> to vector<64x3xf32>
    %1087 = arith.subf %1076, %1086 : vector<64x3xf32>
    %1088 = math.exp %1087 : vector<64x3xf32>
    %cst_498 = arith.constant dense<0.000000e+00> : vector<64xf32>
    %1089 = vector.multi_reduction <add>, %1088, %cst_498 [1] : vector<64x3xf32> to vector<64xf32>
    %1090 = vector.shape_cast %1089 : vector<64xf32> to vector<64x1xf32>
    %1091 = math.log %1090 : vector<64x1xf32>
    %1092 = arith.addf %1085, %1091 : vector<64x1xf32>
    %1093 = vector.broadcast %1092 : vector<64x1xf32> to vector<64x3xf32>
    %1094 = arith.subf %1076, %1093 : vector<64x3xf32>
    %1095 = tpu.iota {dimensions = array<i32: 1>} : vector<64x3xi32>
    %1096 = vector.broadcast %1081 : vector<64x1xi32> to vector<64x3xi32>
    %1097 = arith.cmpi eq, %1095, %1096 : vector<64x3xi32>
    %cst_499 = arith.constant 0.000000e+00 : f32
    %1098 = vector.broadcast %cst_499 : f32 to vector<64x3xf32>
    %1099 = arith.select %1097, %1094, %1098 : vector<64x3xi1>, vector<64x3xf32>
    %cst_500 = arith.constant dense<0.000000e+00> : vector<64xf32>
    %1100 = vector.multi_reduction <add>, %1099, %cst_500 [1] : vector<64x3xf32> to vector<64xf32>
    %1101 = vector.shape_cast %1100 : vector<64xf32> to vector<64x1xf32>
    %cst_501 = arith.constant 0.000000e+00 : f32
    %1102 = vector.broadcast %cst_501 : f32 to vector<64x1xf32>
    %1103 = arith.subf %1102, %1101 : vector<64x1xf32>
    %c-1_i32 = arith.constant -1 : i32
    %1104 = vector.broadcast %c-1_i32 : i32 to vector<64x1xi32>
    %1105 = arith.cmpi ne, %1081, %1104 : vector<64x1xi32>
    %1106 = arith.extui %1105 : vector<64x1xi1> to vector<64x1xi32>
    %1107 = arith.sitofp %1106 : vector<64x1xi32> to vector<64x1xf32>
    %1108 = arith.mulf %1103, %1107 : vector<64x1xf32>
    %cst_502 = arith.constant dense<0.000000e+00> : vector<1xf32>
    %1109 = vector.multi_reduction <add>, %1108, %cst_502 [0] : vector<64x1xf32> to vector<1xf32>
    %1110 = vector.shape_cast %1109 : vector<1xf32> to vector<1x1xf32>
    %c0_503 = arith.constant 0 : index
    %c0_504 = arith.constant 0 : index
    %c0_505 = arith.constant 0 : index
    %1111 = vector.load %arg10[%c0_503, %c0_504, %c0_505] : memref<1x1x1xf32, #tpu.memory_space<vmem>>, vector<1x1x1xf32>
    %1112 = vector.shape_cast %1111 : vector<1x1x1xf32> to vector<1x1xf32>
    %1113 = vector.shape_cast %1110 : vector<1x1xf32> to vector<1x1x1xf32>
    tpu.vector_store %arg10[%c0_503, %c0_504, %c0_505], %1113 {strides = array<i32>} : memref<1x1x1xf32, #tpu.memory_space<vmem>>, vector<1x1x1xf32>,
    %cst_506 = arith.constant dense<0.000000e+00> : vector<1xf32>
    %1114 = vector.multi_reduction <add>, %1107, %cst_506 [0] : vector<64x1xf32> to vector<1xf32>
    %1115 = vector.shape_cast %1114 : vector<1xf32> to vector<1x1xf32>
    %c0_507 = arith.constant 0 : index
    %c0_508 = arith.constant 0 : index
    %c0_509 = arith.constant 0 : index
    %1116 = vector.load %arg11[%c0_507, %c0_508, %c0_509] : memref<1x1x1xf32, #tpu.memory_space<vmem>>, vector<1x1x1xf32>
    %1117 = vector.shape_cast %1116 : vector<1x1x1xf32> to vector<1x1xf32>
    %1118 = vector.shape_cast %1115 : vector<1x1xf32> to vector<1x1x1xf32>
    tpu.vector_store %arg11[%c0_507, %c0_508, %c0_509], %1118 {strides = array<i32>} : memref<1x1x1xf32, #tpu.memory_space<vmem>>, vector<1x1x1xf32>,
    %1119 = arith.mulf %1103, %1107 : vector<64x1xf32>
    %1120 = arith.mulf %1119, %1083 : vector<64x1xf32>
    %cst_510 = arith.constant dense<0.000000e+00> : vector<1xf32>
    %1121 = vector.multi_reduction <add>, %1120, %cst_510 [0] : vector<64x1xf32> to vector<1xf32>
    %1122 = vector.shape_cast %1121 : vector<1xf32> to vector<1x1xf32>
    %c0_511 = arith.constant 0 : index
    %c0_512 = arith.constant 0 : index
    %c0_513 = arith.constant 0 : index
    %1123 = vector.load %arg12[%c0_511, %c0_512, %c0_513] : memref<1x1x1xf32, #tpu.memory_space<vmem>>, vector<1x1x1xf32>
    %1124 = vector.shape_cast %1123 : vector<1x1x1xf32> to vector<1x1xf32>
    %1125 = vector.shape_cast %1122 : vector<1x1xf32> to vector<1x1x1xf32>
    tpu.vector_store %arg12[%c0_511, %c0_512, %c0_513], %1125 {strides = array<i32>} : memref<1x1x1xf32, #tpu.memory_space<vmem>>, vector<1x1x1xf32>,
    %1126 = arith.mulf %1107, %1083 : vector<64x1xf32>
    %cst_514 = arith.constant dense<0.000000e+00> : vector<1xf32>
    %1127 = vector.multi_reduction <add>, %1126, %cst_514 [0] : vector<64x1xf32> to vector<1xf32>
    %1128 = vector.shape_cast %1127 : vector<1xf32> to vector<1x1xf32>
    %c0_515 = arith.constant 0 : index
    %c0_516 = arith.constant 0 : index
    %c0_517 = arith.constant 0 : index
    %1129 = vector.load %arg13[%c0_515, %c0_516, %c0_517] : memref<1x1x1xf32, #tpu.memory_space<vmem>>, vector<1x1x1xf32>
    %1130 = vector.shape_cast %1129 : vector<1x1x1xf32> to vector<1x1xf32>
    %1131 = vector.shape_cast %1128 : vector<1x1xf32> to vector<1x1x1xf32>
    tpu.vector_store %arg13[%c0_515, %c0_516, %c0_517], %1131 {strides = array<i32>} : memref<1x1x1xf32, #tpu.memory_space<vmem>>, vector<1x1x1xf32>,
    return
  }
  func.func @transform_0(%arg0: i32) -> (i32, i32, i32) {
    %c0_i32 = arith.constant 0 : i32
    %c0_i32_0 = arith.constant 0 : i32
    %c0_i32_1 = arith.constant 0 : i32
    return %arg0, %c0_i32, %c0_i32_0 : i32, i32, i32
  }
  func.func @transform_1(%arg0: i32) -> (i32, i32, i32) {
    %c0_i32 = arith.constant 0 : i32
    %c0_i32_0 = arith.constant 0 : i32
    %c0_i32_1 = arith.constant 0 : i32
    return %arg0, %c0_i32, %c0_i32_0 : i32, i32, i32
  }
  func.func @transform_2(%arg0: i32) -> (i32, i32, i32) {
    %c0_i32 = arith.constant 0 : i32
    %c0_i32_0 = arith.constant 0 : i32
    %c0_i32_1 = arith.constant 0 : i32
    return %arg0, %c0_i32, %c0_i32_0 : i32, i32, i32
  }
  func.func @transform_3(%arg0: i32) -> (i32, i32) {
    %c0_i32 = arith.constant 0 : i32
    %c0_i32_0 = arith.constant 0 : i32
    %c0_i32_1 = arith.constant 0 : i32
    return %c0_i32, %c0_i32_0 : i32, i32
  }
  func.func @transform_4(%arg0: i32) -> (i32, i32) {
    %c0_i32 = arith.constant 0 : i32
    %c0_i32_0 = arith.constant 0 : i32
    %c0_i32_1 = arith.constant 0 : i32
    return %c0_i32, %c0_i32_0 : i32, i32
  }
  func.func @transform_5(%arg0: i32) -> (i32, i32) {
    %c0_i32 = arith.constant 0 : i32
    %c0_i32_0 = arith.constant 0 : i32
    %c0_i32_1 = arith.constant 0 : i32
    return %c0_i32, %c0_i32_0 : i32, i32
  }
  func.func @transform_6(%arg0: i32) -> (i32, i32) {
    %c0_i32 = arith.constant 0 : i32
    %c0_i32_0 = arith.constant 0 : i32
    %c0_i32_1 = arith.constant 0 : i32
    return %c0_i32, %c0_i32_0 : i32, i32
  }
  func.func @transform_7(%arg0: i32) -> (i32, i32) {
    %c0_i32 = arith.constant 0 : i32
    %c0_i32_0 = arith.constant 0 : i32
    %c0_i32_1 = arith.constant 0 : i32
    return %c0_i32, %c0_i32_0 : i32, i32
  }
  func.func @transform_8(%arg0: i32) -> (i32, i32, i32) {
    %c0_i32 = arith.constant 0 : i32
    %c0_i32_0 = arith.constant 0 : i32
    %c0_i32_1 = arith.constant 0 : i32
    return %arg0, %c0_i32, %c0_i32_0 : i32, i32, i32
  }
  func.func @transform_9(%arg0: i32) -> (i32, i32, i32) {
    %c0_i32 = arith.constant 0 : i32
    %c0_i32_0 = arith.constant 0 : i32
    %c0_i32_1 = arith.constant 0 : i32
    return %arg0, %c0_i32, %c0_i32_0 : i32, i32, i32
  }
  func.func @transform_10(%arg0: i32) -> (i32, i32, i32) {
    %c0_i32 = arith.constant 0 : i32
    %c0_i32_0 = arith.constant 0 : i32
    %c0_i32_1 = arith.constant 0 : i32
    return %arg0, %c0_i32, %c0_i32_0 : i32, i32, i32
  }
  func.func @transform_11(%arg0: i32) -> (i32, i32, i32) {
    %c0_i32 = arith.constant 0 : i32
    %c0_i32_0 = arith.constant 0 : i32
    %c0_i32_1 = arith.constant 0 : i32
    return %arg0, %c0_i32, %c0_i32_0 : i32, i32, i32
  }
  func.func @transform_12(%arg0: i32) -> (i32, i32, i32) {
    %c0_i32 = arith.constant 0 : i32
    %c0_i32_0 = arith.constant 0 : i32
    %c0_i32_1 = arith.constant 0 : i32
    return %arg0, %c0_i32, %c0_i32_0 : i32, i32, i32
  }
}

</mosaic_0001>

<bundles_post_ra>
// kernel: reverse
= control target key start
LH: loop header
LB: loop body
LE: loop exit
PB: predicated region body
PF: predicated region fallthrough
CT: control target
= control target key end

     0   :  { %v2_v0 = vlaneseq  ;;  %s238_s0 = inlined_call_operand.vmem [shape: f32[8,8,8], index: 0, kind: input, shape index: {}]   ;;  %s239_s1 = inlined_call_operand.vmem [shape: f32[8,8,8], index: 1, kind: output, shape index: {}]  }
   0x1   :  { %v50_v2 = vld [vmem:[%s238_s0 + $0x10] sm:$0xff]  ;;  %v46_v3 = vld [vmem:[%s238_s0] sm:$0xff]  ;;  %v52_v4 = vld [vmem:[%s238_s0 + $0x18] sm:$0xff] }
   0x2   :  { %v3_v1 = vsub.s32 7, %v2_v0  ;;  %v48_v5 = vld [vmem:[%s238_s0 + $0x8] sm:$0xff]  ;;  %v54_v7 = vld [vmem:[%s238_s0 + $0x20] sm:$0xff]  ;;  %v60_v8 = vld [vmem:[%s238_s0 + $0x38] sm:$0xff] }
   0x3   :  { %v56_v6 = vld [vmem:[%s238_s0 + $0x28] sm:$0xff]  ;;  %v58_v9 = vld [vmem:[%s238_s0 + $0x30] sm:$0xff] }
   0x4   :  { %4 = vset.pattern.permute.xlu0 %v3_v1  ;;  %179 = vset.pattern.permute.xlu1 %v3_v1 }
   0x5   :  { %78 = vperm.xlu1 %179, %v50_v2   ;;  %66 = vperm.xlu0 %4, %v46_v3  }
   0x9   :  { %84 = vperm.xlu1 %179, %v52_v4   ;;  %72 = vperm.xlu0 %4, %v48_v5  }
   0xd   :  { %96 = vperm.xlu1 %179, %v56_v6   ;;  %90 = vperm.xlu0 %4, %v54_v7  }
  0x11   :  { %108 = vperm.xlu1 %179, %v60_v8   ;;  %102 = vperm.xlu0 %4, %v58_v9  }
  0x84   :  { %v79_v10 = vpop.permute.xlu1 %78  ;;  %v67_v11 = vpop.permute.xlu0 %66 }
  0x85   :  { %157 = vst [vmem:[%s239_s1 + $0x10] sm:$0xff] %v79_v10  ;;  %153 = vst [vmem:[%s239_s1] sm:$0xff] %v67_v11 }
  0x88   :  { %v85_v12 = vpop.permute.xlu1 %84  ;;  %v73_v13 = vpop.permute.xlu0 %72 }
  0x89   :  { %159 = vst [vmem:[%s239_s1 + $0x18] sm:$0xff] %v85_v12  ;;  %155 = vst [vmem:[%s239_s1 + $0x8] sm:$0xff] %v73_v13 }
  0x8c   :  { %v97_v14 = vpop.permute.xlu1 %96  ;;  %v91_v15 = vpop.permute.xlu0 %90 }
  0x8d   :  { %163 = vst [vmem:[%s239_s1 + $0x28] sm:$0xff] %v97_v14  ;;  %161 = vst [vmem:[%s239_s1 + $0x20] sm:$0xff] %v91_v15 }
  0x90   :  { %v109_v16 = vpop.permute.xlu1 %108  ;;  %v103_v17 = vpop.permute.xlu0 %102 }
  0x91   :  { %167 = vst [vmem:[%s239_s1 + $0x38] sm:$0xff] %v109_v16  ;;  %165 = vst [vmem:[%s239_s1 + $0x30] sm:$0xff] %v103_v17 }

// kernel: model3_forward.1
= control target key start
LH: loop header
LB: loop body
LE: loop exit
PB: predicated region body
PF: predicated region fallthrough
CT: control target
= control target key end

     0   :  { %18 = vsyncpa [#allocation8], 0  ;;  %s16027_s0 = inlined_call_operand.vmem [shape: f32[1,128,8], index: 0, kind: input, shape index: {}]   ;;  %s16028_s1 = inlined_call_operand.vmem [shape: s32[1,64,1], index: 1, kind: input, shape index: {}]   ;;  %s16029_s2 = inlined_call_operand.vmem [shape: f32[1,64,1], index: 2, kind: input, shape index: {}]   ;;  %s16030_s3 = inlined_call_operand.vmem [shape: f32[112,36], index: 3, kind: input, shape index: {}]   ;;  %s16031_s4 = inlined_call_operand.vmem [shape: f32[224,48], index: 4, kind: input, shape index: {}]   ;;  %s16032_s5 = inlined_call_operand.vmem [shape: f32[464,48], index: 5, kind: input, shape index: {}]   ;;  %s16033_s6 = inlined_call_operand.vmem [shape: f32[464,48], index: 6, kind: input, shape index: {}]   ;;  %s16034_s7 = inlined_call_operand.vmem [shape: f32[104,3], index: 7, kind: input, shape index: {}]   ;;  %s16035_s8 = inlined_call_operand.vmem [shape: f32[1,64,3], index: 8, kind: output, shape index: {0}]   ;;  %s16036_s9 = inlined_call_operand.hbm [shape: f32[1,1,1], index: 9, kind: output, shape index: {1}]   ;;  %s16037_s10 = inlined_call_operand.hbm [shape: f32[1,1,1], index: 10, kind: output, shape index: {2}]   ;;  %s16038_s11 = inlined_call_operand.hbm [shape: f32[1,1,1], index: 11, kind: output, shape index: {3}]   ;;  %s16039_s12 = inlined_call_operand.hbm [shape: f32[1,1,1], index: 12, kind: output, shape index: {4}]  }
   0x1   :  { %19 = vsyncpa [#allocation10], 0  ;;  %v53_v0 = vld [vmem:[%s16030_s3] sm:$0xff]  ;;  %vm59_vm0 = vcmask 64512   ;;  %v38_v2 = vld [vmem:[%s16027_s0 + $0x8] sm:$0xff] }
   0x2   :  { %v37_v1 = vld [vmem:[%s16027_s0] sm:$0xff]  ;;  %10740 = vmatprep.subr.mxu0 %v53_v0  ;;  %v39_v3 = vld [vmem:[%s16027_s0 + $0x10] sm:$0xff]  ;;  %v40_v4 = vld [vmem:[%s16027_s0 + $0x18] sm:$0xff] }
   0x3   :  { %10742 = vmatprep.mubr.msk.f32.mxu0 %vm59_vm0, %v37_v1  ;;  %10741 = vmatpush3.msra.mxu0 %v53_v0  ;;  %v41_v5 = vld [vmem:[%s16027_s0 + $0x20] sm:$0xff]  ;;  %v269_v6 = vld [vmem:[%s16030_s3 + $0x8] sm:$0xff]  ;;  %v270_v7 = vld [vmem:[%s16030_s3 + $0x10] sm:$0xff] }
   0x4   :  { %10743 = vmatmul.mubr.msk.f32.vlgmr.msra.gmra.mrb[0].mxu0 %vm59_vm0, %v38_v2  ;;  %v271_v8 = vld [vmem:[%s16030_s3 + $0x18] sm:$0xff]  ;;  %v272_v9 = vld [vmem:[%s16030_s3 + $0x20] sm:$0xff]  ;;  %v12334_v10 = vpack.c.bf16 %v270_v7, %v269_v6 }
   0x5   :  { %10745 = vmatprep.mubr.msk.f32.mxu0 %vm59_vm0, %v39_v3  ;;  %v12338_v11 = vpack.c.bf16 %v272_v9, %v271_v8 }
   0x8   :  { %10746 = vmatmul.mubr.msk.f32.gmra.mrb[2].mxu0 %vm59_vm0, %v40_v4 }
   0x9   :  { %20 = vsyncpa [#allocation13], 0  ;;  %10748 = vmatprep.mubr.msk.f32.mxu0 %vm59_vm0, %v41_v5  ;;  %v42_v12 = vld [vmem:[%s16027_s0 + $0x28] sm:$0xff]  ;;  %v43_v13 = vld [vmem:[%s16027_s0 + $0x30] sm:$0xff]  ;;  %12335 = vmatprep.subr.bf16.mxu0 %v12334_v10  ;;  %vm328_vm1 = vcmask 1043456   ;;  %vm279_vm2 = vcmask 293888  }
   0xa   :  { %13166 = vmatprep.subr.bf16.mxu1 %v12334_v10  ;;  %12337 = vmatpush3.bf16.msra.mxu0 %v12334_v10  ;;  %v44_v14 = vld [vmem:[%s16027_s0 + $0x38] sm:$0xff]  ;;  %v273_v15 = vld [vmem:[%s16030_s3 + $0x28] sm:$0xf]  ;;  %v45_v16 = vld [vmem:[%s16027_s0 + $0x40] sm:$0xff]  ;;  %vm13629_vm3 = vmmov 0   ;;  %vm988_vm4 = vcmask 392192  }
   0xb   :  { %13169 = vmatpush3.bf16.msra.mxu1 %v12334_v10  ;;  %12339 = vmatprep.subr.bf16.mxu0 %v12338_v11  ;;  %v46_v17 = vld [vmem:[%s16027_s0 + $0x48] sm:$0xff]  ;;  %v47_v18 = vld [vmem:[%s16027_s0 + $0x50] sm:$0xff]  ;;  %v48_v19 = vld [vmem:[%s16027_s0 + $0x58] sm:$0xff]  ;;  %vm9182_vm5 = vcmask 23552   ;;  %vm9417_vm14 = vcmask 7168  }
   0xc   :  { %10749 = vmatmul.mubr.msk.f32.gmra.mrb[4].mxu0 %vm59_vm0, %v42_v12  ;;  %13167 = vmatprep.subr.bf16.mxu1 %v12338_v11  ;;  %v49_v20 = vld [vmem:[%s16027_s0 + $0x60] sm:$0xff]  ;;  %v50_v21 = vld [vmem:[%s16027_s0 + $0x68] sm:$0xff]  ;;  %v51_v22 = vld [vmem:[%s16027_s0 + $0x70] sm:$0xff] }
   0xd   :  { %10751 = vmatprep.mubr.msk.f32.mxu0 %vm59_vm0, %v43_v13  ;;  %v52_v23 = vld [vmem:[%s16027_s0 + $0x78] sm:$0xff]  ;;  %v493_v24 = vld [vmem:[%s16030_s3 + $0x30] sm:$0xff]  ;;  %v495_v32 = vld [vmem:[%s16030_s3 + $0x40] sm:$0xff] }
   0xe   :  { %12341 = vmatpush3.bf16.msra.mxu0 %v12338_v11  ;;  %v494_v25 = vld [vmem:[%s16030_s3 + $0x38] sm:$0xff]  ;;  %v496_v33 = vld [vmem:[%s16030_s3 + $0x48] sm:$0xff] }
   0xf   :  { %13170 = vmatpush3.bf16.msra.mxu1 %v12338_v11  ;;  %10774 = vmatprep.subr.msk.mxu0 %vm328_vm1, %v273_v15  ;;  %v12342_v26 = vpack.c.bf16 %v494_v25, %v493_v24  ;;  %v13796_v27 = vld [vmem:[%s16030_s3 + $0x58] ss:$0 sm:$0xff]  ;;  %v12346_v39 = vpack.c.bf16 %v496_v33, %v495_v32 }
  0x10   :  { %10752 = vmatmul.mubr.msk.f32.gmra.mrb[6].mxu0 %vm59_vm0, %v44_v14  ;;  %13168 = vmatprep.subr.msk.mxu1 %vm328_vm1, %v273_v15 }
  0x11   :  { %10754 = vmatprep.mubr.msk.f32.mxu0 %vm59_vm0, %v45_v16  ;;  %v9599_v16 = vld [vmem:[%s16030_s3 + $0x60] ss:$0 sm:$0xff] }
  0x12   :  { %10775 = vmatpush3.msk.msra.mxu0 %vm328_vm1, %v273_v15 }
  0x13   :  { %13171 = vmatpush3.msk.msra.mxu1 %vm328_vm1, %v273_v15  ;;  %12343 = vmatprep.subr.bf16.mxu0 %v12342_v26  ;;  %v497_v15 = vld [vmem:[%s16030_s3 + $0x50] sm:$0xf] }
  0x14   :  { %10755 = vmatmul.mubr.msk.f32.gmra.mrb[8].mxu0 %vm59_vm0, %v46_v17 }
  0x15   :  { %10757 = vmatprep.mubr.msk.f32.mxu0 %vm59_vm0, %v47_v18 }
  0x18   :  { %10758 = vmatmul.mubr.msk.f32.gmra.mrb[10].mxu0 %vm59_vm0, %v48_v19 }
  0x19   :  { %10760 = vmatprep.mubr.msk.f32.mxu0 %vm59_vm0, %v49_v20 }
  0x1c   :  { %10761 = vmatmul.mubr.msk.f32.gmra.mrb[12].mxu0 %vm59_vm0, %v50_v21 }
  0x1d   :  { %10763 = vmatprep.mubr.msk.f32.mxu0 %vm59_vm0, %v51_v22 }
  0x20   :  { %10764 = vmatmul.mubr.msk.f32.gmra.mrb[14].mxu0 %vm59_vm0, %v52_v23 }
  0xd7   :  { %v10744_v28 = vpop.f32.mrb[0].mxu0 }
  0xd8   :  { %v180_v29 = vadd.f32 %v10744_v28, %v13796_v27  ;;  %v174_v30 = vpop.f32.mrb[1].mxu0 }
  0xd9   :  { %v175_v31 = vadd.f32 %v13796_v27, %v174_v30 }
  0xda   :  { %v254_v36 = vmax.f32 %v180_v29, 0.0 }
  0xdb   :  { %v253_v34 = vmax.f32 %v175_v31, 0.0  ;;  %v10747_v35 = vpop.f32.mrb[2].mxu0 }
  0xdc   :  { %v190_v37 = vadd.f32 %v10747_v35, %v13796_v27  ;;  %v184_v38 = vpop.f32.mrb[3].mxu0 }
  0xdd   :  { %v185_v40 = vadd.f32 %v13796_v27, %v184_v38  ;;  %10776 = vmatprep.mubr.msk.f32.mxu0 %vm279_vm2, %v253_v34 }
  0xde   :  { %10777 = vmatmul.mubr.msk.f32.vlgmr.msra.gmra.mrb[16].mxu0 %vm279_vm2, %v254_v36  ;;  %v256_v43 = vmax.f32 %v190_v37, 0.0 }
  0xdf   :  { %v255_v41 = vmax.f32 %v185_v40, 0.0  ;;  %v10750_v42 = vpop.f32.mrb[4].mxu0  ;;  %12345 = vmatpush3.bf16.msra.mxu0 %v12342_v26 }
  0xe0   :  { %v200_v44 = vadd.f32 %v10750_v42, %v13796_v27  ;;  %v194_v45 = vpop.f32.mrb[5].mxu0  ;;  %12347 = vmatprep.subr.bf16.mxu0 %v12346_v39 }
  0xe1   :  { %v195_v46 = vadd.f32 %v13796_v27, %v194_v45  ;;  %10779 = vmatprep.mubr.msk.f32.mxu0 %vm279_vm2, %v255_v41 }
  0xe2   :  { %10780 = vmatmul.mubr.msk.f32.gmra.mrb[18].mxu0 %vm279_vm2, %v256_v43  ;;  %v258_v49 = vmax.f32 %v200_v44, 0.0 }
  0xe3   :  { %v257_v47 = vmax.f32 %v195_v46, 0.0  ;;  %v10753_v48 = vpop.f32.mrb[6].mxu0  ;;  %12349 = vmatpush3.bf16.msra.mxu0 %v12346_v39 }
  0xe4   :  { %v210_v50 = vadd.f32 %v10753_v48, %v13796_v27  ;;  %v204_v51 = vpop.f32.mrb[7].mxu0  ;;  %10808 = vmatprep.subr.msk.mxu0 %vm328_vm1, %v497_v15 }
  0xe5   :  { %v205_v52 = vadd.f32 %v13796_v27, %v204_v51  ;;  %10782 = vmatprep.mubr.msk.f32.mxu0 %vm279_vm2, %v257_v47 }
  0xe6   :  { %10783 = vmatmul.mubr.msk.f32.gmra.mrb[20].mxu0 %vm279_vm2, %v258_v49  ;;  %v260_v55 = vmax.f32 %v210_v50, 0.0 }
  0xe7   :  { %v259_v53 = vmax.f32 %v205_v52, 0.0  ;;  %v10756_v54 = vpop.f32.mrb[8].mxu0  ;;  %10809 = vmatpush3.msk.msra.mxu0 %vm328_vm1, %v497_v15 }
  0xe8   :  { %v220_v56 = vadd.f32 %v10756_v54, %v13796_v27  ;;  %v214_v57 = vpop.f32.mrb[9].mxu0 }
  0xe9   :  { %v215_v58 = vadd.f32 %v13796_v27, %v214_v57  ;;  %10785 = vmatprep.mubr.msk.f32.mxu0 %vm279_vm2, %v259_v53 }
  0xea   :  { %10786 = vmatmul.mubr.msk.f32.gmra.mrb[22].mxu0 %vm279_vm2, %v260_v55  ;;  %v262_v61 = vmax.f32 %v220_v56, 0.0 }
  0xeb   :  { %v261_v59 = vmax.f32 %v215_v58, 0.0  ;;  %v10759_v60 = vpop.f32.mrb[10].mxu0 }
  0xec   :  { %v230_v62 = vadd.f32 %v10759_v60, %v13796_v27  ;;  %v224_v63 = vpop.f32.mrb[11].mxu0 }
  0xed   :  { %v225_v0 = vadd.f32 %v13796_v27, %v224_v63  ;;  %10788 = vmatprep.mubr.msk.f32.mxu1 %vm279_vm2, %v261_v59 }
  0xee   :  { %10789 = vmatmul.mubr.msk.f32.vlgmr.msra.gmra.mrb[0].mxu1 %vm279_vm2, %v262_v61  ;;  %v264_v3 = vmax.f32 %v230_v62, 0.0 }
  0xef   :  { %v263_v1 = vmax.f32 %v225_v0, 0.0  ;;  %v10762_v2 = vpop.f32.mrb[12].mxu0 }
  0xf0   :  { %v240_v4 = vadd.f32 %v10762_v2, %v13796_v27  ;;  %v234_v5 = vpop.f32.mrb[13].mxu0  ;;  %v998_v2 = vld [vmem:[%s16031_s4 + $0x20] sm:$0xff] }
  0xf1   :  { %v235_v6 = vadd.f32 %v13796_v27, %v234_v5  ;;  %10791 = vmatprep.mubr.msk.f32.mxu1 %vm279_vm2, %v263_v1  ;;  %v716_v1 = vld [vmem:[%s16031_s4 + $0x18] sm:$0xff]  ;;  %10862 = vmatprep.subr.mxu0 %v998_v2 }
  0xf2   :  { %10792 = vmatmul.mubr.msk.f32.gmra.mrb[2].mxu1 %vm279_vm2, %v264_v3  ;;  %v266_v9 = vmax.f32 %v240_v4, 0.0  ;;  %10834 = vmatprep.subr.mxu1 %v716_v1  ;;  %v715_v3 = vld [vmem:[%s16031_s4] sm:$0xff]  ;;  %v997_v4 = vld [vmem:[%s16031_s4 + $0x8] sm:$0xff] }
  0xf3   :  { %v265_v7 = vmax.f32 %v235_v6, 0.0  ;;  %v10765_v8 = vpop.f32.mrb[14].mxu0  ;;  %10835 = vmatpush3.msra.mxu1 %v716_v1 }
  0xf4   :  { %v250_v10 = vadd.f32 %v10765_v8, %v13796_v27  ;;  %v244_v11 = vpop.f32.mrb[15].mxu0  ;;  %10848 = vmatprep.subr.mxu1 %v715_v3 }
  0xf5   :  { %v245_v12 = vadd.f32 %v13796_v27, %v244_v11  ;;  %10794 = vmatprep.mubr.msk.f32.mxu1 %vm279_vm2, %v265_v7 }
  0xf6   :  { %10795 = vmatmul.mubr.msk.f32.gmra.mrb[4].mxu1 %vm279_vm2, %v266_v9  ;;  %v268_v14 = vmax.f32 %v250_v10, 0.0 }
  0xf7   :  { %v267_v13 = vmax.f32 %v245_v12, 0.0 }
  0xf9   :  { %10797 = vmatprep.mubr.msk.f32.mxu1 %vm279_vm2, %v267_v13  ;;  %v13881_v13 = vld [vmem:[%s16030_s3 + $0x68] ss:$0 sm:$0xff] }
  0xfa   :  { %10798 = vmatmul.mubr.msk.f32.gmra.mrb[6].mxu1 %vm279_vm2, %v268_v14 }
 0x1b1   :  { %v10778_v17 = vpop.f32.mrb[16].mxu0 }
 0x1b2   :  { %v404_v18 = vadd.f32 %v10778_v17, %v9599_v16  ;;  %v398_v19 = vpop.f32.mrb[17].mxu0 }
 0x1b3   :  { %v399_v20 = vadd.f32 %v9599_v16, %v398_v19 }
 0x1b4   :  { %v478_v23 = vmax.f32 %v404_v18, 0.0 }
 0x1b5   :  { %v477_v21 = vmax.f32 %v399_v20, 0.0  ;;  %v10781_v22 = vpop.f32.mrb[18].mxu0 }
 0x1b6   :  { %v414_v24 = vadd.f32 %v10781_v22, %v9599_v16  ;;  %v408_v25 = vpop.f32.mrb[19].mxu0 }
 0x1b7   :  { %v409_v26 = vadd.f32 %v9599_v16, %v408_v25  ;;  %10810 = vmatprep.mubr.msk.f32.mxu0 %vm279_vm2, %v477_v21 }
 0x1b8   :  { %10811 = vmatmul.mubr.msk.f32.vlgmr.msra.gmra.mrb[24].mxu0 %vm279_vm2, %v478_v23  ;;  %v480_v29 = vmax.f32 %v414_v24, 0.0  ;;  %v1231_v24 = vld [vmem:[%s16031_s4 + $0x28] sm:$0xff] }
 0x1b9   :  { %v479_v27 = vmax.f32 %v409_v26, 0.0  ;;  %v10784_v28 = vpop.f32.mrb[20].mxu0  ;;  %10863 = vmatpush3.msra.mxu0 %v998_v2  ;;  %v1475_v2 = vld [vmem:[%s16031_s4 + $0x90] sm:$0xff] }
 0x1ba   :  { %v424_v30 = vadd.f32 %v10784_v28, %v9599_v16  ;;  %v418_v31 = vpop.f32.mrb[21].mxu0  ;;  %10876 = vmatprep.subr.mxu0 %v997_v4 }
 0x1bb   :  { %v419_v32 = vadd.f32 %v9599_v16, %v418_v31  ;;  %10813 = vmatprep.mubr.msk.f32.mxu0 %vm279_vm2, %v479_v27 }
 0x1bc   :  { %10814 = vmatmul.mubr.msk.f32.gmra.mrb[26].mxu0 %vm279_vm2, %v480_v29  ;;  %v482_v35 = vmax.f32 %v424_v30, 0.0  ;;  %v13628_v30 = vmov 0.0|0.0  }
 0x1bd   :  { %v481_v33 = vmax.f32 %v419_v32, 0.0  ;;  %v10787_v34 = vpop.f32.mrb[22].mxu0 }
 0x1be   :  { %v434_v36 = vadd.f32 %v10787_v34, %v9599_v16  ;;  %v428_v37 = vpop.f32.mrb[23].mxu0 }
 0x1bf   :  { %v429_v38 = vadd.f32 %v9599_v16, %v428_v37  ;;  %10816 = vmatprep.mubr.msk.f32.mxu0 %vm279_vm2, %v481_v33 }
 0x1c0   :  { %10817 = vmatmul.mubr.msk.f32.gmra.mrb[28].mxu0 %vm279_vm2, %v482_v35  ;;  %v484_v41 = vmax.f32 %v434_v36, 0.0 }
 0x1c1   :  { %v483_v39 = vmax.f32 %v429_v38, 0.0  ;;  %v10790_v40 = vpop.f32.mrb[0].mxu1 }
 0x1c2   :  { %v444_v42 = vadd.f32 %v10790_v40, %v9599_v16  ;;  %v438_v43 = vpop.f32.mrb[1].mxu1 }
 0x1c3   :  { %v439_v44 = vadd.f32 %v9599_v16, %v438_v43  ;;  %10819 = vmatprep.mubr.msk.f32.mxu0 %vm279_vm2, %v483_v39 }
 0x1c4   :  { %10820 = vmatmul.mubr.msk.f32.gmra.mrb[30].mxu0 %vm279_vm2, %v484_v41  ;;  %v486_v47 = vmax.f32 %v444_v42, 0.0 }
 0x1c5   :  { %v485_v45 = vmax.f32 %v439_v44, 0.0  ;;  %v10793_v46 = vpop.f32.mrb[2].mxu1  ;;  %v1463_v44 = vld [vmem:[%s16031_s4 + $0x30] sm:$0xff] }
 0x1c6   :  { %v454_v48 = vadd.f32 %v10793_v46, %v9599_v16  ;;  %v448_v49 = vpop.f32.mrb[3].mxu1 }
 0x1c7   :  { %v449_v50 = vadd.f32 %v9599_v16, %v448_v49  ;;  %10822 = vmatprep.mubr.msk.f32.mxu0 %vm279_vm2, %v485_v45  ;;  %v1464_v45 = vld [vmem:[%s16031_s4 + $0x38] sm:$0xff] }
 0x1c8   :  { %10823 = vmatmul.mubr.msk.f32.gmra.mrb[32].mxu0 %vm279_vm2, %v486_v47  ;;  %v488_v53 = vmax.f32 %v454_v48, 0.0  ;;  %v13961_v48 = vpack.c.bf16 %v1464_v45, %v1463_v44 }
 0x1c9   :  { %v487_v51 = vmax.f32 %v449_v50, 0.0  ;;  %v10796_v52 = vpop.f32.mrb[4].mxu1 }
 0x1ca   :  { %v464_v54 = vadd.f32 %v10796_v52, %v9599_v16  ;;  %v458_v55 = vpop.f32.mrb[5].mxu1  ;;  %v1466_v52 = vld [vmem:[%s16031_s4 + $0x48] sm:$0xff] }
 0x1cb   :  { %v459_v56 = vadd.f32 %v9599_v16, %v458_v55  ;;  %10825 = vmatprep.mubr.msk.f32.mxu0 %vm279_vm2, %v487_v51  ;;  %v1465_v51 = vld [vmem:[%s16031_s4 + $0x40] sm:$0xff] }
 0x1cc   :  { %10826 = vmatmul.mubr.msk.f32.gmra.mrb[34].mxu0 %vm279_vm2, %v488_v53  ;;  %v490_v59 = vmax.f32 %v464_v54, 0.0  ;;  %v1230_v53 = vld [vmem:[%s16031_s4 + $0x10] sm:$0xff] }
 0x1cd   :  { %v489_v57 = vmax.f32 %v459_v56, 0.0  ;;  %v10799_v58 = vpop.f32.mrb[6].mxu1  ;;  %v13988_v56 = vpack.c.bf16 %v1466_v52, %v1465_v51 }
 0x1ce   :  { %v474_v60 = vadd.f32 %v10799_v58, %v9599_v16  ;;  %v468_v61 = vpop.f32.mrb[7].mxu1 }
 0x1cf   :  { %v469_v62 = vadd.f32 %v9599_v16, %v468_v61  ;;  %10828 = vmatprep.mubr.msk.f32.mxu0 %vm279_vm2, %v489_v57 }
 0x1d0   :  { %10829 = vmatmul.mubr.msk.f32.gmra.mrb[36].mxu0 %vm279_vm2, %v490_v59  ;;  %v492_v0 = vmax.f32 %v474_v60, 0.0  ;;  %v1467_v59 = vld [vmem:[%s16031_s4 + $0x50] sm:$0xff]  ;;  %v1468_v60 = vld [vmem:[%s16031_s4 + $0x58] sm:$0xff] }
 0x1d1   :  { %v491_v63 = vmax.f32 %v469_v62, 0.0 }
 0x1d3   :  { %10831 = vmatprep.mubr.msk.f32.mxu0 %vm279_vm2, %v491_v63  ;;  %v14014_v63 = vpack.c.bf16 %v1468_v60, %v1467_v59 }
 0x1d4   :  { %10832 = vmatmul.mubr.msk.f32.gmra.mrb[38].mxu0 %vm279_vm2, %v492_v0 }
 0x28b   :  { %v10812_v5 = vpop.f32.mrb[24].mxu0 }
 0x28c   :  { %v620_v6 = vpop.f32.mrb[25].mxu0  ;;  %v626_v40 = vadd.f32 %v10812_v5, %v13881_v13 }
 0x28d   :  { %v621_v37 = vadd.f32 %v13881_v13, %v620_v6  ;;  %v1477_v6 = vld [vmem:[%s16031_s4 + $0xa0] sm:$0xff] }
 0x28e   :  { %v13958_v46 = vmax.f32 %v626_v40, 0.0 }
 0x28f   :  { %v10815_v7 = vpop.f32.mrb[26].mxu0  ;;  %v13937_v42 = vmax.f32 %v621_v37, 0.0 }
 0x290   :  { %v630_v8 = vpop.f32.mrb[27].mxu0  ;;  %v636_v47 = vadd.f32 %v10815_v7, %v13881_v13  ;;  %v1478_v7 = vld [vmem:[%s16031_s4 + $0xa8] sm:$0xff] }
 0x291   :  { %v631_v43 = vadd.f32 %v13881_v13, %v630_v8  ;;  %v14060_v8 = vpack.c.bf16 %v1478_v7, %v1477_v6 }
 0x292   :  { %v13981_v54 = vmax.f32 %v636_v47, 0.0 }
 0x293   :  { %v13872_v9 = vpop.f32.mrb[28].mxu0  ;;  %v13963_v49 = vmax.f32 %v631_v43, 0.0 }
 0x294   :  { %v640_v10 = vpop.f32.mrb[29].mxu0  ;;  %v646_v55 = vadd.f32 %v13872_v9, %v13881_v13  ;;  %v1479_v9 = vld [vmem:[%s16031_s4 + $0xb0] sm:$0xff] }
 0x295   :  { %v641_v50 = vadd.f32 %v13881_v13, %v640_v10  ;;  %v1480_v10 = vld [vmem:[%s16031_s4 + $0xb8] sm:$0xff] }
 0x296   :  { %v14009_v61 = vmax.f32 %v646_v55, 0.0 }
 0x297   :  { %v13874_v11 = vpop.f32.mrb[30].mxu0  ;;  %v13990_v57 = vmax.f32 %v641_v50, 0.0 }
 0x298   :  { %v13876_v12 = vpop.f32.mrb[31].mxu0  ;;  %v656_v62 = vadd.f32 %v13874_v11, %v13881_v13  ;;  %v14076_v11 = vpack.c.bf16 %v1480_v10, %v1479_v9 }
 0x299   :  { %v651_v58 = vadd.f32 %v13881_v13, %v13876_v12  ;;  %v1469_v12 = vld [vmem:[%s16031_s4 + $0x60] sm:$0xff] }
 0x29a   :  { %v14027_v1 = vmax.f32 %v656_v62, 0.0 }
 0x29b   :  { %v10824_v14 = vpop.f32.mrb[32].mxu0  ;;  %v14016_v0 = vmax.f32 %v651_v58, 0.0 }
 0x29c   :  { %v666_v15 = vadd.f32 %v10824_v14, %v13881_v13  ;;  %v660_v16 = vpop.f32.mrb[33].mxu0 }
 0x29d   :  { %v661_v17 = vadd.f32 %v13881_v13, %v660_v16  ;;  %v1472_v16 = vld [vmem:[%s16031_s4 + $0x78] sm:$0xff] }
 0x29e   :  { %v13887_v20 = vmax.f32 %v666_v15, 0.0  ;;  %v1471_v15 = vld [vmem:[%s16031_s4 + $0x70] sm:$0xff] }
 0x29f   :  { %v13885_v18 = vmax.f32 %v661_v17, 0.0  ;;  %v10827_v19 = vpop.f32.mrb[34].mxu0  ;;  %v14110_v17 = vpack.c.bf16 %v1472_v16, %v1471_v15 }
 0x2a0   :  { %v676_v21 = vadd.f32 %v10827_v19, %v13881_v13  ;;  %v670_v22 = vpop.f32.mrb[35].mxu0  ;;  %v1474_v19 = vld [vmem:[%s16031_s4 + $0x88] sm:$0xff] }
 0x2a1   :  { %v671_v23 = vadd.f32 %v13881_v13, %v670_v22  ;;  %10836 = vmatprep.mubr.msk.f32.mxu1 %vm59_vm0, %v13885_v18  ;;  %10864 = vmatprep.mubr.msk.f32.mxu0 %vm59_vm0, %v13885_v18  ;;  %v9668_v22 = vld [vmem:[%s16031_s4 + $0xc8] ss:$0 sm:$0xff] }
 0x2a2   :  { %10837 = vmatmul.mubr.msk.f32.vlgmr.msra.gmra.mrb[8].mxu1 %vm59_vm0, %v13887_v20  ;;  %10865 = vmatmul.mubr.msk.f32.vlgmr.msra.gmra.mrb[40].mxu0 %vm59_vm0, %v13887_v20  ;;  %v13904_v27 = vmax.f32 %v676_v21, 0.0  ;;  %v9651_v21 = vld [vmem:[%s16031_s4 + $0xc0] ss:$0 sm:$0xff] }
 0x2a3   :  { %v13902_v25 = vmax.f32 %v671_v23, 0.0  ;;  %10849 = vmatpush3.msra.mxu1 %v715_v3  ;;  %v10830_v26 = vpop.f32.mrb[36].mxu0  ;;  %10877 = vmatpush3.msra.mxu0 %v997_v4  ;;  %v1476_v3 = vld [vmem:[%s16031_s4 + $0x98] sm:$0xff]  ;;  %v13630_v4 = vmov 0.0  }
 0x2a4   :  { %v686_v28 = vadd.f32 %v10830_v26, %v13881_v13  ;;  %v680_v29 = vpop.f32.mrb[37].mxu0  ;;  %10890 = vmatprep.subr.mxu1 %v1231_v24  ;;  %12350 = vmatprep.subr.bf16.mxu0 %v13628_v30  ;;  %v14045_v5 = vpack.c.bf16 %v1476_v3, %v1475_v2 }
 0x2a5   :  { %v681_v31 = vadd.f32 %v13881_v13, %v680_v29  ;;  %10839 = vmatprep.mubr.msk.f32.mxu1 %vm59_vm0, %v13902_v25  ;;  %10867 = vmatprep.mubr.msk.f32.mxu0 %vm59_vm0, %v13902_v25 }
 0x2a6   :  { %10840 = vmatmul.mubr.msk.f32.gmra.mrb[10].mxu1 %vm59_vm0, %v13904_v27  ;;  %10868 = vmatmul.mubr.msk.f32.gmra.mrb[42].mxu0 %vm59_vm0, %v13904_v27  ;;  %v13919_v34 = vmax.f32 %v686_v28, 0.0 }
 0x2a7   :  { %v13917_v32 = vmax.f32 %v681_v31, 0.0  ;;  %v10833_v33 = vpop.f32.mrb[38].mxu0 }
 0x2a8   :  { %v696_v35 = vadd.f32 %v10833_v33, %v13881_v13  ;;  %v690_v36 = vpop.f32.mrb[39].mxu0 }
 0x2a9   :  { %v691_v38 = vadd.f32 %v13881_v13, %v690_v36  ;;  %10842 = vmatprep.mubr.msk.f32.mxu1 %vm59_vm0, %v13917_v32  ;;  %10870 = vmatprep.mubr.msk.f32.mxu0 %vm59_vm0, %v13917_v32  ;;  %v1470_v13 = vld [vmem:[%s16031_s4 + $0x68] sm:$0xff] }
 0x2aa   :  { %10843 = vmatmul.mubr.msk.f32.gmra.mrb[12].mxu1 %vm59_vm0, %v13919_v34  ;;  %10871 = vmatmul.mubr.msk.f32.gmra.mrb[44].mxu0 %vm59_vm0, %v13919_v34  ;;  %v13935_v41 = vmax.f32 %v696_v35, 0.0  ;;  %v14093_v14 = vpack.c.bf16 %v1470_v13, %v1469_v12 }
 0x2ab   :  { %v13932_v39 = vmax.f32 %v691_v38, 0.0 }
 0x2ad   :  { %10845 = vmatprep.mubr.msk.f32.mxu1 %vm59_vm0, %v13932_v39  ;;  %10873 = vmatprep.mubr.msk.f32.mxu0 %vm59_vm0, %v13932_v39 }
 0x2ae   :  { %10846 = vmatmul.mubr.msk.f32.gmra.mrb[14].mxu1 %vm59_vm0, %v13935_v41  ;;  %10874 = vmatmul.mubr.msk.f32.gmra.mrb[46].mxu0 %vm59_vm0, %v13935_v41 }
 0x2af   :  { %10850 = vmatprep.mubr.msk.f32.mxu1 %vm59_vm0, %v13937_v42  ;;  %10878 = vmatprep.mubr.msk.f32.mxu0 %vm59_vm0, %v13937_v42 }
 0x2b2   :  { %10851 = vmatmul.mubr.msk.f32.vlgmr.msra.gmra.mrb[8].mxu1 %vm59_vm0, %v13958_v46  ;;  %10879 = vmatmul.mubr.msk.f32.vlgmr.msra.gmra.mrb[40].mxu0 %vm59_vm0, %v13958_v46 }
 0x2b3   :  { %10891 = vmatpush3.msra.mxu1 %v1231_v24  ;;  %10853 = vmatprep.mubr.msk.f32.mxu1 %vm59_vm0, %v13963_v49 }
 0x2b4   :  { %10881 = vmatprep.mubr.msk.f32.mxu0 %vm59_vm0, %v13963_v49  ;;  %12352 = vmatpush3.bf16.msra.mxu0 %v13961_v48 }
 0x2b5   :  { %12353 = vmatprep.subr.bf16.mxu0 %v13628_v30  ;;  %10904 = vmatprep.subr.mxu1 %v1230_v53 }
 0x2b6   :  { %10854 = vmatmul.mubr.msk.f32.gmra.mrb[10].mxu1 %vm59_vm0, %v13981_v54  ;;  %10882 = vmatmul.mubr.msk.f32.gmra.mrb[42].mxu0 %vm59_vm0, %v13981_v54 }
 0x2b7   :  { %10856 = vmatprep.mubr.msk.f32.mxu1 %vm59_vm0, %v13990_v57  ;;  %10884 = vmatprep.mubr.msk.f32.mxu0 %vm59_vm0, %v13990_v57 }
 0x2b8   :  { %12355 = vmatpush3.bf16.msra.mxu0 %v13988_v56 }
 0x2b9   :  { %12356 = vmatprep.subr.bf16.mxu0 %v13628_v30 }
 0x2ba   :  { %10857 = vmatmul.mubr.msk.f32.gmra.mrb[12].mxu1 %vm59_vm0, %v14009_v61  ;;  %10885 = vmatmul.mubr.msk.f32.gmra.mrb[44].mxu0 %vm59_vm0, %v14009_v61 }
 0x2bb   :  { %10859 = vmatprep.mubr.msk.f32.mxu1 %vm59_vm0, %v14016_v0  ;;  %10887 = vmatprep.mubr.msk.f32.mxu0 %vm59_vm0, %v14016_v0 }
 0x2bc   :  { %12358 = vmatpush3.bf16.msra.mxu0 %v14014_v63 }
 0x2bd   :  { %12368 = vmatprep.subr.bf16.mxu0 %v13628_v30 }
 0x2be   :  { %10860 = vmatmul.mubr.msk.f32.gmra.mrb[14].mxu1 %vm59_vm0, %v14027_v1  ;;  %10888 = vmatmul.mubr.msk.f32.gmra.mrb[46].mxu0 %vm59_vm0, %v14027_v1 }
 0x2bf   :  { %10892 = vmatprep.mubr.msk.f32.mxu1 %vm59_vm0, %v13885_v18  ;;  %10930 = vmatprep.mubr.msk.f32.mxu0 %vm13629_vm3, %v13630_v4  ;;  %v1473_v18 = vld [vmem:[%s16031_s4 + $0x80] sm:$0xff] }
 0x2c2   :  { %10893 = vmatmul.mubr.msk.f32.vlgmr.msra.gmra.mrb[16].mxu1 %vm59_vm0, %v13887_v20  ;;  %10931 = vmatmul.mubr.f32.vlgmr.msra.gmra.mrb[48].mxu0 %v13630_v4  ;;  %v14126_v20 = vpack.c.bf16 %v1474_v19, %v1473_v18  ;;  %v14183_v19 = vld [vmem:[%s16031_s4 + $0xd8] ss:$0 sm:$0xff] }
 0x2c3   :  { %10905 = vmatpush3.msra.mxu1 %v1230_v53  ;;  %10895 = vmatprep.mubr.msk.f32.mxu1 %vm59_vm0, %v13902_v25 }
 0x2c4   :  { %12359 = vmatprep.subr.bf16.mxu1 %v13628_v30  ;;  %12370 = vmatpush3.bf16.msra.mxu0 %v14045_v5 }
 0x2c5   :  { %12371 = vmatprep.subr.bf16.mxu0 %v13628_v30  ;;  %10960 = vmatprep.mubr.msk.f32.mxu0 %vm13629_vm3, %v13630_v4 }
 0x2c6   :  { %10896 = vmatmul.mubr.msk.f32.gmra.mrb[18].mxu1 %vm59_vm0, %v13904_v27 }
 0x2c7   :  { %10898 = vmatprep.mubr.msk.f32.mxu1 %vm59_vm0, %v13917_v32 }
 0x2c8   :  { %12373 = vmatpush3.bf16.msra.mxu0 %v14060_v8 }
 0x2c9   :  { %12374 = vmatprep.subr.bf16.mxu0 %v13628_v30 }
 0x2ca   :  { %10899 = vmatmul.mubr.msk.f32.gmra.mrb[20].mxu1 %vm59_vm0, %v13919_v34 }
 0x2cb   :  { %10901 = vmatprep.mubr.msk.f32.mxu1 %vm59_vm0, %v13932_v39 }
 0x2cc   :  { %12376 = vmatpush3.bf16.msra.mxu0 %v14076_v11 }
 0x2cd   :  { %12386 = vmatprep.subr.bf16.mxu0 %v13628_v30 }
 0x2ce   :  { %10902 = vmatmul.mubr.msk.f32.gmra.mrb[22].mxu1 %vm59_vm0, %v13935_v41 }
 0x2cf   :  { %10906 = vmatprep.mubr.msk.f32.mxu1 %vm59_vm0, %v13937_v42  ;;  %10961 = vmatmul.mubr.f32.vlgmr.msra.gmra.mrb[50].mxu0 %v13630_v4 }
 0x2d0   :  { %12388 = vmatpush3.bf16.msra.mxu0 %v14093_v14  ;;  %10990 = vmatprep.mubr.msk.f32.mxu0 %vm13629_vm3, %v13630_v4 }
 0x2d1   :  { %12389 = vmatprep.subr.bf16.mxu0 %v13628_v30 }
 0x2d2   :  { %10907 = vmatmul.mubr.msk.f32.vlgmr.msra.gmra.mrb[16].mxu1 %vm59_vm0, %v13958_v46 }
 0x2d3   :  { %12361 = vmatpush3.bf16.msra.mxu1 %v14093_v14  ;;  %10909 = vmatprep.mubr.msk.f32.mxu1 %vm59_vm0, %v13963_v49 }
 0x2d4   :  { %12362 = vmatprep.subr.bf16.mxu1 %v13628_v30  ;;  %12391 = vmatpush3.bf16.msra.mxu0 %v14110_v17 }
 0x2d5   :  { %12392 = vmatprep.subr.bf16.mxu0 %v13628_v30 }
 0x2d6   :  { %10910 = vmatmul.mubr.msk.f32.gmra.mrb[18].mxu1 %vm59_vm0, %v13981_v54 }
 0x2d7   :  { %10912 = vmatprep.mubr.msk.f32.mxu1 %vm59_vm0, %v13990_v57  ;;  %12364 = vmatpush3.bf16.msra.mxu1 %v14110_v17 }
 0x2d8   :  { %12365 = vmatprep.subr.bf16.mxu1 %v13628_v30  ;;  %12394 = vmatpush3.bf16.msra.mxu0 %v14126_v20 }
 0x2d9   :  { %12404 = vmatprep.subr.bf16.mxu0 %v13628_v30 }
 0x2da   :  { %10913 = vmatmul.mubr.msk.f32.gmra.mrb[20].mxu1 %vm59_vm0, %v14009_v61 }
 0x2db   :  { %10915 = vmatprep.mubr.msk.f32.mxu1 %vm59_vm0, %v14016_v0  ;;  %12367 = vmatpush3.bf16.msra.mxu1 %v14126_v20 }
 0x2dc   :  { %12377 = vmatprep.subr.bf16.mxu1 %v13628_v30 }
 0x2de   :  { %10916 = vmatmul.mubr.msk.f32.gmra.mrb[22].mxu1 %vm59_vm0, %v14027_v1  ;;  %v9685_v1 = vld [vmem:[%s16031_s4 + $0xd0] ss:$0 sm:$0xff] }
 0x2df   :  { %10945 = vmatprep.mubr.msk.f32.mxu1 %vm13629_vm3, %v13630_v4 }
 0x2e2   :  { %10946 = vmatmul.mubr.f32.vlgmr.msra.gmra.mrb[24].mxu1 %v13630_v4 }
 0x2e3   :  { %12379 = vmatpush3.bf16.msra.mxu1 %v13961_v48  ;;  %10975 = vmatprep.mubr.msk.f32.mxu1 %vm13629_vm3, %v13630_v4 }
 0x2e4   :  { %12380 = vmatprep.subr.bf16.mxu1 %v13628_v30 }
 0x2e7   :  { %12382 = vmatpush3.bf16.msra.mxu1 %v13988_v56 }
 0x2e8   :  { %12383 = vmatprep.subr.bf16.mxu1 %v13628_v30 }
 0x2eb   :  { %12385 = vmatpush3.bf16.msra.mxu1 %v14014_v63 }
 0x2ec   :  { %12395 = vmatprep.subr.bf16.mxu1 %v13628_v30 }
 0x385   :  { %v10852_v23 = vpop.f32.mrb[8].mxu1  ;;  %v10880_v24 = vpop.f32.mrb[40].mxu0 }
 0x386   :  { %v981_v25 = vadd.f32 %v10852_v23, %v9651_v21  ;;  %v1215_v26 = vadd.f32 %v10880_v24, %v9668_v22  ;;  %v936_v27 = vpop.f32.mrb[9].mxu1  ;;  %v1170_v28 = vpop.f32.mrb[41].mxu0 }
 0x387   :  { %v980_v29 = vadd.f32 %v9651_v21, %v936_v27  ;;  %v1214_v31 = vadd.f32 %v9668_v22, %v1170_v28 }
 0x388   :  { %990 = vst.msk [vmem:[#allocation2 + $0x8] sm:$0xff] %vm988_vm4, %v981_v25  ;;  %1223 = vst.msk [vmem:[#allocation3 + $0x8] sm:$0xff] %vm988_vm4, %v1215_v26 }
 0x389   :  { %989 = vst.msk [vmem:[#allocation2] sm:$0xff] %vm988_vm4, %v980_v29  ;;  %1222 = vst.msk [vmem:[#allocation3] sm:$0xff] %vm988_vm4, %v1214_v31  ;;  %v10855_v32 = vpop.f32.mrb[10].mxu1  ;;  %v10883_v33 = vpop.f32.mrb[42].mxu0 }
 0x38a   :  { %v983_v34 = vadd.f32 %v10855_v32, %v9651_v21  ;;  %v1217_v35 = vadd.f32 %v10883_v33, %v9668_v22  ;;  %v946_v36 = vpop.f32.mrb[11].mxu1  ;;  %v1180_v37 = vpop.f32.mrb[43].mxu0 }
 0x38b   :  { %v982_v38 = vadd.f32 %v9651_v21, %v946_v36  ;;  %v1216_v39 = vadd.f32 %v9668_v22, %v1180_v37 }
 0x38c   :  { %992 = vst.msk [vmem:[#allocation2 + $0x18] sm:$0xff] %vm988_vm4, %v983_v34  ;;  %1225 = vst.msk [vmem:[#allocation3 + $0x18] sm:$0xff] %vm988_vm4, %v1217_v35 }
 0x38d   :  { %991 = vst.msk [vmem:[#allocation2 + $0x10] sm:$0xff] %vm988_vm4, %v982_v38  ;;  %1224 = vst.msk [vmem:[#allocation3 + $0x10] sm:$0xff] %vm988_vm4, %v1216_v39  ;;  %v10858_v40 = vpop.f32.mrb[12].mxu1  ;;  %v10886_v41 = vpop.f32.mrb[44].mxu0 }
 0x38e   :  { %v985_v42 = vadd.f32 %v10858_v40, %v9651_v21  ;;  %v1219_v43 = vadd.f32 %v10886_v41, %v9668_v22  ;;  %v956_v44 = vpop.f32.mrb[13].mxu1  ;;  %v1190_v45 = vpop.f32.mrb[45].mxu0 }
 0x38f   :  { %v984_v46 = vadd.f32 %v9651_v21, %v956_v44  ;;  %v1218_v47 = vadd.f32 %v9668_v22, %v1190_v45 }
 0x390   :  { %994 = vst.msk [vmem:[#allocation2 + $0x28] sm:$0xff] %vm988_vm4, %v985_v42  ;;  %1227 = vst.msk [vmem:[#allocation3 + $0x28] sm:$0xff] %vm988_vm4, %v1219_v43  ;;  %v1629_v59 = vld [vmem:[#allocation2] sm:$0xff] }
 0x391   :  { %993 = vst.msk [vmem:[#allocation2 + $0x20] sm:$0xff] %vm988_vm4, %v984_v46  ;;  %1226 = vst.msk [vmem:[#allocation3 + $0x20] sm:$0xff] %vm988_vm4, %v1218_v47  ;;  %v10861_v49 = vpop.f32.mrb[14].mxu1  ;;  %v10889_v50 = vpop.f32.mrb[46].mxu0  ;;  %v1637_v34 = vld [vmem:[#allocation3] sm:$0xff] }
 0x392   :  { %v987_v51 = vadd.f32 %v10861_v49, %v9651_v21  ;;  %v1221_v52 = vadd.f32 %v10889_v50, %v9668_v22  ;;  %v966_v53 = vpop.f32.mrb[15].mxu1  ;;  %v1200_v54 = vpop.f32.mrb[47].mxu0  ;;  %v1870_v50 = vld [vmem:[#allocation2 + $0x8] sm:$0xff] }
 0x393   :  { %v986_v55 = vadd.f32 %v9651_v21, %v966_v53  ;;  %v1220_v57 = vadd.f32 %v9668_v22, %v1200_v54 }
 0x394   :  { %996 = vst.msk [vmem:[#allocation2 + $0x38] sm:$0xff] %vm988_vm4, %v987_v51  ;;  %1229 = vst.msk [vmem:[#allocation3 + $0x38] sm:$0xff] %vm988_vm4, %v1221_v52 }
 0x395   :  { %995 = vst.msk [vmem:[#allocation2 + $0x30] sm:$0xff] %vm988_vm4, %v986_v55  ;;  %1228 = vst.msk [vmem:[#allocation3 + $0x30] sm:$0xff] %vm988_vm4, %v1220_v57  ;;  %v1555_v58 = vpop.f32.mrb[48].mxu0  ;;  %v1879_v57 = vld [vmem:[#allocation3 + $0x8] sm:$0xff] }
 0x396   :  { %v1630_v60 = vadd.f32 %v1629_v59, %v1555_v58  ;;  %v10932_v61 = vpop.f32.mrb[49].mxu0 }
 0x398   :  { %v9687_v62 = vmul.f32 -1.442695, %v1630_v60 }
 0x39a   :  { %13262 = vpow2.f32 %v9687_v62 }
 0x3a2   :  { %v1712_v0 = vpop.f32.mrb[50].mxu0 }
 0x3a3   :  { %v10962_v2 = vpop.f32.mrb[51].mxu0  ;;  %v1713_v24 = vadd.f32 %v14183_v19, %v1712_v0 }
 0x3a4   :  { %v13263_v3 = vpop.eup %13262 }
 0x3a5   :  { %v1634_v6 = vadd.f32 1.0, %v13263_v3  ;;  %v10908_v7 = vpop.f32.mrb[16].mxu1 }
 0x3a6   :  { %v1448_v9 = vadd.f32 %v10908_v7, %v9685_v1  ;;  %v1403_v10 = vpop.f32.mrb[17].mxu1 }
 0x3a7   :  { %13264 = vrcp.f32 %v1634_v6  ;;  %v1447_v12 = vadd.f32 %v9685_v1, %v1403_v10 }
 0x3a8   :  { %1456 = vst.msk [vmem:[#allocation4 + $0x8] sm:$0xff] %vm988_vm4, %v1448_v9 }
 0x3a9   :  { %1455 = vst.msk [vmem:[#allocation4] sm:$0xff] %vm988_vm4, %v1447_v12  ;;  %v10911_v13 = vpop.f32.mrb[18].mxu1 }
 0x3aa   :  { %v1450_v15 = vadd.f32 %v10911_v13, %v9685_v1  ;;  %v1413_v16 = vpop.f32.mrb[19].mxu1 }
 0x3ab   :  { %v1449_v18 = vadd.f32 %v9685_v1, %v1413_v16 }
 0x3ac   :  { %1458 = vst.msk [vmem:[#allocation4 + $0x18] sm:$0xff] %vm988_vm4, %v1450_v15 }
 0x3ad   :  { %1457 = vst.msk [vmem:[#allocation4 + $0x10] sm:$0xff] %vm988_vm4, %v1449_v18  ;;  %v10914_v21 = vpop.f32.mrb[20].mxu1 }
 0x3ae   :  { %v1452_v22 = vadd.f32 %v10914_v21, %v9685_v1  ;;  %v1423_v23 = vpop.f32.mrb[21].mxu1 }
 0x3af   :  { %v1451_v25 = vadd.f32 %v9685_v1, %v1423_v23  ;;  %v1888_v9 = vld [vmem:[#allocation4 + $0x8] sm:$0xff]  ;;  %v2114_v23 = vld [vmem:[#allocation2 + $0x10] sm:$0xff] }
 0x3b0   :  { %1460 = vst.msk [vmem:[#allocation4 + $0x28] sm:$0xff] %vm988_vm4, %v1452_v22  ;;  %v1645_v39 = vld [vmem:[#allocation4] sm:$0xff] }
 0x3b1   :  { %v13265_v26 = vpop.eup %13264  ;;  %1459 = vst.msk [vmem:[#allocation4 + $0x20] sm:$0xff] %vm988_vm4, %v1451_v25  ;;  %v10917_v27 = vpop.f32.mrb[22].mxu1 }
 0x3b2   :  { %v1716_v28 = vmul.f32 %v13265_v26, %v1713_v24  ;;  %v1454_v29 = vadd.f32 %v10917_v27, %v9685_v1  ;;  %v1433_v31 = vpop.f32.mrb[23].mxu1 }
 0x3b3   :  { %v1453_v32 = vadd.f32 %v9685_v1, %v1433_v31 }
 0x3b4   :  { %1462 = vst.msk [vmem:[#allocation4 + $0x38] sm:$0xff] %vm988_vm4, %v1454_v29  ;;  %v1717_v40 = vadd.f32 %v1716_v28, %v1645_v39  ;;  %v2123_v29 = vld [vmem:[#allocation3 + $0x10] sm:$0xff] }
 0x3b5   :  { %1461 = vst.msk [vmem:[#allocation4 + $0x30] sm:$0xff] %vm988_vm4, %v1453_v32  ;;  %v1625_v33 = vpop.f32.mrb[24].mxu1 }
 0x3b6   :  { %v1638_v35 = vadd.f32 %v1637_v34, %v1625_v33  ;;  %v10947_v36 = vpop.f32.mrb[25].mxu1 }
 0x3b8   :  { %v9688_v37 = vmul.f32 -1.442695, %v1638_v35 }
 0x3ba   :  { %13266 = vpow2.f32 %v9688_v37 }
 0x3c4   :  { %v13267_v38 = vpop.eup %13266 }
 0x3c5   :  { %v1642_v41 = vadd.f32 1.0, %v13267_v38 }
 0x3c7   :  { %13268 = vrcp.f32 %v1642_v41 }
 0x3c8   :  { %13270 = vtanh.f32 %v1717_v40 }
 0x3d1   :  { %v13269_v42 = vpop.eup %13268 }
 0x3d2   :  { %v1719_v43 = vsub.f32 1.0, %v13269_v42  ;;  %v13271_v44 = vpop.eup %13270  ;;  %v1721_v46 = vmul.f32 0.0, %v13269_v42  ;;  %v2132_v42 = vld [vmem:[#allocation4 + $0x10] sm:$0xff] }
 0x3d4   :  { %v1720_v45 = vmul.f32 %v13271_v44, %v1719_v43 }
 0x3d6   :  { %v1722_v47 = vadd.f32 %v1721_v46, %v1720_v45 }
 0x3d8   :  { %10976 = vmatmul.mubr.msk.f32.vlgmr.msra.gmra.mrb[26].mxu1 %vm988_vm4, %v1722_v47  ;;  %1723 = vst.msk [vmem:[#allocation5] sm:$0xff] %vm988_vm4, %v1722_v47  ;;  %1725 = vst.msk [vmem:[#allocation6 + $0x38] sm:$0xff] %vm988_vm4, %v1722_v47  ;;  %10991 = vmatmul.mubr.msk.f32.vlgmr.msra.gmra.mrb[52].mxu0 %vm988_vm4, %v1722_v47 }
 0x3d9   :  { %12397 = vmatpush3.bf16.msra.mxu1 %v14045_v5  ;;  %11005 = vmatprep.mubr.msk.f32.mxu1 %vm13629_vm3, %v13630_v4 }
 0x3da   :  { %12398 = vmatprep.subr.bf16.mxu1 %v13628_v30  ;;  %12406 = vmatpush3.bf16.msra.mxu0 %v13961_v48 }
 0x3db   :  { %12407 = vmatprep.subr.bf16.mxu0 %v13628_v30  ;;  %11020 = vmatprep.mubr.msk.f32.mxu0 %vm13629_vm3, %v13630_v4 }
 0x3dd   :  { %12400 = vmatpush3.bf16.msra.mxu1 %v14060_v8 }
 0x3de   :  { %12401 = vmatprep.subr.bf16.mxu1 %v13628_v30  ;;  %12409 = vmatpush3.bf16.msra.mxu0 %v13988_v56 }
 0x3df   :  { %12410 = vmatprep.subr.bf16.mxu0 %v13628_v30 }
 0x3e1   :  { %12403 = vmatpush3.bf16.msra.mxu1 %v14076_v11 }
 0x3e2   :  { %12413 = vmatprep.subr.bf16.mxu1 %v13628_v30  ;;  %12412 = vmatpush3.bf16.msra.mxu0 %v14014_v63 }
 0x3e3   :  { %12422 = vmatprep.subr.bf16.mxu0 %v13628_v30 }
 0x3e4   :  { %11006 = vmatmul.mubr.msk.f32.vlgmr.msra.gmra.mrb[28].mxu1 %vm988_vm4, %v1722_v47 }
 0x3e5   :  { %12415 = vmatpush3.bf16.msra.mxu1 %v14093_v14  ;;  %11035 = vmatprep.mubr.msk.f32.mxu1 %vm13629_vm3, %v13630_v4 }
 0x3e6   :  { %12416 = vmatprep.subr.bf16.mxu1 %v13628_v30 }
 0x3e9   :  { %12418 = vmatpush3.bf16.msra.mxu1 %v14110_v17 }
 0x3ea   :  { %12419 = vmatprep.subr.bf16.mxu1 %v13628_v30 }
 0x3ed   :  { %12421 = vmatpush3.bf16.msra.mxu1 %v14126_v20 }
 0x3ee   :  { %12431 = vmatprep.subr.bf16.mxu1 %v13628_v30 }
 0x4ab   :  { %v1795_v49 = vpop.f32.mrb[26].mxu1  ;;  %v1865_v51 = vpop.f32.mrb[52].mxu0 }
 0x4ac   :  { %v1871_v52 = vadd.f32 %v1870_v50, %v1795_v49  ;;  %v10977_v53 = vpop.f32.mrb[27].mxu1  ;;  %v10992_v54 = vpop.f32.mrb[53].mxu0  ;;  %v1880_v58 = vadd.f32 %v1879_v57, %v1865_v51 }
 0x4ae   :  { %v9691_v55 = vmul.f32 -1.442695, %v1871_v52  ;;  %v9692_v59 = vmul.f32 -1.442695, %v1880_v58  ;;  %v2358_v52 = vld [vmem:[#allocation2 + $0x18] sm:$0xff] }
 0x4b0   :  { %13272 = vpow2.f32 %v9691_v55 }
 0x4b1   :  { %13274 = vpow2.f32 %v9692_v59  ;;  %v2367_v59 = vld [vmem:[#allocation3 + $0x18] sm:$0xff] }
 0x4b7   :  { %v1955_v60 = vpop.f32.mrb[28].mxu1 }
 0x4b8   :  { %v11007_v61 = vpop.f32.mrb[29].mxu1  ;;  %v1956_v3 = vadd.f32 %v14183_v19, %v1955_v60 }
 0x4ba   :  { %v13273_v62 = vpop.eup %13272 }
 0x4bb   :  { %v1875_v0 = vadd.f32 1.0, %v13273_v62  ;;  %v13275_v1 = vpop.eup %13274 }
 0x4bc   :  { %v1884_v2 = vadd.f32 1.0, %v13275_v1 }
 0x4bd   :  { %13276 = vrcp.f32 %v1875_v0 }
 0x4be   :  { %13278 = vrcp.f32 %v1884_v2 }
 0x4c7   :  { %v13277_v6 = vpop.eup %13276 }
 0x4c8   :  { %v1959_v7 = vmul.f32 %v13277_v6, %v1956_v3  ;;  %v13279_v12 = vpop.eup %13278 }
 0x4c9   :  { %v1962_v13 = vsub.f32 1.0, %v13279_v12  ;;  %v1964_v16 = vmul.f32 %v13279_v12, %v1722_v47  ;;  %v2376_v12 = vld [vmem:[#allocation4 + $0x18] sm:$0xff] }
 0x4ca   :  { %v1960_v10 = vadd.f32 %v1959_v7, %v1888_v9 }
 0x4cc   :  { %13280 = vtanh.f32 %v1960_v10 }
 0x4d6   :  { %v13281_v15 = vpop.eup %13280 }
 0x4d7   :  { %v1963_v18 = vmul.f32 %v13281_v15, %v1962_v13 }
 0x4d9   :  { %v1965_v21 = vadd.f32 %v1964_v16, %v1963_v18 }
 0x4db   :  { %1967 = vst.msk [vmem:[#allocation5 + $0x8] sm:$0xff] %vm988_vm4, %v1965_v21  ;;  %11021 = vmatmul.mubr.msk.f32.vlgmr.msra.gmra.mrb[54].mxu0 %vm988_vm4, %v1965_v21  ;;  %1969 = vst.msk [vmem:[#allocation6 + $0x30] sm:$0xff] %vm988_vm4, %v1965_v21  ;;  %11036 = vmatmul.mubr.msk.f32.vlgmr.msra.gmra.mrb[30].mxu1 %vm988_vm4, %v1965_v21 }
 0x4dc   :  { %12424 = vmatpush3.bf16.msra.mxu0 %v14045_v5  ;;  %11050 = vmatprep.mubr.msk.f32.mxu0 %vm13629_vm3, %v13630_v4 }
 0x4dd   :  { %12425 = vmatprep.subr.bf16.mxu0 %v13628_v30  ;;  %12433 = vmatpush3.bf16.msra.mxu1 %v13961_v48 }
 0x4de   :  { %12434 = vmatprep.subr.bf16.mxu1 %v13628_v30  ;;  %11065 = vmatprep.mubr.msk.f32.mxu1 %vm13629_vm3, %v13630_v4 }
 0x4e0   :  { %12427 = vmatpush3.bf16.msra.mxu0 %v14060_v8 }
 0x4e1   :  { %12428 = vmatprep.subr.bf16.mxu0 %v13628_v30  ;;  %12436 = vmatpush3.bf16.msra.mxu1 %v13988_v56 }
 0x4e2   :  { %12437 = vmatprep.subr.bf16.mxu1 %v13628_v30 }
 0x4e4   :  { %12430 = vmatpush3.bf16.msra.mxu0 %v14076_v11 }
 0x4e5   :  { %12440 = vmatprep.subr.bf16.mxu0 %v13628_v30  ;;  %12439 = vmatpush3.bf16.msra.mxu1 %v14014_v63 }
 0x4e6   :  { %12449 = vmatprep.subr.bf16.mxu1 %v13628_v30 }
 0x4e7   :  { %11051 = vmatmul.mubr.msk.f32.vlgmr.msra.gmra.mrb[56].mxu0 %vm988_vm4, %v1965_v21 }
 0x4e8   :  { %12442 = vmatpush3.bf16.msra.mxu0 %v14093_v14  ;;  %11080 = vmatprep.mubr.msk.f32.mxu0 %vm13629_vm3, %v13630_v4 }
 0x4e9   :  { %12443 = vmatprep.subr.bf16.mxu0 %v13628_v30 }
 0x4ec   :  { %12445 = vmatpush3.bf16.msra.mxu0 %v14110_v17 }
 0x4ed   :  { %12446 = vmatprep.subr.bf16.mxu0 %v13628_v30 }
 0x4f0   :  { %12448 = vmatpush3.bf16.msra.mxu0 %v14126_v20 }
 0x4f1   :  { %12458 = vmatprep.subr.bf16.mxu0 %v13628_v30 }
 0x5ae   :  { %v2039_v22 = vpop.f32.mrb[54].mxu0  ;;  %v2109_v24 = vpop.f32.mrb[30].mxu1 }
 0x5af   :  { %v2115_v25 = vadd.f32 %v2114_v23, %v2039_v22  ;;  %v11022_v26 = vpop.f32.mrb[55].mxu0  ;;  %v11037_v27 = vpop.f32.mrb[31].mxu1  ;;  %v2124_v31 = vadd.f32 %v2123_v29, %v2109_v24 }
 0x5b1   :  { %v9696_v28 = vmul.f32 -1.442695, %v2115_v25  ;;  %v9697_v32 = vmul.f32 -1.442695, %v2124_v31  ;;  %v2602_v25 = vld [vmem:[#allocation2 + $0x20] sm:$0xff] }
 0x5b3   :  { %13282 = vpow2.f32 %v9696_v28 }
 0x5b4   :  { %13284 = vpow2.f32 %v9697_v32  ;;  %v2611_v32 = vld [vmem:[#allocation3 + $0x20] sm:$0xff] }
 0x5ba   :  { %v2199_v33 = vpop.f32.mrb[56].mxu0 }
 0x5bb   :  { %v11052_v34 = vpop.f32.mrb[57].mxu0  ;;  %v2200_v39 = vadd.f32 %v14183_v19, %v2199_v33 }
 0x5bd   :  { %v13283_v35 = vpop.eup %13282 }
 0x5be   :  { %v2119_v36 = vadd.f32 1.0, %v13283_v35  ;;  %v13285_v37 = vpop.eup %13284 }
 0x5bf   :  { %v2128_v38 = vadd.f32 1.0, %v13285_v37 }
 0x5c0   :  { %13286 = vrcp.f32 %v2119_v36 }
 0x5c1   :  { %13288 = vrcp.f32 %v2128_v38 }
 0x5ca   :  { %v13287_v40 = vpop.eup %13286 }
 0x5cb   :  { %v2203_v41 = vmul.f32 %v13287_v40, %v2200_v39  ;;  %v13289_v44 = vpop.eup %13288 }
 0x5cc   :  { %v2206_v45 = vsub.f32 1.0, %v13289_v44  ;;  %v2208_v47 = vmul.f32 %v13289_v44, %v1965_v21  ;;  %v2620_v44 = vld [vmem:[#allocation4 + $0x20] sm:$0xff] }
 0x5cd   :  { %v2204_v43 = vadd.f32 %v2203_v41, %v2132_v42 }
 0x5cf   :  { %13290 = vtanh.f32 %v2204_v43 }
 0x5d9   :  { %v13291_v46 = vpop.eup %13290 }
 0x5da   :  { %v2207_v49 = vmul.f32 %v13291_v46, %v2206_v45 }
 0x5dc   :  { %v2209_v50 = vadd.f32 %v2208_v47, %v2207_v49 }
 0x5de   :  { %11066 = vmatmul.mubr.msk.f32.vlgmr.msra.gmra.mrb[32].mxu1 %vm988_vm4, %v2209_v50  ;;  %2211 = vst.msk [vmem:[#allocation5 + $0x10] sm:$0xff] %vm988_vm4, %v2209_v50  ;;  %2213 = vst.msk [vmem:[#allocation6 + $0x28] sm:$0xff] %vm988_vm4, %v2209_v50  ;;  %11081 = vmatmul.mubr.msk.f32.vlgmr.msra.gmra.mrb[58].mxu0 %vm988_vm4, %v2209_v50 }
 0x5df   :  { %12451 = vmatpush3.bf16.msra.mxu1 %v14045_v5  ;;  %11095 = vmatprep.mubr.msk.f32.mxu1 %vm13629_vm3, %v13630_v4 }
 0x5e0   :  { %12452 = vmatprep.subr.bf16.mxu1 %v13628_v30  ;;  %12460 = vmatpush3.bf16.msra.mxu0 %v13961_v48 }
 0x5e1   :  { %12461 = vmatprep.subr.bf16.mxu0 %v13628_v30  ;;  %11110 = vmatprep.mubr.msk.f32.mxu0 %vm13629_vm3, %v13630_v4 }
 0x5e3   :  { %12454 = vmatpush3.bf16.msra.mxu1 %v14060_v8 }
 0x5e4   :  { %12455 = vmatprep.subr.bf16.mxu1 %v13628_v30  ;;  %12463 = vmatpush3.bf16.msra.mxu0 %v13988_v56 }
 0x5e5   :  { %12464 = vmatprep.subr.bf16.mxu0 %v13628_v30 }
 0x5e7   :  { %12457 = vmatpush3.bf16.msra.mxu1 %v14076_v11 }
 0x5e8   :  { %12467 = vmatprep.subr.bf16.mxu1 %v13628_v30  ;;  %12466 = vmatpush3.bf16.msra.mxu0 %v14014_v63 }
 0x5e9   :  { %12476 = vmatprep.subr.bf16.mxu0 %v13628_v30 }
 0x5ea   :  { %11096 = vmatmul.mubr.msk.f32.vlgmr.msra.gmra.mrb[34].mxu1 %vm988_vm4, %v2209_v50 }
 0x5eb   :  { %12469 = vmatpush3.bf16.msra.mxu1 %v14093_v14  ;;  %11125 = vmatprep.mubr.msk.f32.mxu1 %vm13629_vm3, %v13630_v4 }
 0x5ec   :  { %12470 = vmatprep.subr.bf16.mxu1 %v13628_v30 }
 0x5ef   :  { %12472 = vmatpush3.bf16.msra.mxu1 %v14110_v17 }
 0x5f0   :  { %12473 = vmatprep.subr.bf16.mxu1 %v13628_v30 }
 0x5f3   :  { %12475 = vmatpush3.bf16.msra.mxu1 %v14126_v20 }
 0x5f4   :  { %12485 = vmatprep.subr.bf16.mxu1 %v13628_v30 }
 0x6b1   :  { %v2283_v51 = vpop.f32.mrb[32].mxu1  ;;  %v2353_v53 = vpop.f32.mrb[58].mxu0 }
 0x6b2   :  { %v2359_v54 = vadd.f32 %v2358_v52, %v2283_v51  ;;  %v11067_v55 = vpop.f32.mrb[33].mxu1  ;;  %v11082_v57 = vpop.f32.mrb[59].mxu0  ;;  %v2368_v60 = vadd.f32 %v2367_v59, %v2353_v53 }
 0x6b4   :  { %v9701_v58 = vmul.f32 -1.442695, %v2359_v54  ;;  %v9702_v61 = vmul.f32 -1.442695, %v2368_v60  ;;  %v2846_v54 = vld [vmem:[#allocation2 + $0x28] sm:$0xff] }
 0x6b6   :  { %13292 = vpow2.f32 %v9701_v58 }
 0x6b7   :  { %13294 = vpow2.f32 %v9702_v61  ;;  %v2855_v61 = vld [vmem:[#allocation3 + $0x28] sm:$0xff] }
 0x6bd   :  { %v2443_v62 = vpop.f32.mrb[34].mxu1 }
 0x6be   :  { %v11097_v0 = vpop.f32.mrb[35].mxu1  ;;  %v2444_v7 = vadd.f32 %v14183_v19, %v2443_v62 }
 0x6c0   :  { %v13293_v1 = vpop.eup %13292 }
 0x6c1   :  { %v2363_v2 = vadd.f32 1.0, %v13293_v1  ;;  %v13295_v3 = vpop.eup %13294 }
 0x6c2   :  { %v2372_v6 = vadd.f32 1.0, %v13295_v3 }
 0x6c3   :  { %13296 = vrcp.f32 %v2363_v2 }
 0x6c4   :  { %13298 = vrcp.f32 %v2372_v6 }
 0x6cd   :  { %v13297_v9 = vpop.eup %13296 }
 0x6ce   :  { %v2447_v10 = vmul.f32 %v13297_v9, %v2444_v7  ;;  %v13299_v15 = vpop.eup %13298 }
 0x6cf   :  { %v2450_v16 = vsub.f32 1.0, %v13299_v15  ;;  %v2452_v21 = vmul.f32 %v13299_v15, %v2209_v50  ;;  %v2864_v15 = vld [vmem:[#allocation4 + $0x28] sm:$0xff] }
 0x6d0   :  { %v2448_v13 = vadd.f32 %v2447_v10, %v2376_v12 }
 0x6d2   :  { %13300 = vtanh.f32 %v2448_v13 }
 0x6dc   :  { %v13301_v18 = vpop.eup %13300 }
 0x6dd   :  { %v2451_v22 = vmul.f32 %v13301_v18, %v2450_v16 }
 0x6df   :  { %v2453_v23 = vadd.f32 %v2452_v21, %v2451_v22 }
 0x6e1   :  { %11111 = vmatmul.mubr.msk.f32.vlgmr.msra.gmra.mrb[60].mxu0 %vm988_vm4, %v2453_v23  ;;  %2455 = vst.msk [vmem:[#allocation5 + $0x18] sm:$0xff] %vm988_vm4, %v2453_v23  ;;  %2457 = vst.msk [vmem:[#allocation6 + $0x20] sm:$0xff] %vm988_vm4, %v2453_v23  ;;  %11126 = vmatmul.mubr.msk.f32.vlgmr.msra.gmra.mrb[36].mxu1 %vm988_vm4, %v2453_v23 }
 0x6e2   :  { %12478 = vmatpush3.bf16.msra.mxu0 %v14045_v5  ;;  %11140 = vmatprep.mubr.msk.f32.mxu0 %vm13629_vm3, %v13630_v4 }
 0x6e3   :  { %12479 = vmatprep.subr.bf16.mxu0 %v13628_v30  ;;  %12487 = vmatpush3.bf16.msra.mxu1 %v13961_v48 }
 0x6e4   :  { %12488 = vmatprep.subr.bf16.mxu1 %v13628_v30  ;;  %11155 = vmatprep.mubr.msk.f32.mxu1 %vm13629_vm3, %v13630_v4 }
 0x6e6   :  { %12481 = vmatpush3.bf16.msra.mxu0 %v14060_v8 }
 0x6e7   :  { %12482 = vmatprep.subr.bf16.mxu0 %v13628_v30  ;;  %12490 = vmatpush3.bf16.msra.mxu1 %v13988_v56 }
 0x6e8   :  { %12491 = vmatprep.subr.bf16.mxu1 %v13628_v30 }
 0x6ea   :  { %12484 = vmatpush3.bf16.msra.mxu0 %v14076_v11 }
 0x6eb   :  { %12494 = vmatprep.subr.bf16.mxu0 %v13628_v30  ;;  %12493 = vmatpush3.bf16.msra.mxu1 %v14014_v63 }
 0x6ec   :  { %12503 = vmatprep.subr.bf16.mxu1 %v13628_v30 }
 0x6ed   :  { %11141 = vmatmul.mubr.msk.f32.vlgmr.msra.gmra.mrb[62].mxu0 %vm988_vm4, %v2453_v23 }
 0x6ee   :  { %12496 = vmatpush3.bf16.msra.mxu0 %v14093_v14  ;;  %11170 = vmatprep.mubr.msk.f32.mxu0 %vm13629_vm3, %v13630_v4 }
 0x6ef   :  { %12497 = vmatprep.subr.bf16.mxu0 %v13628_v30 }
 0x6f2   :  { %12499 = vmatpush3.bf16.msra.mxu0 %v14110_v17 }
 0x6f3   :  { %12500 = vmatprep.subr.bf16.mxu0 %v13628_v30 }
 0x6f6   :  { %12502 = vmatpush3.bf16.msra.mxu0 %v14126_v20 }
 0x6f7   :  { %12512 = vmatprep.subr.bf16.mxu0 %v13628_v30 }
 0x7b4   :  { %v2527_v24 = vpop.f32.mrb[60].mxu0  ;;  %v2597_v26 = vpop.f32.mrb[36].mxu1 }
 0x7b5   :  { %v2603_v27 = vadd.f32 %v2602_v25, %v2527_v24  ;;  %v11112_v28 = vpop.f32.mrb[61].mxu0  ;;  %v11127_v29 = vpop.f32.mrb[37].mxu1  ;;  %v2612_v33 = vadd.f32 %v2611_v32, %v2597_v26 }
 0x7b7   :  { %v9706_v31 = vmul.f32 -1.442695, %v2603_v27  ;;  %v9707_v34 = vmul.f32 -1.442695, %v2612_v33 }
 0x7b9   :  { %13302 = vpow2.f32 %v9706_v31  ;;  %v3099_v31 = vld [vmem:[#allocation3 + $0x30] sm:$0xff] }
 0x7ba   :  { %13304 = vpow2.f32 %v9707_v34 }
 0x7c0   :  { %v2687_v35 = vpop.f32.mrb[62].mxu0 }
 0x7c1   :  { %v11142_v36 = vpop.f32.mrb[63].mxu0  ;;  %v2688_v41 = vadd.f32 %v14183_v19, %v2687_v35 }
 0x7c3   :  { %v13303_v37 = vpop.eup %13302 }
 0x7c4   :  { %v2607_v38 = vadd.f32 1.0, %v13303_v37  ;;  %v13305_v39 = vpop.eup %13304 }
 0x7c5   :  { %v2616_v40 = vadd.f32 1.0, %v13305_v39 }
 0x7c6   :  { %13306 = vrcp.f32 %v2607_v38 }
 0x7c7   :  { %13308 = vrcp.f32 %v2616_v40  ;;  %v3108_v40 = vld [vmem:[#allocation4 + $0x30] sm:$0xff] }
 0x7d0   :  { %v13307_v42 = vpop.eup %13306 }
 0x7d1   :  { %v2691_v43 = vmul.f32 %v13307_v42, %v2688_v41  ;;  %v13309_v46 = vpop.eup %13308 }
 0x7d2   :  { %v2694_v47 = vsub.f32 1.0, %v13309_v46  ;;  %v2696_v50 = vmul.f32 %v13309_v46, %v2453_v23 }
 0x7d3   :  { %v2692_v45 = vadd.f32 %v2691_v43, %v2620_v44 }
 0x7d5   :  { %13310 = vtanh.f32 %v2692_v45 }
 0x7df   :  { %v13311_v49 = vpop.eup %13310 }
 0x7e0   :  { %v2695_v51 = vmul.f32 %v13311_v49, %v2694_v47  ;;  %v3455_v49 = vld [vmem:[%s16032_s5 + $0x90] sm:$0xff] }
 0x7e2   :  { %v2697_v52 = vadd.f32 %v2696_v50, %v2695_v51  ;;  %v3746_v50 = vld [vmem:[%s16032_s5 + $0xc0] sm:$0xff] }
 0x7e4   :  { %11156 = vmatmul.mubr.msk.f32.vlgmr.msra.gmra.mrb[38].mxu1 %vm988_vm4, %v2697_v52  ;;  %2699 = vst.msk [vmem:[#allocation5 + $0x20] sm:$0xff] %vm988_vm4, %v2697_v52  ;;  %2701 = vst.msk [vmem:[#allocation6 + $0x18] sm:$0xff] %vm988_vm4, %v2697_v52  ;;  %11171 = vmatmul.mubr.msk.f32.vlgmr.msra.gmra.mrb[64].mxu0 %vm988_vm4, %v2697_v52 }
 0x7e5   :  { %12505 = vmatpush3.bf16.msra.mxu1 %v14045_v5  ;;  %11185 = vmatprep.mubr.msk.f32.mxu1 %vm13629_vm3, %v13630_v4 }
 0x7e6   :  { %12506 = vmatprep.subr.bf16.mxu1 %v13628_v30  ;;  %12514 = vmatpush3.bf16.msra.mxu0 %v13961_v48 }
 0x7e7   :  { %12515 = vmatprep.subr.bf16.mxu0 %v13628_v30  ;;  %11200 = vmatprep.mubr.msk.f32.mxu0 %vm13629_vm3, %v13630_v4 }
 0x7e9   :  { %12508 = vmatpush3.bf16.msra.mxu1 %v14060_v8 }
 0x7ea   :  { %12509 = vmatprep.subr.bf16.mxu1 %v13628_v30  ;;  %12517 = vmatpush3.bf16.msra.mxu0 %v13988_v56 }
 0x7eb   :  { %12518 = vmatprep.subr.bf16.mxu0 %v13628_v30 }
 0x7ed   :  { %12511 = vmatpush3.bf16.msra.mxu1 %v14076_v11 }
 0x7ee   :  { %12521 = vmatprep.subr.bf16.mxu1 %v13628_v30  ;;  %12520 = vmatpush3.bf16.msra.mxu0 %v14014_v63 }
 0x7ef   :  { %12530 = vmatprep.subr.bf16.mxu0 %v13628_v30 }
 0x7f0   :  { %11186 = vmatmul.mubr.msk.f32.vlgmr.msra.gmra.mrb[40].mxu1 %vm988_vm4, %v2697_v52 }
 0x7f1   :  { %12523 = vmatpush3.bf16.msra.mxu1 %v14093_v14  ;;  %11215 = vmatprep.mubr.msk.f32.mxu1 %vm13629_vm3, %v13630_v4 }
 0x7f2   :  { %12524 = vmatprep.subr.bf16.mxu1 %v13628_v30 }
 0x7f5   :  { %12526 = vmatpush3.bf16.msra.mxu1 %v14110_v17 }
 0x7f6   :  { %12527 = vmatprep.subr.bf16.mxu1 %v13628_v30 }
 0x7f9   :  { %12529 = vmatpush3.bf16.msra.mxu1 %v14126_v20 }
 0x7fa   :  { %12539 = vmatprep.subr.bf16.mxu1 %v13628_v30 }
 0x8b7   :  { %v2771_v53 = vpop.f32.mrb[38].mxu1  ;;  %v2841_v55 = vpop.f32.mrb[64].mxu0 }
 0x8b8   :  { %v2847_v57 = vadd.f32 %v2846_v54, %v2771_v53  ;;  %v11157_v58 = vpop.f32.mrb[39].mxu1  ;;  %v11172_v59 = vpop.f32.mrb[65].mxu0  ;;  %v2856_v62 = vadd.f32 %v2855_v61, %v2841_v55  ;;  %v3458_v53 = vld [vmem:[%s16032_s5 + $0xa8] sm:$0xff]  ;;  %v3748_v54 = vld [vmem:[%s16032_s5 + $0xd0] sm:$0xff] }
 0x8b9   :  { %v3459_v58 = vld [vmem:[%s16032_s5 + $0xb0] sm:$0xff]  ;;  %v3460_v59 = vld [vmem:[%s16032_s5 + $0xb8] sm:$0xff] }
 0x8ba   :  { %v9711_v60 = vmul.f32 -1.442695, %v2847_v57  ;;  %v9712_v0 = vmul.f32 -1.442695, %v2856_v62  ;;  %v3749_v57 = vld [vmem:[%s16032_s5 + $0xd8] sm:$0xff]  ;;  %v12574_v61 = vpack.c.bf16 %v3460_v59, %v3459_v58  ;;  %v3750_v62 = vld [vmem:[%s16032_s5 + $0xe0] sm:$0xff] }
 0x8bb   :  { %v14514_v58 = vld [vmem:[#allocation6 + $0x38] sm:$0xff]  ;;  %v4226_v59 = vld [vmem:[%s16032_s5 + $0x120] sm:$0xff] }
 0x8bc   :  { %13312 = vpow2.f32 %v9711_v60  ;;  %v12594_v60 = vpack.c.bf16 %v3749_v57, %v3748_v54  ;;  %v14502_v54 = vld [vmem:[#allocation6 + $0x28] sm:$0xff]  ;;  %v14508_v57 = vld [vmem:[#allocation6 + $0x30] sm:$0xff] }
 0x8bd   :  { %13314 = vpow2.f32 %v9712_v0  ;;  %v3751_v0 = vld [vmem:[%s16032_s5 + $0xe8] sm:$0xff] }
 0x8c3   :  { %v2931_v1 = vpop.f32.mrb[40].mxu1 }
 0x8c4   :  { %v11187_v2 = vpop.f32.mrb[41].mxu1  ;;  %v2932_v10 = vadd.f32 %v14183_v19, %v2931_v1  ;;  %v12598_v1 = vpack.c.bf16 %v3751_v0, %v3750_v62  ;;  %v3991_v62 = vld [vmem:[%s16032_s5 + $0x100] sm:$0xff]  ;;  %v3992_v0 = vld [vmem:[%s16032_s5 + $0x108] sm:$0xff] }
 0x8c5   :  { %v3449_v2 = vld [vmem:[%s16032_s5] sm:$0xff] }
 0x8c6   :  { %v13313_v3 = vpop.eup %13312 }
 0x8c7   :  { %v2851_v6 = vadd.f32 1.0, %v13313_v3  ;;  %v13315_v7 = vpop.eup %13314  ;;  %v3450_v3 = vld [vmem:[%s16032_s5 + $0x8] sm:$0xff] }
 0x8c8   :  { %v2860_v9 = vadd.f32 1.0, %v13315_v7  ;;  %v3740_v7 = vld [vmem:[%s16032_s5 + $0x30] sm:$0xff] }
 0x8c9   :  { %13316 = vrcp.f32 %v2851_v6  ;;  %v12578_v6 = vpack.c.bf16 %v3450_v3, %v3449_v2  ;;  %v14541_v2 = vld [vmem:[#allocation5 + $0x8] sm:$0xff]  ;;  %v12618_v3 = vpack.c.bf16 %v3992_v0, %v3991_v62 }
 0x8ca   :  { %13318 = vrcp.f32 %v2860_v9  ;;  %v3741_v9 = vld [vmem:[%s16032_s5 + $0x38] sm:$0xff] }
 0x8d3   :  { %v13317_v12 = vpop.eup %13316 }
 0x8d4   :  { %v2935_v13 = vmul.f32 %v13317_v12, %v2932_v10  ;;  %v13319_v18 = vpop.eup %13318  ;;  %v12602_v10 = vpack.c.bf16 %v3741_v9, %v3740_v7  ;;  %v4229_v7 = vld [vmem:[%s16032_s5 + $0x138] sm:$0xff]  ;;  %v14553_v9 = vld [vmem:[#allocation5 + $0x10] sm:$0xff] }
 0x8d5   :  { %v2938_v21 = vsub.f32 1.0, %v13319_v18  ;;  %v2940_v23 = vmul.f32 %v13319_v18, %v2697_v52  ;;  %v3457_v52 = vld [vmem:[%s16032_s5 + $0xa0] sm:$0xff] }
 0x8d6   :  { %v2936_v16 = vadd.f32 %v2935_v13, %v2864_v15  ;;  %v12570_v55 = vpack.c.bf16 %v3458_v53, %v3457_v52  ;;  %v3334_v13 = vld [vmem:[#allocation2 + $0x38] sm:$0xff] }
 0x8d7   :  { %v3990_v52 = vld [vmem:[%s16032_s5 + $0xf8] sm:$0xff] }
 0x8d8   :  { %13320 = vtanh.f32 %v2936_v16 }
 0x8e2   :  { %v13321_v22 = vpop.eup %13320 }
 0x8e3   :  { %v2939_v24 = vmul.f32 %v13321_v22, %v2938_v21 }
 0x8e5   :  { %v2941_v25 = vadd.f32 %v2940_v23, %v2939_v24  ;;  %v3343_v23 = vld [vmem:[#allocation3 + $0x38] sm:$0xff] }
 0x8e7   :  { %11201 = vmatmul.mubr.msk.f32.vlgmr.msra.gmra.mrb[66].mxu0 %vm988_vm4, %v2941_v25  ;;  %2943 = vst.msk [vmem:[#allocation5 + $0x28] sm:$0xff] %vm988_vm4, %v2941_v25  ;;  %2945 = vst.msk [vmem:[#allocation6 + $0x10] sm:$0xff] %vm988_vm4, %v2941_v25  ;;  %11216 = vmatmul.mubr.msk.f32.vlgmr.msra.gmra.mrb[42].mxu1 %vm988_vm4, %v2941_v25 }
 0x8e8   :  { %12532 = vmatpush3.bf16.msra.mxu0 %v14045_v5  ;;  %11230 = vmatprep.mubr.msk.f32.mxu0 %vm13629_vm3, %v13630_v4 }
 0x8e9   :  { %12533 = vmatprep.subr.bf16.mxu0 %v13628_v30  ;;  %12541 = vmatpush3.bf16.msra.mxu1 %v13961_v48 }
 0x8ea   :  { %12542 = vmatprep.subr.bf16.mxu1 %v13628_v30  ;;  %11245 = vmatprep.mubr.msk.f32.mxu1 %vm13629_vm3, %v13630_v4 }
 0x8ec   :  { %12535 = vmatpush3.bf16.msra.mxu0 %v14060_v8 }
 0x8ed   :  { %12536 = vmatprep.subr.bf16.mxu0 %v13628_v30  ;;  %12544 = vmatpush3.bf16.msra.mxu1 %v13988_v56  ;;  %v3090_v56 = vld [vmem:[#allocation2 + $0x30] sm:$0xff] }
 0x8ee   :  { %12545 = vmatprep.subr.bf16.mxu1 %v13628_v30 }
 0x8f0   :  { %12538 = vmatpush3.bf16.msra.mxu0 %v14076_v11 }
 0x8f1   :  { %12548 = vmatprep.subr.bf16.mxu0 %v13628_v30  ;;  %12547 = vmatpush3.bf16.msra.mxu1 %v14014_v63 }
 0x8f2   :  { %12557 = vmatprep.subr.bf16.mxu1 %v13628_v30 }
 0x8f3   :  { %11231 = vmatmul.mubr.msk.f32.vlgmr.msra.gmra.mrb[68].mxu0 %vm988_vm4, %v2941_v25 }
 0x8f4   :  { %12550 = vmatpush3.bf16.msra.mxu0 %v14093_v14  ;;  %11260 = vmatprep.mubr.msk.f32.mxu0 %vm13629_vm3, %v13630_v4 }
 0x8f5   :  { %12551 = vmatprep.subr.bf16.mxu0 %v13628_v30 }
 0x8f8   :  { %12553 = vmatpush3.bf16.msra.mxu0 %v14110_v17 }
 0x8f9   :  { %12554 = vmatprep.subr.bf16.mxu0 %v13628_v30 }
 0x8fc   :  { %12556 = vmatpush3.bf16.msra.mxu0 %v14126_v20 }
 0x9ba   :  { %v3015_v48 = vpop.f32.mrb[66].mxu0  ;;  %v3085_v63 = vpop.f32.mrb[42].mxu1 }
 0x9bb   :  { %v3091_v26 = vadd.f32 %v3090_v56, %v3015_v48  ;;  %v11202_v27 = vpop.f32.mrb[67].mxu0  ;;  %v11217_v28 = vpop.f32.mrb[43].mxu1  ;;  %v3100_v14 = vadd.f32 %v3099_v31, %v3085_v63 }
 0x9bd   :  { %v9716_v29 = vmul.f32 -1.442695, %v3091_v26  ;;  %v9717_v32 = vmul.f32 -1.442695, %v3100_v14 }
 0x9bf   :  { %13322 = vpow2.f32 %v9716_v29 }
 0x9c0   :  { %13324 = vpow2.f32 %v9717_v32  ;;  %v3352_v32 = vld [vmem:[#allocation4 + $0x38] sm:$0xff] }
 0x9c6   :  { %v3175_v33 = vpop.f32.mrb[68].mxu0 }
 0x9c7   :  { %v11232_v34 = vpop.f32.mrb[69].mxu0  ;;  %v3176_v20 = vadd.f32 %v14183_v19, %v3175_v33 }
 0x9c9   :  { %v13323_v35 = vpop.eup %13322 }
 0x9ca   :  { %v3095_v17 = vadd.f32 1.0, %v13323_v35  ;;  %v13325_v36 = vpop.eup %13324 }
 0x9cb   :  { %v3104_v37 = vadd.f32 1.0, %v13325_v36 }
 0x9cc   :  { %13326 = vrcp.f32 %v3095_v17 }
 0x9cd   :  { %13328 = vrcp.f32 %v3104_v37 }
 0x9d6   :  { %v13327_v38 = vpop.eup %13326 }
 0x9d7   :  { %v3179_v39 = vmul.f32 %v13327_v38, %v3176_v20  ;;  %v13329_v42 = vpop.eup %13328  ;;  %v3452_v38 = vld [vmem:[%s16032_s5 + $0x18] sm:$0xff] }
 0x9d8   :  { %v3182_v43 = vsub.f32 1.0, %v13329_v42  ;;  %v3184_v45 = vmul.f32 %v13329_v42, %v2941_v25  ;;  %v3742_v42 = vld [vmem:[%s16032_s5 + $0x40] sm:$0xff] }
 0x9d9   :  { %v3180_v41 = vadd.f32 %v3179_v39, %v3108_v40 }
 0x9db   :  { %13330 = vtanh.f32 %v3180_v41 }
 0x9e5   :  { %v13331_v44 = vpop.eup %13330 }
 0x9e6   :  { %v3183_v46 = vmul.f32 %v13331_v44, %v3182_v43  ;;  %v3743_v43 = vld [vmem:[%s16032_s5 + $0x48] sm:$0xff]  ;;  %v14466_v44 = vld [vmem:[#allocation6 + $0x10] sm:$0xff] }
 0x9e8   :  { %v14371_v47 = vadd.f32 %v3184_v45, %v3183_v46  ;;  %v3453_v45 = vld [vmem:[%s16032_s5 + $0x20] sm:$0xff]  ;;  %v3454_v46 = vld [vmem:[%s16032_s5 + $0x28] sm:$0xff] }
 0x9ea   :  { %3189 = vst.msk [vmem:[#allocation6 + $0x8] sm:$0xff] %vm988_vm4, %v14371_v47  ;;  %11246 = vmatmul.mubr.msk.f32.vlgmr.msra.gmra.mrb[44].mxu1 %vm988_vm4, %v14371_v47  ;;  %3187 = vst.msk [vmem:[#allocation5 + $0x30] sm:$0xff] %vm988_vm4, %v14371_v47  ;;  %11261 = vmatmul.mubr.msk.f32.vlgmr.msra.gmra.mrb[70].mxu0 %vm988_vm4, %v14371_v47 }
 0x9eb   :  { %12559 = vmatpush3.bf16.msra.mxu1 %v14045_v5  ;;  %11275 = vmatprep.mubr.msk.f32.mxu1 %vm13629_vm3, %v13630_v4  ;;  %v3456_v5 = vld [vmem:[%s16032_s5 + $0x98] sm:$0xff] }
 0x9ec   :  { %12560 = vmatprep.subr.bf16.mxu1 %v13628_v30 }
 0x9ef   :  { %12562 = vmatpush3.bf16.msra.mxu1 %v14060_v8  ;;  %v12566_v8 = vpack.c.bf16 %v3456_v5, %v3455_v49  ;;  %v14478_v49 = vld [vmem:[#allocation6 + $0x18] sm:$0xff]  ;;  %v12586_v5 = vpack.c.bf16 %v3454_v46, %v3453_v45  ;;  %v4242_v45 = vld [vmem:[%s16032_s5 + $0x1a0] sm:$0xff]  ;;  %v4243_v46 = vld [vmem:[%s16032_s5 + $0x1a8] sm:$0xff] }
 0x9f0   :  { %12563 = vmatprep.subr.bf16.mxu1 %v13628_v30 }
 0x9f1   :  { %12567 = vmatprep.subr.bf16.mxu0 %v12566_v8  ;;  %v14454_v41 = vld [vmem:[#allocation6 + $0x8] sm:$0xff] }
 0x9f2   :  { %12569 = vmatpush3.bf16.msra.mxu0 %v12566_v8  ;;  %v3745_v8 = vld [vmem:[%s16032_s5 + $0x58] sm:$0xff] }
 0x9f3   :  { %12565 = vmatpush3.bf16.msra.mxu1 %v14076_v11  ;;  %v3747_v11 = vld [vmem:[%s16032_s5 + $0xc8] sm:$0xff]  ;;  %12571 = vmatprep.subr.bf16.mxu0 %v12570_v55 }
 0x9f4   :  { %v12590_v51 = vpack.c.bf16 %v3747_v11, %v3746_v50  ;;  %v3744_v50 = vld [vmem:[%s16032_s5 + $0x50] sm:$0xff]  ;;  %v14490_v11 = vld [vmem:[#allocation6 + $0x20] sm:$0xff] }
 0x9f5   :  { %v12610_v53 = vpack.c.bf16 %v3745_v8, %v3744_v50 }
 0x9f6   :  { %11276 = vmatmul.mubr.msk.f32.vlgmr.msra.gmra.mrb[46].mxu1 %vm988_vm4, %v14371_v47  ;;  %12591 = vmatprep.subr.bf16.mxu1 %v12590_v51 }
 0x9f7   :  { %12593 = vmatpush3.bf16.msra.mxu1 %v12590_v51  ;;  %12573 = vmatpush3.bf16.msra.mxu0 %v12570_v55  ;;  %v3989_v51 = vld [vmem:[%s16032_s5 + $0xf0] sm:$0xff] }
 0x9f8   :  { %12595 = vmatprep.subr.bf16.mxu1 %v12594_v60  ;;  %12575 = vmatprep.subr.bf16.mxu0 %v12574_v61  ;;  %v12614_v55 = vpack.c.bf16 %v3990_v52, %v3989_v51 }
 0x9fb   :  { %12597 = vmatpush3.bf16.msra.mxu1 %v12594_v60  ;;  %12577 = vmatpush3.bf16.msra.mxu0 %v12574_v61  ;;  %v4227_v60 = vld [vmem:[%s16032_s5 + $0x128] sm:$0xff]  ;;  %v14526_v61 = vld [vmem:[#allocation5] sm:$0xff] }
 0x9fc   :  { %12599 = vmatprep.subr.bf16.mxu1 %v12598_v1  ;;  %12579 = vmatprep.subr.bf16.mxu0 %v12578_v6 }
 0x9ff   :  { %12601 = vmatpush3.bf16.msra.mxu1 %v12598_v1  ;;  %v14539_v1 = vpack.c.bf16 %v4227_v60, %v4226_v59 }
 0xa00   :  { %12603 = vmatprep.subr.bf16.mxu1 %v12602_v10 }
 0xabd   :  { %v3259_v12 = vpop.f32.mrb[44].mxu1  ;;  %v3329_v15 = vpop.f32.mrb[70].mxu0 }
 0xabe   :  { %v3335_v16 = vadd.f32 %v3334_v13, %v3259_v12  ;;  %v11247_v18 = vpop.f32.mrb[45].mxu1  ;;  %v11262_v21 = vpop.f32.mrb[71].mxu0  ;;  %v3344_v24 = vadd.f32 %v3343_v23, %v3329_v15  ;;  %v3994_v12 = vld [vmem:[%s16032_s5 + $0x118] sm:$0xff]  ;;  %v3983_v23 = vld [vmem:[%s16032_s5 + $0x60] sm:$0xff] }
 0xabf   :  { %v14568_v15 = vld [vmem:[#allocation5 + $0x18] sm:$0xff]  ;;  %v4230_v18 = vld [vmem:[%s16032_s5 + $0x140] sm:$0xff]  ;;  %v4231_v21 = vld [vmem:[%s16032_s5 + $0x148] sm:$0xff] }
 0xac0   :  { %v9721_v22 = vmul.f32 -1.442695, %v3335_v16  ;;  %v9722_v25 = vmul.f32 -1.442695, %v3344_v24  ;;  %v3984_v24 = vld [vmem:[%s16032_s5 + $0x68] sm:$0xff] }
 0xac2   :  { %13332 = vpow2.f32 %v9721_v22  ;;  %v14581_v22 = vld [vmem:[#allocation5 + $0x20] sm:$0xff] }
 0xac3   :  { %13334 = vpow2.f32 %v9722_v25  ;;  %v14594_v25 = vpack.c.bf16 %v4231_v21, %v4230_v18 }
 0xac9   :  { %v3419_v48 = vpop.f32.mrb[46].mxu1 }
 0xaca   :  { %v11277_v56 = vpop.f32.mrb[47].mxu1  ;;  %v3420_v29 = vadd.f32 %v14183_v19, %v3419_v48  ;;  %v3451_v19 = vld [vmem:[%s16032_s5 + $0x10] sm:$0xff]  ;;  %v14596_v48 = vld [vmem:[#allocation5 + $0x28] sm:$0xff] }
 0xacb   :  { %v12582_v40 = vpack.c.bf16 %v3452_v38, %v3451_v19  ;;  %v12626_v56 = vpack.c.bf16 %v3984_v24, %v3983_v23 }
 0xacc   :  { %v13333_v63 = vpop.eup %13332 }
 0xacd   :  { %v3339_v26 = vadd.f32 1.0, %v13333_v63  ;;  %v13335_v27 = vpop.eup %13334  ;;  %v14603_v63 = vld [vmem:[#allocation5 + $0x30] sm:$0xff] }
 0xace   :  { %v3348_v28 = vadd.f32 1.0, %v13335_v27  ;;  %v4233_v27 = vld [vmem:[%s16032_s5 + $0x158] sm:$0xff] }
 0xacf   :  { %13336 = vrcp.f32 %v3339_v26  ;;  %v4232_v26 = vld [vmem:[%s16032_s5 + $0x150] sm:$0xff] }
 0xad0   :  { %13338 = vrcp.f32 %v3348_v28 }
 0xad9   :  { %v13337_v31 = vpop.eup %13336 }
 0xada   :  { %v3423_v14 = vmul.f32 %v13337_v31, %v3420_v29  ;;  %v13339_v34 = vpop.eup %13338  ;;  %v3985_v29 = vld [vmem:[%s16032_s5 + $0x70] sm:$0xff]  ;;  %v3986_v31 = vld [vmem:[%s16032_s5 + $0x78] sm:$0xff] }
 0xadb   :  { %v3426_v35 = vsub.f32 1.0, %v13339_v34  ;;  %v3428_v36 = vmul.f32 %v13339_v34, %v14371_v47  ;;  %v12606_v47 = vpack.c.bf16 %v3743_v43, %v3742_v42  ;;  %v12630_v34 = vpack.c.bf16 %v3986_v31, %v3985_v29  ;;  %v4240_v42 = vld [vmem:[%s16032_s5 + $0x190] sm:$0xff]  ;;  %v4241_v43 = vld [vmem:[%s16032_s5 + $0x198] sm:$0xff] }
 0xadc   :  { %v3424_v33 = vadd.f32 %v3423_v14, %v3352_v32  ;;  %v14633_v14 = vpack.c.bf16 %v4233_v27, %v4232_v26  ;;  %v4234_v32 = vld [vmem:[%s16032_s5 + $0x160] sm:$0xff] }
 0xade   :  { %13340 = vtanh.f32 %v3424_v33  ;;  %v4235_v33 = vld [vmem:[%s16032_s5 + $0x168] sm:$0xff] }
 0xae8   :  { %v13341_v17 = vpop.eup %13340 }
 0xae9   :  { %v3427_v37 = vmul.f32 %v13341_v17, %v3426_v35  ;;  %v3987_v35 = vld [vmem:[%s16032_s5 + $0x80] sm:$0xff]  ;;  %v3988_v17 = vld [vmem:[%s16032_s5 + $0x88] sm:$0xff] }
 0xaea   :  { %v12634_v19 = vpack.c.bf16 %v3988_v17, %v3987_v35  ;;  %v9774_v17 = vld [vmem:[%s16032_s5 + $0x1c0] ss:$0 sm:$0xff] }
 0xaeb   :  { %v3429_v20 = vadd.f32 %v3428_v36, %v3427_v37  ;;  %v14651_v36 = vpack.c.bf16 %v4235_v33, %v4234_v32  ;;  %v4236_v37 = vld [vmem:[%s16032_s5 + $0x170] sm:$0xff] }
 0xaed   :  { %3431 = vst.msk [vmem:[#allocation5 + $0x38] sm:$0xff] %vm988_vm4, %v3429_v20  ;;  %3432 = vst.msk [vmem:[#allocation6] sm:$0xff] %vm988_vm4, %v3429_v20  ;;  %v4237_v20 = vld [vmem:[%s16032_s5 + $0x178] sm:$0xff] }
 0xaee   :  { %v14669_v38 = vpack.c.bf16 %v4237_v20, %v4236_v37 }
 0xaf4   :  { %v14448_v39 = vld [vmem:[#allocation6] sm:$0xff]  ;;  %v14616_v28 = vld [vmem:[#allocation5 + $0x38] sm:$0xff] }
 0xaf5   :  { %11290 = vmatprep.mubr.msk.f32.mxu0 %vm988_vm4, %v14448_v39  ;;  %11338 = vmatprep.mubr.msk.f32.mxu1 %vm988_vm4, %v14448_v39 }
 0xaf6   :  { %11291 = vmatmul.mubr.msk.f32.vlgmr.msra.gmra.mrb[72].mxu0 %vm988_vm4, %v14454_v41  ;;  %11339 = vmatmul.mubr.msk.f32.vlgmr.msra.gmra.mrb[48].mxu1 %vm988_vm4, %v14454_v41 }
 0xaf7   :  { %12581 = vmatpush3.bf16.msra.mxu0 %v12578_v6  ;;  %11293 = vmatprep.mubr.msk.f32.mxu0 %vm988_vm4, %v14466_v44  ;;  %v4228_v6 = vld [vmem:[%s16032_s5 + $0x130] sm:$0xff] }
 0xaf8   :  { %11341 = vmatprep.mubr.msk.f32.mxu1 %vm988_vm4, %v14466_v44  ;;  %12583 = vmatprep.subr.bf16.mxu0 %v12582_v40  ;;  %v14566_v13 = vpack.c.bf16 %v4229_v7, %v4228_v6 }
 0xaf9   :  { %12605 = vmatpush3.bf16.msra.mxu1 %v12602_v10  ;;  %v3993_v10 = vld [vmem:[%s16032_s5 + $0x110] sm:$0xff] }
 0xafa   :  { %11294 = vmatmul.mubr.msk.f32.gmra.mrb[74].mxu0 %vm988_vm4, %v14478_v49  ;;  %11342 = vmatmul.mubr.msk.f32.gmra.mrb[50].mxu1 %vm988_vm4, %v14478_v49  ;;  %v12622_v16 = vpack.c.bf16 %v3994_v12, %v3993_v10 }
 0xafb   :  { %11296 = vmatprep.mubr.msk.f32.mxu0 %vm988_vm4, %v14490_v11  ;;  %11344 = vmatprep.mubr.msk.f32.mxu1 %vm988_vm4, %v14490_v11 }
 0xafc   :  { %12585 = vmatpush3.bf16.msra.mxu0 %v12582_v40  ;;  %12607 = vmatprep.subr.bf16.mxu1 %v12606_v47  ;;  %v4239_v40 = vld [vmem:[%s16032_s5 + $0x188] sm:$0xff] }
 0xafd   :  { %12609 = vmatpush3.bf16.msra.mxu1 %v12606_v47  ;;  %12587 = vmatprep.subr.bf16.mxu0 %v12586_v5  ;;  %v14723_v47 = vpack.c.bf16 %v4243_v46, %v4242_v45 }
 0xafe   :  { %11297 = vmatmul.mubr.msk.f32.gmra.mrb[76].mxu0 %vm988_vm4, %v14502_v54  ;;  %11345 = vmatmul.mubr.msk.f32.gmra.mrb[52].mxu1 %vm988_vm4, %v14502_v54 }
 0xaff   :  { %11299 = vmatprep.mubr.msk.f32.mxu0 %vm988_vm4, %v14508_v57  ;;  %11347 = vmatprep.mubr.msk.f32.mxu1 %vm988_vm4, %v14508_v57 }
 0xb00   :  { %12589 = vmatpush3.bf16.msra.mxu0 %v12586_v5  ;;  %12611 = vmatprep.subr.bf16.mxu1 %v12610_v53  ;;  %v9757_v5 = vld [vmem:[%s16032_s5 + $0x1b8] ss:$0 sm:$0xff] }
 0xb01   :  { %12613 = vmatpush3.bf16.msra.mxu1 %v12610_v53  ;;  %12615 = vmatprep.subr.bf16.mxu0 %v12614_v55 }
 0xb02   :  { %11300 = vmatmul.mubr.msk.f32.gmra.mrb[78].mxu0 %vm988_vm4, %v14514_v58  ;;  %11348 = vmatmul.mubr.msk.f32.gmra.mrb[54].mxu1 %vm988_vm4, %v14514_v58 }
 0xb03   :  { %11314 = vmatprep.mubr.msk.f32.mxu0 %vm988_vm4, %v14526_v61  ;;  %11362 = vmatprep.mubr.msk.f32.mxu1 %vm988_vm4, %v14526_v61 }
 0xb04   :  { %12638 = vmatprep.subr.bf16.mxu1 %v13628_v30 }
 0xb06   :  { %11315 = vmatmul.mubr.msk.f32.vlgmr.msra.gmra.mrb[72].mxu0 %vm988_vm4, %v14541_v2  ;;  %11363 = vmatmul.mubr.msk.f32.vlgmr.msra.gmra.mrb[48].mxu1 %vm988_vm4, %v14541_v2 }
 0xb07   :  { %12617 = vmatpush3.bf16.msra.mxu0 %v12614_v55  ;;  %11317 = vmatprep.mubr.msk.f32.mxu0 %vm988_vm4, %v14553_v9 }
 0xb08   :  { %11365 = vmatprep.mubr.msk.f32.mxu1 %vm988_vm4, %v14553_v9  ;;  %12640 = vmatpush3.bf16.msra.mxu1 %v14539_v1 }
 0xb09   :  { %12619 = vmatprep.subr.bf16.mxu0 %v12618_v3  ;;  %12641 = vmatprep.subr.bf16.mxu1 %v13628_v30 }
 0xb0a   :  { %11318 = vmatmul.mubr.msk.f32.gmra.mrb[74].mxu0 %vm988_vm4, %v14568_v15  ;;  %11366 = vmatmul.mubr.msk.f32.gmra.mrb[50].mxu1 %vm988_vm4, %v14568_v15 }
 0xb0b   :  { %11320 = vmatprep.mubr.msk.f32.mxu0 %vm988_vm4, %v14581_v22  ;;  %11368 = vmatprep.mubr.msk.f32.mxu1 %vm988_vm4, %v14581_v22 }
 0xb0c   :  { %12621 = vmatpush3.bf16.msra.mxu0 %v12618_v3  ;;  %12643 = vmatpush3.bf16.msra.mxu1 %v14566_v13 }
 0xb0d   :  { %12623 = vmatprep.subr.bf16.mxu0 %v12622_v16  ;;  %12644 = vmatprep.subr.bf16.mxu1 %v13628_v30 }
 0xb0e   :  { %11321 = vmatmul.mubr.msk.f32.gmra.mrb[76].mxu0 %vm988_vm4, %v14596_v48  ;;  %11369 = vmatmul.mubr.msk.f32.gmra.mrb[52].mxu1 %vm988_vm4, %v14596_v48 }
 0xb0f   :  { %11323 = vmatprep.mubr.msk.f32.mxu0 %vm988_vm4, %v14603_v63  ;;  %11371 = vmatprep.mubr.msk.f32.mxu1 %vm988_vm4, %v14603_v63 }
 0xb10   :  { %12625 = vmatpush3.bf16.msra.mxu0 %v12622_v16  ;;  %12646 = vmatpush3.bf16.msra.mxu1 %v14594_v25 }
 0xb11   :  { %12627 = vmatprep.subr.bf16.mxu0 %v12626_v56  ;;  %12647 = vmatprep.subr.bf16.mxu1 %v13628_v30 }
 0xb12   :  { %11324 = vmatmul.mubr.msk.f32.gmra.mrb[78].mxu0 %vm988_vm4, %v14616_v28  ;;  %11372 = vmatmul.mubr.msk.f32.gmra.mrb[54].mxu1 %vm988_vm4, %v14616_v28 }
 0xb13   :  { %11386 = vmatprep.mubr.msk.f32.mxu0 %vm988_vm4, %v14448_v39  ;;  %11434 = vmatprep.mubr.msk.f32.mxu1 %vm13629_vm3, %v13630_v4  ;;  %v4238_v39 = vld [vmem:[%s16032_s5 + $0x180] sm:$0xff] }
 0xb16   :  { %11387 = vmatmul.mubr.msk.f32.vlgmr.msra.gmra.mrb[80].mxu0 %vm988_vm4, %v14454_v41  ;;  %11435 = vmatmul.mubr.f32.vlgmr.msra.gmra.mrb[56].mxu1 %v13630_v4  ;;  %v14690_v41 = vpack.c.bf16 %v4239_v40, %v4238_v39 }
 0xb17   :  { %12629 = vmatpush3.bf16.msra.mxu0 %v12626_v56  ;;  %12649 = vmatpush3.bf16.msra.mxu1 %v14633_v14 }
 0xb18   :  { %11389 = vmatprep.mubr.msk.f32.mxu0 %vm988_vm4, %v14466_v44  ;;  %12650 = vmatprep.subr.bf16.mxu1 %v13628_v30  ;;  %v14707_v44 = vpack.c.bf16 %v4241_v43, %v4240_v42 }
 0xb19   :  { %12631 = vmatprep.subr.bf16.mxu0 %v12630_v34  ;;  %11449 = vmatprep.mubr.msk.f32.mxu1 %vm13629_vm3, %v13630_v4 }
 0xb1a   :  { %11390 = vmatmul.mubr.msk.f32.gmra.mrb[82].mxu0 %vm988_vm4, %v14478_v49  ;;  %v9740_v49 = vld [vmem:[%s16032_s5 + $0x1b0] ss:$0 sm:$0xff] }
 0xb1b   :  { %12652 = vmatpush3.bf16.msra.mxu1 %v14651_v36  ;;  %11392 = vmatprep.mubr.msk.f32.mxu0 %vm988_vm4, %v14490_v11 }
 0xb1c   :  { %12633 = vmatpush3.bf16.msra.mxu0 %v12630_v34  ;;  %12653 = vmatprep.subr.bf16.mxu1 %v13628_v30 }
 0xb1d   :  { %12635 = vmatprep.subr.bf16.mxu0 %v12634_v19 }
 0xb1e   :  { %11393 = vmatmul.mubr.msk.f32.gmra.mrb[84].mxu0 %vm988_vm4, %v14502_v54 }
 0xb1f   :  { %12655 = vmatpush3.bf16.msra.mxu1 %v14669_v38  ;;  %11395 = vmatprep.mubr.msk.f32.mxu0 %vm988_vm4, %v14508_v57 }
 0xb20   :  { %12637 = vmatpush3.bf16.msra.mxu0 %v12634_v19  ;;  %12665 = vmatprep.subr.bf16.mxu1 %v13628_v30 }
 0xb21   :  { %12656 = vmatprep.subr.bf16.mxu0 %v13628_v30 }
 0xb22   :  { %11450 = vmatmul.mubr.f32.vlgmr.msra.gmra.mrb[58].mxu1 %v13630_v4  ;;  %11396 = vmatmul.mubr.msk.f32.gmra.mrb[86].mxu0 %vm988_vm4, %v14514_v58 }
 0xb23   :  { %11410 = vmatprep.mubr.msk.f32.mxu0 %vm988_vm4, %v14526_v61  ;;  %12667 = vmatpush3.bf16.msra.mxu1 %v14539_v1 }
 0xb24   :  { %12668 = vmatprep.subr.bf16.mxu1 %v13628_v30  ;;  %11479 = vmatprep.mubr.msk.f32.mxu1 %vm13629_vm3, %v13630_v4 }
 0xb26   :  { %11411 = vmatmul.mubr.msk.f32.vlgmr.msra.gmra.mrb[80].mxu0 %vm988_vm4, %v14541_v2 }
 0xb27   :  { %12658 = vmatpush3.bf16.msra.mxu0 %v14690_v41  ;;  %11413 = vmatprep.mubr.msk.f32.mxu0 %vm988_vm4, %v14553_v9 }
 0xb28   :  { %12659 = vmatprep.subr.bf16.mxu0 %v13628_v30  ;;  %12670 = vmatpush3.bf16.msra.mxu1 %v14566_v13 }
 0xb29   :  { %12671 = vmatprep.subr.bf16.mxu1 %v13628_v30 }
 0xb2a   :  { %11414 = vmatmul.mubr.msk.f32.gmra.mrb[82].mxu0 %vm988_vm4, %v14568_v15 }
 0xb2b   :  { %11416 = vmatprep.mubr.msk.f32.mxu0 %vm988_vm4, %v14581_v22  ;;  %12661 = vmatpush3.bf16.msra.mxu0 %v14707_v44 }
 0xb2c   :  { %12662 = vmatprep.subr.bf16.mxu0 %v13628_v30  ;;  %12673 = vmatpush3.bf16.msra.mxu1 %v14594_v25 }
 0xb2d   :  { %12683 = vmatprep.subr.bf16.mxu1 %v13628_v30 }
 0xb2e   :  { %11417 = vmatmul.mubr.msk.f32.gmra.mrb[84].mxu0 %vm988_vm4, %v14596_v48 }
 0xb2f   :  { %11419 = vmatprep.mubr.msk.f32.mxu0 %vm988_vm4, %v14603_v63  ;;  %12664 = vmatpush3.bf16.msra.mxu0 %v14723_v47 }
 0xb30   :  { %12674 = vmatprep.subr.bf16.mxu0 %v13628_v30 }
 0xb32   :  { %11420 = vmatmul.mubr.msk.f32.gmra.mrb[86].mxu0 %vm988_vm4, %v14616_v28 }
 0xb33   :  { %11464 = vmatprep.mubr.msk.f32.mxu0 %vm13629_vm3, %v13630_v4 }
 0xb36   :  { %11465 = vmatmul.mubr.f32.vlgmr.msra.gmra.mrb[88].mxu0 %v13630_v4 }
 0xb37   :  { %12676 = vmatpush3.bf16.msra.mxu0 %v14633_v14  ;;  %11494 = vmatprep.mubr.msk.f32.mxu0 %vm13629_vm3, %v13630_v4 }
 0xb38   :  { %12677 = vmatprep.subr.bf16.mxu0 %v13628_v30 }
 0xb3b   :  { %12679 = vmatpush3.bf16.msra.mxu0 %v14651_v36 }
 0xb3c   :  { %12680 = vmatprep.subr.bf16.mxu0 %v13628_v30 }
 0xb3f   :  { %12682 = vmatpush3.bf16.msra.mxu0 %v14669_v38 }
 0xb40   :  { %12692 = vmatprep.subr.bf16.mxu0 %v13628_v30 }
 0xbd9   :  { %v11316_v50 = vpop.f32.mrb[72].mxu0  ;;  %v11364_v8 = vpop.f32.mrb[48].mxu1 }
 0xbda   :  { %v3725_v11 = vadd.f32 %v11316_v50, %v9740_v49  ;;  %v3968_v51 = vadd.f32 %v11364_v8, %v9757_v5  ;;  %v3680_v52 = vpop.f32.mrb[73].mxu0  ;;  %v3923_v53 = vpop.f32.mrb[49].mxu1 }
 0xbdb   :  { %v3724_v54 = vadd.f32 %v9740_v49, %v3680_v52  ;;  %v3967_v55 = vadd.f32 %v9757_v5, %v3923_v53 }
 0xbdc   :  { %3733 = vst.msk [vmem:[#allocation2 + $0x8] sm:$0xff] %vm988_vm4, %v3725_v11  ;;  %3976 = vst.msk [vmem:[#allocation3 + $0x8] sm:$0xff] %vm988_vm4, %v3968_v51 }
 0xbdd   :  { %3732 = vst.msk [vmem:[#allocation2] sm:$0xff] %vm988_vm4, %v3724_v54  ;;  %3975 = vst.msk [vmem:[#allocation3] sm:$0xff] %vm988_vm4, %v3967_v55  ;;  %v11319_v57 = vpop.f32.mrb[74].mxu0  ;;  %v11367_v58 = vpop.f32.mrb[50].mxu1 }
 0xbde   :  { %v3727_v59 = vadd.f32 %v11319_v57, %v9740_v49  ;;  %v3970_v60 = vadd.f32 %v11367_v58, %v9757_v5  ;;  %v3690_v61 = vpop.f32.mrb[75].mxu0  ;;  %v3933_v62 = vpop.f32.mrb[51].mxu1  ;;  %v14781_v58 = vld [vmem:[%s16032_s5 + $0x1c8] ss:$0 sm:$0xff] }
 0xbdf   :  { %v3726_v0 = vadd.f32 %v9740_v49, %v3690_v61  ;;  %v3969_v2 = vadd.f32 %v9757_v5, %v3933_v62 }
 0xbe0   :  { %3735 = vst.msk [vmem:[#allocation2 + $0x18] sm:$0xff] %vm988_vm4, %v3727_v59  ;;  %3978 = vst.msk [vmem:[#allocation3 + $0x18] sm:$0xff] %vm988_vm4, %v3970_v60 }
 0xbe1   :  { %3734 = vst.msk [vmem:[#allocation2 + $0x10] sm:$0xff] %vm988_vm4, %v3726_v0  ;;  %3977 = vst.msk [vmem:[#allocation3 + $0x10] sm:$0xff] %vm988_vm4, %v3969_v2  ;;  %v11322_v3 = vpop.f32.mrb[76].mxu0  ;;  %v11370_v6 = vpop.f32.mrb[52].mxu1 }
 0xbe2   :  { %v3729_v7 = vadd.f32 %v11322_v3, %v9740_v49  ;;  %v3972_v9 = vadd.f32 %v11370_v6, %v9757_v5  ;;  %v3700_v10 = vpop.f32.mrb[77].mxu0  ;;  %v3943_v12 = vpop.f32.mrb[53].mxu1 }
 0xbe3   :  { %v3728_v15 = vadd.f32 %v9740_v49, %v3700_v10  ;;  %v3971_v16 = vadd.f32 %v9757_v5, %v3943_v12 }
 0xbe4   :  { %3737 = vst.msk [vmem:[#allocation2 + $0x28] sm:$0xff] %vm988_vm4, %v3729_v7  ;;  %3980 = vst.msk [vmem:[#allocation3 + $0x28] sm:$0xff] %vm988_vm4, %v3972_v9  ;;  %v4389_v27 = vld [vmem:[#allocation2] sm:$0xff] }
 0xbe5   :  { %3736 = vst.msk [vmem:[#allocation2 + $0x20] sm:$0xff] %vm988_vm4, %v3728_v15  ;;  %3979 = vst.msk [vmem:[#allocation3 + $0x20] sm:$0xff] %vm988_vm4, %v3971_v16  ;;  %v11325_v18 = vpop.f32.mrb[78].mxu0  ;;  %v11373_v21 = vpop.f32.mrb[54].mxu1  ;;  %v4397_v33 = vld [vmem:[#allocation3] sm:$0xff] }
 0xbe6   :  { %v3731_v22 = vadd.f32 %v11325_v18, %v9740_v49  ;;  %v3974_v23 = vadd.f32 %v11373_v21, %v9757_v5  ;;  %v3710_v24 = vpop.f32.mrb[79].mxu0  ;;  %v3953_v48 = vpop.f32.mrb[55].mxu1  ;;  %v4628_v21 = vld [vmem:[#allocation2 + $0x8] sm:$0xff] }
 0xbe7   :  { %v3730_v56 = vadd.f32 %v9740_v49, %v3710_v24  ;;  %v3973_v63 = vadd.f32 %v9757_v5, %v3953_v48 }
 0xbe8   :  { %3739 = vst.msk [vmem:[#allocation2 + $0x38] sm:$0xff] %vm988_vm4, %v3731_v22  ;;  %3982 = vst.msk [vmem:[#allocation3 + $0x38] sm:$0xff] %vm988_vm4, %v3974_v23 }
 0xbe9   :  { %3738 = vst.msk [vmem:[#allocation2 + $0x30] sm:$0xff] %vm988_vm4, %v3730_v56  ;;  %3981 = vst.msk [vmem:[#allocation3 + $0x30] sm:$0xff] %vm988_vm4, %v3973_v63  ;;  %v4315_v26 = vpop.f32.mrb[56].mxu1  ;;  %v4636_v63 = vld [vmem:[#allocation3 + $0x8] sm:$0xff] }
 0xbea   :  { %v4390_v28 = vadd.f32 %v4389_v27, %v4315_v26  ;;  %v11436_v29 = vpop.f32.mrb[57].mxu1 }
 0xbec   :  { %v9776_v31 = vmul.f32 -1.442695, %v4390_v28 }
 0xbee   :  { %13342 = vpow2.f32 %v9776_v31 }
 0xbf5   :  { %v4385_v32 = vpop.f32.mrb[58].mxu1 }
 0xbf6   :  { %v4398_v34 = vadd.f32 %v4397_v33, %v4385_v32  ;;  %v11451_v35 = vpop.f32.mrb[59].mxu1 }
 0xbf8   :  { %v9777_v37 = vmul.f32 -1.442695, %v4398_v34  ;;  %v13343_v19 = vpop.eup %13342 }
 0xbf9   :  { %v11412_v20 = vpop.f32.mrb[80].mxu0  ;;  %v4394_v43 = vadd.f32 1.0, %v13343_v19 }
 0xbfa   :  { %v4211_v39 = vadd.f32 %v11412_v20, %v9774_v17  ;;  %v4166_v40 = vpop.f32.mrb[81].mxu0  ;;  %13344 = vpow2.f32 %v9777_v37 }
 0xbfb   :  { %v4210_v42 = vadd.f32 %v9774_v17, %v4166_v40  ;;  %13346 = vrcp.f32 %v4394_v43 }
 0xbfc   :  { %4219 = vst.msk [vmem:[#allocation4 + $0x8] sm:$0xff] %vm988_vm4, %v4211_v39 }
 0xbfd   :  { %4218 = vst.msk [vmem:[#allocation4] sm:$0xff] %vm988_vm4, %v4210_v42  ;;  %v11415_v45 = vpop.f32.mrb[82].mxu0 }
 0xbfe   :  { %v4213_v46 = vadd.f32 %v11415_v45, %v9774_v17  ;;  %v4176_v49 = vpop.f32.mrb[83].mxu0 }
 0xbff   :  { %v4212_v5 = vadd.f32 %v9774_v17, %v4176_v49 }
 0xc00   :  { %4221 = vst.msk [vmem:[#allocation4 + $0x18] sm:$0xff] %vm988_vm4, %v4213_v46 }
 0xc01   :  { %4220 = vst.msk [vmem:[#allocation4 + $0x10] sm:$0xff] %vm988_vm4, %v4212_v5  ;;  %v11418_v50 = vpop.f32.mrb[84].mxu0  ;;  %v4867_v5 = vld [vmem:[#allocation2 + $0x10] sm:$0xff] }
 0xc02   :  { %v4215_v8 = vadd.f32 %v11418_v50, %v9774_v17  ;;  %v4186_v11 = vpop.f32.mrb[85].mxu0 }
 0xc03   :  { %v4214_v51 = vadd.f32 %v9774_v17, %v4186_v11  ;;  %v4644_v20 = vld [vmem:[#allocation4 + $0x8] sm:$0xff] }
 0xc04   :  { %4223 = vst.msk [vmem:[#allocation4 + $0x28] sm:$0xff] %vm988_vm4, %v4215_v8  ;;  %v13345_v52 = vpop.eup %13344  ;;  %v4405_v3 = vld [vmem:[#allocation4] sm:$0xff] }
 0xc05   :  { %4222 = vst.msk [vmem:[#allocation4 + $0x20] sm:$0xff] %vm988_vm4, %v4214_v51  ;;  %v11421_v53 = vpop.f32.mrb[86].mxu0  ;;  %v4402_v59 = vadd.f32 1.0, %v13345_v52  ;;  %v13347_v0 = vpop.eup %13346 }
 0xc06   :  { %v4217_v54 = vadd.f32 %v11421_v53, %v9774_v17  ;;  %v4196_v55 = vpop.f32.mrb[87].mxu0  ;;  %v4875_v53 = vld [vmem:[#allocation3 + $0x10] sm:$0xff] }
 0xc07   :  { %v4216_v57 = vadd.f32 %v9774_v17, %v4196_v55  ;;  %13348 = vrcp.f32 %v4402_v59 }
 0xc08   :  { %4225 = vst.msk [vmem:[#allocation4 + $0x38] sm:$0xff] %vm988_vm4, %v4217_v54 }
 0xc09   :  { %4224 = vst.msk [vmem:[#allocation4 + $0x30] sm:$0xff] %vm988_vm4, %v4216_v57  ;;  %v4472_v60 = vpop.f32.mrb[88].mxu0 }
 0xc0a   :  { %v4473_v61 = vadd.f32 %v14781_v58, %v4472_v60  ;;  %v11466_v62 = vpop.f32.mrb[89].mxu0 }
 0xc0c   :  { %v4476_v2 = vmul.f32 %v13347_v0, %v4473_v61 }
 0xc0e   :  { %v4477_v6 = vadd.f32 %v4476_v2, %v4405_v3 }
 0xc10   :  { %13350 = vtanh.f32 %v4477_v6 }
 0xc11   :  { %v13349_v7 = vpop.eup %13348 }
 0xc12   :  { %v4479_v9 = vsub.f32 1.0, %v13349_v7  ;;  %v4481_v12 = vmul.f32 0.0, %v13349_v7  ;;  %v4883_v7 = vld [vmem:[#allocation4 + $0x10] sm:$0xff] }
 0xc1a   :  { %v13351_v10 = vpop.eup %13350 }
 0xc1b   :  { %v4480_v15 = vmul.f32 %v13351_v10, %v4479_v9 }
 0xc1d   :  { %v4482_v16 = vadd.f32 %v4481_v12, %v4480_v15 }
 0xc1f   :  { %11480 = vmatmul.mubr.msk.f32.vlgmr.msra.gmra.mrb[60].mxu1 %vm988_vm4, %v4482_v16  ;;  %4483 = vst.msk [vmem:[#allocation5] sm:$0xff] %vm988_vm4, %v4482_v16  ;;  %4484 = vst.msk [vmem:[#allocation6 + $0x38] sm:$0xff] %vm988_vm4, %v4482_v16  ;;  %11495 = vmatmul.mubr.msk.f32.vlgmr.msra.gmra.mrb[90].mxu0 %vm988_vm4, %v4482_v16 }
 0xc20   :  { %12685 = vmatpush3.bf16.msra.mxu1 %v14690_v41  ;;  %11509 = vmatprep.mubr.msk.f32.mxu1 %vm13629_vm3, %v13630_v4 }
 0xc21   :  { %12686 = vmatprep.subr.bf16.mxu1 %v13628_v30  ;;  %12694 = vmatpush3.bf16.msra.mxu0 %v14539_v1 }
 0xc22   :  { %12695 = vmatprep.subr.bf16.mxu0 %v13628_v30  ;;  %11524 = vmatprep.mubr.msk.f32.mxu0 %vm13629_vm3, %v13630_v4 }
 0xc24   :  { %12688 = vmatpush3.bf16.msra.mxu1 %v14707_v44 }
 0xc25   :  { %12689 = vmatprep.subr.bf16.mxu1 %v13628_v30  ;;  %12697 = vmatpush3.bf16.msra.mxu0 %v14566_v13 }
 0xc26   :  { %12698 = vmatprep.subr.bf16.mxu0 %v13628_v30 }
 0xc28   :  { %12691 = vmatpush3.bf16.msra.mxu1 %v14723_v47 }
 0xc29   :  { %12701 = vmatprep.subr.bf16.mxu1 %v13628_v30  ;;  %12700 = vmatpush3.bf16.msra.mxu0 %v14594_v25 }
 0xc2a   :  { %12710 = vmatprep.subr.bf16.mxu0 %v13628_v30 }
 0xc2b   :  { %11510 = vmatmul.mubr.msk.f32.vlgmr.msra.gmra.mrb[62].mxu1 %vm988_vm4, %v4482_v16 }
 0xc2c   :  { %12703 = vmatpush3.bf16.msra.mxu1 %v14633_v14  ;;  %11539 = vmatprep.mubr.msk.f32.mxu1 %vm13629_vm3, %v13630_v4 }
 0xc2d   :  { %12704 = vmatprep.subr.bf16.mxu1 %v13628_v30 }
 0xc30   :  { %12706 = vmatpush3.bf16.msra.mxu1 %v14651_v36 }
 0xc31   :  { %12707 = vmatprep.subr.bf16.mxu1 %v13628_v30 }
 0xc34   :  { %12709 = vmatpush3.bf16.msra.mxu1 %v14669_v38 }
 0xc35   :  { %12719 = vmatprep.subr.bf16.mxu1 %v13628_v30 }
 0xcf2   :  { %v4554_v18 = vpop.f32.mrb[60].mxu1  ;;  %v4624_v22 = vpop.f32.mrb[90].mxu0 }
 0xcf3   :  { %v4629_v23 = vadd.f32 %v4628_v21, %v4554_v18  ;;  %v11481_v24 = vpop.f32.mrb[61].mxu1  ;;  %v11496_v48 = vpop.f32.mrb[91].mxu0  ;;  %v4637_v26 = vadd.f32 %v4636_v63, %v4624_v22 }
 0xcf5   :  { %v9780_v56 = vmul.f32 -1.442695, %v4629_v23  ;;  %v9781_v27 = vmul.f32 -1.442695, %v4637_v26  ;;  %v5106_v23 = vld [vmem:[#allocation2 + $0x18] sm:$0xff] }
 0xcf7   :  { %13352 = vpow2.f32 %v9780_v56 }
 0xcf8   :  { %13354 = vpow2.f32 %v9781_v27  ;;  %v5114_v27 = vld [vmem:[#allocation3 + $0x18] sm:$0xff] }
 0xcfe   :  { %v4711_v28 = vpop.f32.mrb[62].mxu1 }
 0xcff   :  { %v11511_v29 = vpop.f32.mrb[63].mxu1  ;;  %v4712_v35 = vadd.f32 %v14781_v58, %v4711_v28 }
 0xd01   :  { %v13353_v31 = vpop.eup %13352 }
 0xd02   :  { %v4633_v32 = vadd.f32 1.0, %v13353_v31  ;;  %v13355_v33 = vpop.eup %13354 }
 0xd03   :  { %v4641_v34 = vadd.f32 1.0, %v13355_v33 }
 0xd04   :  { %13356 = vrcp.f32 %v4633_v32 }
 0xd05   :  { %13358 = vrcp.f32 %v4641_v34 }
 0xd0e   :  { %v13357_v17 = vpop.eup %13356 }
 0xd0f   :  { %v4715_v37 = vmul.f32 %v13357_v17, %v4712_v35  ;;  %v13359_v39 = vpop.eup %13358 }
 0xd10   :  { %v4718_v40 = vsub.f32 1.0, %v13359_v39  ;;  %v4720_v43 = vmul.f32 %v13359_v39, %v4482_v16  ;;  %v5122_v39 = vld [vmem:[#allocation4 + $0x18] sm:$0xff] }
 0xd11   :  { %v4716_v19 = vadd.f32 %v4715_v37, %v4644_v20 }
 0xd13   :  { %13360 = vtanh.f32 %v4716_v19 }
 0xd1d   :  { %v13361_v42 = vpop.eup %13360 }
 0xd1e   :  { %v4719_v45 = vmul.f32 %v13361_v42, %v4718_v40 }
 0xd20   :  { %v4721_v46 = vadd.f32 %v4720_v43, %v4719_v45 }
 0xd22   :  { %4722 = vst.msk [vmem:[#allocation5 + $0x8] sm:$0xff] %vm988_vm4, %v4721_v46  ;;  %11525 = vmatmul.mubr.msk.f32.vlgmr.msra.gmra.mrb[92].mxu0 %vm988_vm4, %v4721_v46  ;;  %4723 = vst.msk [vmem:[#allocation6 + $0x30] sm:$0xff] %vm988_vm4, %v4721_v46  ;;  %11540 = vmatmul.mubr.msk.f32.vlgmr.msra.gmra.mrb[64].mxu1 %vm988_vm4, %v4721_v46 }
 0xd23   :  { %12712 = vmatpush3.bf16.msra.mxu0 %v14690_v41  ;;  %11554 = vmatprep.mubr.msk.f32.mxu0 %vm13629_vm3, %v13630_v4 }
 0xd24   :  { %12713 = vmatprep.subr.bf16.mxu0 %v13628_v30  ;;  %12721 = vmatpush3.bf16.msra.mxu1 %v14539_v1 }
 0xd25   :  { %12722 = vmatprep.subr.bf16.mxu1 %v13628_v30  ;;  %11569 = vmatprep.mubr.msk.f32.mxu1 %vm13629_vm3, %v13630_v4 }
 0xd27   :  { %12715 = vmatpush3.bf16.msra.mxu0 %v14707_v44 }
 0xd28   :  { %12716 = vmatprep.subr.bf16.mxu0 %v13628_v30  ;;  %12724 = vmatpush3.bf16.msra.mxu1 %v14566_v13 }
 0xd29   :  { %12725 = vmatprep.subr.bf16.mxu1 %v13628_v30 }
 0xd2b   :  { %12718 = vmatpush3.bf16.msra.mxu0 %v14723_v47 }
 0xd2c   :  { %12728 = vmatprep.subr.bf16.mxu0 %v13628_v30  ;;  %12727 = vmatpush3.bf16.msra.mxu1 %v14594_v25 }
 0xd2d   :  { %12737 = vmatprep.subr.bf16.mxu1 %v13628_v30 }
 0xd2e   :  { %11555 = vmatmul.mubr.msk.f32.vlgmr.msra.gmra.mrb[94].mxu0 %vm988_vm4, %v4721_v46 }
 0xd2f   :  { %12730 = vmatpush3.bf16.msra.mxu0 %v14633_v14  ;;  %11584 = vmatprep.mubr.msk.f32.mxu0 %vm13629_vm3, %v13630_v4 }
 0xd30   :  { %12731 = vmatprep.subr.bf16.mxu0 %v13628_v30 }
 0xd33   :  { %12733 = vmatpush3.bf16.msra.mxu0 %v14651_v36 }
 0xd34   :  { %12734 = vmatprep.subr.bf16.mxu0 %v13628_v30 }
 0xd37   :  { %12736 = vmatpush3.bf16.msra.mxu0 %v14669_v38 }
 0xd38   :  { %12746 = vmatprep.subr.bf16.mxu0 %v13628_v30 }
 0xdf5   :  { %v4793_v49 = vpop.f32.mrb[92].mxu0  ;;  %v4863_v50 = vpop.f32.mrb[64].mxu1 }
 0xdf6   :  { %v4868_v8 = vadd.f32 %v4867_v5, %v4793_v49  ;;  %v11526_v11 = vpop.f32.mrb[93].mxu0  ;;  %v11541_v51 = vpop.f32.mrb[65].mxu1  ;;  %v4876_v54 = vadd.f32 %v4875_v53, %v4863_v50 }
 0xdf8   :  { %v9785_v52 = vmul.f32 -1.442695, %v4868_v8  ;;  %v9786_v55 = vmul.f32 -1.442695, %v4876_v54  ;;  %v5345_v8 = vld [vmem:[#allocation2 + $0x20] sm:$0xff] }
 0xdfa   :  { %13362 = vpow2.f32 %v9785_v52 }
 0xdfb   :  { %13364 = vpow2.f32 %v9786_v55  ;;  %v5353_v55 = vld [vmem:[#allocation3 + $0x20] sm:$0xff] }
 0xe01   :  { %v4950_v57 = vpop.f32.mrb[94].mxu0 }
 0xe02   :  { %v11556_v59 = vpop.f32.mrb[95].mxu0  ;;  %v4951_v2 = vadd.f32 %v14781_v58, %v4950_v57 }
 0xe04   :  { %v13363_v60 = vpop.eup %13362 }
 0xe05   :  { %v4872_v61 = vadd.f32 1.0, %v13363_v60  ;;  %v13365_v62 = vpop.eup %13364 }
 0xe06   :  { %v4880_v0 = vadd.f32 1.0, %v13365_v62 }
 0xe07   :  { %13366 = vrcp.f32 %v4872_v61 }
 0xe08   :  { %13368 = vrcp.f32 %v4880_v0 }
 0xe11   :  { %v13367_v3 = vpop.eup %13366 }
 0xe12   :  { %v4954_v6 = vmul.f32 %v13367_v3, %v4951_v2  ;;  %v13369_v10 = vpop.eup %13368 }
 0xe13   :  { %v4957_v12 = vsub.f32 1.0, %v13369_v10  ;;  %v4959_v16 = vmul.f32 %v13369_v10, %v4721_v46  ;;  %v5361_v10 = vld [vmem:[#allocation4 + $0x20] sm:$0xff] }
 0xe14   :  { %v4955_v9 = vadd.f32 %v4954_v6, %v4883_v7 }
 0xe16   :  { %13370 = vtanh.f32 %v4955_v9 }
 0xe20   :  { %v13371_v15 = vpop.eup %13370 }
 0xe21   :  { %v4958_v18 = vmul.f32 %v13371_v15, %v4957_v12 }
 0xe23   :  { %v4960_v21 = vadd.f32 %v4959_v16, %v4958_v18 }
 0xe25   :  { %11570 = vmatmul.mubr.msk.f32.vlgmr.msra.gmra.mrb[66].mxu1 %vm988_vm4, %v4960_v21  ;;  %4961 = vst.msk [vmem:[#allocation5 + $0x10] sm:$0xff] %vm988_vm4, %v4960_v21  ;;  %4962 = vst.msk [vmem:[#allocation6 + $0x28] sm:$0xff] %vm988_vm4, %v4960_v21  ;;  %11585 = vmatmul.mubr.msk.f32.vlgmr.msra.gmra.mrb[96].mxu0 %vm988_vm4, %v4960_v21 }
 0xe26   :  { %12739 = vmatpush3.bf16.msra.mxu1 %v14690_v41  ;;  %11599 = vmatprep.mubr.msk.f32.mxu1 %vm13629_vm3, %v13630_v4 }
 0xe27   :  { %12740 = vmatprep.subr.bf16.mxu1 %v13628_v30  ;;  %12748 = vmatpush3.bf16.msra.mxu0 %v14539_v1 }
 0xe28   :  { %12749 = vmatprep.subr.bf16.mxu0 %v13628_v30  ;;  %11614 = vmatprep.mubr.msk.f32.mxu0 %vm13629_vm3, %v13630_v4 }
 0xe2a   :  { %12742 = vmatpush3.bf16.msra.mxu1 %v14707_v44 }
 0xe2b   :  { %12743 = vmatprep.subr.bf16.mxu1 %v13628_v30  ;;  %12751 = vmatpush3.bf16.msra.mxu0 %v14566_v13 }
 0xe2c   :  { %12752 = vmatprep.subr.bf16.mxu0 %v13628_v30 }
 0xe2e   :  { %12745 = vmatpush3.bf16.msra.mxu1 %v14723_v47 }
 0xe2f   :  { %12755 = vmatprep.subr.bf16.mxu1 %v13628_v30  ;;  %12754 = vmatpush3.bf16.msra.mxu0 %v14594_v25 }
 0xe30   :  { %12764 = vmatprep.subr.bf16.mxu0 %v13628_v30 }
 0xe31   :  { %11600 = vmatmul.mubr.msk.f32.vlgmr.msra.gmra.mrb[68].mxu1 %vm988_vm4, %v4960_v21 }
 0xe32   :  { %12757 = vmatpush3.bf16.msra.mxu1 %v14633_v14  ;;  %11629 = vmatprep.mubr.msk.f32.mxu1 %vm13629_vm3, %v13630_v4 }
 0xe33   :  { %12758 = vmatprep.subr.bf16.mxu1 %v13628_v30 }
 0xe36   :  { %12760 = vmatpush3.bf16.msra.mxu1 %v14651_v36 }
 0xe37   :  { %12761 = vmatprep.subr.bf16.mxu1 %v13628_v30 }
 0xe3a   :  { %12763 = vmatpush3.bf16.msra.mxu1 %v14669_v38 }
 0xe3b   :  { %12773 = vmatprep.subr.bf16.mxu1 %v13628_v30 }
 0xef8   :  { %v5032_v22 = vpop.f32.mrb[66].mxu1  ;;  %v5102_v24 = vpop.f32.mrb[96].mxu0 }
 0xef9   :  { %v5107_v48 = vadd.f32 %v5106_v23, %v5032_v22  ;;  %v11571_v56 = vpop.f32.mrb[67].mxu1  ;;  %v11586_v63 = vpop.f32.mrb[97].mxu0  ;;  %v5115_v28 = vadd.f32 %v5114_v27, %v5102_v24 }
 0xefb   :  { %v9790_v26 = vmul.f32 -1.442695, %v5107_v48  ;;  %v9791_v29 = vmul.f32 -1.442695, %v5115_v28  ;;  %v5584_v48 = vld [vmem:[#allocation2 + $0x28] sm:$0xff] }
 0xefd   :  { %13372 = vpow2.f32 %v9790_v26 }
 0xefe   :  { %13374 = vpow2.f32 %v9791_v29  ;;  %v5592_v29 = vld [vmem:[#allocation3 + $0x28] sm:$0xff] }
 0xf04   :  { %v5189_v31 = vpop.f32.mrb[68].mxu1 }
 0xf05   :  { %v11601_v32 = vpop.f32.mrb[69].mxu1  ;;  %v5190_v37 = vadd.f32 %v14781_v58, %v5189_v31 }
 0xf07   :  { %v13373_v33 = vpop.eup %13372 }
 0xf08   :  { %v5111_v34 = vadd.f32 1.0, %v13373_v33  ;;  %v13375_v35 = vpop.eup %13374 }
 0xf09   :  { %v5119_v17 = vadd.f32 1.0, %v13375_v35 }
 0xf0a   :  { %13376 = vrcp.f32 %v5111_v34 }
 0xf0b   :  { %13378 = vrcp.f32 %v5119_v17 }
 0xf14   :  { %v13377_v20 = vpop.eup %13376 }
 0xf15   :  { %v5193_v19 = vmul.f32 %v13377_v20, %v5190_v37  ;;  %v13379_v42 = vpop.eup %13378 }
 0xf16   :  { %v5196_v43 = vsub.f32 1.0, %v13379_v42  ;;  %v5198_v46 = vmul.f32 %v13379_v42, %v4960_v21  ;;  %v5600_v42 = vld [vmem:[#allocation4 + $0x28] sm:$0xff] }
 0xf17   :  { %v5194_v40 = vadd.f32 %v5193_v19, %v5122_v39 }
 0xf19   :  { %13380 = vtanh.f32 %v5194_v40 }
 0xf23   :  { %v13381_v45 = vpop.eup %13380 }
 0xf24   :  { %v5197_v49 = vmul.f32 %v13381_v45, %v5196_v43 }
 0xf26   :  { %v5199_v5 = vadd.f32 %v5198_v46, %v5197_v49 }
 0xf28   :  { %11615 = vmatmul.mubr.msk.f32.vlgmr.msra.gmra.mrb[98].mxu0 %vm988_vm4, %v5199_v5  ;;  %5200 = vst.msk [vmem:[#allocation5 + $0x18] sm:$0xff] %vm988_vm4, %v5199_v5  ;;  %5201 = vst.msk [vmem:[#allocation6 + $0x20] sm:$0xff] %vm988_vm4, %v5199_v5  ;;  %11630 = vmatmul.mubr.msk.f32.vlgmr.msra.gmra.mrb[70].mxu1 %vm988_vm4, %v5199_v5 }
 0xf29   :  { %12766 = vmatpush3.bf16.msra.mxu0 %v14690_v41  ;;  %11644 = vmatprep.mubr.msk.f32.mxu0 %vm13629_vm3, %v13630_v4 }
 0xf2a   :  { %12767 = vmatprep.subr.bf16.mxu0 %v13628_v30  ;;  %12775 = vmatpush3.bf16.msra.mxu1 %v14539_v1 }
 0xf2b   :  { %12776 = vmatprep.subr.bf16.mxu1 %v13628_v30  ;;  %11659 = vmatprep.mubr.msk.f32.mxu1 %vm13629_vm3, %v13630_v4 }
 0xf2d   :  { %12769 = vmatpush3.bf16.msra.mxu0 %v14707_v44 }
 0xf2e   :  { %12770 = vmatprep.subr.bf16.mxu0 %v13628_v30  ;;  %12778 = vmatpush3.bf16.msra.mxu1 %v14566_v13 }
 0xf2f   :  { %12779 = vmatprep.subr.bf16.mxu1 %v13628_v30 }
 0xf31   :  { %12772 = vmatpush3.bf16.msra.mxu0 %v14723_v47 }
 0xf32   :  { %12782 = vmatprep.subr.bf16.mxu0 %v13628_v30  ;;  %12781 = vmatpush3.bf16.msra.mxu1 %v14594_v25 }
 0xf33   :  { %12791 = vmatprep.subr.bf16.mxu1 %v13628_v30 }
 0xf34   :  { %11645 = vmatmul.mubr.msk.f32.vlgmr.msra.gmra.mrb[100].mxu0 %vm988_vm4, %v5199_v5 }
 0xf35   :  { %12784 = vmatpush3.bf16.msra.mxu0 %v14633_v14  ;;  %11674 = vmatprep.mubr.msk.f32.mxu0 %vm13629_vm3, %v13630_v4 }
 0xf36   :  { %12785 = vmatprep.subr.bf16.mxu0 %v13628_v30 }
 0xf39   :  { %12787 = vmatpush3.bf16.msra.mxu0 %v14651_v36 }
 0xf3a   :  { %12788 = vmatprep.subr.bf16.mxu0 %v13628_v30 }
 0xf3d   :  { %12790 = vmatpush3.bf16.msra.mxu0 %v14669_v38 }
 0xf3e   :  { %12800 = vmatprep.subr.bf16.mxu0 %v13628_v30 }
 0xffb   :  { %v5271_v50 = vpop.f32.mrb[98].mxu0  ;;  %v5341_v11 = vpop.f32.mrb[70].mxu1 }
 0xffc   :  { %v5346_v51 = vadd.f32 %v5345_v8, %v5271_v50  ;;  %v11616_v52 = vpop.f32.mrb[99].mxu0  ;;  %v11631_v53 = vpop.f32.mrb[71].mxu1  ;;  %v5354_v57 = vadd.f32 %v5353_v55, %v5341_v11 }
 0xffe   :  { %v9795_v54 = vmul.f32 -1.442695, %v5346_v51  ;;  %v9796_v59 = vmul.f32 -1.442695, %v5354_v57 }
0x1000   :  { %13382 = vpow2.f32 %v9795_v54  ;;  %v5831_v54 = vld [vmem:[#allocation3 + $0x30] sm:$0xff] }
0x1001   :  { %13384 = vpow2.f32 %v9796_v59 }
0x1007   :  { %v5428_v60 = vpop.f32.mrb[100].mxu0 }
0x1008   :  { %v11646_v61 = vpop.f32.mrb[101].mxu0  ;;  %v5429_v6 = vadd.f32 %v14781_v58, %v5428_v60 }
0x100a   :  { %v13383_v62 = vpop.eup %13382 }
0x100b   :  { %v5350_v0 = vadd.f32 1.0, %v13383_v62  ;;  %v13385_v2 = vpop.eup %13384 }
0x100c   :  { %v5358_v3 = vadd.f32 1.0, %v13385_v2 }
0x100d   :  { %13386 = vrcp.f32 %v5350_v0 }
0x100e   :  { %13388 = vrcp.f32 %v5358_v3  ;;  %v5839_v3 = vld [vmem:[#allocation4 + $0x30] sm:$0xff] }
0x1017   :  { %v13387_v7 = vpop.eup %13386 }
0x1018   :  { %v5432_v9 = vmul.f32 %v13387_v7, %v5429_v6  ;;  %v13389_v15 = vpop.eup %13388 }
0x1019   :  { %v5435_v16 = vsub.f32 1.0, %v13389_v15  ;;  %v5437_v21 = vmul.f32 %v13389_v15, %v5199_v5 }
0x101a   :  { %v5433_v12 = vadd.f32 %v5432_v9, %v5361_v10 }
0x101c   :  { %13390 = vtanh.f32 %v5433_v12 }
0x1026   :  { %v13391_v18 = vpop.eup %13390 }
0x1027   :  { %v5436_v22 = vmul.f32 %v13391_v18, %v5435_v16  ;;  %v6471_v18 = vld [vmem:[%s16033_s6 + $0xc0] sm:$0xff] }
0x1029   :  { %v5438_v23 = vadd.f32 %v5437_v21, %v5436_v22  ;;  %v6180_v21 = vld [vmem:[%s16033_s6 + $0x90] sm:$0xff] }
0x102b   :  { %11660 = vmatmul.mubr.msk.f32.vlgmr.msra.gmra.mrb[72].mxu1 %vm988_vm4, %v5438_v23  ;;  %5439 = vst.msk [vmem:[#allocation5 + $0x20] sm:$0xff] %vm988_vm4, %v5438_v23  ;;  %5440 = vst.msk [vmem:[#allocation6 + $0x18] sm:$0xff] %vm988_vm4, %v5438_v23  ;;  %11675 = vmatmul.mubr.msk.f32.vlgmr.msra.gmra.mrb[102].mxu0 %vm988_vm4, %v5438_v23 }
0x102c   :  { %12793 = vmatpush3.bf16.msra.mxu1 %v14690_v41  ;;  %11689 = vmatprep.mubr.msk.f32.mxu1 %vm13629_vm3, %v13630_v4 }
0x102d   :  { %12794 = vmatprep.subr.bf16.mxu1 %v13628_v30  ;;  %12802 = vmatpush3.bf16.msra.mxu0 %v14539_v1 }
0x102e   :  { %12803 = vmatprep.subr.bf16.mxu0 %v13628_v30  ;;  %11704 = vmatprep.mubr.msk.f32.mxu0 %vm13629_vm3, %v13630_v4 }
0x1030   :  { %12796 = vmatpush3.bf16.msra.mxu1 %v14707_v44 }
0x1031   :  { %12797 = vmatprep.subr.bf16.mxu1 %v13628_v30  ;;  %12805 = vmatpush3.bf16.msra.mxu0 %v14566_v13 }
0x1032   :  { %12806 = vmatprep.subr.bf16.mxu0 %v13628_v30 }
0x1034   :  { %12799 = vmatpush3.bf16.msra.mxu1 %v14723_v47 }
0x1035   :  { %12809 = vmatprep.subr.bf16.mxu1 %v13628_v30  ;;  %12808 = vmatpush3.bf16.msra.mxu0 %v14594_v25 }
0x1036   :  { %12818 = vmatprep.subr.bf16.mxu0 %v13628_v30 }
0x1037   :  { %11690 = vmatmul.mubr.msk.f32.vlgmr.msra.gmra.mrb[74].mxu1 %vm988_vm4, %v5438_v23 }
0x1038   :  { %12811 = vmatpush3.bf16.msra.mxu1 %v14633_v14  ;;  %11719 = vmatprep.mubr.msk.f32.mxu1 %vm13629_vm3, %v13630_v4 }
0x1039   :  { %12812 = vmatprep.subr.bf16.mxu1 %v13628_v30 }
0x103c   :  { %12814 = vmatpush3.bf16.msra.mxu1 %v14651_v36 }
0x103d   :  { %12815 = vmatprep.subr.bf16.mxu1 %v13628_v30 }
0x1040   :  { %12817 = vmatpush3.bf16.msra.mxu1 %v14669_v38 }
0x1041   :  { %12827 = vmatprep.subr.bf16.mxu1 %v13628_v30 }
0x10fe   :  { %v5510_v24 = vpop.f32.mrb[72].mxu1  ;;  %v5580_v56 = vpop.f32.mrb[102].mxu0 }
0x10ff   :  { %v5585_v63 = vadd.f32 %v5584_v48, %v5510_v24  ;;  %v11661_v26 = vpop.f32.mrb[73].mxu1  ;;  %v11676_v27 = vpop.f32.mrb[103].mxu0  ;;  %v5593_v31 = vadd.f32 %v5592_v29, %v5580_v56  ;;  %v6474_v24 = vld [vmem:[%s16033_s6 + $0xd8] sm:$0xff]  ;;  %v6182_v48 = vld [vmem:[%s16033_s6 + $0xa0] sm:$0xff] }
0x1100   :  { %v6475_v26 = vld [vmem:[%s16033_s6 + $0xe0] sm:$0xff]  ;;  %v6476_v27 = vld [vmem:[%s16033_s6 + $0xe8] sm:$0xff] }
0x1101   :  { %v9800_v28 = vmul.f32 -1.442695, %v5585_v63  ;;  %v9801_v32 = vmul.f32 -1.442695, %v5593_v31  ;;  %v6183_v63 = vld [vmem:[%s16033_s6 + $0xa8] sm:$0xff]  ;;  %v12886_v29 = vpack.c.bf16 %v6476_v27, %v6475_v26  ;;  %v6184_v31 = vld [vmem:[%s16033_s6 + $0xb0] sm:$0xff] }
0x1102   :  { %v6951_v26 = vld [vmem:[%s16033_s6 + $0x120] sm:$0xff]  ;;  %v6952_v27 = vld [vmem:[%s16033_s6 + $0x128] sm:$0xff] }
0x1103   :  { %13392 = vpow2.f32 %v9800_v28  ;;  %v12858_v28 = vpack.c.bf16 %v6183_v63, %v6182_v48  ;;  %v15096_v48 = vld [vmem:[#allocation6 + $0x28] sm:$0xff]  ;;  %v15102_v63 = vld [vmem:[#allocation6 + $0x30] sm:$0xff] }
0x1104   :  { %13394 = vpow2.f32 %v9801_v32  ;;  %v6185_v32 = vld [vmem:[%s16033_s6 + $0xb8] sm:$0xff] }
0x110a   :  { %v5667_v33 = vpop.f32.mrb[74].mxu1 }
0x110b   :  { %v11691_v34 = vpop.f32.mrb[75].mxu1  ;;  %v5668_v19 = vadd.f32 %v14781_v58, %v5667_v33  ;;  %v12862_v33 = vpack.c.bf16 %v6185_v32, %v6184_v31  ;;  %v6716_v31 = vld [vmem:[%s16033_s6 + $0x100] sm:$0xff]  ;;  %v6717_v32 = vld [vmem:[%s16033_s6 + $0x108] sm:$0xff] }
0x110c   :  { %v6465_v34 = vld [vmem:[%s16033_s6 + $0x30] sm:$0xff] }
0x110d   :  { %v13393_v35 = vpop.eup %13392 }
0x110e   :  { %v5589_v17 = vadd.f32 1.0, %v13393_v35  ;;  %v13395_v37 = vpop.eup %13394  ;;  %v6466_v35 = vld [vmem:[%s16033_s6 + $0x38] sm:$0xff] }
0x110f   :  { %v5597_v20 = vadd.f32 1.0, %v13395_v37  ;;  %v6174_v37 = vld [vmem:[%s16033_s6] sm:$0xff] }
0x1110   :  { %13396 = vrcp.f32 %v5589_v17  ;;  %v12890_v17 = vpack.c.bf16 %v6466_v35, %v6465_v34  ;;  %v15135_v34 = vld [vmem:[#allocation5 + $0x8] sm:$0xff]  ;;  %v6953_v35 = vld [vmem:[%s16033_s6 + $0x130] sm:$0xff] }
0x1111   :  { %13398 = vrcp.f32 %v5597_v20  ;;  %v6175_v20 = vld [vmem:[%s16033_s6 + $0x8] sm:$0xff] }
0x111a   :  { %v13397_v39 = vpop.eup %13396 }
0x111b   :  { %v5671_v40 = vmul.f32 %v13397_v39, %v5668_v19  ;;  %v13399_v45 = vpop.eup %13398  ;;  %v12866_v19 = vpack.c.bf16 %v6175_v20, %v6174_v37  ;;  %v12906_v37 = vpack.c.bf16 %v6717_v32, %v6716_v31  ;;  %v15147_v20 = vld [vmem:[#allocation5 + $0x10] sm:$0xff] }
0x111c   :  { %v5674_v46 = vsub.f32 1.0, %v13399_v45  ;;  %v5676_v5 = vmul.f32 %v13399_v45, %v5438_v23  ;;  %v6473_v23 = vld [vmem:[%s16033_s6 + $0xd0] sm:$0xff] }
0x111d   :  { %v5672_v43 = vadd.f32 %v5671_v40, %v5600_v42  ;;  %v12882_v56 = vpack.c.bf16 %v6474_v24, %v6473_v23  ;;  %v6062_v40 = vld [vmem:[#allocation2 + $0x38] sm:$0xff]  ;;  %v6714_v23 = vld [vmem:[%s16033_s6 + $0xf0] sm:$0xff] }
0x111e   :  { %v6715_v24 = vld [vmem:[%s16033_s6 + $0xf8] sm:$0xff] }
0x111f   :  { %13400 = vtanh.f32 %v5672_v43 }
0x1129   :  { %v13401_v49 = vpop.eup %13400 }
0x112a   :  { %v5675_v50 = vmul.f32 %v13401_v49, %v5674_v46 }
0x112c   :  { %v5677_v8 = vadd.f32 %v5676_v5, %v5675_v50  ;;  %v6070_v5 = vld [vmem:[#allocation3 + $0x38] sm:$0xff] }
0x112e   :  { %11705 = vmatmul.mubr.msk.f32.vlgmr.msra.gmra.mrb[104].mxu0 %vm988_vm4, %v5677_v8  ;;  %5678 = vst.msk [vmem:[#allocation5 + $0x28] sm:$0xff] %vm988_vm4, %v5677_v8  ;;  %5679 = vst.msk [vmem:[#allocation6 + $0x10] sm:$0xff] %vm988_vm4, %v5677_v8  ;;  %11720 = vmatmul.mubr.msk.f32.vlgmr.msra.gmra.mrb[76].mxu1 %vm988_vm4, %v5677_v8 }
0x112f   :  { %12820 = vmatpush3.bf16.msra.mxu0 %v14690_v41  ;;  %11734 = vmatprep.mubr.msk.f32.mxu0 %vm13629_vm3, %v13630_v4 }
0x1130   :  { %12821 = vmatprep.subr.bf16.mxu0 %v13628_v30  ;;  %12829 = vmatpush3.bf16.msra.mxu1 %v14539_v1 }
0x1131   :  { %12830 = vmatprep.subr.bf16.mxu1 %v13628_v30  ;;  %11749 = vmatprep.mubr.msk.f32.mxu1 %vm13629_vm3, %v13630_v4 }
0x1133   :  { %12823 = vmatpush3.bf16.msra.mxu0 %v14707_v44 }
0x1134   :  { %12824 = vmatprep.subr.bf16.mxu0 %v13628_v30  ;;  %12832 = vmatpush3.bf16.msra.mxu1 %v14566_v13  ;;  %v5823_v13 = vld [vmem:[#allocation2 + $0x30] sm:$0xff] }
0x1135   :  { %12833 = vmatprep.subr.bf16.mxu1 %v13628_v30 }
0x1137   :  { %12826 = vmatpush3.bf16.msra.mxu0 %v14723_v47 }
0x1138   :  { %12836 = vmatprep.subr.bf16.mxu0 %v13628_v30  ;;  %12835 = vmatpush3.bf16.msra.mxu1 %v14594_v25 }
0x1139   :  { %12845 = vmatprep.subr.bf16.mxu1 %v13628_v30 }
0x113a   :  { %11735 = vmatmul.mubr.msk.f32.vlgmr.msra.gmra.mrb[106].mxu0 %vm988_vm4, %v5677_v8 }
0x113b   :  { %12838 = vmatpush3.bf16.msra.mxu0 %v14633_v14  ;;  %11764 = vmatprep.mubr.msk.f32.mxu0 %vm13629_vm3, %v13630_v4 }
0x113c   :  { %12839 = vmatprep.subr.bf16.mxu0 %v13628_v30 }
0x113f   :  { %12841 = vmatpush3.bf16.msra.mxu0 %v14651_v36 }
0x1140   :  { %12842 = vmatprep.subr.bf16.mxu0 %v13628_v30 }
0x1143   :  { %12844 = vmatpush3.bf16.msra.mxu0 %v14669_v38 }
0x1201   :  { %v5749_v1 = vpop.f32.mrb[104].mxu0  ;;  %v5819_v25 = vpop.f32.mrb[76].mxu1 }
0x1202   :  { %v5824_v11 = vadd.f32 %v5823_v13, %v5749_v1  ;;  %v11706_v51 = vpop.f32.mrb[105].mxu0  ;;  %v11721_v52 = vpop.f32.mrb[77].mxu1  ;;  %v5832_v14 = vadd.f32 %v5831_v54, %v5819_v25 }
0x1204   :  { %v9805_v53 = vmul.f32 -1.442695, %v5824_v11  ;;  %v9806_v55 = vmul.f32 -1.442695, %v5832_v14 }
0x1206   :  { %13402 = vpow2.f32 %v9805_v53 }
0x1207   :  { %13404 = vpow2.f32 %v9806_v55  ;;  %v6078_v55 = vld [vmem:[#allocation4 + $0x38] sm:$0xff] }
0x120d   :  { %v5906_v57 = vpop.f32.mrb[106].mxu0 }
0x120e   :  { %v11736_v59 = vpop.f32.mrb[107].mxu0  ;;  %v5907_v38 = vadd.f32 %v14781_v58, %v5906_v57 }
0x1210   :  { %v13403_v60 = vpop.eup %13402 }
0x1211   :  { %v5828_v36 = vadd.f32 1.0, %v13403_v60  ;;  %v13405_v61 = vpop.eup %13404 }
0x1212   :  { %v5836_v62 = vadd.f32 1.0, %v13405_v61 }
0x1213   :  { %13406 = vrcp.f32 %v5828_v36 }
0x1214   :  { %13408 = vrcp.f32 %v5836_v62 }
0x121d   :  { %v13407_v0 = vpop.eup %13406 }
0x121e   :  { %v5910_v2 = vmul.f32 %v13407_v0, %v5907_v38  ;;  %v13409_v7 = vpop.eup %13408  ;;  %v6468_v0 = vld [vmem:[%s16033_s6 + $0x48] sm:$0xff] }
0x121f   :  { %v5913_v9 = vsub.f32 1.0, %v13409_v7  ;;  %v5915_v12 = vmul.f32 %v13409_v7, %v5677_v8 }
0x1220   :  { %v5911_v6 = vadd.f32 %v5910_v2, %v5839_v3  ;;  %v6176_v2 = vld [vmem:[%s16033_s6 + $0x10] sm:$0xff]  ;;  %v6177_v3 = vld [vmem:[%s16033_s6 + $0x18] sm:$0xff] }
0x1222   :  { %13410 = vtanh.f32 %v5911_v6 }
0x122c   :  { %v13411_v10 = vpop.eup %13410 }
0x122d   :  { %v5914_v15 = vmul.f32 %v13411_v10, %v5913_v9  ;;  %v15056_v9 = vld [vmem:[#allocation6 + $0x10] sm:$0xff] }
0x122f   :  { %v14965_v16 = vadd.f32 %v5915_v12, %v5914_v15  ;;  %v12870_v12 = vpack.c.bf16 %v6177_v3, %v6176_v2  ;;  %v6469_v15 = vld [vmem:[%s16033_s6 + $0x50] sm:$0xff]  ;;  %v6963_v2 = vld [vmem:[%s16033_s6 + $0x180] sm:$0xff]  ;;  %v6964_v3 = vld [vmem:[%s16033_s6 + $0x188] sm:$0xff] }
0x1231   :  { %5918 = vst.msk [vmem:[#allocation6 + $0x8] sm:$0xff] %vm988_vm4, %v14965_v16  ;;  %11750 = vmatmul.mubr.msk.f32.vlgmr.msra.gmra.mrb[78].mxu1 %vm988_vm4, %v14965_v16  ;;  %5917 = vst.msk [vmem:[#allocation5 + $0x30] sm:$0xff] %vm988_vm4, %v14965_v16  ;;  %11765 = vmatmul.mubr.msk.f32.vlgmr.msra.gmra.mrb[108].mxu0 %vm988_vm4, %v14965_v16 }
0x1232   :  { %12847 = vmatpush3.bf16.msra.mxu1 %v14690_v41  ;;  %11779 = vmatprep.mubr.msk.f32.mxu1 %vm13629_vm3, %v13630_v4  ;;  %v6472_v41 = vld [vmem:[%s16033_s6 + $0xc8] sm:$0xff] }
0x1233   :  { %12848 = vmatprep.subr.bf16.mxu1 %v13628_v30 }
0x1236   :  { %12850 = vmatpush3.bf16.msra.mxu1 %v14707_v44  ;;  %v12878_v44 = vpack.c.bf16 %v6472_v41, %v6471_v18  ;;  %v6178_v18 = vld [vmem:[%s16033_s6 + $0x20] sm:$0xff]  ;;  %v6179_v41 = vld [vmem:[%s16033_s6 + $0x28] sm:$0xff] }
0x1237   :  { %12851 = vmatprep.subr.bf16.mxu1 %v13628_v30 }
0x1238   :  { %v15054_v7 = vld [vmem:[#allocation6 + $0x8] sm:$0xff] }
0x123a   :  { %12853 = vmatpush3.bf16.msra.mxu1 %v14723_v47  ;;  %v6181_v47 = vld [vmem:[%s16033_s6 + $0x98] sm:$0xff] }
0x123b   :  { %v12854_v22 = vpack.c.bf16 %v6181_v47, %v6180_v21  ;;  %12879 = vmatprep.subr.bf16.mxu1 %v12878_v44  ;;  %v15078_v21 = vld [vmem:[#allocation6 + $0x18] sm:$0xff]  ;;  %v12874_v47 = vpack.c.bf16 %v6179_v41, %v6178_v18  ;;  %v9829_v18 = vld [vmem:[%s16033_s6 + $0x1b0] ss:$0 sm:$0xff] }
0x123c   :  { %v9846_v41 = vld [vmem:[%s16033_s6 + $0x1b8] ss:$0 sm:$0xff] }
0x123d   :  { %11780 = vmatmul.mubr.msk.f32.vlgmr.msra.gmra.mrb[80].mxu1 %vm988_vm4, %v14965_v16  ;;  %12855 = vmatprep.subr.bf16.mxu0 %v12854_v22 }
0x123e   :  { %12881 = vmatpush3.bf16.msra.mxu1 %v12878_v44  ;;  %12857 = vmatpush3.bf16.msra.mxu0 %v12854_v22  ;;  %v15084_v22 = vld [vmem:[#allocation6 + $0x20] sm:$0xff] }
0x123f   :  { %12883 = vmatprep.subr.bf16.mxu1 %v12882_v56  ;;  %12859 = vmatprep.subr.bf16.mxu0 %v12858_v28 }
0x1242   :  { %12885 = vmatpush3.bf16.msra.mxu1 %v12882_v56  ;;  %12861 = vmatpush3.bf16.msra.mxu0 %v12858_v28  ;;  %v12902_v56 = vpack.c.bf16 %v6715_v24, %v6714_v23  ;;  %v15114_v28 = vld [vmem:[#allocation6 + $0x38] sm:$0xff] }
0x1243   :  { %12887 = vmatprep.subr.bf16.mxu1 %v12886_v29  ;;  %12863 = vmatprep.subr.bf16.mxu0 %v12862_v33 }
0x1246   :  { %12889 = vmatpush3.bf16.msra.mxu1 %v12886_v29  ;;  %12865 = vmatpush3.bf16.msra.mxu0 %v12862_v33  ;;  %v15121_v29 = vld [vmem:[#allocation5] sm:$0xff]  ;;  %v15133_v33 = vpack.c.bf16 %v6952_v27, %v6951_v26 }
0x1247   :  { %12891 = vmatprep.subr.bf16.mxu1 %v12890_v17  ;;  %12867 = vmatprep.subr.bf16.mxu0 %v12866_v19 }
0x1304   :  { %v5988_v39 = vpop.f32.mrb[78].mxu1  ;;  %v6058_v42 = vpop.f32.mrb[108].mxu0 }
0x1305   :  { %v6063_v43 = vadd.f32 %v6062_v40, %v5988_v39  ;;  %v11751_v45 = vpop.f32.mrb[79].mxu1  ;;  %v11766_v46 = vpop.f32.mrb[109].mxu0  ;;  %v6071_v50 = vadd.f32 %v6070_v5, %v6058_v42  ;;  %v6719_v39 = vld [vmem:[%s16033_s6 + $0x118] sm:$0xff]  ;;  %v6708_v5 = vld [vmem:[%s16033_s6 + $0x60] sm:$0xff] }
0x1306   :  { %v15162_v42 = vld [vmem:[#allocation5 + $0x18] sm:$0xff]  ;;  %v6956_v45 = vld [vmem:[%s16033_s6 + $0x148] sm:$0xff] }
0x1307   :  { %v9810_v49 = vmul.f32 -1.442695, %v6063_v43  ;;  %v9811_v8 = vmul.f32 -1.442695, %v6071_v50  ;;  %v6955_v43 = vld [vmem:[%s16033_s6 + $0x140] sm:$0xff]  ;;  %v6709_v50 = vld [vmem:[%s16033_s6 + $0x68] sm:$0xff] }
0x1309   :  { %13412 = vpow2.f32 %v9810_v49  ;;  %v15175_v49 = vld [vmem:[#allocation5 + $0x20] sm:$0xff] }
0x130a   :  { %13414 = vpow2.f32 %v9811_v8  ;;  %v15188_v8 = vpack.c.bf16 %v6956_v45, %v6955_v43 }
0x1310   :  { %v6145_v1 = vpop.f32.mrb[80].mxu1 }
0x1311   :  { %v11781_v13 = vpop.f32.mrb[81].mxu1  ;;  %v6146_v53 = vadd.f32 %v14781_v58, %v6145_v1  ;;  %v6467_v58 = vld [vmem:[%s16033_s6 + $0x40] sm:$0xff]  ;;  %v15190_v1 = vld [vmem:[#allocation5 + $0x28] sm:$0xff] }
0x1312   :  { %v12894_v10 = vpack.c.bf16 %v6468_v0, %v6467_v58  ;;  %v12914_v13 = vpack.c.bf16 %v6709_v50, %v6708_v5 }
0x1313   :  { %v13413_v25 = vpop.eup %13412 }
0x1314   :  { %v6067_v11 = vadd.f32 1.0, %v13413_v25  ;;  %v13415_v51 = vpop.eup %13414  ;;  %v15197_v25 = vld [vmem:[#allocation5 + $0x30] sm:$0xff] }
0x1315   :  { %v6075_v52 = vadd.f32 1.0, %v13415_v51  ;;  %v6958_v51 = vld [vmem:[%s16033_s6 + $0x158] sm:$0xff] }
0x1316   :  { %13416 = vrcp.f32 %v6067_v11  ;;  %v6957_v11 = vld [vmem:[%s16033_s6 + $0x150] sm:$0xff] }
0x1317   :  { %13418 = vrcp.f32 %v6075_v52 }
0x1320   :  { %v13417_v54 = vpop.eup %13416 }
0x1321   :  { %v6149_v14 = vmul.f32 %v13417_v54, %v6146_v53  ;;  %v13419_v59 = vpop.eup %13418  ;;  %v6710_v53 = vld [vmem:[%s16033_s6 + $0x70] sm:$0xff]  ;;  %v6711_v54 = vld [vmem:[%s16033_s6 + $0x78] sm:$0xff] }
0x1322   :  { %v6152_v60 = vsub.f32 1.0, %v13419_v59  ;;  %v6154_v61 = vmul.f32 %v13419_v59, %v14965_v16  ;;  %v6470_v16 = vld [vmem:[%s16033_s6 + $0x58] sm:$0xff]  ;;  %v12918_v59 = vpack.c.bf16 %v6711_v54, %v6710_v53 }
0x1323   :  { %v6150_v57 = vadd.f32 %v6149_v14, %v6078_v55  ;;  %v12898_v44 = vpack.c.bf16 %v6470_v16, %v6469_v15  ;;  %v15227_v14 = vpack.c.bf16 %v6958_v51, %v6957_v11  ;;  %v6959_v55 = vld [vmem:[%s16033_s6 + $0x160] sm:$0xff]  ;;  %v6968_v15 = vld [vmem:[%s16033_s6 + $0x1a8] sm:$0xff] }
0x1325   :  { %13420 = vtanh.f32 %v6150_v57  ;;  %v6960_v57 = vld [vmem:[%s16033_s6 + $0x168] sm:$0xff] }
0x132f   :  { %v13421_v36 = vpop.eup %13420 }
0x1330   :  { %v6153_v62 = vmul.f32 %v13421_v36, %v6152_v60  ;;  %v6712_v60 = vld [vmem:[%s16033_s6 + $0x80] sm:$0xff]  ;;  %v6713_v36 = vld [vmem:[%s16033_s6 + $0x88] sm:$0xff] }
0x1331   :  { %v12922_v58 = vpack.c.bf16 %v6713_v36, %v6712_v60  ;;  %v9863_v36 = vld [vmem:[%s16033_s6 + $0x1c0] ss:$0 sm:$0xff] }
0x1332   :  { %v6155_v38 = vadd.f32 %v6154_v61, %v6153_v62  ;;  %v15247_v61 = vpack.c.bf16 %v6960_v57, %v6959_v55  ;;  %v6961_v62 = vld [vmem:[%s16033_s6 + $0x170] sm:$0xff] }
0x1334   :  { %6156 = vst.msk [vmem:[#allocation5 + $0x38] sm:$0xff] %vm988_vm4, %v6155_v38  ;;  %6157 = vst.msk [vmem:[#allocation6] sm:$0xff] %vm988_vm4, %v6155_v38  ;;  %v6962_v38 = vld [vmem:[%s16033_s6 + $0x178] sm:$0xff] }
0x1335   :  { %v15263_v0 = vpack.c.bf16 %v6962_v38, %v6961_v62 }
0x133b   :  { %v15048_v6 = vld [vmem:[#allocation6] sm:$0xff]  ;;  %v15210_v52 = vld [vmem:[#allocation5 + $0x38] sm:$0xff] }
0x133c   :  { %11794 = vmatprep.mubr.msk.f32.mxu0 %vm988_vm4, %v15048_v6  ;;  %11842 = vmatprep.mubr.msk.f32.mxu1 %vm988_vm4, %v15048_v6 }
0x133d   :  { %11795 = vmatmul.mubr.msk.f32.vlgmr.msra.gmra.mrb[110].mxu0 %vm988_vm4, %v15054_v7  ;;  %11843 = vmatmul.mubr.msk.f32.vlgmr.msra.gmra.mrb[82].mxu1 %vm988_vm4, %v15054_v7 }
0x133e   :  { %12893 = vmatpush3.bf16.msra.mxu1 %v12890_v17  ;;  %11797 = vmatprep.mubr.msk.f32.mxu0 %vm988_vm4, %v15056_v9  ;;  %v6954_v17 = vld [vmem:[%s16033_s6 + $0x138] sm:$0xff] }
0x133f   :  { %11845 = vmatprep.mubr.msk.f32.mxu1 %vm988_vm4, %v15056_v9  ;;  %12869 = vmatpush3.bf16.msra.mxu0 %v12866_v19  ;;  %v6718_v19 = vld [vmem:[%s16033_s6 + $0x110] sm:$0xff]  ;;  %v15160_v40 = vpack.c.bf16 %v6954_v17, %v6953_v35 }
0x1340   :  { %12895 = vmatprep.subr.bf16.mxu1 %v12894_v10  ;;  %12871 = vmatprep.subr.bf16.mxu0 %v12870_v12  ;;  %v12910_v46 = vpack.c.bf16 %v6719_v39, %v6718_v19 }
0x1341   :  { %11798 = vmatmul.mubr.msk.f32.gmra.mrb[112].mxu0 %vm988_vm4, %v15078_v21  ;;  %11846 = vmatmul.mubr.msk.f32.gmra.mrb[84].mxu1 %vm988_vm4, %v15078_v21 }
0x1342   :  { %11800 = vmatprep.mubr.msk.f32.mxu0 %vm988_vm4, %v15084_v22  ;;  %11848 = vmatprep.mubr.msk.f32.mxu1 %vm988_vm4, %v15084_v22 }
0x1343   :  { %12897 = vmatpush3.bf16.msra.mxu1 %v12894_v10  ;;  %12873 = vmatpush3.bf16.msra.mxu0 %v12870_v12  ;;  %v6967_v12 = vld [vmem:[%s16033_s6 + $0x1a0] sm:$0xff] }
0x1344   :  { %12899 = vmatprep.subr.bf16.mxu1 %v12898_v44  ;;  %12875 = vmatprep.subr.bf16.mxu0 %v12874_v47  ;;  %v15309_v16 = vpack.c.bf16 %v6968_v15, %v6967_v12 }
0x1345   :  { %11801 = vmatmul.mubr.msk.f32.gmra.mrb[114].mxu0 %vm988_vm4, %v15096_v48  ;;  %11849 = vmatmul.mubr.msk.f32.gmra.mrb[86].mxu1 %vm988_vm4, %v15096_v48 }
0x1346   :  { %11803 = vmatprep.mubr.msk.f32.mxu0 %vm988_vm4, %v15102_v63  ;;  %11851 = vmatprep.mubr.msk.f32.mxu1 %vm988_vm4, %v15102_v63 }
0x1347   :  { %12901 = vmatpush3.bf16.msra.mxu1 %v12898_v44  ;;  %12877 = vmatpush3.bf16.msra.mxu0 %v12874_v47 }
0x1348   :  { %12926 = vmatprep.subr.bf16.mxu1 %v13628_v30  ;;  %12903 = vmatprep.subr.bf16.mxu0 %v12902_v56 }
0x1349   :  { %11804 = vmatmul.mubr.msk.f32.gmra.mrb[116].mxu0 %vm988_vm4, %v15114_v28  ;;  %11852 = vmatmul.mubr.msk.f32.gmra.mrb[88].mxu1 %vm988_vm4, %v15114_v28 }
0x134a   :  { %11818 = vmatprep.mubr.msk.f32.mxu0 %vm988_vm4, %v15121_v29  ;;  %11866 = vmatprep.mubr.msk.f32.mxu1 %vm988_vm4, %v15121_v29 }
0x134d   :  { %11819 = vmatmul.mubr.msk.f32.vlgmr.msra.gmra.mrb[110].mxu0 %vm988_vm4, %v15135_v34  ;;  %11867 = vmatmul.mubr.msk.f32.vlgmr.msra.gmra.mrb[82].mxu1 %vm988_vm4, %v15135_v34 }
0x134e   :  { %12928 = vmatpush3.bf16.msra.mxu1 %v15133_v33  ;;  %11821 = vmatprep.mubr.msk.f32.mxu0 %vm988_vm4, %v15147_v20 }
0x134f   :  { %11869 = vmatprep.mubr.msk.f32.mxu1 %vm988_vm4, %v15147_v20  ;;  %12905 = vmatpush3.bf16.msra.mxu0 %v12902_v56 }
0x1350   :  { %12929 = vmatprep.subr.bf16.mxu1 %v13628_v30  ;;  %12907 = vmatprep.subr.bf16.mxu0 %v12906_v37 }
0x1351   :  { %11822 = vmatmul.mubr.msk.f32.gmra.mrb[112].mxu0 %vm988_vm4, %v15162_v42  ;;  %11870 = vmatmul.mubr.msk.f32.gmra.mrb[84].mxu1 %vm988_vm4, %v15162_v42 }
0x1352   :  { %11824 = vmatprep.mubr.msk.f32.mxu0 %vm988_vm4, %v15175_v49  ;;  %11872 = vmatprep.mubr.msk.f32.mxu1 %vm988_vm4, %v15175_v49 }
0x1353   :  { %12931 = vmatpush3.bf16.msra.mxu1 %v15160_v40  ;;  %12909 = vmatpush3.bf16.msra.mxu0 %v12906_v37 }
0x1354   :  { %12932 = vmatprep.subr.bf16.mxu1 %v13628_v30  ;;  %12911 = vmatprep.subr.bf16.mxu0 %v12910_v46 }
0x1355   :  { %11825 = vmatmul.mubr.msk.f32.gmra.mrb[114].mxu0 %vm988_vm4, %v15190_v1  ;;  %11873 = vmatmul.mubr.msk.f32.gmra.mrb[86].mxu1 %vm988_vm4, %v15190_v1 }
0x1356   :  { %11827 = vmatprep.mubr.msk.f32.mxu0 %vm988_vm4, %v15197_v25  ;;  %11875 = vmatprep.mubr.msk.f32.mxu1 %vm988_vm4, %v15197_v25 }
0x1357   :  { %12934 = vmatpush3.bf16.msra.mxu1 %v15188_v8  ;;  %12913 = vmatpush3.bf16.msra.mxu0 %v12910_v46 }
0x1358   :  { %12935 = vmatprep.subr.bf16.mxu1 %v13628_v30  ;;  %12915 = vmatprep.subr.bf16.mxu0 %v12914_v13 }
0x1359   :  { %11828 = vmatmul.mubr.msk.f32.gmra.mrb[116].mxu0 %vm988_vm4, %v15210_v52  ;;  %11876 = vmatmul.mubr.msk.f32.gmra.mrb[88].mxu1 %vm988_vm4, %v15210_v52 }
0x135a   :  { %11890 = vmatprep.mubr.msk.f32.mxu0 %vm988_vm4, %v15048_v6  ;;  %11938 = vmatprep.mubr.msk.f32.mxu1 %vm13629_vm3, %v13630_v4  ;;  %v15277_v6 = vpack.c.bf16 %v6964_v3, %v6963_v2 }
0x135d   :  { %11891 = vmatmul.mubr.msk.f32.vlgmr.msra.gmra.mrb[118].mxu0 %vm988_vm4, %v15054_v7  ;;  %11939 = vmatmul.mubr.f32.vlgmr.msra.gmra.mrb[90].mxu1 %v13630_v4  ;;  %v6965_v7 = vld [vmem:[%s16033_s6 + $0x190] sm:$0xff] }
0x135e   :  { %12937 = vmatpush3.bf16.msra.mxu1 %v15227_v14  ;;  %11893 = vmatprep.mubr.msk.f32.mxu0 %vm988_vm4, %v15056_v9  ;;  %v6966_v9 = vld [vmem:[%s16033_s6 + $0x198] sm:$0xff] }
0x135f   :  { %12917 = vmatpush3.bf16.msra.mxu0 %v12914_v13  ;;  %12938 = vmatprep.subr.bf16.mxu1 %v13628_v30  ;;  %v15293_v10 = vpack.c.bf16 %v6966_v9, %v6965_v7 }
0x1360   :  { %12919 = vmatprep.subr.bf16.mxu0 %v12918_v59  ;;  %11953 = vmatprep.mubr.msk.f32.mxu1 %vm13629_vm3, %v13630_v4 }
0x1361   :  { %11894 = vmatmul.mubr.msk.f32.gmra.mrb[120].mxu0 %vm988_vm4, %v15078_v21 }
0x1362   :  { %12940 = vmatpush3.bf16.msra.mxu1 %v15247_v61  ;;  %11896 = vmatprep.mubr.msk.f32.mxu0 %vm988_vm4, %v15084_v22 }
0x1363   :  { %12941 = vmatprep.subr.bf16.mxu1 %v13628_v30  ;;  %12921 = vmatpush3.bf16.msra.mxu0 %v12918_v59 }
0x1364   :  { %12923 = vmatprep.subr.bf16.mxu0 %v12922_v58 }
0x1365   :  { %11897 = vmatmul.mubr.msk.f32.gmra.mrb[122].mxu0 %vm988_vm4, %v15096_v48 }
0x1366   :  { %12943 = vmatpush3.bf16.msra.mxu1 %v15263_v0  ;;  %11899 = vmatprep.mubr.msk.f32.mxu0 %vm988_vm4, %v15102_v63 }
0x1367   :  { %12925 = vmatpush3.bf16.msra.mxu0 %v12922_v58  ;;  %12944 = vmatprep.subr.bf16.mxu1 %v13628_v30 }
0x1368   :  { %12953 = vmatprep.subr.bf16.mxu0 %v13628_v30 }
0x1369   :  { %11954 = vmatmul.mubr.f32.vlgmr.msra.gmra.mrb[92].mxu1 %v13630_v4  ;;  %11900 = vmatmul.mubr.msk.f32.gmra.mrb[124].mxu0 %vm988_vm4, %v15114_v28 }
0x136a   :  { %11914 = vmatprep.mubr.msk.f32.mxu0 %vm988_vm4, %v15121_v29  ;;  %12946 = vmatpush3.bf16.msra.mxu1 %v15277_v6 }
0x136b   :  { %12947 = vmatprep.subr.bf16.mxu1 %v13628_v30  ;;  %11968 = vmatprep.mubr.msk.f32.mxu1 %vm13629_vm3, %v13630_v4 }
0x136d   :  { %11915 = vmatmul.mubr.msk.f32.vlgmr.msra.gmra.mrb[118].mxu0 %vm988_vm4, %v15135_v34 }
0x136e   :  { %11917 = vmatprep.mubr.msk.f32.mxu0 %vm988_vm4, %v15147_v20  ;;  %12949 = vmatpush3.bf16.msra.mxu1 %v15293_v10 }
0x136f   :  { %12950 = vmatprep.subr.bf16.mxu1 %v13628_v30  ;;  %12955 = vmatpush3.bf16.msra.mxu0 %v15133_v33 }
0x1370   :  { %12956 = vmatprep.subr.bf16.mxu0 %v13628_v30 }
0x1371   :  { %11918 = vmatmul.mubr.msk.f32.gmra.mrb[120].mxu0 %vm988_vm4, %v15162_v42 }
0x1372   :  { %11920 = vmatprep.mubr.msk.f32.mxu0 %vm988_vm4, %v15175_v49  ;;  %12952 = vmatpush3.bf16.msra.mxu1 %v15309_v16 }
0x1373   :  { %12962 = vmatprep.subr.bf16.mxu1 %v13628_v30  ;;  %12958 = vmatpush3.bf16.msra.mxu0 %v15160_v40 }
0x1374   :  { %12959 = vmatprep.subr.bf16.mxu0 %v13628_v30 }
0x1375   :  { %11921 = vmatmul.mubr.msk.f32.gmra.mrb[122].mxu0 %vm988_vm4, %v15190_v1  ;;  %11969 = vmatmul.mubr.f32.vlgmr.msra.gmra.mrb[94].mxu1 %v13630_v4 }
0x1376   :  { %11923 = vmatprep.mubr.msk.f32.mxu0 %vm988_vm4, %v15197_v25  ;;  %12964 = vmatpush3.bf16.msra.mxu1 %v15227_v14 }
0x1377   :  { %12965 = vmatprep.subr.bf16.mxu1 %v13628_v30  ;;  %12961 = vmatpush3.bf16.msra.mxu0 %v15188_v8 }
0x1378   :  { %11998 = vmatprep.mubr.msk.f32.mxu1 %vm13629_vm3, %v13630_v4  ;;  %12971 = vmatprep.subr.bf16.mxu0 %v13628_v30 }
0x1379   :  { %11924 = vmatmul.mubr.msk.f32.gmra.mrb[124].mxu0 %vm988_vm4, %v15210_v52 }
0x137a   :  { %12967 = vmatpush3.bf16.msra.mxu1 %v15247_v61  ;;  %11983 = vmatprep.mubr.msk.f32.mxu0 %vm13629_vm3, %v13630_v4 }
0x137b   :  { %12968 = vmatprep.subr.bf16.mxu1 %v13628_v30 }
0x137e   :  { %12970 = vmatpush3.bf16.msra.mxu1 %v15263_v0 }
0x137f   :  { %12980 = vmatprep.subr.bf16.mxu1 %v13628_v30 }
0x1420   :  { %v11820_v21 = vpop.f32.mrb[110].mxu0  ;;  %v11868_v44 = vpop.f32.mrb[82].mxu1 }
0x1421   :  { %v6450_v47 = vadd.f32 %v11820_v21, %v9829_v18  ;;  %v6693_v22 = vadd.f32 %v11868_v44, %v9846_v41  ;;  %v6405_v23 = vpop.f32.mrb[111].mxu0  ;;  %v6648_v24 = vpop.f32.mrb[83].mxu1  ;;  %v15371_v21 = vld [vmem:[%s16033_s6 + $0x1c8] ss:$0 sm:$0xff]  ;;  %s13632_s6 = smov [#allocation9]  }
0x1422   :  { %v6449_v48 = vadd.f32 %v9829_v18, %v6405_v23  ;;  %v6692_v56 = vadd.f32 %v9846_v41, %v6648_v24  ;;  %s9541_s17 = sshll.u32 %s13632_s6, 4  ;;  %s9542_s17 = int_to_ptr.vmem [resolvable:$true] %s9541_s17 }
0x1423   :  { %6458 = vst.msk [vmem:[#allocation2 + $0x8] sm:$0xff] %vm988_vm4, %v6450_v47  ;;  %6701 = vst.msk [vmem:[#allocation3 + $0x8] sm:$0xff] %vm988_vm4, %v6693_v22  ;;  %s13538_s18 = scalar_lea.vmem %s9542_s17, 32  ;;  %p13539_p1 = scmp.lt.s32.totalorder %s9542_s17, %s9542_s17 }
0x1424   :  { %6457 = vst.msk [vmem:[#allocation2] sm:$0xff] %vm988_vm4, %v6449_v48  ;;  %6700 = vst.msk [vmem:[#allocation3] sm:$0xff] %vm988_vm4, %v6692_v56  ;;  %v11823_v63 = vpop.f32.mrb[112].mxu0  ;;  %v11871_v26 = vpop.f32.mrb[84].mxu1 }
0x1425   :  { %v6452_v27 = vadd.f32 %v11823_v63, %v9829_v18  ;;  %v6695_v28 = vadd.f32 %v11871_v26, %v9846_v41  ;;  %v6415_v29 = vpop.f32.mrb[113].mxu0  ;;  %v6658_v31 = vpop.f32.mrb[85].mxu1 }
0x1426   :  { %v6451_v32 = vadd.f32 %v9829_v18, %v6415_v29  ;;  %v6694_v34 = vadd.f32 %v9846_v41, %v6658_v31 }
0x1427   :  { %6460 = vst.msk [vmem:[#allocation2 + $0x18] sm:$0xff] %vm988_vm4, %v6452_v27  ;;  %6703 = vst.msk [vmem:[#allocation3 + $0x18] sm:$0xff] %vm988_vm4, %v6695_v28 }
0x1428   :  { %6459 = vst.msk [vmem:[#allocation2 + $0x10] sm:$0xff] %vm988_vm4, %v6451_v32  ;;  %6702 = vst.msk [vmem:[#allocation3 + $0x10] sm:$0xff] %vm988_vm4, %v6694_v34  ;;  %v11826_v35 = vpop.f32.mrb[114].mxu0  ;;  %v11874_v17 = vpop.f32.mrb[86].mxu1 }
0x1429   :  { %v6454_v37 = vadd.f32 %v11826_v35, %v9829_v18  ;;  %v6697_v20 = vadd.f32 %v11874_v17, %v9846_v41  ;;  %v6425_v19 = vpop.f32.mrb[115].mxu0  ;;  %v6668_v39 = vpop.f32.mrb[87].mxu1 }
0x142a   :  { %v6453_v42 = vadd.f32 %v9829_v18, %v6425_v19  ;;  %v6696_v43 = vadd.f32 %v9846_v41, %v6668_v39 }
0x142b   :  { %6462 = vst.msk [vmem:[#allocation2 + $0x28] sm:$0xff] %vm988_vm4, %v6454_v37  ;;  %6705 = vst.msk [vmem:[#allocation3 + $0x28] sm:$0xff] %vm988_vm4, %v6697_v20  ;;  %v7114_v51 = vld [vmem:[#allocation2] sm:$0xff] }
0x142c   :  { %6461 = vst.msk [vmem:[#allocation2 + $0x20] sm:$0xff] %vm988_vm4, %v6453_v42  ;;  %6704 = vst.msk [vmem:[#allocation3 + $0x20] sm:$0xff] %vm988_vm4, %v6696_v43  ;;  %v11829_v45 = vpop.f32.mrb[116].mxu0  ;;  %v11877_v46 = vpop.f32.mrb[88].mxu1  ;;  %v7122_v57 = vld [vmem:[#allocation3] sm:$0xff] }
0x142d   :  { %v6456_v49 = vadd.f32 %v11829_v45, %v9829_v18  ;;  %v6699_v5 = vadd.f32 %v11877_v46, %v9846_v41  ;;  %v6435_v50 = vpop.f32.mrb[117].mxu0  ;;  %v6678_v1 = vpop.f32.mrb[89].mxu1  ;;  %v7353_v46 = vld [vmem:[#allocation2 + $0x8] sm:$0xff] }
0x142e   :  { %v6455_v13 = vadd.f32 %v9829_v18, %v6435_v50  ;;  %v6698_v25 = vadd.f32 %v9846_v41, %v6678_v1 }
0x142f   :  { %6464 = vst.msk [vmem:[#allocation2 + $0x38] sm:$0xff] %vm988_vm4, %v6456_v49  ;;  %6707 = vst.msk [vmem:[#allocation3 + $0x38] sm:$0xff] %vm988_vm4, %v6699_v5 }
0x1430   :  { %6463 = vst.msk [vmem:[#allocation2 + $0x30] sm:$0xff] %vm988_vm4, %v6455_v13  ;;  %6706 = vst.msk [vmem:[#allocation3 + $0x30] sm:$0xff] %vm988_vm4, %v6698_v25  ;;  %v7040_v11 = vpop.f32.mrb[90].mxu1  ;;  %v7361_v25 = vld [vmem:[#allocation3 + $0x8] sm:$0xff] }
0x1431   :  { %v7115_v52 = vadd.f32 %v7114_v51, %v7040_v11  ;;  %v11940_v53 = vpop.f32.mrb[91].mxu1 }
0x1433   :  { %v9865_v54 = vmul.f32 -1.442695, %v7115_v52 }
0x1435   :  { %13422 = vpow2.f32 %v9865_v54 }
0x143c   :  { %v7110_v55 = vpop.f32.mrb[92].mxu1 }
0x143d   :  { %v7123_v59 = vadd.f32 %v7122_v57, %v7110_v55  ;;  %v11955_v60 = vpop.f32.mrb[93].mxu1 }
0x143f   :  { %v13423_v62 = vpop.eup %13422  ;;  %v9866_v38 = vmul.f32 -1.442695, %v7123_v59 }
0x1440   :  { %v7119_v58 = vadd.f32 1.0, %v13423_v62  ;;  %v11916_v2 = vpop.f32.mrb[118].mxu0 }
0x1441   :  { %13424 = vpow2.f32 %v9866_v38  ;;  %v6936_v3 = vadd.f32 %v11916_v2, %v9863_v36  ;;  %v6891_v7 = vpop.f32.mrb[119].mxu0 }
0x1442   :  { %13426 = vrcp.f32 %v7119_v58  ;;  %v6935_v9 = vadd.f32 %v9863_v36, %v6891_v7 }
0x1443   :  { %6944 = vst.msk [vmem:[#allocation4 + $0x8] sm:$0xff] %vm988_vm4, %v6936_v3 }
0x1444   :  { %6943 = vst.msk [vmem:[#allocation4] sm:$0xff] %vm988_vm4, %v6935_v9  ;;  %v11919_v12 = vpop.f32.mrb[120].mxu0 }
0x1445   :  { %v6938_v15 = vadd.f32 %v11919_v12, %v9863_v36  ;;  %v6901_v18 = vpop.f32.mrb[121].mxu0 }
0x1446   :  { %v6937_v41 = vadd.f32 %v9863_v36, %v6901_v18 }
0x1447   :  { %6946 = vst.msk [vmem:[#allocation4 + $0x18] sm:$0xff] %vm988_vm4, %v6938_v15 }
0x1448   :  { %6945 = vst.msk [vmem:[#allocation4 + $0x10] sm:$0xff] %vm988_vm4, %v6937_v41  ;;  %v11922_v44 = vpop.f32.mrb[122].mxu0  ;;  %v7197_v47 = vpop.f32.mrb[94].mxu1  ;;  %v7592_v41 = vld [vmem:[#allocation2 + $0x10] sm:$0xff] }
0x1449   :  { %v6940_v22 = vadd.f32 %v11922_v44, %v9863_v36  ;;  %v6911_v23 = vpop.f32.mrb[123].mxu0  ;;  %v7198_v24 = vadd.f32 %v15371_v21, %v7197_v47  ;;  %v11970_v48 = vpop.f32.mrb[95].mxu1 }
0x144a   :  { %v6939_v56 = vadd.f32 %v9863_v36, %v6911_v23  ;;  %v7369_v38 = vld [vmem:[#allocation4 + $0x8] sm:$0xff]  ;;  %v7600_v48 = vld [vmem:[#allocation3 + $0x10] sm:$0xff] }
0x144b   :  { %v13425_v63 = vpop.eup %13424  ;;  %6948 = vst.msk [vmem:[#allocation4 + $0x28] sm:$0xff] %vm988_vm4, %v6940_v22  ;;  %v7130_v34 = vld [vmem:[#allocation4] sm:$0xff] }
0x144c   :  { %v13427_v26 = vpop.eup %13426  ;;  %v7127_v27 = vadd.f32 1.0, %v13425_v63  ;;  %6947 = vst.msk [vmem:[#allocation4 + $0x20] sm:$0xff] %vm988_vm4, %v6939_v56  ;;  %v11925_v28 = vpop.f32.mrb[124].mxu0 }
0x144d   :  { %v7201_v29 = vmul.f32 %v13427_v26, %v7198_v24  ;;  %v6942_v31 = vadd.f32 %v11925_v28, %v9863_v36  ;;  %v6921_v32 = vpop.f32.mrb[125].mxu0 }
0x144e   :  { %13428 = vrcp.f32 %v7127_v27  ;;  %v6941_v35 = vadd.f32 %v9863_v36, %v6921_v32 }
0x144f   :  { %v7202_v17 = vadd.f32 %v7201_v29, %v7130_v34  ;;  %6950 = vst.msk [vmem:[#allocation4 + $0x38] sm:$0xff] %vm988_vm4, %v6942_v31 }
0x1450   :  { %6949 = vst.msk [vmem:[#allocation4 + $0x30] sm:$0xff] %vm988_vm4, %v6941_v35 }
0x1451   :  { %13430 = vtanh.f32 %v7202_v17 }
0x1458   :  { %v13429_v37 = vpop.eup %13428 }
0x1459   :  { %v7204_v20 = vsub.f32 1.0, %v13429_v37  ;;  %v7206_v39 = vmul.f32 0.0, %v13429_v37  ;;  %v7608_v37 = vld [vmem:[#allocation4 + $0x10] sm:$0xff] }
0x145b   :  { %v13431_v19 = vpop.eup %13430 }
0x145c   :  { %v7205_v42 = vmul.f32 %v13431_v19, %v7204_v20 }
0x145e   :  { %v7207_v43 = vadd.f32 %v7206_v39, %v7205_v42 }
0x1460   :  { %11984 = vmatmul.mubr.msk.f32.vlgmr.msra.gmra.mrb[126].mxu0 %vm988_vm4, %v7207_v43  ;;  %7208 = vst.msk [vmem:[#allocation5] sm:$0xff] %vm988_vm4, %v7207_v43  ;;  %7209 = vst.msk [vmem:[#allocation6 + $0x38] sm:$0xff] %vm988_vm4, %v7207_v43  ;;  %11999 = vmatmul.mubr.msk.f32.vlgmr.msra.gmra.mrb[96].mxu1 %vm988_vm4, %v7207_v43 }
0x1461   :  { %12973 = vmatpush3.bf16.msra.mxu0 %v15277_v6  ;;  %12013 = vmatprep.mubr.msk.f32.mxu0 %vm13629_vm3, %v13630_v4 }
0x1462   :  { %12974 = vmatprep.subr.bf16.mxu0 %v13628_v30  ;;  %12982 = vmatpush3.bf16.msra.mxu1 %v15133_v33 }
0x1463   :  { %12983 = vmatprep.subr.bf16.mxu1 %v13628_v30  ;;  %12028 = vmatprep.mubr.msk.f32.mxu1 %vm13629_vm3, %v13630_v4 }
0x1465   :  { %12976 = vmatpush3.bf16.msra.mxu0 %v15293_v10 }
0x1466   :  { %12977 = vmatprep.subr.bf16.mxu0 %v13628_v30  ;;  %12985 = vmatpush3.bf16.msra.mxu1 %v15160_v40 }
0x1467   :  { %12986 = vmatprep.subr.bf16.mxu1 %v13628_v30 }
0x1469   :  { %12979 = vmatpush3.bf16.msra.mxu0 %v15309_v16 }
0x146a   :  { %12989 = vmatprep.subr.bf16.mxu0 %v13628_v30  ;;  %12988 = vmatpush3.bf16.msra.mxu1 %v15188_v8 }
0x146b   :  { %12998 = vmatprep.subr.bf16.mxu1 %v13628_v30 }
0x146c   :  { %12014 = vmatmul.mubr.msk.f32.vlgmr.msra.gmra.mrb[128].mxu0 %vm988_vm4, %v7207_v43 }
0x146d   :  { %12991 = vmatpush3.bf16.msra.mxu0 %v15227_v14  ;;  %12043 = vmatprep.mubr.msk.f32.mxu0 %vm13629_vm3, %v13630_v4 }
0x146e   :  { %12992 = vmatprep.subr.bf16.mxu0 %v13628_v30 }
0x1471   :  { %12994 = vmatpush3.bf16.msra.mxu0 %v15247_v61 }
0x1472   :  { %12995 = vmatprep.subr.bf16.mxu0 %v13628_v30 }
0x1475   :  { %12997 = vmatpush3.bf16.msra.mxu0 %v15263_v0 }
0x1476   :  { %13007 = vmatprep.subr.bf16.mxu0 %v13628_v30 }
0x1533   :  { %v7279_v45 = vpop.f32.mrb[126].mxu0  ;;  %v7349_v49 = vpop.f32.mrb[96].mxu1 }
0x1534   :  { %v7354_v5 = vadd.f32 %v7353_v46, %v7279_v45  ;;  %v11985_v50 = vpop.f32.mrb[127].mxu0  ;;  %v12000_v1 = vpop.f32.mrb[97].mxu1  ;;  %v7362_v11 = vadd.f32 %v7361_v25, %v7349_v49 }
0x1536   :  { %v9869_v13 = vmul.f32 -1.442695, %v7354_v5  ;;  %v9870_v51 = vmul.f32 -1.442695, %v7362_v11  ;;  %v7831_v5 = vld [vmem:[#allocation2 + $0x18] sm:$0xff] }
0x1538   :  { %13432 = vpow2.f32 %v9869_v13 }
0x1539   :  { %13434 = vpow2.f32 %v9870_v51  ;;  %v7839_v51 = vld [vmem:[#allocation3 + $0x18] sm:$0xff] }
0x153f   :  { %v7436_v52 = vpop.f32.mrb[128].mxu0 }
0x1540   :  { %v12015_v53 = vpop.f32.mrb[129].mxu0  ;;  %v7437_v60 = vadd.f32 %v15371_v21, %v7436_v52 }
0x1542   :  { %v13433_v54 = vpop.eup %13432 }
0x1543   :  { %v7358_v55 = vadd.f32 1.0, %v13433_v54  ;;  %v13435_v57 = vpop.eup %13434 }
0x1544   :  { %v7366_v59 = vadd.f32 1.0, %v13435_v57 }
0x1545   :  { %13436 = vrcp.f32 %v7358_v55 }
0x1546   :  { %13438 = vrcp.f32 %v7366_v59 }
0x154f   :  { %v13437_v36 = vpop.eup %13436 }
0x1550   :  { %v7440_v62 = vmul.f32 %v13437_v36, %v7437_v60  ;;  %v13439_v2 = vpop.eup %13438 }
0x1551   :  { %v7443_v3 = vsub.f32 1.0, %v13439_v2  ;;  %v7445_v9 = vmul.f32 %v13439_v2, %v7207_v43  ;;  %v7847_v2 = vld [vmem:[#allocation4 + $0x18] sm:$0xff] }
0x1552   :  { %v7441_v58 = vadd.f32 %v7440_v62, %v7369_v38 }
0x1554   :  { %13440 = vtanh.f32 %v7441_v58 }
0x155e   :  { %v13441_v7 = vpop.eup %13440 }
0x155f   :  { %v7444_v12 = vmul.f32 %v13441_v7, %v7443_v3 }
0x1561   :  { %v7446_v15 = vadd.f32 %v7445_v9, %v7444_v12 }
0x1563   :  { %7447 = vst.msk [vmem:[#allocation5 + $0x8] sm:$0xff] %vm988_vm4, %v7446_v15  ;;  %12029 = vmatmul.mubr.msk.f32.vlgmr.msra.gmra.mrb[98].mxu1 %vm988_vm4, %v7446_v15  ;;  %7448 = vst.msk [vmem:[#allocation6 + $0x30] sm:$0xff] %vm988_vm4, %v7446_v15  ;;  %12044 = vmatmul.mubr.msk.f32.vlgmr.msra.gmra.mrb[130].mxu0 %vm988_vm4, %v7446_v15 }
0x1564   :  { %13000 = vmatpush3.bf16.msra.mxu1 %v15277_v6  ;;  %12058 = vmatprep.mubr.msk.f32.mxu1 %vm13629_vm3, %v13630_v4 }
0x1565   :  { %13001 = vmatprep.subr.bf16.mxu1 %v13628_v30  ;;  %13009 = vmatpush3.bf16.msra.mxu0 %v15133_v33 }
0x1566   :  { %13010 = vmatprep.subr.bf16.mxu0 %v13628_v30  ;;  %12073 = vmatprep.mubr.msk.f32.mxu0 %vm13629_vm3, %v13630_v4 }
0x1568   :  { %13003 = vmatpush3.bf16.msra.mxu1 %v15293_v10 }
0x1569   :  { %13004 = vmatprep.subr.bf16.mxu1 %v13628_v30  ;;  %13012 = vmatpush3.bf16.msra.mxu0 %v15160_v40 }
0x156a   :  { %13013 = vmatprep.subr.bf16.mxu0 %v13628_v30 }
0x156c   :  { %13006 = vmatpush3.bf16.msra.mxu1 %v15309_v16 }
0x156d   :  { %13016 = vmatprep.subr.bf16.mxu1 %v13628_v30  ;;  %13015 = vmatpush3.bf16.msra.mxu0 %v15188_v8 }
0x156e   :  { %13025 = vmatprep.subr.bf16.mxu0 %v13628_v30 }
0x156f   :  { %12059 = vmatmul.mubr.msk.f32.vlgmr.msra.gmra.mrb[100].mxu1 %vm988_vm4, %v7446_v15 }
0x1570   :  { %13018 = vmatpush3.bf16.msra.mxu1 %v15227_v14  ;;  %12088 = vmatprep.mubr.msk.f32.mxu1 %vm13629_vm3, %v13630_v4 }
0x1571   :  { %13019 = vmatprep.subr.bf16.mxu1 %v13628_v30 }
0x1574   :  { %13021 = vmatpush3.bf16.msra.mxu1 %v15247_v61 }
0x1575   :  { %13022 = vmatprep.subr.bf16.mxu1 %v13628_v30 }
0x1578   :  { %13024 = vmatpush3.bf16.msra.mxu1 %v15263_v0 }
0x1579   :  { %13034 = vmatprep.subr.bf16.mxu1 %v13628_v30 }
0x1636   :  { %v7518_v18 = vpop.f32.mrb[98].mxu1  ;;  %v7588_v44 = vpop.f32.mrb[130].mxu0 }
0x1637   :  { %v7593_v47 = vadd.f32 %v7592_v41, %v7518_v18  ;;  %v12030_v22 = vpop.f32.mrb[99].mxu1  ;;  %v12045_v23 = vpop.f32.mrb[131].mxu0  ;;  %v7601_v56 = vadd.f32 %v7600_v48, %v7588_v44 }
0x1639   :  { %v9874_v24 = vmul.f32 -1.442695, %v7593_v47  ;;  %v9875_v63 = vmul.f32 -1.442695, %v7601_v56  ;;  %v8070_v47 = vld [vmem:[#allocation2 + $0x20] sm:$0xff] }
0x163b   :  { %13442 = vpow2.f32 %v9874_v24 }
0x163c   :  { %13444 = vpow2.f32 %v9875_v63  ;;  %v8078_v63 = vld [vmem:[#allocation3 + $0x20] sm:$0xff] }
0x1642   :  { %v7675_v26 = vpop.f32.mrb[100].mxu1 }
0x1643   :  { %v12060_v27 = vpop.f32.mrb[101].mxu1  ;;  %v7676_v34 = vadd.f32 %v15371_v21, %v7675_v26 }
0x1645   :  { %v13443_v28 = vpop.eup %13442 }
0x1646   :  { %v7597_v29 = vadd.f32 1.0, %v13443_v28  ;;  %v13445_v31 = vpop.eup %13444 }
0x1647   :  { %v7605_v32 = vadd.f32 1.0, %v13445_v31 }
0x1648   :  { %13446 = vrcp.f32 %v7597_v29 }
0x1649   :  { %13448 = vrcp.f32 %v7605_v32 }
0x1652   :  { %v13447_v35 = vpop.eup %13446 }
0x1653   :  { %v7679_v17 = vmul.f32 %v13447_v35, %v7676_v34  ;;  %v13449_v19 = vpop.eup %13448 }
0x1654   :  { %v7682_v39 = vsub.f32 1.0, %v13449_v19  ;;  %v7684_v43 = vmul.f32 %v13449_v19, %v7446_v15  ;;  %v8086_v19 = vld [vmem:[#allocation4 + $0x20] sm:$0xff] }
0x1655   :  { %v7680_v20 = vadd.f32 %v7679_v17, %v7608_v37 }
0x1657   :  { %13450 = vtanh.f32 %v7680_v20 }
0x1661   :  { %v13451_v42 = vpop.eup %13450 }
0x1662   :  { %v7683_v45 = vmul.f32 %v13451_v42, %v7682_v39 }
0x1664   :  { %v7685_v46 = vadd.f32 %v7684_v43, %v7683_v45 }
0x1666   :  { %12074 = vmatmul.mubr.msk.f32.vlgmr.msra.gmra.mrb[132].mxu0 %vm988_vm4, %v7685_v46  ;;  %7686 = vst.msk [vmem:[#allocation5 + $0x10] sm:$0xff] %vm988_vm4, %v7685_v46  ;;  %7687 = vst.msk [vmem:[#allocation6 + $0x28] sm:$0xff] %vm988_vm4, %v7685_v46  ;;  %12089 = vmatmul.mubr.msk.f32.vlgmr.msra.gmra.mrb[102].mxu1 %vm988_vm4, %v7685_v46 }
0x1667   :  { %13027 = vmatpush3.bf16.msra.mxu0 %v15277_v6  ;;  %12103 = vmatprep.mubr.msk.f32.mxu0 %vm13629_vm3, %v13630_v4 }
0x1668   :  { %13028 = vmatprep.subr.bf16.mxu0 %v13628_v30  ;;  %13036 = vmatpush3.bf16.msra.mxu1 %v15133_v33 }
0x1669   :  { %13037 = vmatprep.subr.bf16.mxu1 %v13628_v30  ;;  %12118 = vmatprep.mubr.msk.f32.mxu1 %vm13629_vm3, %v13630_v4 }
0x166b   :  { %13030 = vmatpush3.bf16.msra.mxu0 %v15293_v10 }
0x166c   :  { %13031 = vmatprep.subr.bf16.mxu0 %v13628_v30  ;;  %13039 = vmatpush3.bf16.msra.mxu1 %v15160_v40 }
0x166d   :  { %13040 = vmatprep.subr.bf16.mxu1 %v13628_v30 }
0x166f   :  { %13033 = vmatpush3.bf16.msra.mxu0 %v15309_v16 }
0x1670   :  { %13043 = vmatprep.subr.bf16.mxu0 %v13628_v30  ;;  %13042 = vmatpush3.bf16.msra.mxu1 %v15188_v8 }
0x1671   :  { %13052 = vmatprep.subr.bf16.mxu1 %v13628_v30 }
0x1672   :  { %12104 = vmatmul.mubr.msk.f32.vlgmr.msra.gmra.mrb[134].mxu0 %vm988_vm4, %v7685_v46 }
0x1673   :  { %13045 = vmatpush3.bf16.msra.mxu0 %v15227_v14  ;;  %12133 = vmatprep.mubr.msk.f32.mxu0 %vm13629_vm3, %v13630_v4 }
0x1674   :  { %13046 = vmatprep.subr.bf16.mxu0 %v13628_v30 }
0x1677   :  { %13048 = vmatpush3.bf16.msra.mxu0 %v15247_v61 }
0x1678   :  { %13049 = vmatprep.subr.bf16.mxu0 %v13628_v30 }
0x167b   :  { %13051 = vmatpush3.bf16.msra.mxu0 %v15263_v0 }
0x167c   :  { %13061 = vmatprep.subr.bf16.mxu0 %v13628_v30 }
0x1739   :  { %v7757_v49 = vpop.f32.mrb[132].mxu0  ;;  %v7827_v50 = vpop.f32.mrb[102].mxu1 }
0x173a   :  { %v7832_v1 = vadd.f32 %v7831_v5, %v7757_v49  ;;  %v12075_v13 = vpop.f32.mrb[133].mxu0  ;;  %v12090_v25 = vpop.f32.mrb[103].mxu1  ;;  %v7840_v52 = vadd.f32 %v7839_v51, %v7827_v50 }
0x173c   :  { %v9879_v11 = vmul.f32 -1.442695, %v7832_v1  ;;  %v9880_v53 = vmul.f32 -1.442695, %v7840_v52  ;;  %v8309_v1 = vld [vmem:[#allocation2 + $0x28] sm:$0xff] }
0x173e   :  { %13452 = vpow2.f32 %v9879_v11 }
0x173f   :  { %13454 = vpow2.f32 %v9880_v53  ;;  %v8317_v53 = vld [vmem:[#allocation3 + $0x28] sm:$0xff] }
0x1745   :  { %v7914_v54 = vpop.f32.mrb[134].mxu0 }
0x1746   :  { %v12105_v55 = vpop.f32.mrb[135].mxu0  ;;  %v7915_v62 = vadd.f32 %v15371_v21, %v7914_v54 }
0x1748   :  { %v13453_v57 = vpop.eup %13452 }
0x1749   :  { %v7836_v59 = vadd.f32 1.0, %v13453_v57  ;;  %v13455_v60 = vpop.eup %13454 }
0x174a   :  { %v7844_v36 = vadd.f32 1.0, %v13455_v60 }
0x174b   :  { %13456 = vrcp.f32 %v7836_v59 }
0x174c   :  { %13458 = vrcp.f32 %v7844_v36 }
0x1755   :  { %v13457_v38 = vpop.eup %13456 }
0x1756   :  { %v7918_v58 = vmul.f32 %v13457_v38, %v7915_v62  ;;  %v13459_v7 = vpop.eup %13458 }
0x1757   :  { %v7921_v9 = vsub.f32 1.0, %v13459_v7  ;;  %v7923_v15 = vmul.f32 %v13459_v7, %v7685_v46  ;;  %v8325_v7 = vld [vmem:[#allocation4 + $0x28] sm:$0xff] }
0x1758   :  { %v7919_v3 = vadd.f32 %v7918_v58, %v7847_v2 }
0x175a   :  { %13460 = vtanh.f32 %v7919_v3 }
0x1764   :  { %v13461_v12 = vpop.eup %13460 }
0x1765   :  { %v7922_v18 = vmul.f32 %v13461_v12, %v7921_v9 }
0x1767   :  { %v7924_v41 = vadd.f32 %v7923_v15, %v7922_v18 }
0x1769   :  { %12119 = vmatmul.mubr.msk.f32.vlgmr.msra.gmra.mrb[104].mxu1 %vm988_vm4, %v7924_v41  ;;  %7925 = vst.msk [vmem:[#allocation5 + $0x18] sm:$0xff] %vm988_vm4, %v7924_v41  ;;  %7926 = vst.msk [vmem:[#allocation6 + $0x20] sm:$0xff] %vm988_vm4, %v7924_v41  ;;  %12134 = vmatmul.mubr.msk.f32.vlgmr.msra.gmra.mrb[136].mxu0 %vm988_vm4, %v7924_v41 }
0x176a   :  { %13054 = vmatpush3.bf16.msra.mxu1 %v15277_v6  ;;  %12148 = vmatprep.mubr.msk.f32.mxu1 %vm13629_vm3, %v13630_v4 }
0x176b   :  { %13055 = vmatprep.subr.bf16.mxu1 %v13628_v30  ;;  %13063 = vmatpush3.bf16.msra.mxu0 %v15133_v33 }
0x176c   :  { %13064 = vmatprep.subr.bf16.mxu0 %v13628_v30  ;;  %12163 = vmatprep.mubr.msk.f32.mxu0 %vm13629_vm3, %v13630_v4 }
0x176e   :  { %13057 = vmatpush3.bf16.msra.mxu1 %v15293_v10 }
0x176f   :  { %13058 = vmatprep.subr.bf16.mxu1 %v13628_v30  ;;  %13066 = vmatpush3.bf16.msra.mxu0 %v15160_v40 }
0x1770   :  { %13067 = vmatprep.subr.bf16.mxu0 %v13628_v30 }
0x1772   :  { %13060 = vmatpush3.bf16.msra.mxu1 %v15309_v16 }
0x1773   :  { %13070 = vmatprep.subr.bf16.mxu1 %v13628_v30  ;;  %13069 = vmatpush3.bf16.msra.mxu0 %v15188_v8 }
0x1774   :  { %13079 = vmatprep.subr.bf16.mxu0 %v13628_v30 }
0x1775   :  { %12149 = vmatmul.mubr.msk.f32.vlgmr.msra.gmra.mrb[106].mxu1 %vm988_vm4, %v7924_v41 }
0x1776   :  { %13072 = vmatpush3.bf16.msra.mxu1 %v15227_v14  ;;  %12178 = vmatprep.mubr.msk.f32.mxu1 %vm13629_vm3, %v13630_v4 }
0x1777   :  { %13073 = vmatprep.subr.bf16.mxu1 %v13628_v30 }
0x177a   :  { %13075 = vmatpush3.bf16.msra.mxu1 %v15247_v61 }
0x177b   :  { %13076 = vmatprep.subr.bf16.mxu1 %v13628_v30 }
0x177e   :  { %13078 = vmatpush3.bf16.msra.mxu1 %v15263_v0 }
0x177f   :  { %13088 = vmatprep.subr.bf16.mxu1 %v13628_v30 }
0x183c   :  { %v7996_v44 = vpop.f32.mrb[104].mxu1  ;;  %v8066_v22 = vpop.f32.mrb[136].mxu0 }
0x183d   :  { %v8071_v23 = vadd.f32 %v8070_v47, %v7996_v44  ;;  %v12120_v24 = vpop.f32.mrb[105].mxu1  ;;  %v12135_v48 = vpop.f32.mrb[137].mxu0  ;;  %v8079_v26 = vadd.f32 %v8078_v63, %v8066_v22 }
0x183f   :  { %v9884_v56 = vmul.f32 -1.442695, %v8071_v23  ;;  %v9885_v27 = vmul.f32 -1.442695, %v8079_v26 }
0x1841   :  { %13462 = vpow2.f32 %v9884_v56  ;;  %v8556_v56 = vld [vmem:[#allocation3 + $0x30] sm:$0xff] }
0x1842   :  { %13464 = vpow2.f32 %v9885_v27 }
0x1848   :  { %v8153_v28 = vpop.f32.mrb[106].mxu1 }
0x1849   :  { %v12150_v29 = vpop.f32.mrb[107].mxu1  ;;  %v8154_v17 = vadd.f32 %v15371_v21, %v8153_v28 }
0x184b   :  { %v13463_v31 = vpop.eup %13462 }
0x184c   :  { %v8075_v32 = vadd.f32 1.0, %v13463_v31  ;;  %v13465_v34 = vpop.eup %13464 }
0x184d   :  { %v8083_v35 = vadd.f32 1.0, %v13465_v34 }
0x184e   :  { %13466 = vrcp.f32 %v8075_v32 }
0x184f   :  { %13468 = vrcp.f32 %v8083_v35  ;;  %v8564_v35 = vld [vmem:[#allocation4 + $0x30] sm:$0xff] }
0x1858   :  { %v13467_v37 = vpop.eup %13466 }
0x1859   :  { %v8157_v20 = vmul.f32 %v13467_v37, %v8154_v17  ;;  %v13469_v42 = vpop.eup %13468 }
0x185a   :  { %v8160_v43 = vsub.f32 1.0, %v13469_v42  ;;  %v8162_v46 = vmul.f32 %v13469_v42, %v7924_v41 }
0x185b   :  { %v8158_v39 = vadd.f32 %v8157_v20, %v8086_v19 }
0x185d   :  { %13470 = vtanh.f32 %v8158_v39 }
0x1867   :  { %v13471_v45 = vpop.eup %13470 }
0x1868   :  { %v8161_v49 = vmul.f32 %v13471_v45, %v8160_v43  ;;  %v8905_v45 = vld [vmem:[%s16034_s7 + $0x30] sm:$0xff] }
0x186a   :  { %v8163_v5 = vadd.f32 %v8162_v46, %v8161_v49  ;;  %v8909_v49 = vld [vmem:[%s16034_s7 + $0x50] sm:$0xff] }
0x186c   :  { %12164 = vmatmul.mubr.msk.f32.vlgmr.msra.gmra.mrb[138].mxu0 %vm988_vm4, %v8163_v5  ;;  %8164 = vst.msk [vmem:[#allocation5 + $0x20] sm:$0xff] %vm988_vm4, %v8163_v5  ;;  %8165 = vst.msk [vmem:[#allocation6 + $0x18] sm:$0xff] %vm988_vm4, %v8163_v5  ;;  %12179 = vmatmul.mubr.msk.f32.vlgmr.msra.gmra.mrb[108].mxu1 %vm988_vm4, %v8163_v5 }
0x186d   :  { %13081 = vmatpush3.bf16.msra.mxu0 %v15277_v6  ;;  %12193 = vmatprep.mubr.msk.f32.mxu0 %vm13629_vm3, %v13630_v4 }
0x186e   :  { %13082 = vmatprep.subr.bf16.mxu0 %v13628_v30  ;;  %13090 = vmatpush3.bf16.msra.mxu1 %v15133_v33 }
0x186f   :  { %13091 = vmatprep.subr.bf16.mxu1 %v13628_v30  ;;  %12208 = vmatprep.mubr.msk.f32.mxu1 %vm13629_vm3, %v13630_v4 }
0x1871   :  { %13084 = vmatpush3.bf16.msra.mxu0 %v15293_v10 }
0x1872   :  { %13085 = vmatprep.subr.bf16.mxu0 %v13628_v30  ;;  %13093 = vmatpush3.bf16.msra.mxu1 %v15160_v40 }
0x1873   :  { %13094 = vmatprep.subr.bf16.mxu1 %v13628_v30 }
0x1875   :  { %13087 = vmatpush3.bf16.msra.mxu0 %v15309_v16 }
0x1876   :  { %13097 = vmatprep.subr.bf16.mxu0 %v13628_v30  ;;  %13096 = vmatpush3.bf16.msra.mxu1 %v15188_v8 }
0x1877   :  { %13106 = vmatprep.subr.bf16.mxu1 %v13628_v30 }
0x1878   :  { %12194 = vmatmul.mubr.msk.f32.vlgmr.msra.gmra.mrb[140].mxu0 %vm988_vm4, %v8163_v5 }
0x1879   :  { %13099 = vmatpush3.bf16.msra.mxu0 %v15227_v14  ;;  %12223 = vmatprep.mubr.msk.f32.mxu0 %vm13629_vm3, %v13630_v4 }
0x187a   :  { %13100 = vmatprep.subr.bf16.mxu0 %v13628_v30 }
0x187d   :  { %13102 = vmatpush3.bf16.msra.mxu0 %v15247_v61 }
0x187e   :  { %13103 = vmatprep.subr.bf16.mxu0 %v13628_v30 }
0x1881   :  { %13105 = vmatpush3.bf16.msra.mxu0 %v15263_v0 }
0x1882   :  { %13115 = vmatprep.subr.bf16.mxu0 %v13628_v30 }
0x193f   :  { %v8235_v50 = vpop.f32.mrb[138].mxu0  ;;  %v8305_v13 = vpop.f32.mrb[108].mxu1 }
0x1940   :  { %v8310_v25 = vadd.f32 %v8309_v1, %v8235_v50  ;;  %v12165_v11 = vpop.f32.mrb[139].mxu0  ;;  %v12180_v51 = vpop.f32.mrb[109].mxu1  ;;  %v8318_v54 = vadd.f32 %v8317_v53, %v8305_v13  ;;  %v8899_v1 = vld [vmem:[%s16034_s7] sm:$0xff]  ;;  %v8900_v13 = vld [vmem:[%s16034_s7 + $0x8] sm:$0xff] }
0x1941   :  { %v8787_v51 = vld [vmem:[#allocation2 + $0x38] sm:$0xff] }
0x1942   :  { %v9889_v52 = vmul.f32 -1.442695, %v8310_v25  ;;  %v9890_v55 = vmul.f32 -1.442695, %v8318_v54  ;;  %v13154_v25 = vpack.c.bf16 %v8900_v13, %v8899_v1 }
0x1944   :  { %13472 = vpow2.f32 %v9889_v52 }
0x1945   :  { %13474 = vpow2.f32 %v9890_v55 }
0x194b   :  { %v8392_v57 = vpop.f32.mrb[140].mxu0 }
0x194c   :  { %v12195_v59 = vpop.f32.mrb[141].mxu0  ;;  %v8393_v58 = vadd.f32 %v15371_v21, %v8392_v57 }
0x194d   :  { %v8795_v59 = vld [vmem:[#allocation3 + $0x38] sm:$0xff] }
0x194e   :  { %v13473_v60 = vpop.eup %13472 }
0x194f   :  { %v8314_v36 = vadd.f32 1.0, %v13473_v60  ;;  %v13475_v62 = vpop.eup %13474 }
0x1950   :  { %v8322_v38 = vadd.f32 1.0, %v13475_v62 }
0x1951   :  { %13476 = vrcp.f32 %v8314_v36 }
0x1952   :  { %13478 = vrcp.f32 %v8322_v38 }
0x195b   :  { %v13477_v2 = vpop.eup %13476 }
0x195c   :  { %v8396_v3 = vmul.f32 %v13477_v2, %v8393_v58  ;;  %v13479_v12 = vpop.eup %13478 }
0x195d   :  { %v8399_v15 = vsub.f32 1.0, %v13479_v12  ;;  %v8401_v41 = vmul.f32 %v13479_v12, %v8163_v5  ;;  %v8910_v5 = vld [vmem:[%s16034_s7 + $0x58] sm:$0xff] }
0x195e   :  { %v8397_v9 = vadd.f32 %v8396_v3, %v8325_v7  ;;  %v13150_v50 = vpack.c.bf16 %v8910_v5, %v8909_v49 }
0x1960   :  { %13480 = vtanh.f32 %v8397_v9 }
0x196a   :  { %v13481_v18 = vpop.eup %13480 }
0x196b   :  { %v8400_v44 = vmul.f32 %v13481_v18, %v8399_v15  ;;  %v8803_v18 = vld [vmem:[#allocation4 + $0x38] sm:$0xff] }
0x196d   :  { %v8402_v47 = vadd.f32 %v8401_v41, %v8400_v44 }
0x196f   :  { %12209 = vmatmul.mubr.msk.f32.vlgmr.msra.gmra.mrb[110].mxu1 %vm988_vm4, %v8402_v47  ;;  %8403 = vst.msk [vmem:[#allocation5 + $0x28] sm:$0xff] %vm988_vm4, %v8402_v47  ;;  %8404 = vst.msk [vmem:[#allocation6 + $0x10] sm:$0xff] %vm988_vm4, %v8402_v47  ;;  %12224 = vmatmul.mubr.msk.f32.vlgmr.msra.gmra.mrb[142].mxu0 %vm988_vm4, %v8402_v47 }
0x1970   :  { %13108 = vmatpush3.bf16.msra.mxu1 %v15277_v6  ;;  %12238 = vmatprep.mubr.msk.f32.mxu1 %vm13629_vm3, %v13630_v4 }
0x1971   :  { %13109 = vmatprep.subr.bf16.mxu1 %v13628_v30  ;;  %13117 = vmatpush3.bf16.msra.mxu0 %v15133_v33 }
0x1972   :  { %13118 = vmatprep.subr.bf16.mxu0 %v13628_v30  ;;  %12253 = vmatprep.mubr.msk.f32.mxu0 %vm13629_vm3, %v13630_v4 }
0x1974   :  { %13111 = vmatpush3.bf16.msra.mxu1 %v15293_v10 }
0x1975   :  { %13112 = vmatprep.subr.bf16.mxu1 %v13628_v30  ;;  %13120 = vmatpush3.bf16.msra.mxu0 %v15160_v40  ;;  %v8548_v40 = vld [vmem:[#allocation2 + $0x30] sm:$0xff] }
0x1976   :  { %13121 = vmatprep.subr.bf16.mxu0 %v13628_v30 }
0x1978   :  { %13114 = vmatpush3.bf16.msra.mxu1 %v15309_v16 }
0x1979   :  { %13124 = vmatprep.subr.bf16.mxu1 %v13628_v30  ;;  %13123 = vmatpush3.bf16.msra.mxu0 %v15188_v8 }
0x197a   :  { %13133 = vmatprep.subr.bf16.mxu0 %v13628_v30 }
0x197b   :  { %12239 = vmatmul.mubr.msk.f32.vlgmr.msra.gmra.mrb[112].mxu1 %vm988_vm4, %v8402_v47 }
0x197c   :  { %13126 = vmatpush3.bf16.msra.mxu1 %v15227_v14  ;;  %12268 = vmatprep.mubr.msk.f32.mxu1 %vm13629_vm3, %v13630_v4 }
0x197d   :  { %13127 = vmatprep.subr.bf16.mxu1 %v13628_v30 }
0x1980   :  { %13129 = vmatpush3.bf16.msra.mxu1 %v15247_v61 }
0x1981   :  { %13130 = vmatprep.subr.bf16.mxu1 %v13628_v30 }
0x1984   :  { %13132 = vmatpush3.bf16.msra.mxu1 %v15263_v0 }
0x1a42   :  { %v8474_v33 = vpop.f32.mrb[110].mxu1  ;;  %v8544_v8 = vpop.f32.mrb[142].mxu0 }
0x1a43   :  { %v8549_v22 = vadd.f32 %v8548_v40, %v8474_v33  ;;  %v12210_v23 = vpop.f32.mrb[111].mxu1  ;;  %v12225_v24 = vpop.f32.mrb[143].mxu0  ;;  %v8557_v14 = vadd.f32 %v8556_v56, %v8544_v8 }
0x1a44   :  { %v8902_v23 = vld [vmem:[%s16034_s7 + $0x18] sm:$0xff] }
0x1a45   :  { %v9894_v48 = vmul.f32 -1.442695, %v8549_v22  ;;  %v9895_v63 = vmul.f32 -1.442695, %v8557_v14  ;;  %v8903_v14 = vld [vmem:[%s16034_s7 + $0x20] sm:$0xff] }
0x1a47   :  { %13482 = vpow2.f32 %v9894_v48 }
0x1a48   :  { %13484 = vpow2.f32 %v9895_v63  ;;  %v8904_v63 = vld [vmem:[%s16034_s7 + $0x28] sm:$0xff] }
0x1a4e   :  { %v8631_v26 = vpop.f32.mrb[112].mxu1 }
0x1a4f   :  { %v12240_v27 = vpop.f32.mrb[113].mxu1  ;;  %v8632_v0 = vadd.f32 %v15371_v21, %v8631_v26  ;;  %v8893_v26 = vld [vmem:[#allocation6 + $0x10] sm:$0xff] }
0x1a50   :  { %v13162_v27 = vpack.c.bf16 %v8904_v63, %v8903_v14 }
0x1a51   :  { %v13483_v28 = vpop.eup %13482 }
0x1a52   :  { %v8553_v61 = vadd.f32 1.0, %v13483_v28  ;;  %v13485_v29 = vpop.eup %13484  ;;  %v8894_v28 = vld [vmem:[#allocation6 + $0x18] sm:$0xff] }
0x1a53   :  { %v8561_v31 = vadd.f32 1.0, %v13485_v29  ;;  %v8896_v29 = vld [vmem:[#allocation6 + $0x28] sm:$0xff] }
0x1a54   :  { %13486 = vrcp.f32 %v8553_v61  ;;  %v8895_v61 = vld [vmem:[#allocation6 + $0x20] sm:$0xff] }
0x1a55   :  { %13488 = vrcp.f32 %v8561_v31  ;;  %v8897_v31 = vld [vmem:[#allocation6 + $0x30] sm:$0xff] }
0x1a5e   :  { %v13487_v32 = vpop.eup %13486 }
0x1a5f   :  { %v8635_v34 = vmul.f32 %v13487_v32, %v8632_v0  ;;  %v13489_v37 = vpop.eup %13488  ;;  %v8898_v0 = vld [vmem:[#allocation6 + $0x38] sm:$0xff]  ;;  %v8883_v32 = vld [vmem:[#allocation5] sm:$0xff] }
0x1a60   :  { %v8638_v20 = vsub.f32 1.0, %v13489_v37  ;;  %v8640_v39 = vmul.f32 %v13489_v37, %v8402_v47  ;;  %v8887_v37 = vld [vmem:[#allocation5 + $0x20] sm:$0xff] }
0x1a61   :  { %v8636_v17 = vadd.f32 %v8635_v34, %v8564_v35  ;;  %v8884_v34 = vld [vmem:[#allocation5 + $0x8] sm:$0xff]  ;;  %v8885_v35 = vld [vmem:[#allocation5 + $0x10] sm:$0xff] }
0x1a63   :  { %13490 = vtanh.f32 %v8636_v17  ;;  %v8886_v17 = vld [vmem:[#allocation5 + $0x18] sm:$0xff] }
0x1a6d   :  { %v13491_v19 = vpop.eup %13490 }
0x1a6e   :  { %v8639_v42 = vmul.f32 %v13491_v19, %v8638_v20  ;;  %v8888_v20 = vld [vmem:[#allocation5 + $0x28] sm:$0xff] }
0x1a70   :  { %v8641_v43 = vadd.f32 %v8640_v39, %v8639_v42  ;;  %v9918_v42 = vld [vmem:[%s16034_s7 + $0x60] ss:$0 sm:$0xff] }
0x1a72   :  { %8643 = vst.msk [vmem:[#allocation6 + $0x8] sm:$0xff] %vm988_vm4, %v8641_v43  ;;  %12254 = vmatmul.mubr.msk.f32.vlgmr.msra.gmra.mrb[144].mxu0 %vm988_vm4, %v8641_v43  ;;  %8642 = vst.msk [vmem:[#allocation5 + $0x30] sm:$0xff] %vm988_vm4, %v8641_v43  ;;  %12269 = vmatmul.mubr.msk.f32.vlgmr.msra.gmra.mrb[114].mxu1 %vm988_vm4, %v8641_v43 }
0x1a73   :  { %13135 = vmatpush3.bf16.msra.mxu0 %v15277_v6  ;;  %12283 = vmatprep.mubr.msk.f32.mxu0 %vm13629_vm3, %v13630_v4  ;;  %v8906_v6 = vld [vmem:[%s16034_s7 + $0x38] sm:$0xff] }
0x1a74   :  { %13136 = vmatprep.subr.bf16.mxu0 %v13628_v30  ;;  %v13142_v46 = vpack.c.bf16 %v8906_v6, %v8905_v45 }
0x1a76   :  { %13143 = vmatprep.subr.bf16.mxu1 %v13142_v46 }
0x1a77   :  { %13138 = vmatpush3.bf16.msra.mxu0 %v15293_v10  ;;  %13145 = vmatpush3.bf16.msra.mxu1 %v13142_v46  ;;  %v8907_v10 = vld [vmem:[%s16034_s7 + $0x40] sm:$0xff] }
0x1a78   :  { %13139 = vmatprep.subr.bf16.mxu0 %v13628_v30  ;;  %v8908_v30 = vld [vmem:[%s16034_s7 + $0x48] sm:$0xff] }
0x1a79   :  { %v8892_v56 = vld [vmem:[#allocation6 + $0x8] sm:$0xff]  ;;  %v8889_v19 = vld [vmem:[#allocation5 + $0x30] sm:$0xff] }
0x1a7b   :  { %13141 = vmatpush3.bf16.msra.mxu0 %v15309_v16  ;;  %v13146_v16 = vpack.c.bf16 %v8908_v30, %v8907_v10 }
0x1a7d   :  { %13147 = vmatprep.subr.bf16.mxu1 %v13146_v16 }
0x1a7e   :  { %12284 = vmatmul.mubr.msk.f32.vlgmr.msra.gmra.mrb[146].mxu0 %vm988_vm4, %v8641_v43  ;;  %13149 = vmatpush3.bf16.msra.mxu1 %v13146_v16 }
0x1a7f   :  { %13151 = vmatprep.subr.bf16.mxu1 %v13150_v50 }
0x1a82   :  { %13153 = vmatpush3.bf16.msra.mxu1 %v13150_v50 }
0x1a83   :  { %13155 = vmatprep.subr.bf16.mxu1 %v13154_v25 }
0x1b45   :  { %v8713_v11 = vpop.f32.mrb[144].mxu0  ;;  %v8783_v52 = vpop.f32.mrb[114].mxu1 }
0x1b46   :  { %v8788_v53 = vadd.f32 %v8787_v51, %v8713_v11  ;;  %v12255_v54 = vpop.f32.mrb[145].mxu0  ;;  %v12270_v55 = vpop.f32.mrb[115].mxu1  ;;  %v8796_v60 = vadd.f32 %v8795_v59, %v8783_v52 }
0x1b48   :  { %v9899_v57 = vmul.f32 -1.442695, %v8788_v53  ;;  %v9900_v36 = vmul.f32 -1.442695, %v8796_v60 }
0x1b4a   :  { %13492 = vpow2.f32 %v9899_v57 }
0x1b4b   :  { %13494 = vpow2.f32 %v9900_v36 }
0x1b51   :  { %v8870_v62 = vpop.f32.mrb[146].mxu0 }
0x1b52   :  { %v12285_v38 = vpop.f32.mrb[147].mxu0  ;;  %v8871_v9 = vadd.f32 %v15371_v21, %v8870_v62  ;;  %v8901_v21 = vld [vmem:[%s16034_s7 + $0x10] sm:$0xff] }
0x1b53   :  { %v13158_v48 = vpack.c.bf16 %v8902_v23, %v8901_v21  ;;  %v13631_v38 = vmov 0  }
0x1b54   :  { %v13493_v58 = vpop.eup %13492  ;;  %13261 = vset.pattern.permute.xlu1 %v13631_v38  ;;  %13260 = vset.pattern.permute.xlu0 %v13631_v38 }
0x1b55   :  { %v8792_v2 = vadd.f32 1.0, %v13493_v58  ;;  %v13495_v3 = vpop.eup %13494 }
0x1b56   :  { %v8800_v7 = vadd.f32 1.0, %v13495_v3 }
0x1b57   :  { %13496 = vrcp.f32 %v8792_v2 }
0x1b58   :  { %13498 = vrcp.f32 %v8800_v7 }
0x1b61   :  { %v13497_v12 = vpop.eup %13496 }
0x1b62   :  { %v8874_v15 = vmul.f32 %v13497_v12, %v8871_v9  ;;  %v13499_v44 = vpop.eup %13498 }
0x1b63   :  { %v8877_v47 = vsub.f32 1.0, %v13499_v44  ;;  %v8879_v40 = vmul.f32 %v13499_v44, %v8641_v43 }
0x1b64   :  { %v8875_v41 = vadd.f32 %v8874_v15, %v8803_v18 }
0x1b66   :  { %13500 = vtanh.f32 %v8875_v41 }
0x1b70   :  { %v13501_v33 = vpop.eup %13500 }
0x1b71   :  { %v8878_v8 = vmul.f32 %v13501_v33, %v8877_v47 }
0x1b73   :  { %v8880_v22 = vadd.f32 %v8879_v40, %v8878_v8 }
0x1b75   :  { %8881 = vst.msk [vmem:[#allocation5 + $0x38] sm:$0xff] %vm988_vm4, %v8880_v22  ;;  %8882 = vst.msk [vmem:[#allocation6] sm:$0xff] %vm988_vm4, %v8880_v22 }
0x1b7c   :  { %v8891_v24 = vld [vmem:[#allocation6] sm:$0xff]  ;;  %v8890_v39 = vld [vmem:[#allocation5 + $0x38] sm:$0xff] }
0x1b7d   :  { %12298 = vmatprep.mubr.msk.f32.mxu1 %vm988_vm4, %v8891_v24 }
0x1b7e   :  { %12299 = vmatmul.mubr.msk.f32.vlgmr.msra.gmra.mrb[116].mxu1 %vm988_vm4, %v8892_v56 }
0x1b7f   :  { %13157 = vmatpush3.bf16.msra.mxu1 %v13154_v25  ;;  %12301 = vmatprep.mubr.msk.f32.mxu1 %vm988_vm4, %v8893_v26 }
0x1b80   :  { %13159 = vmatprep.subr.bf16.mxu1 %v13158_v48 }
0x1b82   :  { %12302 = vmatmul.mubr.msk.f32.gmra.mrb[118].mxu1 %vm988_vm4, %v8894_v28 }
0x1b83   :  { %12304 = vmatprep.mubr.msk.f32.mxu1 %vm988_vm4, %v8895_v61  ;;  %13161 = vmatpush3.bf16.msra.mxu1 %v13158_v48 }
0x1b84   :  { %13163 = vmatprep.subr.bf16.mxu1 %v13162_v27 }
0x1b86   :  { %12305 = vmatmul.mubr.msk.f32.gmra.mrb[120].mxu1 %vm988_vm4, %v8896_v29 }
0x1b87   :  { %12307 = vmatprep.mubr.msk.f32.mxu1 %vm988_vm4, %v8897_v31  ;;  %13165 = vmatpush3.bf16.msra.mxu1 %v13162_v27 }
0x1b8a   :  { %12308 = vmatmul.mubr.msk.f32.gmra.mrb[122].mxu1 %vm988_vm4, %v8898_v0 }
0x1b8b   :  { %12322 = vmatprep.mubr.msk.f32.mxu1 %vm988_vm4, %v8883_v32 }
0x1b8e   :  { %12323 = vmatmul.mubr.msk.f32.vlgmr.msra.gmra.mrb[116].mxu1 %vm988_vm4, %v8884_v34 }
0x1b8f   :  { %12325 = vmatprep.mubr.msk.f32.mxu1 %vm988_vm4, %v8885_v35 }
0x1b92   :  { %12326 = vmatmul.mubr.msk.f32.gmra.mrb[118].mxu1 %vm988_vm4, %v8886_v17 }
0x1b93   :  { %12328 = vmatprep.mubr.msk.f32.mxu1 %vm988_vm4, %v8887_v37 }
0x1b96   :  { %12329 = vmatmul.mubr.msk.f32.gmra.mrb[120].mxu1 %vm988_vm4, %v8888_v20 }
0x1b97   :  { %12331 = vmatprep.mubr.msk.f32.mxu1 %vm988_vm4, %v8889_v19 }
0x1b9a   :  { %12332 = vmatmul.mubr.msk.f32.gmra.mrb[122].mxu1 %vm988_vm4, %v8890_v39 }
0x1c61   :  { %v12324_v43 = vpop.f32.mrb[116].mxu1 }
0x1c62   :  { %v15629_v45 = vadd.f32 %v12324_v43, %v9918_v42  ;;  %v9130_v6 = vpop.f32.mrb[117].mxu1 }
0x1c63   :  { %v15631_v46 = vadd.f32 %v9918_v42, %v9130_v6 }
0x1c64   :  { %9184 = vst.msk [vmem:[%s16035_s8 + $0x8] sm:$0xff] %vm9182_vm5, %v15629_v45  ;;  %v9210_v1 = vsel %vm9182_vm5, %v15629_v45, -inf }
0x1c65   :  { %9183 = vst.msk [vmem:[%s16035_s8] sm:$0xff] %vm9182_vm5, %v15631_v46  ;;  %v12327_v10 = vpop.f32.mrb[118].mxu1  ;;  %v9207_v30 = vsel %vm9182_vm5, %v15631_v46, -inf }
0x1c66   :  { %v15645_v16 = vadd.f32 %v12327_v10, %v9918_v42  ;;  %9208 = vmax.xlane.f32.xlu0 %v9207_v30  ;;  %v9140_v49 = vpop.f32.mrb[119].mxu1  ;;  %v15744_v10 = vld [vmem:[%s16028_s1 + $0x8] sm:$0xff]  ;;  %v15749_v30 = vld [vmem:[%s16028_s1] sm:$0xff] }
0x1c67   :  { %v15647_v5 = vadd.f32 %v9918_v42, %v9140_v49  ;;  %v15755_v49 = vld [vmem:[%s16028_s1 + $0x10] sm:$0xff]  ;;  %vm9386_vm11 = vcmp.ne.s32.totalorder %v15744_v10, 4294967295  ;;  %vm9385_vm12 = vcmp.ne.s32.totalorder %v15749_v30, 4294967295 }
0x1c68   :  { %9186 = vst.msk [vmem:[%s16035_s8 + $0x18] sm:$0xff] %vm9182_vm5, %v15645_v16  ;;  %v9216_v53 = vsel %vm9182_vm5, %v15645_v16, -inf  ;;  %vm9387_vm15 = vcmp.ne.s32.totalorder %v15755_v49, 4294967295 }
0x1c69   :  { %9185 = vst.msk [vmem:[%s16035_s8 + $0x10] sm:$0xff] %vm9182_vm5, %v15647_v5  ;;  %v12330_v50 = vpop.f32.mrb[120].mxu1  ;;  %v9213_v13 = vsel %vm9182_vm5, %v15647_v5, -inf }
0x1c6a   :  { %v15663_v25 = vadd.f32 %v12330_v50, %v9918_v42  ;;  %9211 = vmax.xlane.f32.xlu0 %v9210_v1  ;;  %9214 = vmax.xlane.f32.xlu1 %v9213_v13  ;;  %v9150_v11 = vpop.f32.mrb[121].mxu1  ;;  %v15762_v50 = vld [vmem:[%s16028_s1 + $0x18] sm:$0xff]  ;;  %v15768_v1 = vld [vmem:[%s16028_s1 + $0x20] sm:$0xff]  ;;  %v15774_v13 = vld [vmem:[%s16028_s1 + $0x28] sm:$0xff] }
0x1c6b   :  { %v15665_v51 = vadd.f32 %v9918_v42, %v9150_v11  ;;  %v15780_v11 = vld [vmem:[%s16028_s1 + $0x30] sm:$0xff]  ;;  %vm9388_vm1 = vcmp.ne.s32.totalorder %v15762_v50, 4294967295  ;;  %vm9389_vm3 = vcmp.ne.s32.totalorder %v15768_v1, 4294967295  ;;  %vm9390_vm4 = vcmp.ne.s32.totalorder %v15774_v13, 4294967295 }
0x1c6c   :  { %9188 = vst.msk [vmem:[%s16035_s8 + $0x28] sm:$0xff] %vm9182_vm5, %v15663_v25  ;;  %v9222_v60 = vsel %vm9182_vm5, %v15663_v25, -inf }
0x1c6d   :  { %9187 = vst.msk [vmem:[%s16035_s8 + $0x20] sm:$0xff] %vm9182_vm5, %v15665_v51  ;;  %v12333_v52 = vpop.f32.mrb[122].mxu1  ;;  %v9219_v54 = vsel %vm9182_vm5, %v15665_v51, -inf }
0x1c6e   :  { %v15681_v55 = vadd.f32 %v12333_v52, %v9918_v42  ;;  %9217 = vmax.xlane.f32.xlu1 %v9216_v53  ;;  %9220 = vmax.xlane.f32.xlu0 %v9219_v54  ;;  %v9160_v57 = vpop.f32.mrb[123].mxu1  ;;  %v15786_v52 = vld [vmem:[%s16028_s1 + $0x38] sm:$0xff] }
0x1c6f   :  { %v15683_v59 = vadd.f32 %v9918_v42, %v9160_v57 }
0x1c70   :  { %9190 = vst.msk [vmem:[%s16035_s8 + $0x38] sm:$0xff] %vm9182_vm5, %v15681_v55  ;;  %v9228_v62 = vsel %vm9182_vm5, %v15681_v55, -inf }
0x1c71   :  { %9189 = vst.msk [vmem:[%s16035_s8 + $0x30] sm:$0xff] %vm9182_vm5, %v15683_v59  ;;  %v9225_v36 = vsel %vm9182_vm5, %v15683_v59, -inf }
0x1c72   :  { %9223 = vmax.xlane.f32.xlu1 %v9222_v60  ;;  %9226 = vmax.xlane.f32.xlu0 %v9225_v36 }
0x1c76   :  { %9229 = vmax.xlane.f32.xlu1 %v9228_v62 }
0x1cf3   :  { %v15701_v58 = vpop.xlane.xlu0 %9208 }
0x1cf4   :  { %v9231_v2 = vsub.f32 %v15631_v46, %v15701_v58 }
0x1cf6   :  { %v9239_v3 = vmul.f32 1.442695, %v9231_v2 }
0x1cf7   :  { %v15705_v7 = vpop.xlane.xlu0 %9211  ;;  %v15707_v9 = vpop.xlane.xlu1 %9214 }
0x1cf8   :  { %13502 = vpow2.f32 %v9239_v3  ;;  %v9232_v12 = vsub.f32 %v15629_v45, %v15705_v7  ;;  %v9233_v15 = vsub.f32 %v15647_v5, %v15707_v9  ;;  %v9311_v3 = vlaneseq }
0x1cfa   :  { %v9241_v18 = vmul.f32 1.442695, %v9232_v12  ;;  %v9243_v41 = vmul.f32 1.442695, %v9233_v15 }
0x1cfb   :  { %v15713_v44 = vpop.xlane.xlu1 %9217  ;;  %v15715_v47 = vpop.xlane.xlu0 %9220 }
0x1cfc   :  { %13504 = vpow2.f32 %v9241_v18  ;;  %v9234_v33 = vsub.f32 %v15645_v16, %v15713_v44  ;;  %v9235_v40 = vsub.f32 %v15665_v51, %v15715_v47 }
0x1cfd   :  { %13506 = vpow2.f32 %v9243_v41 }
0x1cfe   :  { %v9245_v8 = vmul.f32 1.442695, %v9234_v33  ;;  %v9247_v22 = vmul.f32 1.442695, %v9235_v40 }
0x1cff   :  { %v15721_v21 = vpop.xlane.xlu1 %9223  ;;  %v15723_v23 = vpop.xlane.xlu0 %9226 }
0x1d00   :  { %13508 = vpow2.f32 %v9245_v8  ;;  %v9236_v24 = vsub.f32 %v15663_v25, %v15721_v21  ;;  %v9237_v48 = vsub.f32 %v15683_v59, %v15723_v23 }
0x1d01   :  { %13510 = vpow2.f32 %v9247_v22  ;;  %v15790_v22 = vand.u32 127, %v9311_v3 }
0x1d02   :  { %v13503_v56 = vpop.eup %13502  ;;  %v9249_v14 = vmul.f32 1.442695, %v9236_v24  ;;  %v9251_v63 = vmul.f32 1.442695, %v9237_v48 }
0x1d03   :  { %v15729_v26 = vpop.xlane.xlu1 %9229  ;;  %v9255_v27 = vsel %vm9182_vm5, %v13503_v56, 0.0 }
0x1d04   :  { %13512 = vpow2.f32 %v9249_v14  ;;  %v9238_v28 = vsub.f32 %v15681_v55, %v15729_v26  ;;  %9256 = vadd.xlane.f32.xlu0 %v9255_v27 }
0x1d05   :  { %13514 = vpow2.f32 %v9251_v63 }
0x1d06   :  { %v13505_v61 = vpop.eup %13504  ;;  %v9253_v29 = vmul.f32 1.442695, %v9238_v28 }
0x1d07   :  { %v13507_v31 = vpop.eup %13506  ;;  %v9258_v0 = vsel %vm9182_vm5, %v13505_v61, 0.0 }
0x1d08   :  { %13516 = vpow2.f32 %v9253_v29  ;;  %9259 = vadd.xlane.f32.xlu1 %v9258_v0  ;;  %v9261_v32 = vsel %vm9182_vm5, %v13507_v31, 0.0 }
0x1d09   :  { %9262 = vadd.xlane.f32.xlu0 %v9261_v32 }
0x1d0a   :  { %v13509_v34 = vpop.eup %13508 }
0x1d0b   :  { %v13511_v35 = vpop.eup %13510  ;;  %v9264_v17 = vsel %vm9182_vm5, %v13509_v34, 0.0 }
0x1d0c   :  { %9265 = vadd.xlane.f32.xlu1 %v9264_v17  ;;  %v9267_v37 = vsel %vm9182_vm5, %v13511_v35, 0.0 }
0x1d0d   :  { %9268 = vadd.xlane.f32.xlu0 %v9267_v37 }
0x1d0e   :  { %v13513_v20 = vpop.eup %13512 }
0x1d0f   :  { %v13515_v19 = vpop.eup %13514  ;;  %v9270_v39 = vsel %vm9182_vm5, %v13513_v20, 0.0 }
0x1d10   :  { %9271 = vadd.xlane.f32.xlu1 %v9270_v39  ;;  %v9273_v42 = vsel %vm9182_vm5, %v13515_v19, 0.0 }
0x1d11   :  { %9274 = vadd.xlane.f32.xlu0 %v9273_v42 }
0x1d12   :  { %v13517_v43 = vpop.eup %13516 }
0x1d13   :  { %v9276_v6 = vsel %vm9182_vm5, %v13517_v43, 0.0 }
0x1d14   :  { %9277 = vadd.xlane.f32.xlu1 %v9276_v6 }
0x1d25   :  { %9317 = vperm.xlu1 %13261, %v15744_v10  }
0x1d27   :  { %9314 = vperm.xlu0 %13260, %v15749_v30  }
0x1d29   :  { %9320 = vperm.xlu1 %13261, %v15755_v49   ;;  %v15840_v49 = vsel %vm9387_vm15, 1.0, %v13630_v4 }
0x1d2d   :  { %9323 = vperm.xlu1 %13261, %v15762_v50   ;;  %v15859_v50 = vld [vmem:[%s16029_s2 + $0x10] sm:$0xff] }
0x1d31   :  { %9326 = vperm.xlu1 %13261, %v15768_v1  }
0x1d35   :  { %9329 = vperm.xlu1 %13261, %v15774_v13  }
0x1d39   :  { %9332 = vperm.xlu1 %13261, %v15780_v11  }
0x1d3d   :  { %9335 = vperm.xlu1 %13261, %v15786_v52  }
0x1d91   :  { %v9257_v53 = vpop.xlane.xlu0 %9256 }
0x1d92   :  { %13518 = vlog2.f32 %v9257_v53 }
0x1d95   :  { %v9260_v54 = vpop.xlane.xlu1 %9259 }
0x1d96   :  { %13520 = vlog2.f32 %v9260_v54  ;;  %v9263_v57 = vpop.xlane.xlu0 %9262 }
0x1d97   :  { %13522 = vlog2.f32 %v9263_v57 }
0x1d99   :  { %v9266_v60 = vpop.xlane.xlu1 %9265 }
0x1d9a   :  { %13524 = vlog2.f32 %v9266_v60  ;;  %v9269_v36 = vpop.xlane.xlu0 %9268 }
0x1d9b   :  { %13526 = vlog2.f32 %v9269_v36 }
0x1d9c   :  { %v13519_v62 = vpop.eup %13518 }
0x1d9d   :  { %v9272_v38 = vpop.xlane.xlu1 %9271  ;;  %v9280_v2 = vmul.f32 0.6931472, %v13519_v62 }
0x1d9e   :  { %13528 = vlog2.f32 %v9272_v38  ;;  %v9275_v41 = vpop.xlane.xlu0 %9274  ;;  %v15821_v38 = vsel %vm9385_vm12, 1.0, %v13630_v4 }
0x1d9f   :  { %v9295_v40 = vadd.f32 %v9280_v2, %v15701_v58  ;;  %13530 = vlog2.f32 %v9275_v41 }
0x1da0   :  { %v13521_v12 = vpop.eup %13520 }
0x1da1   :  { %v13523_v15 = vpop.eup %13522  ;;  %v9282_v18 = vmul.f32 0.6931472, %v13521_v12  ;;  %v9278_v33 = vpop.xlane.xlu1 %9277  ;;  %v9303_v29 = vsub.f32 %v15631_v46, %v9295_v40 }
0x1da2   :  { %v9284_v8 = vmul.f32 0.6931472, %v13523_v15  ;;  %13532 = vlog2.f32 %v9278_v33  ;;  %v15834_v15 = vld [vmem:[%s16029_s2] sm:$0xff] }
0x1da3   :  { %v9296_v24 = vadd.f32 %v9282_v18, %v15705_v7  ;;  %v9493_v18 = vmul.f32 %v15821_v38, %v15834_v15 }
0x1da4   :  { %v13525_v48 = vpop.eup %13524  ;;  %v9297_v56 = vadd.f32 %v9284_v8, %v15707_v9 }
0x1da5   :  { %v9286_v14 = vmul.f32 0.6931472, %v13525_v48  ;;  %v9318_v63 = vpop.permute.xlu1 %9317  ;;  %v9304_v27 = vsub.f32 %v15629_v45, %v9296_v24  ;;  %v13527_v28 = vpop.eup %13526  ;;  %v15850_v24 = vld [vmem:[%s16029_s2 + $0x8] sm:$0xff]  ;;  %v9501_v48 = vsel %vm9417_vm14, %v9493_v18, 0.0 }
0x1da6   :  { %vm9338_vm6 = vcmp.eq.s32.totalorder %v15790_v22, %v9318_v63  ;;  %v9315_v61 = vpop.permute.xlu0 %9314  ;;  %v9288_v9 = vmul.f32 0.6931472, %v13527_v28  ;;  %v9305_v34 = vsub.f32 %v15647_v5, %v9297_v56 }
0x1da7   :  { %vm9337_vm7 = vcmp.eq.s32.totalorder %v15790_v22, %v9315_v61  ;;  %v9346_v58 = vsel %vm9338_vm6, %v9304_v27, 0.0  ;;  %v9298_v0 = vadd.f32 %v9286_v14, %v15713_v44  ;;  %vm9392_vm6 = vcmp.ne.s32.totalorder %v15786_v52, 4294967295 }
0x1da8   :  { %v9356_v7 = vsel %vm9182_vm5, %v9346_v58, 0.0  ;;  %v9345_v31 = vsel %vm9337_vm7, %v9303_v29, 0.0  ;;  %v13529_v35 = vpop.eup %13528  ;;  %v9299_v37 = vadd.f32 %v9288_v9, %v15715_v47  ;;  %vm9439_vm7 = vcmask 0  }
0x1da9   :  { %v9321_v32 = vpop.permute.xlu1 %9320  ;;  %9357 = vadd.xlane.f32.xlu0 %v9356_v7  ;;  %v9353_v45 = vsel %vm9182_vm5, %v9345_v31, 0.0  ;;  %v9290_v20 = vmul.f32 0.6931472, %v13529_v35  ;;  %v9306_v44 = vsub.f32 %v15645_v16, %v9298_v0  ;;  %v13531_v39 = vpop.eup %13530  ;;  %v15875_v7 = vld [vmem:[%s16029_s2 + $0x18] sm:$0xff]  ;;  %v15889_v35 = vld [vmem:[%s16029_s2 + $0x20] sm:$0xff] }
0x1daa   :  { %vm9339_vm8 = vcmp.eq.s32.totalorder %v15790_v22, %v9321_v32  ;;  %9354 = vadd.xlane.f32.xlu1 %v9353_v45  ;;  %v9292_v6 = vmul.f32 0.6931472, %v13531_v39  ;;  %v9307_v54 = vsub.f32 %v15665_v51, %v9299_v37  ;;  %v15818_v51 = vsel %vm9386_vm11, 1.0, %v13630_v4 }
0x1dab   :  { %v9347_v46 = vsel %vm9339_vm8, %v9305_v34, 0.0  ;;  %v9300_v43 = vadd.f32 %v9290_v20, %v15721_v21  ;;  %v9442_v30 = vsel %vm9417_vm14, %v15818_v51, 0.0  ;;  %v9494_v56 = vmul.f32 %v15818_v51, %v15850_v24 }
0x1dac   :  { %v9359_v17 = vsel %vm9182_vm5, %v9347_v46, 0.0  ;;  %v13533_v57 = vpop.eup %13532  ;;  %v9301_v60 = vadd.f32 %v9292_v6, %v15723_v23  ;;  %v9441_v23 = vsel %vm9417_vm14, %v15821_v38, 0.0  ;;  %v15880_v32 = vsel %vm9389_vm3, 1.0, %v13630_v4 }
0x1dad   :  { %v9324_v19 = vpop.permute.xlu1 %9323  ;;  %9360 = vadd.xlane.f32.xlu0 %v9359_v17  ;;  %v9294_v36 = vmul.f32 0.6931472, %v13533_v57  ;;  %v9308_v21 = vsub.f32 %v15663_v25, %v9300_v43  ;;  %v9443_v41 = vadd.f32 %v9442_v30, %v9441_v23  ;;  %v9502_v28 = vsel %vm9417_vm14, %v9494_v56, 0.0 }
0x1dae   :  { %vm9340_vm9 = vcmp.eq.s32.totalorder %v15790_v22, %v9324_v19  ;;  %v9309_v12 = vsub.f32 %v15683_v59, %v9301_v60  ;;  %v9503_v29 = vadd.f32 %v9502_v28, %v9501_v48  ;;  %v9448_v1 = vsel %vm9417_vm14, %v15880_v32, 0.0 }
0x1daf   :  { %v9348_v42 = vsel %vm9340_vm9, %v9306_v44, 0.0  ;;  %v9302_v2 = vadd.f32 %v9294_v36, %v15729_v26  ;;  %v9444_v26 = vsel %vm9417_vm14, %v15840_v49, 0.0  ;;  %v9497_v46 = vmul.f32 %v15880_v32, %v15889_v35  ;;  %v15903_v44 = vld [vmem:[%s16029_s2 + $0x28] sm:$0xff]  ;;  %v15930_v36 = vld [vmem:[%s16029_s2 + $0x38] sm:$0xff] }
0x1db0   :  { %v9362_v5 = vsel %vm9182_vm5, %v9348_v42, 0.0  ;;  %v9445_v14 = vadd.f32 %v9444_v26, %v9443_v41  ;;  %v15894_v37 = vsel %vm9390_vm4, 1.0, %v13630_v4 }
0x1db1   :  { %v9327_v53 = vpop.permute.xlu1 %9326  ;;  %9363 = vadd.xlane.f32.xlu1 %v9362_v5  ;;  %v9310_v8 = vsub.f32 %v15681_v55, %v9302_v2  ;;  %v15862_v55 = vsel %vm9388_vm1, 1.0, %v13630_v4  ;;  %v9450_v20 = vsel %vm9417_vm14, %v15894_v37, 0.0  ;;  %v9508_v13 = vsel %vm9417_vm14, %v9497_v46, 0.0 }
0x1db2   :  { %vm9341_vm10 = vcmp.eq.s32.totalorder %v15790_v22, %v9327_v53  ;;  %v9446_v61 = vsel %vm9417_vm14, %v15862_v55, 0.0  ;;  %v9496_v0 = vmul.f32 %v15862_v55, %v15875_v7  ;;  %v9498_v39 = vmul.f32 %v15894_v37, %v15903_v44  ;;  %v15917_v53 = vld [vmem:[%s16029_s2 + $0x30] sm:$0xff]  ;;  %s13534_s2 = scalar_lea.vmem %s9542_s17, 16 }
0x1db3   :  { %v9349_v47 = vsel %vm9341_vm10, %v9307_v54, 0.0  ;;  %v9447_v9 = vadd.f32 %v9446_v61, %v9445_v14  ;;  %p13535_p0 = scmp.ne.s32.totalorder %s9542_s17, %s13534_s2  ;;  %p13540_p2 = scmp.lt.s32.totalorder %s13538_s18, %s13534_s2 }
0x1db4   :  { %v9365_v16 = vsel %vm9182_vm5, %v9349_v47, 0.0  ;;  %v9506_v45 = vsel %vm9417_vm14, %v9496_v0, 0.0  ;;  %v15922_v47 = vsel %vm9392_vm6, 1.0, %v13630_v4 }
0x1db5   :  { %v9330_v62 = vpop.permute.xlu1 %9329  ;;  %9366 = vadd.xlane.f32.xlu0 %v9365_v16  ;;  %v9449_v17 = vadd.f32 %v9448_v1, %v9447_v9  ;;  %v9454_v16 = vsel %vm9417_vm14, %v15922_v47, 0.0  ;;  %p13541_p3 = por %p13540_p2, %p13539_p1 }
0x1db6   :  { %vm9342_vm13 = vcmp.eq.s32.totalorder %v15790_v22, %v9330_v62  ;;  %v9500_v62 = vmul.f32 %v15922_v47, %v15930_v36 }
0x1db7   :  { %v9350_v10 = vsel %vm9342_vm13, %v9308_v21, 0.0  ;;  %v9451_v42 = vadd.f32 %v9450_v20, %v9449_v17  ;;  %p13542_p4 = pnand %p13541_p3, %p13535_p0 }
0x1db8   :  { %v9368_v25 = vsel %vm9182_vm5, %v9350_v10, 0.0  ;;  %v9514_v10 = vsel %vm9417_vm14, %v9500_v62, 0.0 }
0x1db9   :  { %v9333_v3 = vpop.permute.xlu1 %9332  ;;  %9369 = vadd.xlane.f32.xlu1 %v9368_v25 }
0x1dba   :  { %vm9343_vm0 = vcmp.eq.s32.totalorder %v15790_v22, %v9333_v3 }
0x1dbb   :  { %v9351_v33 = vsel %vm9343_vm0, %v9309_v12, 0.0 }
0x1dbc   :  { %v9371_v59 = vsel %vm9182_vm5, %v9351_v33, 0.0 }
0x1dbd   :  { %v9336_v40 = vpop.permute.xlu1 %9335  ;;  %9372 = vadd.xlane.f32.xlu0 %v9371_v59 }
0x1dbe   :  { %vm9344_vm2 = vcmp.eq.s32.totalorder %v15790_v22, %v9336_v40  ;;  %v9495_v22 = vmul.f32 %v15840_v49, %v15859_v50 }
0x1dbf   :  { %v9352_v63 = vsel %vm9344_vm2, %v9310_v8, 0.0 }
0x1dc0   :  { %v9374_v27 = vsel %vm9182_vm5, %v9352_v63, 0.0  ;;  %v9504_v58 = vsel %vm9417_vm14, %v9495_v22, 0.0  ;;  %vm9391_vm5 = vcmp.ne.s32.totalorder %v15780_v11, 4294967295  ;;  %v9510_v11 = vsel %vm9417_vm14, %v9498_v39, 0.0 }
0x1dc1   :  { %9375 = vadd.xlane.f32.xlu1 %v9374_v27  ;;  %v9505_v31 = vadd.f32 %v9504_v58, %v9503_v29  ;;  %v15908_v5 = vsel %vm9391_vm5, 1.0, %v13630_v4 }
0x1dc2   :  { %v9452_v43 = vsel %vm9417_vm14, %v15908_v5, 0.0  ;;  %v9499_v54 = vmul.f32 %v15908_v5, %v15917_v53 }
0x1dc3   :  { %v9507_v34 = vadd.f32 %v9506_v45, %v9505_v31  ;;  %v9453_v57 = vadd.f32 %v9452_v43, %v9451_v42 }
0x1dc4   :  { %v9512_v52 = vsel %vm9417_vm14, %v9499_v54, 0.0 }
0x1dc5   :  { %v9509_v19 = vadd.f32 %v9508_v13, %v9507_v34  ;;  %v9455_v21 = vadd.f32 %v9454_v16, %v9453_v57 }
0x1dc7   :  { %v9511_v6 = vadd.f32 %v9510_v11, %v9509_v19  ;;  %v9456_v4 = vrot.slane %v9455_v21, 4 }
0x1dc9   :  { %v9513_v60 = vadd.f32 %v9512_v52, %v9511_v6  ;;  %v9457_v25 = vadd.f32 %v9456_v4, %v9455_v21 }
0x1dcb   :  { %v9515_v30 = vadd.f32 %v9514_v10, %v9513_v60  ;;  %v9458_v3 = vrot.slane %v9457_v25, 2 }
0x1dcd   :  { %v9516_v23 = vrot.slane %v9515_v30, 4  ;;  %v9459_v18 = vadd.f32 %v9458_v3, %v9457_v25 }
0x1dcf   :  { %v9517_v2 = vadd.f32 %v9516_v23, %v9515_v30  ;;  %v9460_v33 = vrot.slane %v9459_v18, 1 }
0x1dd1   :  { %v9518_v12 = vrot.slane %v9517_v2, 2  ;;  %v9461_v59 = vadd.f32 %v9460_v33, %v9459_v18 }
0x1dd3   :  { %v9519_v41 = vadd.f32 %v9518_v12, %v9517_v2  ;;  %9462 = vst.msk [vmem:[#allocation9] sm:$0x1] %vm9439_vm7, %v9461_v59 }
0x1dd5   :  { %v9520_v26 = vrot.slane %v9519_v41, 1 }
0x1dd7   :  { %v9521_v40 = vadd.f32 %v9520_v26, %v9519_v41 }
0x1dd8   :  { %13545 = shalt.err (!%p13542_p4)
}
0x1dd9   :  { %s13546_s21 = scalar_lea.hbm %s16037_s10, 16 }
0x1dda   :  { %p13547_p5 = scmp.ne.s32.totalorder %s16037_s10, %s13546_s21  ;;  %p13550_p6 = scmp.lt.u32.totalorder %s13546_s21, %s16037_s10 }
0x1ddc   :  { %p13552_p7 = pnand %p13550_p6, %p13547_p5 }
0x1dde   :  { %13555 = shalt.err (!%p13552_p7)
}
0x1ddf   :  { %9544 = dma.vmem_to_hbm [thread:$0]  %s9542_s17, 16, %s16037_s10, [#allocation10]   ;;  %9522 = vst.msk [vmem:[#allocation12] sm:$0x1] %vm9439_vm7, %v9521_v40 }
0x1de0   :  { %s13633_s25 = smov [#allocation12]  }
0x1de1   :  { %s9561_s26 = sshll.u32 %s13633_s25, 4  ;;  %s9562_s26 = int_to_ptr.vmem [resolvable:$true] %s9561_s26 }
0x1de2   :  { %s13556_s27 = scalar_lea.vmem %s9562_s26, 16  ;;  %s13560_s28 = scalar_lea.vmem %s9562_s26, 32 }
0x1de3   :  { %p13557_p8 = scmp.ne.s32.totalorder %s9562_s26, %s13556_s27  ;;  %p13561_p9 = scmp.lt.s32.totalorder %s9562_s26, %s9562_s26 }
0x1de4   :  { %p13562_p10 = scmp.lt.s32.totalorder %s13560_s28, %s13556_s27 }
0x1de6   :  { %p13563_p11 = por %p13562_p10, %p13561_p9 }
0x1de8   :  { %p13564_p12 = pnand %p13563_p11, %p13557_p8 }
0x1dea   :  { %13567 = shalt.err (!%p13564_p12)
}
0x1deb   :  { %s13568_s13 = scalar_lea.hbm %s16039_s12, 16 }
0x1dec   :  { %p13569_p13 = scmp.ne.s32.totalorder %s16039_s12, %s13568_s13  ;;  %p13572_p0 = scmp.lt.u32.totalorder %s13568_s13, %s16039_s12 }
0x1dee   :  { %p13574_p1 = pnand %p13572_p0, %p13569_p13 }
0x1df0   :  { %13577 = shalt.err (!%p13574_p1)
}
0x1df1   :  { %9564 = dma.vmem_to_hbm [thread:$0]  %s9562_s26, 16, %s16039_s12, [#allocation13]  }
0x1df2   :  { %s13634_s12 = smov [#allocation7]   ;;  %s13635_s0 = smov [#allocation11]  }
0x1df3   :  { %s9531_s16 = sshll.u32 %s13634_s12, 4  ;;  %s9551_s6 = sshll.u32 %s13635_s0, 4  ;;  %s9532_s16 = int_to_ptr.vmem [resolvable:$true] %s9531_s16  ;;  %s15994_s6 = int_to_ptr.vmem [resolvable:$true] %s9551_s6 }
0x1df4   :  { %s13578_s17 = scalar_lea.vmem %s9532_s16, 16  ;;  %s13582_s2 = scalar_lea.vmem %s9532_s16, 32 }
0x1df5   :  { %p13579_p2 = scmp.ne.s32.totalorder %s9532_s16, %s13578_s17  ;;  %p13583_p3 = scmp.lt.s32.totalorder %s9532_s16, %s9532_s16 }
0x1df6   :  { %p13584_p4 = scmp.lt.s32.totalorder %s13582_s2, %s13578_s17 }
0x1df8   :  { %p13585_p5 = por %p13584_p4, %p13583_p3 }
0x1dfa   :  { %p13586_p6 = pnand %p13585_p5, %p13579_p2 }
0x1e36   :  { %v9358_v8 = vpop.xlane.xlu0 %9357 }
0x1e37   :  { %v9355_v48 = vpop.xlane.xlu1 %9354  ;;  %v9378_v56 = vsub.f32 0.0, %v9358_v8 }
0x1e38   :  { %v9377_v63 = vsub.f32 0.0, %v9355_v48 }
0x1e39   :  { %v9410_v28 = vmul.f32 %v15818_v51, %v9378_v56 }
0x1e3a   :  { %v9361_v14 = vpop.xlane.xlu0 %9360  ;;  %v9409_v61 = vmul.f32 %v15821_v38, %v9377_v63 }
0x1e3b   :  { %v9379_v27 = vsub.f32 0.0, %v9361_v14  ;;  %v9464_v31 = vmul.f32 %v9410_v28, %v15850_v24  ;;  %v9419_v46 = vsel %vm9417_vm14, %v9410_v28, 0.0 }
0x1e3c   :  { %v9463_v9 = vmul.f32 %v9409_v61, %v15834_v15  ;;  %v9418_v34 = vsel %vm9417_vm14, %v9409_v61, 0.0 }
0x1e3d   :  { %v9411_v58 = vmul.f32 %v15840_v49, %v9379_v27  ;;  %v9472_v38 = vsel %vm9417_vm14, %v9464_v31, 0.0 }
0x1e3e   :  { %v9364_v22 = vpop.xlane.xlu1 %9363  ;;  %v9471_v49 = vsel %vm9417_vm14, %v9463_v9, 0.0 }
0x1e3f   :  { %v9380_v29 = vsub.f32 0.0, %v9364_v22  ;;  %v9465_v51 = vmul.f32 %v9411_v58, %v15859_v50  ;;  %v9421_v24 = vsel %vm9417_vm14, %v9411_v58, 0.0 }
0x1e41   :  { %v9412_v1 = vmul.f32 %v15862_v55, %v9380_v29  ;;  %v9420_v55 = vadd.f32 %v9419_v46, %v9418_v34  ;;  %v9474_v19 = vsel %vm9417_vm14, %v9465_v51, 0.0 }
0x1e42   :  { %v9367_v0 = vpop.xlane.xlu0 %9366 }
0x1e43   :  { %v9381_v45 = vsub.f32 0.0, %v9367_v0  ;;  %v9466_v15 = vmul.f32 %v9412_v1, %v15875_v7  ;;  %v9423_v39 = vsel %vm9417_vm14, %v9412_v1, 0.0  ;;  %v9422_v43 = vadd.f32 %v9421_v24, %v9420_v55 }
0x1e45   :  { %v9413_v17 = vmul.f32 %v15880_v32, %v9381_v45  ;;  %v9473_v32 = vadd.f32 %v9472_v38, %v9471_v49  ;;  %v9476_v6 = vsel %vm9417_vm14, %v9466_v15, 0.0  ;;  %v9424_v52 = vadd.f32 %v9423_v39, %v9422_v43 }
0x1e46   :  { %v9370_v20 = vpop.xlane.xlu1 %9369 }
0x1e47   :  { %v9382_v13 = vsub.f32 0.0, %v9370_v20  ;;  %v9467_v42 = vmul.f32 %v9413_v17, %v15889_v35  ;;  %v9425_v54 = vsel %vm9417_vm14, %v9413_v17, 0.0  ;;  %v9475_v16 = vadd.f32 %v9474_v19, %v9473_v32 }
0x1e49   :  { %v9414_v50 = vmul.f32 %v15894_v37, %v9382_v13  ;;  %v9478_v60 = vsel %vm9417_vm14, %v9467_v42, 0.0  ;;  %v9477_v21 = vadd.f32 %v9476_v6, %v9475_v16  ;;  %v9426_v37 = vadd.f32 %v9425_v54, %v9424_v52 }
0x1e4a   :  { %v9373_v11 = vpop.xlane.xlu0 %9372 }
0x1e4b   :  { %v9468_v57 = vmul.f32 %v9414_v50, %v15903_v44  ;;  %v9383_v7 = vsub.f32 0.0, %v9373_v11  ;;  %v9427_v62 = vsel %vm9417_vm14, %v9414_v50, 0.0  ;;  %v9479_v44 = vadd.f32 %v9478_v60, %v9477_v21 }
0x1e4c   :  { %v9428_v2 = vadd.f32 %v9427_v62, %v9426_v37 }
0x1e4d   :  { %v9415_v35 = vmul.f32 %v15908_v5, %v9383_v7  ;;  %v9480_v30 = vsel %vm9417_vm14, %v9468_v57, 0.0 }
0x1e4e   :  { %v9376_v10 = vpop.xlane.xlu1 %9375  ;;  %v9481_v18 = vadd.f32 %v9480_v30, %v9479_v44 }
0x1e4f   :  { %v9429_v4 = vsel %vm9417_vm14, %v9415_v35, 0.0  ;;  %v9469_v23 = vmul.f32 %v9415_v35, %v15917_v53  ;;  %v9384_v25 = vsub.f32 0.0, %v9376_v10 }
0x1e50   :  { %v9430_v41 = vadd.f32 %v9429_v4, %v9428_v2 }
0x1e51   :  { %v9482_v3 = vsel %vm9417_vm14, %v9469_v23, 0.0  ;;  %v9416_v12 = vmul.f32 %v15922_v47, %v9384_v25 }
0x1e52   :  { %v9483_v26 = vadd.f32 %v9482_v3, %v9481_v18 }
0x1e53   :  { %v9431_v5 = vsel %vm9417_vm14, %v9416_v12, 0.0  ;;  %v9470_v33 = vmul.f32 %v9416_v12, %v15930_v36 }
0x1e54   :  { %v9432_v59 = vadd.f32 %v9431_v5, %v9430_v41 }
0x1e55   :  { %v9484_v40 = vsel %vm9417_vm14, %v9470_v33, 0.0 }
0x1e56   :  { %v9433_v8 = vrot.slane %v9432_v59, 4  ;;  %v9485_v48 = vadd.f32 %v9484_v40, %v9483_v26 }
0x1e58   :  { %v9486_v53 = vrot.slane %v9485_v48, 4  ;;  %v9434_v56 = vadd.f32 %v9433_v8, %v9432_v59 }
0x1e5a   :  { %v9435_v14 = vrot.slane %v9434_v56, 2  ;;  %v9487_v63 = vadd.f32 %v9486_v53, %v9485_v48 }
0x1e5c   :  { %v9436_v27 = vadd.f32 %v9435_v14, %v9434_v56  ;;  %v9488_v28 = vrot.slane %v9487_v63, 2 }
0x1e5e   :  { %v9437_v47 = vrot.slane %v9436_v27, 1  ;;  %v9489_v22 = vadd.f32 %v9488_v28, %v9487_v63 }
0x1e60   :  { %v9438_v61 = vadd.f32 %v9437_v47, %v9436_v27  ;;  %v9490_v36 = vrot.slane %v9489_v22, 1 }
0x1e62   :  { %9440 = vst.msk [vmem:[#allocation7] sm:$0x1] %vm9439_vm7, %v9438_v61  ;;  %v9491_v29 = vadd.f32 %v9490_v36, %v9489_v22 }
0x1e63   :  { %13589 = shalt.err (!%p13586_p6)
}
0x1e64   :  { %s13590_s20 = scalar_lea.hbm %s16036_s9, 16 }
0x1e65   :  { %p13591_p7 = scmp.ne.s32.totalorder %s16036_s9, %s13590_s20  ;;  %p13594_p8 = scmp.lt.u32.totalorder %s13590_s20, %s16036_s9 }
0x1e67   :  { %p13596_p9 = pnand %p13594_p8, %p13591_p7 }
0x1e69   :  { %13599 = shalt.err (!%p13596_p9)
}
0x1e6a   :  { %9534 = dma.vmem_to_hbm [thread:$0]  %s9532_s16, 16, %s16036_s9, [#allocation8]   ;;  %9492 = vst.msk [vmem:[#allocation11] sm:$0x1] %vm9439_vm7, %v9491_v29 }
0x1e6b   :  { %s13600_s24 = scalar_lea.vmem %s15994_s6, 16  ;;  %s13604_s25 = scalar_lea.vmem %s15994_s6, 32 }
0x1e6c   :  { %p13601_p10 = scmp.ne.s32.totalorder %s15994_s6, %s13600_s24  ;;  %p13605_p11 = scmp.lt.s32.totalorder %s15994_s6, %s15994_s6 }
0x1e6d   :  { %p13606_p12 = scmp.lt.s32.totalorder %s13604_s25, %s13600_s24 }
0x1e6f   :  { %p13607_p13 = por %p13606_p12, %p13605_p11 }
0x1e71   :  { %p13608_p0 = pnand %p13607_p13, %p13601_p10 }
0x1e73   :  { %13611 = shalt.err (!%p13608_p0)
}
0x1e74   :  { %s13612_s28 = scalar_lea.hbm %s16038_s11, 16 }
0x1e75   :  { %p13613_p1 = scmp.ne.s32.totalorder %s16038_s11, %s13612_s28  ;;  %p13616_p2 = scmp.lt.u32.totalorder %s13612_s28, %s16038_s11 }
0x1e77   :  { %p13618_p3 = pnand %p13616_p2, %p13613_p1 }
0x1e79   :  { %13621 = shalt.err (!%p13618_p3)
}
0x1e7a   :  { %9554 = dma.vmem_to_hbm [thread:$0]  %s15994_s6, 16, %s16038_s11, [#allocation10]  }
0x1e7b   :  { %13622 = dma.done.wait [#allocation8], 16  }
0x1e7c   :  { %13623 = vsyncadd [#allocation8], 4294967280 }
0x1e7d   :  { %13624 = dma.done.wait [#allocation10], 32  }
0x1e7e   :  { %13625 = vsyncadd [#allocation10], 4294967264 }
0x1e7f   :  { %13626 = dma.done.wait [#allocation13], 16  }
0x1e80   :  { %13627 = vsyncadd [#allocation13], 4294967280 }
0x1e81   :  { %9579 = vsyncpa [#allocation8], 1 }
0x1e82   :  { %9580 = vsyncpa [#allocation10], 1 }
0x1e83   :  { %9581 = vsyncpa [#allocation13], 1 }

</bundles_post_ra>
